<compile_context>
chip_gen: v5e
topology: v5e:2x2
jax: 0.10.0
libtpu: 0.0.40
codegen_flags: <defaults>
</compile_context>

<pallas_src>
import jax
import jax.numpy as jnp
from jax import lax
from jax.experimental import pallas as pl
from jax.experimental.pallas import tpu as pltpu


# ---------------- parameter preparation (hoisted out of the forward path) ----------

def _fold_bn(gamma, beta, mean, var, eps=1e-5):
    s = gamma / jnp.sqrt(var + eps)
    return s, beta - mean * s


def prepare_params(p):
    """Fold BN into scale/shift and pre-transpose all weights, once."""
    prep = {"id": None, "blocks": []}
    if p["id"] is not None:
        s, b = _fold_bn(*p["id"]["bn"])
        prep["id"] = {"w": jnp.transpose(p["id"]["w"]).astype(jnp.float32),      # (Cin, Cout)
                      "s": s.reshape(1, -1).astype(jnp.float32),
                      "b": b.reshape(1, -1).astype(jnp.float32)}
    for blk in p["blocks"]:
        ci = blk["dw"].shape[0]
        s, b = _fold_bn(*blk["bn"])
        prep["blocks"].append({
            "dw": blk["dw"].transpose(1, 2, 0).reshape(9, ci).astype(jnp.float32),  # (9, ci)
            "pw": jnp.transpose(blk["pw"]).astype(jnp.float32),                     # (ci, co)
            "s": s.reshape(1, -1).astype(jnp.float32),
            "b": b.reshape(1, -1).astype(jnp.float32),
            "activate": bool(blk["activate"]),
        })
    return prep


# ---------------- the fused Pallas kernel ----------------

def _build_unit_kernel(H, W, Ho, Wo, stride, Cin, Cout, blocks, resize_identity):
    """`blocks`: list of dicts with static ints ci/co and bool activate."""
    n_blocks = len(blocks)

    def pw_bn(v, pw_ref, s_ref, b_ref, ci):
        # 1x1 conv as unrolled VPU MACs (ci <= 8) fused with folded BN scale/shift.
        acc = v[:, :, 0:1] * pw_ref[0:1, :]
        for c in range(1, ci):
            acc = acc + v[:, :, c:c + 1] * pw_ref[c:c + 1, :]
        return acc * s_ref[...] + b_ref[...]

    def kernel(*refs):
        it = iter(refs)
        x_ref = next(it)
        blk_refs = [(next(it), next(it), next(it), next(it)) for _ in range(n_blocks)]
        if resize_identity:
            wid_ref, sid_ref, bid_ref = next(it), next(it), next(it)
        o_ref = next(it)
        pad_ref = next(it)

        x = x_ref[0].astype(jnp.float32)                         # (H, W, Cin)

        # ---- identity branch (full resolution; stride handled in the epilogue) ----
        if resize_identity:
            identity = pw_bn(x, wid_ref, sid_ref, bid_ref, Cin)  # (H, W, Cout)
        else:
            identity = x

        # ---- body: reps x (ReLU -> depthwise 3x3 -> pointwise 1x1 -> BN) ----
        y = x
        for (dw_ref, pw_ref, s_ref, b_ref), cfg in zip(blk_refs, blocks):
            ci, act = cfg["ci"], cfg["activate"]
            v = jnp.maximum(y, 0.0) if act else y
            # zero-padded depthwise 3x3 (stride 1); padding done in VMEM scratch.
            pad_ref[...] = jnp.zeros_like(pad_ref)
            pad_ref[1:H + 1, 1:W + 1, 0:ci] = v
            acc = None
            for kh in range(3):
                for kw in range(3):
                    k = kh * 3 + kw
                    patch = pad_ref[kh:kh + H, kw:kw + W, 0:ci]          # (H, W, ci)
                    term = patch * dw_ref[k:k + 1, :]
                    acc = term if acc is None else acc + term
            y = pw_bn(acc, pw_ref, s_ref, b_ref, ci)                     # (H, W, co)

        # ---- pool + residual add + stride-s subsample, fused epilogue ----
        if stride != 1:
            pad_ref[...] = jnp.full((H + 2, W + 2, pad_ref.shape[-1]), -jnp.inf, jnp.float32)
            pad_ref[1:H + 1, 1:W + 1, 0:Cout] = y
            m = None
            for kh in range(3):
                for kw in range(3):
                    patch = pad_ref[kh:kh + H, kw:kw + W, 0:Cout]
                    m = patch if m is None else jnp.maximum(m, patch)
            full = m + identity                                          # (H, W, Cout)
            # stride-s subsample: rows via unit-stride slices + leading-dim concat,
            # columns written straight into the output block.
            hsub = jnp.concatenate([full[i:i + 1] for i in range(0, H, stride)], axis=0)
            for jo in range(Wo):
                js = jo * stride
                o_ref[0, :, jo:jo + 1, :] = hsub[:, js:js + 1, :].astype(o_ref.dtype)
        else:
            o_ref[0] = (y + identity).astype(o_ref.dtype)

    return kernel


# ---------------- forward wrapper (single pallas_call) ----------------

def xception_unit_forward_nchw(x_nchw, prep, stride):
    """XceptionUnit forward.  x: (N, Cin, H, W) NCHW -> (N, Cout, Ho, Wo) NCHW."""
    x = jnp.transpose(x_nchw, (0, 2, 3, 1)).astype(jnp.float32)   # NCHW -> NHWC (edge only)
    N, H, W, Cin = x.shape
    resize_identity = prep["id"] is not None

    inputs = [x]
    in_specs = [pl.BlockSpec((1, H, W, Cin), lambda n: (n, 0, 0, 0))]
    blocks_cfg = []
    for blk in prep["blocks"]:
        ci, co = blk["pw"].shape
        blocks_cfg.append({"ci": int(ci), "co": int(co), "activate": blk["activate"]})
        inputs += [blk["dw"], blk["pw"], blk["s"], blk["b"]]
        in_specs += [pl.BlockSpec((9, ci), lambda n: (0, 0)),
                     pl.BlockSpec((ci, co), lambda n: (0, 0)),
                     pl.BlockSpec((1, co), lambda n: (0, 0)),
                     pl.BlockSpec((1, co), lambda n: (0, 0))]
    if resize_identity:
        Cout = int(prep["id"]["w"].shape[1])
        inputs += [prep["id"]["w"], prep["id"]["s"], prep["id"]["b"]]
        in_specs += [pl.BlockSpec((Cin, Cout), lambda n: (0, 0)),
                     pl.BlockSpec((1, Cout), lambda n: (0, 0)),
                     pl.BlockSpec((1, Cout), lambda n: (0, 0))]
    else:
        Cout = blocks_cfg[-1]["co"] if blocks_cfg else Cin

    if stride != 1:
        Ho = (H - 1) // stride + 1
        Wo = (W - 1) // stride + 1
    else:
        Ho, Wo = H, W
    Cmax = max([Cin, Cout] + [c["ci"] for c in blocks_cfg] + [c["co"] for c in blocks_cfg])

    kernel = _build_unit_kernel(H, W, Ho, Wo, stride, Cin, Cout, blocks_cfg, resize_identity)
    out = pl.pallas_call(
        kernel,
        out_shape=jax.ShapeDtypeStruct((N, Ho, Wo, Cout), jnp.float32),
        grid=(N,),
        in_specs=in_specs,
        out_specs=pl.BlockSpec((1, Ho, Wo, Cout), lambda n: (n, 0, 0, 0)),
        scratch_shapes=[pltpu.VMEM((H + 2, W + 2, Cmax), jnp.float32)],
        compiler_params=pltpu.CompilerParams(dimension_semantics=("parallel",)),
    )(*inputs)
    return jnp.transpose(out, (0, 3, 1, 2))                       # NHWC -> NCHW (edge only)


# ---------------- pure-JAX reference (for validation) ----------------

def _bn_ref(x_nchw, gamma, beta, mean, var, eps=1e-5):
    g = gamma.reshape(1, -1, 1, 1)
    b = beta.reshape(1, -1, 1, 1)
    m = mean.reshape(1, -1, 1, 1)
    v = var.reshape(1, -1, 1, 1)
    return (x_nchw - m) / jnp.sqrt(v + eps) * g + b


def ref_forward_nchw(x, p, stride):
    dn = ("NCHW", "OIHW", "NCHW")
    if p["id"] is not None:
        ident = lax.conv_general_dilated(x, p["id"]["w"][:, :, None, None],
                                         (stride, stride), "VALID", dimension_numbers=dn)
        ident = _bn_ref(ident, *p["id"]["bn"])
    else:
        ident = x
    y = x
    for blk in p["blocks"]:
        if blk["activate"]:
            y = jnp.maximum(y, 0.0)
        cin = blk["dw"].shape[0]
        y = lax.conv_general_dilated(y, blk["dw"][:, None, :, :], (1, 1), ((1, 1), (1, 1)),
                                     dimension_numbers=dn, feature_group_count=cin)
        y = lax.conv_general_dilated(y, blk["pw"][:, :, None, None], (1, 1), "VALID",
                                     dimension_numbers=dn)
        y = _bn_ref(y, *blk["bn"])
    if stride != 1:
        y = lax.reduce_window(y, -jnp.inf, lax.max, (1, 1, 3, 3), (1, 1, stride, stride),
                              ((0, 0), (0, 0), (1, 1), (1, 1)))
    return y + ident


# ---------------- deterministic parameter construction ----------------

def make_params(key, in_ch, out_ch, stride, reps, start_with_relu=True, grow_first=True):
    ks = list(jax.random.split(key, reps * 6 + 8))
    ki = iter(ks)

    def bn_params(c):
        gamma = 1.0 + 0.1 * jax.random.normal(next(ki), (c,), jnp.float32)
        beta = 0.1 * jax.random.normal(next(ki), (c,), jnp.float32)
        mean = 0.1 * jax.random.normal(next(ki), (c,), jnp.float32)
        var = jax.random.uniform(next(ki), (c,), jnp.float32, 0.5, 1.5)
        return (gamma, beta, mean, var)

    resize_identity = (in_ch != out_ch) or (stride != 1)
    ident = None
    if resize_identity:
        ident = {"w": 0.1 * jax.random.normal(next(ki), (out_ch, in_ch), jnp.float32),
                 "bn": bn_params(out_ch)}

    blocks = []
    for i in range(reps):
        if (grow_first and i == 0) or ((not grow_first) and i == reps - 1):
            ci, co = in_ch, out_ch
        elif grow_first:
            ci, co = out_ch, out_ch
        else:
            ci, co = in_ch, in_ch
        blocks.append({
            "dw": 0.1 * jax.random.normal(next(ki), (ci, 3, 3), jnp.float32),
            "pw": 0.1 * jax.random.normal(next(ki), (co, ci), jnp.float32),
            "bn": bn_params(co),
            "activate": (start_with_relu if i == 0 else True),
        })
    return {"id": ident, "blocks": blocks}


# ---------------- main ----------------

if __name__ == "__main__":
    key = jax.random.PRNGKey(0)
    k_par, k_x = jax.random.split(key)

    N, Cin, H, W = 2, 4, 16, 16
    Cout, stride, reps = 8, 2, 2

    params = make_params(k_par, Cin, Cout, stride, reps,
                         start_with_relu=True, grow_first=True)
    prep = prepare_params(params)          # hoisted: BN folding + weight transposes
    x_nchw = jax.random.normal(k_x, (N, Cin, H, W), jnp.float32)

    out = xception_unit_forward_nchw(x_nchw, prep, stride)
    out = jax.block_until_ready(out)

    ref = ref_forward_nchw(x_nchw, params, stride)
    assert out.shape == ref.shape == (N, Cout, H // stride, W // stride), (out.shape, ref.shape)
    max_err = float(jnp.max(jnp.abs(out - ref)))
    assert jnp.allclose(out, ref, rtol=1e-3, atol=1e-4), f"max abs err {max_err}"

    print("KERNEL_OK")
</pallas_src>

<mosaic_0001>
module attributes {stable_mosaic.version = 11 : i64} {
  func.func @kernel(%arg0: i32, %arg1: memref<1x16x16x4xf32, #tpu.memory_space<vmem>>, %arg2: memref<9x4xf32, #tpu.memory_space<vmem>>, %arg3: memref<4x8xf32, #tpu.memory_space<vmem>>, %arg4: memref<1x8xf32, #tpu.memory_space<vmem>>, %arg5: memref<1x8xf32, #tpu.memory_space<vmem>>, %arg6: memref<9x8xf32, #tpu.memory_space<vmem>>, %arg7: memref<8x8xf32, #tpu.memory_space<vmem>>, %arg8: memref<1x8xf32, #tpu.memory_space<vmem>>, %arg9: memref<1x8xf32, #tpu.memory_space<vmem>>, %arg10: memref<4x8xf32, #tpu.memory_space<vmem>>, %arg11: memref<1x8xf32, #tpu.memory_space<vmem>>, %arg12: memref<1x8xf32, #tpu.memory_space<vmem>>, %arg13: memref<1x8x8x8xf32, #tpu.memory_space<vmem>>, %arg14: memref<18x18x8xf32, #tpu.memory_space<vmem>>) attributes {dimension_semantics = [#tpu.dimension_semantics<parallel>], iteration_bounds = array<i64: 2>, scalar_prefetch = 0 : i64, scratch_operands = 1 : i64, tpu.core_type = #tpu.core_type<tc>, window_params = [{transform_indices = @transform_0, window_bounds = array<i64: 1, 16, 16, 4>}, {pipeline_mode = #tpu.pipeline_mode<synchronous>, transform_indices = @transform_1, window_bounds = array<i64: 9, 4>}, {pipeline_mode = #tpu.pipeline_mode<synchronous>, transform_indices = @transform_2, window_bounds = array<i64: 4, 8>}, {pipeline_mode = #tpu.pipeline_mode<synchronous>, transform_indices = @transform_3, window_bounds = array<i64: 1, 8>}, {pipeline_mode = #tpu.pipeline_mode<synchronous>, transform_indices = @transform_4, window_bounds = array<i64: 1, 8>}, {pipeline_mode = #tpu.pipeline_mode<synchronous>, transform_indices = @transform_5, window_bounds = array<i64: 9, 8>}, {pipeline_mode = #tpu.pipeline_mode<synchronous>, transform_indices = @transform_6, window_bounds = array<i64: 8, 8>}, {pipeline_mode = #tpu.pipeline_mode<synchronous>, transform_indices = @transform_7, window_bounds = array<i64: 1, 8>}, {pipeline_mode = #tpu.pipeline_mode<synchronous>, transform_indices = @transform_8, window_bounds = array<i64: 1, 8>}, {pipeline_mode = #tpu.pipeline_mode<synchronous>, transform_indices = @transform_9, window_bounds = array<i64: 4, 8>}, {pipeline_mode = #tpu.pipeline_mode<synchronous>, transform_indices = @transform_10, window_bounds = array<i64: 1, 8>}, {pipeline_mode = #tpu.pipeline_mode<synchronous>, transform_indices = @transform_11, window_bounds = array<i64: 1, 8>}, {transform_indices = @transform_12, window_bounds = array<i64: 1, 8, 8, 8>}]} {
    %c0 = arith.constant 0 : index
    %c0_0 = arith.constant 0 : index
    %c0_1 = arith.constant 0 : index
    %c0_2 = arith.constant 0 : index
    %0 = vector.load %arg1[%c0, %c0_0, %c0_1, %c0_2] : memref<1x16x16x4xf32, #tpu.memory_space<vmem>>, vector<1x16x16x4xf32>
    %1 = vector.shape_cast %0 : vector<1x16x16x4xf32> to vector<16x16x4xf32>
    %2 = vector.extract_strided_slice %1 {offsets = [0, 0, 0], sizes = [16, 16, 1], strides = [1, 1, 1]} : vector<16x16x4xf32> to vector<16x16x1xf32>
    %c0_3 = arith.constant 0 : index
    %c0_4 = arith.constant 0 : index
    %3 = vector.load %arg10[%c0_3, %c0_4] : memref<4x8xf32, #tpu.memory_space<vmem>>, vector<1x8xf32>
    %4 = vector.shape_cast %3 : vector<1x8xf32> to vector<1x1x8xf32>
    %5 = vector.broadcast %2 : vector<16x16x1xf32> to vector<16x16x8xf32>
    %6 = vector.broadcast %4 : vector<1x1x8xf32> to vector<16x16x8xf32>
    %7 = arith.mulf %5, %6 : vector<16x16x8xf32>
    %8 = vector.extract_strided_slice %1 {offsets = [0, 0, 1], sizes = [16, 16, 1], strides = [1, 1, 1]} : vector<16x16x4xf32> to vector<16x16x1xf32>
    %c1 = arith.constant 1 : index
    %c0_5 = arith.constant 0 : index
    %9 = vector.load %arg10[%c1, %c0_5] : memref<4x8xf32, #tpu.memory_space<vmem>>, vector<1x8xf32>
    %10 = vector.shape_cast %9 : vector<1x8xf32> to vector<1x1x8xf32>
    %11 = vector.broadcast %8 : vector<16x16x1xf32> to vector<16x16x8xf32>
    %12 = vector.broadcast %10 : vector<1x1x8xf32> to vector<16x16x8xf32>
    %13 = arith.mulf %11, %12 : vector<16x16x8xf32>
    %14 = arith.addf %7, %13 : vector<16x16x8xf32>
    %15 = vector.extract_strided_slice %1 {offsets = [0, 0, 2], sizes = [16, 16, 1], strides = [1, 1, 1]} : vector<16x16x4xf32> to vector<16x16x1xf32>
    %c2 = arith.constant 2 : index
    %c0_6 = arith.constant 0 : index
    %16 = vector.load %arg10[%c2, %c0_6] : memref<4x8xf32, #tpu.memory_space<vmem>>, vector<1x8xf32>
    %17 = vector.shape_cast %16 : vector<1x8xf32> to vector<1x1x8xf32>
    %18 = vector.broadcast %15 : vector<16x16x1xf32> to vector<16x16x8xf32>
    %19 = vector.broadcast %17 : vector<1x1x8xf32> to vector<16x16x8xf32>
    %20 = arith.mulf %18, %19 : vector<16x16x8xf32>
    %21 = arith.addf %14, %20 : vector<16x16x8xf32>
    %22 = vector.extract_strided_slice %1 {offsets = [0, 0, 3], sizes = [16, 16, 1], strides = [1, 1, 1]} : vector<16x16x4xf32> to vector<16x16x1xf32>
    %c3 = arith.constant 3 : index
    %c0_7 = arith.constant 0 : index
    %23 = vector.load %arg10[%c3, %c0_7] : memref<4x8xf32, #tpu.memory_space<vmem>>, vector<1x8xf32>
    %24 = vector.shape_cast %23 : vector<1x8xf32> to vector<1x1x8xf32>
    %25 = vector.broadcast %22 : vector<16x16x1xf32> to vector<16x16x8xf32>
    %26 = vector.broadcast %24 : vector<1x1x8xf32> to vector<16x16x8xf32>
    %27 = arith.mulf %25, %26 : vector<16x16x8xf32>
    %28 = arith.addf %21, %27 : vector<16x16x8xf32>
    %c0_8 = arith.constant 0 : index
    %c0_9 = arith.constant 0 : index
    %29 = vector.load %arg11[%c0_8, %c0_9] : memref<1x8xf32, #tpu.memory_space<vmem>>, vector<1x8xf32>
    %30 = vector.shape_cast %29 : vector<1x8xf32> to vector<1x1x8xf32>
    %31 = vector.broadcast %30 : vector<1x1x8xf32> to vector<16x16x8xf32>
    %32 = arith.mulf %28, %31 : vector<16x16x8xf32>
    %c0_10 = arith.constant 0 : index
    %c0_11 = arith.constant 0 : index
    %33 = vector.load %arg12[%c0_10, %c0_11] : memref<1x8xf32, #tpu.memory_space<vmem>>, vector<1x8xf32>
    %34 = vector.shape_cast %33 : vector<1x8xf32> to vector<1x1x8xf32>
    %35 = vector.broadcast %34 : vector<1x1x8xf32> to vector<16x16x8xf32>
    %36 = arith.addf %32, %35 : vector<16x16x8xf32>
    %cst = arith.constant 0.000000e+00 : f32
    %37 = vector.broadcast %cst : f32 to vector<16x16x4xf32>
    %38 = arith.maximumf %1, %37 : vector<16x16x4xf32>
    %cst_12 = arith.constant 0.000000e+00 : f32
    %39 = vector.broadcast %cst_12 : f32 to vector<18x18x8xf32>
    %c0_13 = arith.constant 0 : index
    %c0_14 = arith.constant 0 : index
    %c0_15 = arith.constant 0 : index
    %40 = vector.load %arg14[%c0_13, %c0_14, %c0_15] : memref<18x18x8xf32, #tpu.memory_space<vmem>>, vector<18x18x8xf32>
    tpu.vector_store %arg14[%c0_13, %c0_14, %c0_15], %39 {strides = array<i32>} : memref<18x18x8xf32, #tpu.memory_space<vmem>>, vector<18x18x8xf32>,
    %c1_16 = arith.constant 1 : index
    %c1_17 = arith.constant 1 : index
    %c0_18 = arith.constant 0 : index
    %41 = vector.load %arg14[%c1_16, %c1_17, %c0_18] : memref<18x18x8xf32, #tpu.memory_space<vmem>>, vector<16x16x4xf32>
    tpu.vector_store %arg14[%c1_16, %c1_17, %c0_18], %38 {strides = array<i32>} : memref<18x18x8xf32, #tpu.memory_space<vmem>>, vector<16x16x4xf32>,
    %c0_19 = arith.constant 0 : index
    %c0_20 = arith.constant 0 : index
    %c0_21 = arith.constant 0 : index
    %42 = vector.load %arg14[%c0_19, %c0_20, %c0_21] : memref<18x18x8xf32, #tpu.memory_space<vmem>>, vector<16x16x4xf32>
    %c0_22 = arith.constant 0 : index
    %c0_23 = arith.constant 0 : index
    %43 = vector.load %arg2[%c0_22, %c0_23] : memref<9x4xf32, #tpu.memory_space<vmem>>, vector<1x4xf32>
    %44 = vector.shape_cast %43 : vector<1x4xf32> to vector<1x1x4xf32>
    %45 = vector.broadcast %44 : vector<1x1x4xf32> to vector<16x16x4xf32>
    %46 = arith.mulf %42, %45 : vector<16x16x4xf32>
    %c0_24 = arith.constant 0 : index
    %c1_25 = arith.constant 1 : index
    %c0_26 = arith.constant 0 : index
    %47 = vector.load %arg14[%c0_24, %c1_25, %c0_26] : memref<18x18x8xf32, #tpu.memory_space<vmem>>, vector<16x16x4xf32>
    %c1_27 = arith.constant 1 : index
    %c0_28 = arith.constant 0 : index
    %48 = vector.load %arg2[%c1_27, %c0_28] : memref<9x4xf32, #tpu.memory_space<vmem>>, vector<1x4xf32>
    %49 = vector.shape_cast %48 : vector<1x4xf32> to vector<1x1x4xf32>
    %50 = vector.broadcast %49 : vector<1x1x4xf32> to vector<16x16x4xf32>
    %51 = arith.mulf %47, %50 : vector<16x16x4xf32>
    %52 = arith.addf %46, %51 : vector<16x16x4xf32>
    %c0_29 = arith.constant 0 : index
    %c2_30 = arith.constant 2 : index
    %c0_31 = arith.constant 0 : index
    %53 = vector.load %arg14[%c0_29, %c2_30, %c0_31] : memref<18x18x8xf32, #tpu.memory_space<vmem>>, vector<16x16x4xf32>
    %c2_32 = arith.constant 2 : index
    %c0_33 = arith.constant 0 : index
    %54 = vector.load %arg2[%c2_32, %c0_33] : memref<9x4xf32, #tpu.memory_space<vmem>>, vector<1x4xf32>
    %55 = vector.shape_cast %54 : vector<1x4xf32> to vector<1x1x4xf32>
    %56 = vector.broadcast %55 : vector<1x1x4xf32> to vector<16x16x4xf32>
    %57 = arith.mulf %53, %56 : vector<16x16x4xf32>
    %58 = arith.addf %52, %57 : vector<16x16x4xf32>
    %c1_34 = arith.constant 1 : index
    %c0_35 = arith.constant 0 : index
    %c0_36 = arith.constant 0 : index
    %59 = vector.load %arg14[%c1_34, %c0_35, %c0_36] : memref<18x18x8xf32, #tpu.memory_space<vmem>>, vector<16x16x4xf32>
    %c3_37 = arith.constant 3 : index
    %c0_38 = arith.constant 0 : index
    %60 = vector.load %arg2[%c3_37, %c0_38] : memref<9x4xf32, #tpu.memory_space<vmem>>, vector<1x4xf32>
    %61 = vector.shape_cast %60 : vector<1x4xf32> to vector<1x1x4xf32>
    %62 = vector.broadcast %61 : vector<1x1x4xf32> to vector<16x16x4xf32>
    %63 = arith.mulf %59, %62 : vector<16x16x4xf32>
    %64 = arith.addf %58, %63 : vector<16x16x4xf32>
    %c1_39 = arith.constant 1 : index
    %c1_40 = arith.constant 1 : index
    %c0_41 = arith.constant 0 : index
    %65 = vector.load %arg14[%c1_39, %c1_40, %c0_41] : memref<18x18x8xf32, #tpu.memory_space<vmem>>, vector<16x16x4xf32>
    %c4 = arith.constant 4 : index
    %c0_42 = arith.constant 0 : index
    %66 = vector.load %arg2[%c4, %c0_42] : memref<9x4xf32, #tpu.memory_space<vmem>>, vector<1x4xf32>
    %67 = vector.shape_cast %66 : vector<1x4xf32> to vector<1x1x4xf32>
    %68 = vector.broadcast %67 : vector<1x1x4xf32> to vector<16x16x4xf32>
    %69 = arith.mulf %65, %68 : vector<16x16x4xf32>
    %70 = arith.addf %64, %69 : vector<16x16x4xf32>
    %c1_43 = arith.constant 1 : index
    %c2_44 = arith.constant 2 : index
    %c0_45 = arith.constant 0 : index
    %71 = vector.load %arg14[%c1_43, %c2_44, %c0_45] : memref<18x18x8xf32, #tpu.memory_space<vmem>>, vector<16x16x4xf32>
    %c5 = arith.constant 5 : index
    %c0_46 = arith.constant 0 : index
    %72 = vector.load %arg2[%c5, %c0_46] : memref<9x4xf32, #tpu.memory_space<vmem>>, vector<1x4xf32>
    %73 = vector.shape_cast %72 : vector<1x4xf32> to vector<1x1x4xf32>
    %74 = vector.broadcast %73 : vector<1x1x4xf32> to vector<16x16x4xf32>
    %75 = arith.mulf %71, %74 : vector<16x16x4xf32>
    %76 = arith.addf %70, %75 : vector<16x16x4xf32>
    %c2_47 = arith.constant 2 : index
    %c0_48 = arith.constant 0 : index
    %c0_49 = arith.constant 0 : index
    %77 = vector.load %arg14[%c2_47, %c0_48, %c0_49] : memref<18x18x8xf32, #tpu.memory_space<vmem>>, vector<16x16x4xf32>
    %c6 = arith.constant 6 : index
    %c0_50 = arith.constant 0 : index
    %78 = vector.load %arg2[%c6, %c0_50] : memref<9x4xf32, #tpu.memory_space<vmem>>, vector<1x4xf32>
    %79 = vector.shape_cast %78 : vector<1x4xf32> to vector<1x1x4xf32>
    %80 = vector.broadcast %79 : vector<1x1x4xf32> to vector<16x16x4xf32>
    %81 = arith.mulf %77, %80 : vector<16x16x4xf32>
    %82 = arith.addf %76, %81 : vector<16x16x4xf32>
    %c2_51 = arith.constant 2 : index
    %c1_52 = arith.constant 1 : index
    %c0_53 = arith.constant 0 : index
    %83 = vector.load %arg14[%c2_51, %c1_52, %c0_53] : memref<18x18x8xf32, #tpu.memory_space<vmem>>, vector<16x16x4xf32>
    %c7 = arith.constant 7 : index
    %c0_54 = arith.constant 0 : index
    %84 = vector.load %arg2[%c7, %c0_54] : memref<9x4xf32, #tpu.memory_space<vmem>>, vector<1x4xf32>
    %85 = vector.shape_cast %84 : vector<1x4xf32> to vector<1x1x4xf32>
    %86 = vector.broadcast %85 : vector<1x1x4xf32> to vector<16x16x4xf32>
    %87 = arith.mulf %83, %86 : vector<16x16x4xf32>
    %88 = arith.addf %82, %87 : vector<16x16x4xf32>
    %c2_55 = arith.constant 2 : index
    %c2_56 = arith.constant 2 : index
    %c0_57 = arith.constant 0 : index
    %89 = vector.load %arg14[%c2_55, %c2_56, %c0_57] : memref<18x18x8xf32, #tpu.memory_space<vmem>>, vector<16x16x4xf32>
    %c8 = arith.constant 8 : index
    %c0_58 = arith.constant 0 : index
    %90 = vector.load %arg2[%c8, %c0_58] : memref<9x4xf32, #tpu.memory_space<vmem>>, vector<1x4xf32>
    %91 = vector.shape_cast %90 : vector<1x4xf32> to vector<1x1x4xf32>
    %92 = vector.broadcast %91 : vector<1x1x4xf32> to vector<16x16x4xf32>
    %93 = arith.mulf %89, %92 : vector<16x16x4xf32>
    %94 = arith.addf %88, %93 : vector<16x16x4xf32>
    %95 = vector.extract_strided_slice %94 {offsets = [0, 0, 0], sizes = [16, 16, 1], strides = [1, 1, 1]} : vector<16x16x4xf32> to vector<16x16x1xf32>
    %c0_59 = arith.constant 0 : index
    %c0_60 = arith.constant 0 : index
    %96 = vector.load %arg3[%c0_59, %c0_60] : memref<4x8xf32, #tpu.memory_space<vmem>>, vector<1x8xf32>
    %97 = vector.shape_cast %96 : vector<1x8xf32> to vector<1x1x8xf32>
    %98 = vector.broadcast %95 : vector<16x16x1xf32> to vector<16x16x8xf32>
    %99 = vector.broadcast %97 : vector<1x1x8xf32> to vector<16x16x8xf32>
    %100 = arith.mulf %98, %99 : vector<16x16x8xf32>
    %101 = vector.extract_strided_slice %94 {offsets = [0, 0, 1], sizes = [16, 16, 1], strides = [1, 1, 1]} : vector<16x16x4xf32> to vector<16x16x1xf32>
    %c1_61 = arith.constant 1 : index
    %c0_62 = arith.constant 0 : index
    %102 = vector.load %arg3[%c1_61, %c0_62] : memref<4x8xf32, #tpu.memory_space<vmem>>, vector<1x8xf32>
    %103 = vector.shape_cast %102 : vector<1x8xf32> to vector<1x1x8xf32>
    %104 = vector.broadcast %101 : vector<16x16x1xf32> to vector<16x16x8xf32>
    %105 = vector.broadcast %103 : vector<1x1x8xf32> to vector<16x16x8xf32>
    %106 = arith.mulf %104, %105 : vector<16x16x8xf32>
    %107 = arith.addf %100, %106 : vector<16x16x8xf32>
    %108 = vector.extract_strided_slice %94 {offsets = [0, 0, 2], sizes = [16, 16, 1], strides = [1, 1, 1]} : vector<16x16x4xf32> to vector<16x16x1xf32>
    %c2_63 = arith.constant 2 : index
    %c0_64 = arith.constant 0 : index
    %109 = vector.load %arg3[%c2_63, %c0_64] : memref<4x8xf32, #tpu.memory_space<vmem>>, vector<1x8xf32>
    %110 = vector.shape_cast %109 : vector<1x8xf32> to vector<1x1x8xf32>
    %111 = vector.broadcast %108 : vector<16x16x1xf32> to vector<16x16x8xf32>
    %112 = vector.broadcast %110 : vector<1x1x8xf32> to vector<16x16x8xf32>
    %113 = arith.mulf %111, %112 : vector<16x16x8xf32>
    %114 = arith.addf %107, %113 : vector<16x16x8xf32>
    %115 = vector.extract_strided_slice %94 {offsets = [0, 0, 3], sizes = [16, 16, 1], strides = [1, 1, 1]} : vector<16x16x4xf32> to vector<16x16x1xf32>
    %c3_65 = arith.constant 3 : index
    %c0_66 = arith.constant 0 : index
    %116 = vector.load %arg3[%c3_65, %c0_66] : memref<4x8xf32, #tpu.memory_space<vmem>>, vector<1x8xf32>
    %117 = vector.shape_cast %116 : vector<1x8xf32> to vector<1x1x8xf32>
    %118 = vector.broadcast %115 : vector<16x16x1xf32> to vector<16x16x8xf32>
    %119 = vector.broadcast %117 : vector<1x1x8xf32> to vector<16x16x8xf32>
    %120 = arith.mulf %118, %119 : vector<16x16x8xf32>
    %121 = arith.addf %114, %120 : vector<16x16x8xf32>
    %c0_67 = arith.constant 0 : index
    %c0_68 = arith.constant 0 : index
    %122 = vector.load %arg4[%c0_67, %c0_68] : memref<1x8xf32, #tpu.memory_space<vmem>>, vector<1x8xf32>
    %123 = vector.shape_cast %122 : vector<1x8xf32> to vector<1x1x8xf32>
    %124 = vector.broadcast %123 : vector<1x1x8xf32> to vector<16x16x8xf32>
    %125 = arith.mulf %121, %124 : vector<16x16x8xf32>
    %c0_69 = arith.constant 0 : index
    %c0_70 = arith.constant 0 : index
    %126 = vector.load %arg5[%c0_69, %c0_70] : memref<1x8xf32, #tpu.memory_space<vmem>>, vector<1x8xf32>
    %127 = vector.shape_cast %126 : vector<1x8xf32> to vector<1x1x8xf32>
    %128 = vector.broadcast %127 : vector<1x1x8xf32> to vector<16x16x8xf32>
    %129 = arith.addf %125, %128 : vector<16x16x8xf32>
    %cst_71 = arith.constant 0.000000e+00 : f32
    %130 = vector.broadcast %cst_71 : f32 to vector<16x16x8xf32>
    %131 = arith.maximumf %129, %130 : vector<16x16x8xf32>
    %cst_72 = arith.constant 0.000000e+00 : f32
    %132 = vector.broadcast %cst_72 : f32 to vector<18x18x8xf32>
    %c0_73 = arith.constant 0 : index
    %c0_74 = arith.constant 0 : index
    %c0_75 = arith.constant 0 : index
    %133 = vector.load %arg14[%c0_73, %c0_74, %c0_75] : memref<18x18x8xf32, #tpu.memory_space<vmem>>, vector<18x18x8xf32>
    tpu.vector_store %arg14[%c0_73, %c0_74, %c0_75], %132 {strides = array<i32>} : memref<18x18x8xf32, #tpu.memory_space<vmem>>, vector<18x18x8xf32>,
    %c1_76 = arith.constant 1 : index
    %c1_77 = arith.constant 1 : index
    %c0_78 = arith.constant 0 : index
    %134 = vector.load %arg14[%c1_76, %c1_77, %c0_78] : memref<18x18x8xf32, #tpu.memory_space<vmem>>, vector<16x16x8xf32>
    tpu.vector_store %arg14[%c1_76, %c1_77, %c0_78], %131 {strides = array<i32>} : memref<18x18x8xf32, #tpu.memory_space<vmem>>, vector<16x16x8xf32>,
    %c0_79 = arith.constant 0 : index
    %c0_80 = arith.constant 0 : index
    %c0_81 = arith.constant 0 : index
    %135 = vector.load %arg14[%c0_79, %c0_80, %c0_81] : memref<18x18x8xf32, #tpu.memory_space<vmem>>, vector<16x16x8xf32>
    %c0_82 = arith.constant 0 : index
    %c0_83 = arith.constant 0 : index
    %136 = vector.load %arg6[%c0_82, %c0_83] : memref<9x8xf32, #tpu.memory_space<vmem>>, vector<1x8xf32>
    %137 = vector.shape_cast %136 : vector<1x8xf32> to vector<1x1x8xf32>
    %138 = vector.broadcast %137 : vector<1x1x8xf32> to vector<16x16x8xf32>
    %139 = arith.mulf %135, %138 : vector<16x16x8xf32>
    %c0_84 = arith.constant 0 : index
    %c1_85 = arith.constant 1 : index
    %c0_86 = arith.constant 0 : index
    %140 = vector.load %arg14[%c0_84, %c1_85, %c0_86] : memref<18x18x8xf32, #tpu.memory_space<vmem>>, vector<16x16x8xf32>
    %c1_87 = arith.constant 1 : index
    %c0_88 = arith.constant 0 : index
    %141 = vector.load %arg6[%c1_87, %c0_88] : memref<9x8xf32, #tpu.memory_space<vmem>>, vector<1x8xf32>
    %142 = vector.shape_cast %141 : vector<1x8xf32> to vector<1x1x8xf32>
    %143 = vector.broadcast %142 : vector<1x1x8xf32> to vector<16x16x8xf32>
    %144 = arith.mulf %140, %143 : vector<16x16x8xf32>
    %145 = arith.addf %139, %144 : vector<16x16x8xf32>
    %c0_89 = arith.constant 0 : index
    %c2_90 = arith.constant 2 : index
    %c0_91 = arith.constant 0 : index
    %146 = vector.load %arg14[%c0_89, %c2_90, %c0_91] : memref<18x18x8xf32, #tpu.memory_space<vmem>>, vector<16x16x8xf32>
    %c2_92 = arith.constant 2 : index
    %c0_93 = arith.constant 0 : index
    %147 = vector.load %arg6[%c2_92, %c0_93] : memref<9x8xf32, #tpu.memory_space<vmem>>, vector<1x8xf32>
    %148 = vector.shape_cast %147 : vector<1x8xf32> to vector<1x1x8xf32>
    %149 = vector.broadcast %148 : vector<1x1x8xf32> to vector<16x16x8xf32>
    %150 = arith.mulf %146, %149 : vector<16x16x8xf32>
    %151 = arith.addf %145, %150 : vector<16x16x8xf32>
    %c1_94 = arith.constant 1 : index
    %c0_95 = arith.constant 0 : index
    %c0_96 = arith.constant 0 : index
    %152 = vector.load %arg14[%c1_94, %c0_95, %c0_96] : memref<18x18x8xf32, #tpu.memory_space<vmem>>, vector<16x16x8xf32>
    %c3_97 = arith.constant 3 : index
    %c0_98 = arith.constant 0 : index
    %153 = vector.load %arg6[%c3_97, %c0_98] : memref<9x8xf32, #tpu.memory_space<vmem>>, vector<1x8xf32>
    %154 = vector.shape_cast %153 : vector<1x8xf32> to vector<1x1x8xf32>
    %155 = vector.broadcast %154 : vector<1x1x8xf32> to vector<16x16x8xf32>
    %156 = arith.mulf %152, %155 : vector<16x16x8xf32>
    %157 = arith.addf %151, %156 : vector<16x16x8xf32>
    %c1_99 = arith.constant 1 : index
    %c1_100 = arith.constant 1 : index
    %c0_101 = arith.constant 0 : index
    %158 = vector.load %arg14[%c1_99, %c1_100, %c0_101] : memref<18x18x8xf32, #tpu.memory_space<vmem>>, vector<16x16x8xf32>
    %c4_102 = arith.constant 4 : index
    %c0_103 = arith.constant 0 : index
    %159 = vector.load %arg6[%c4_102, %c0_103] : memref<9x8xf32, #tpu.memory_space<vmem>>, vector<1x8xf32>
    %160 = vector.shape_cast %159 : vector<1x8xf32> to vector<1x1x8xf32>
    %161 = vector.broadcast %160 : vector<1x1x8xf32> to vector<16x16x8xf32>
    %162 = arith.mulf %158, %161 : vector<16x16x8xf32>
    %163 = arith.addf %157, %162 : vector<16x16x8xf32>
    %c1_104 = arith.constant 1 : index
    %c2_105 = arith.constant 2 : index
    %c0_106 = arith.constant 0 : index
    %164 = vector.load %arg14[%c1_104, %c2_105, %c0_106] : memref<18x18x8xf32, #tpu.memory_space<vmem>>, vector<16x16x8xf32>
    %c5_107 = arith.constant 5 : index
    %c0_108 = arith.constant 0 : index
    %165 = vector.load %arg6[%c5_107, %c0_108] : memref<9x8xf32, #tpu.memory_space<vmem>>, vector<1x8xf32>
    %166 = vector.shape_cast %165 : vector<1x8xf32> to vector<1x1x8xf32>
    %167 = vector.broadcast %166 : vector<1x1x8xf32> to vector<16x16x8xf32>
    %168 = arith.mulf %164, %167 : vector<16x16x8xf32>
    %169 = arith.addf %163, %168 : vector<16x16x8xf32>
    %c2_109 = arith.constant 2 : index
    %c0_110 = arith.constant 0 : index
    %c0_111 = arith.constant 0 : index
    %170 = vector.load %arg14[%c2_109, %c0_110, %c0_111] : memref<18x18x8xf32, #tpu.memory_space<vmem>>, vector<16x16x8xf32>
    %c6_112 = arith.constant 6 : index
    %c0_113 = arith.constant 0 : index
    %171 = vector.load %arg6[%c6_112, %c0_113] : memref<9x8xf32, #tpu.memory_space<vmem>>, vector<1x8xf32>
    %172 = vector.shape_cast %171 : vector<1x8xf32> to vector<1x1x8xf32>
    %173 = vector.broadcast %172 : vector<1x1x8xf32> to vector<16x16x8xf32>
    %174 = arith.mulf %170, %173 : vector<16x16x8xf32>
    %175 = arith.addf %169, %174 : vector<16x16x8xf32>
    %c2_114 = arith.constant 2 : index
    %c1_115 = arith.constant 1 : index
    %c0_116 = arith.constant 0 : index
    %176 = vector.load %arg14[%c2_114, %c1_115, %c0_116] : memref<18x18x8xf32, #tpu.memory_space<vmem>>, vector<16x16x8xf32>
    %c7_117 = arith.constant 7 : index
    %c0_118 = arith.constant 0 : index
    %177 = vector.load %arg6[%c7_117, %c0_118] : memref<9x8xf32, #tpu.memory_space<vmem>>, vector<1x8xf32>
    %178 = vector.shape_cast %177 : vector<1x8xf32> to vector<1x1x8xf32>
    %179 = vector.broadcast %178 : vector<1x1x8xf32> to vector<16x16x8xf32>
    %180 = arith.mulf %176, %179 : vector<16x16x8xf32>
    %181 = arith.addf %175, %180 : vector<16x16x8xf32>
    %c2_119 = arith.constant 2 : index
    %c2_120 = arith.constant 2 : index
    %c0_121 = arith.constant 0 : index
    %182 = vector.load %arg14[%c2_119, %c2_120, %c0_121] : memref<18x18x8xf32, #tpu.memory_space<vmem>>, vector<16x16x8xf32>
    %c8_122 = arith.constant 8 : index
    %c0_123 = arith.constant 0 : index
    %183 = vector.load %arg6[%c8_122, %c0_123] : memref<9x8xf32, #tpu.memory_space<vmem>>, vector<1x8xf32>
    %184 = vector.shape_cast %183 : vector<1x8xf32> to vector<1x1x8xf32>
    %185 = vector.broadcast %184 : vector<1x1x8xf32> to vector<16x16x8xf32>
    %186 = arith.mulf %182, %185 : vector<16x16x8xf32>
    %187 = arith.addf %181, %186 : vector<16x16x8xf32>
    %188 = vector.extract_strided_slice %187 {offsets = [0, 0, 0], sizes = [16, 16, 1], strides = [1, 1, 1]} : vector<16x16x8xf32> to vector<16x16x1xf32>
    %c0_124 = arith.constant 0 : index
    %c0_125 = arith.constant 0 : index
    %189 = vector.load %arg7[%c0_124, %c0_125] : memref<8x8xf32, #tpu.memory_space<vmem>>, vector<1x8xf32>
    %190 = vector.shape_cast %189 : vector<1x8xf32> to vector<1x1x8xf32>
    %191 = vector.broadcast %188 : vector<16x16x1xf32> to vector<16x16x8xf32>
    %192 = vector.broadcast %190 : vector<1x1x8xf32> to vector<16x16x8xf32>
    %193 = arith.mulf %191, %192 : vector<16x16x8xf32>
    %194 = vector.extract_strided_slice %187 {offsets = [0, 0, 1], sizes = [16, 16, 1], strides = [1, 1, 1]} : vector<16x16x8xf32> to vector<16x16x1xf32>
    %c1_126 = arith.constant 1 : index
    %c0_127 = arith.constant 0 : index
    %195 = vector.load %arg7[%c1_126, %c0_127] : memref<8x8xf32, #tpu.memory_space<vmem>>, vector<1x8xf32>
    %196 = vector.shape_cast %195 : vector<1x8xf32> to vector<1x1x8xf32>
    %197 = vector.broadcast %194 : vector<16x16x1xf32> to vector<16x16x8xf32>
    %198 = vector.broadcast %196 : vector<1x1x8xf32> to vector<16x16x8xf32>
    %199 = arith.mulf %197, %198 : vector<16x16x8xf32>
    %200 = arith.addf %193, %199 : vector<16x16x8xf32>
    %201 = vector.extract_strided_slice %187 {offsets = [0, 0, 2], sizes = [16, 16, 1], strides = [1, 1, 1]} : vector<16x16x8xf32> to vector<16x16x1xf32>
    %c2_128 = arith.constant 2 : index
    %c0_129 = arith.constant 0 : index
    %202 = vector.load %arg7[%c2_128, %c0_129] : memref<8x8xf32, #tpu.memory_space<vmem>>, vector<1x8xf32>
    %203 = vector.shape_cast %202 : vector<1x8xf32> to vector<1x1x8xf32>
    %204 = vector.broadcast %201 : vector<16x16x1xf32> to vector<16x16x8xf32>
    %205 = vector.broadcast %203 : vector<1x1x8xf32> to vector<16x16x8xf32>
    %206 = arith.mulf %204, %205 : vector<16x16x8xf32>
    %207 = arith.addf %200, %206 : vector<16x16x8xf32>
    %208 = vector.extract_strided_slice %187 {offsets = [0, 0, 3], sizes = [16, 16, 1], strides = [1, 1, 1]} : vector<16x16x8xf32> to vector<16x16x1xf32>
    %c3_130 = arith.constant 3 : index
    %c0_131 = arith.constant 0 : index
    %209 = vector.load %arg7[%c3_130, %c0_131] : memref<8x8xf32, #tpu.memory_space<vmem>>, vector<1x8xf32>
    %210 = vector.shape_cast %209 : vector<1x8xf32> to vector<1x1x8xf32>
    %211 = vector.broadcast %208 : vector<16x16x1xf32> to vector<16x16x8xf32>
    %212 = vector.broadcast %210 : vector<1x1x8xf32> to vector<16x16x8xf32>
    %213 = arith.mulf %211, %212 : vector<16x16x8xf32>
    %214 = arith.addf %207, %213 : vector<16x16x8xf32>
    %215 = vector.extract_strided_slice %187 {offsets = [0, 0, 4], sizes = [16, 16, 1], strides = [1, 1, 1]} : vector<16x16x8xf32> to vector<16x16x1xf32>
    %c4_132 = arith.constant 4 : index
    %c0_133 = arith.constant 0 : index
    %216 = vector.load %arg7[%c4_132, %c0_133] : memref<8x8xf32, #tpu.memory_space<vmem>>, vector<1x8xf32>
    %217 = vector.shape_cast %216 : vector<1x8xf32> to vector<1x1x8xf32>
    %218 = vector.broadcast %215 : vector<16x16x1xf32> to vector<16x16x8xf32>
    %219 = vector.broadcast %217 : vector<1x1x8xf32> to vector<16x16x8xf32>
    %220 = arith.mulf %218, %219 : vector<16x16x8xf32>
    %221 = arith.addf %214, %220 : vector<16x16x8xf32>
    %222 = vector.extract_strided_slice %187 {offsets = [0, 0, 5], sizes = [16, 16, 1], strides = [1, 1, 1]} : vector<16x16x8xf32> to vector<16x16x1xf32>
    %c5_134 = arith.constant 5 : index
    %c0_135 = arith.constant 0 : index
    %223 = vector.load %arg7[%c5_134, %c0_135] : memref<8x8xf32, #tpu.memory_space<vmem>>, vector<1x8xf32>
    %224 = vector.shape_cast %223 : vector<1x8xf32> to vector<1x1x8xf32>
    %225 = vector.broadcast %222 : vector<16x16x1xf32> to vector<16x16x8xf32>
    %226 = vector.broadcast %224 : vector<1x1x8xf32> to vector<16x16x8xf32>
    %227 = arith.mulf %225, %226 : vector<16x16x8xf32>
    %228 = arith.addf %221, %227 : vector<16x16x8xf32>
    %229 = vector.extract_strided_slice %187 {offsets = [0, 0, 6], sizes = [16, 16, 1], strides = [1, 1, 1]} : vector<16x16x8xf32> to vector<16x16x1xf32>
    %c6_136 = arith.constant 6 : index
    %c0_137 = arith.constant 0 : index
    %230 = vector.load %arg7[%c6_136, %c0_137] : memref<8x8xf32, #tpu.memory_space<vmem>>, vector<1x8xf32>
    %231 = vector.shape_cast %230 : vector<1x8xf32> to vector<1x1x8xf32>
    %232 = vector.broadcast %229 : vector<16x16x1xf32> to vector<16x16x8xf32>
    %233 = vector.broadcast %231 : vector<1x1x8xf32> to vector<16x16x8xf32>
    %234 = arith.mulf %232, %233 : vector<16x16x8xf32>
    %235 = arith.addf %228, %234 : vector<16x16x8xf32>
    %236 = vector.extract_strided_slice %187 {offsets = [0, 0, 7], sizes = [16, 16, 1], strides = [1, 1, 1]} : vector<16x16x8xf32> to vector<16x16x1xf32>
    %c7_138 = arith.constant 7 : index
    %c0_139 = arith.constant 0 : index
    %237 = vector.load %arg7[%c7_138, %c0_139] : memref<8x8xf32, #tpu.memory_space<vmem>>, vector<1x8xf32>
    %238 = vector.shape_cast %237 : vector<1x8xf32> to vector<1x1x8xf32>
    %239 = vector.broadcast %236 : vector<16x16x1xf32> to vector<16x16x8xf32>
    %240 = vector.broadcast %238 : vector<1x1x8xf32> to vector<16x16x8xf32>
    %241 = arith.mulf %239, %240 : vector<16x16x8xf32>
    %242 = arith.addf %235, %241 : vector<16x16x8xf32>
    %c0_140 = arith.constant 0 : index
    %c0_141 = arith.constant 0 : index
    %243 = vector.load %arg8[%c0_140, %c0_141] : memref<1x8xf32, #tpu.memory_space<vmem>>, vector<1x8xf32>
    %244 = vector.shape_cast %243 : vector<1x8xf32> to vector<1x1x8xf32>
    %245 = vector.broadcast %244 : vector<1x1x8xf32> to vector<16x16x8xf32>
    %246 = arith.mulf %242, %245 : vector<16x16x8xf32>
    %c0_142 = arith.constant 0 : index
    %c0_143 = arith.constant 0 : index
    %247 = vector.load %arg9[%c0_142, %c0_143] : memref<1x8xf32, #tpu.memory_space<vmem>>, vector<1x8xf32>
    %248 = vector.shape_cast %247 : vector<1x8xf32> to vector<1x1x8xf32>
    %249 = vector.broadcast %248 : vector<1x1x8xf32> to vector<16x16x8xf32>
    %250 = arith.addf %246, %249 : vector<16x16x8xf32>
    %cst_144 = arith.constant 0xFF800000 : f32
    %251 = vector.broadcast %cst_144 : f32 to vector<18x18x8xf32>
    %c0_145 = arith.constant 0 : index
    %c0_146 = arith.constant 0 : index
    %c0_147 = arith.constant 0 : index
    %252 = vector.load %arg14[%c0_145, %c0_146, %c0_147] : memref<18x18x8xf32, #tpu.memory_space<vmem>>, vector<18x18x8xf32>
    tpu.vector_store %arg14[%c0_145, %c0_146, %c0_147], %251 {strides = array<i32>} : memref<18x18x8xf32, #tpu.memory_space<vmem>>, vector<18x18x8xf32>,
    %c1_148 = arith.constant 1 : index
    %c1_149 = arith.constant 1 : index
    %c0_150 = arith.constant 0 : index
    %253 = vector.load %arg14[%c1_148, %c1_149, %c0_150] : memref<18x18x8xf32, #tpu.memory_space<vmem>>, vector<16x16x8xf32>
    tpu.vector_store %arg14[%c1_148, %c1_149, %c0_150], %250 {strides = array<i32>} : memref<18x18x8xf32, #tpu.memory_space<vmem>>, vector<16x16x8xf32>,
    %c0_151 = arith.constant 0 : index
    %c0_152 = arith.constant 0 : index
    %c0_153 = arith.constant 0 : index
    %254 = vector.load %arg14[%c0_151, %c0_152, %c0_153] : memref<18x18x8xf32, #tpu.memory_space<vmem>>, vector<16x16x8xf32>
    %c0_154 = arith.constant 0 : index
    %c1_155 = arith.constant 1 : index
    %c0_156 = arith.constant 0 : index
    %255 = vector.load %arg14[%c0_154, %c1_155, %c0_156] : memref<18x18x8xf32, #tpu.memory_space<vmem>>, vector<16x16x8xf32>
    %256 = arith.maximumf %254, %255 : vector<16x16x8xf32>
    %c0_157 = arith.constant 0 : index
    %c2_158 = arith.constant 2 : index
    %c0_159 = arith.constant 0 : index
    %257 = vector.load %arg14[%c0_157, %c2_158, %c0_159] : memref<18x18x8xf32, #tpu.memory_space<vmem>>, vector<16x16x8xf32>
    %258 = arith.maximumf %256, %257 : vector<16x16x8xf32>
    %c1_160 = arith.constant 1 : index
    %c0_161 = arith.constant 0 : index
    %c0_162 = arith.constant 0 : index
    %259 = vector.load %arg14[%c1_160, %c0_161, %c0_162] : memref<18x18x8xf32, #tpu.memory_space<vmem>>, vector<16x16x8xf32>
    %260 = arith.maximumf %258, %259 : vector<16x16x8xf32>
    %c1_163 = arith.constant 1 : index
    %c1_164 = arith.constant 1 : index
    %c0_165 = arith.constant 0 : index
    %261 = vector.load %arg14[%c1_163, %c1_164, %c0_165] : memref<18x18x8xf32, #tpu.memory_space<vmem>>, vector<16x16x8xf32>
    %262 = arith.maximumf %260, %261 : vector<16x16x8xf32>
    %c1_166 = arith.constant 1 : index
    %c2_167 = arith.constant 2 : index
    %c0_168 = arith.constant 0 : index
    %263 = vector.load %arg14[%c1_166, %c2_167, %c0_168] : memref<18x18x8xf32, #tpu.memory_space<vmem>>, vector<16x16x8xf32>
    %264 = arith.maximumf %262, %263 : vector<16x16x8xf32>
    %c2_169 = arith.constant 2 : index
    %c0_170 = arith.constant 0 : index
    %c0_171 = arith.constant 0 : index
    %265 = vector.load %arg14[%c2_169, %c0_170, %c0_171] : memref<18x18x8xf32, #tpu.memory_space<vmem>>, vector<16x16x8xf32>
    %266 = arith.maximumf %264, %265 : vector<16x16x8xf32>
    %c2_172 = arith.constant 2 : index
    %c1_173 = arith.constant 1 : index
    %c0_174 = arith.constant 0 : index
    %267 = vector.load %arg14[%c2_172, %c1_173, %c0_174] : memref<18x18x8xf32, #tpu.memory_space<vmem>>, vector<16x16x8xf32>
    %268 = arith.maximumf %266, %267 : vector<16x16x8xf32>
    %c2_175 = arith.constant 2 : index
    %c2_176 = arith.constant 2 : index
    %c0_177 = arith.constant 0 : index
    %269 = vector.load %arg14[%c2_175, %c2_176, %c0_177] : memref<18x18x8xf32, #tpu.memory_space<vmem>>, vector<16x16x8xf32>
    %270 = arith.maximumf %268, %269 : vector<16x16x8xf32>
    %271 = arith.addf %270, %36 : vector<16x16x8xf32>
    %272 = vector.extract_strided_slice %271 {offsets = [0, 0, 0], sizes = [1, 16, 8], strides = [1, 1, 1]} : vector<16x16x8xf32> to vector<1x16x8xf32>
    %273 = vector.extract_strided_slice %271 {offsets = [2, 0, 0], sizes = [1, 16, 8], strides = [1, 1, 1]} : vector<16x16x8xf32> to vector<1x16x8xf32>
    %274 = vector.extract_strided_slice %271 {offsets = [4, 0, 0], sizes = [1, 16, 8], strides = [1, 1, 1]} : vector<16x16x8xf32> to vector<1x16x8xf32>
    %275 = vector.extract_strided_slice %271 {offsets = [6, 0, 0], sizes = [1, 16, 8], strides = [1, 1, 1]} : vector<16x16x8xf32> to vector<1x16x8xf32>
    %276 = vector.extract_strided_slice %271 {offsets = [8, 0, 0], sizes = [1, 16, 8], strides = [1, 1, 1]} : vector<16x16x8xf32> to vector<1x16x8xf32>
    %277 = vector.extract_strided_slice %271 {offsets = [10, 0, 0], sizes = [1, 16, 8], strides = [1, 1, 1]} : vector<16x16x8xf32> to vector<1x16x8xf32>
    %278 = vector.extract_strided_slice %271 {offsets = [12, 0, 0], sizes = [1, 16, 8], strides = [1, 1, 1]} : vector<16x16x8xf32> to vector<1x16x8xf32>
    %279 = vector.extract_strided_slice %271 {offsets = [14, 0, 0], sizes = [1, 16, 8], strides = [1, 1, 1]} : vector<16x16x8xf32> to vector<1x16x8xf32>
    %280 = tpu.concatenate %272, %273, %274, %275, %276, %277, %278, %279 in 0 : vector<1x16x8xf32>, vector<1x16x8xf32>, vector<1x16x8xf32>, vector<1x16x8xf32>, vector<1x16x8xf32>, vector<1x16x8xf32>, vector<1x16x8xf32>, vector<1x16x8xf32> -> vector<8x16x8xf32>
    %281 = vector.extract_strided_slice %280 {offsets = [0, 0, 0], sizes = [8, 1, 8], strides = [1, 1, 1]} : vector<8x16x8xf32> to vector<8x1x8xf32>
    %c0_178 = arith.constant 0 : index
    %c0_179 = arith.constant 0 : index
    %c0_180 = arith.constant 0 : index
    %c0_181 = arith.constant 0 : index
    %282 = vector.load %arg13[%c0_178, %c0_179, %c0_180, %c0_181] : memref<1x8x8x8xf32, #tpu.memory_space<vmem>>, vector<1x8x1x8xf32>
    %283 = vector.shape_cast %282 : vector<1x8x1x8xf32> to vector<8x1x8xf32>
    %284 = vector.shape_cast %281 : vector<8x1x8xf32> to vector<1x8x1x8xf32>
    tpu.vector_store %arg13[%c0_178, %c0_179, %c0_180, %c0_181], %284 {strides = array<i32>} : memref<1x8x8x8xf32, #tpu.memory_space<vmem>>, vector<1x8x1x8xf32>,
    %285 = vector.extract_strided_slice %280 {offsets = [0, 2, 0], sizes = [8, 1, 8], strides = [1, 1, 1]} : vector<8x16x8xf32> to vector<8x1x8xf32>
    %c0_182 = arith.constant 0 : index
    %c0_183 = arith.constant 0 : index
    %c1_184 = arith.constant 1 : index
    %c0_185 = arith.constant 0 : index
    %286 = vector.load %arg13[%c0_182, %c0_183, %c1_184, %c0_185] : memref<1x8x8x8xf32, #tpu.memory_space<vmem>>, vector<1x8x1x8xf32>
    %287 = vector.shape_cast %286 : vector<1x8x1x8xf32> to vector<8x1x8xf32>
    %288 = vector.shape_cast %285 : vector<8x1x8xf32> to vector<1x8x1x8xf32>
    tpu.vector_store %arg13[%c0_182, %c0_183, %c1_184, %c0_185], %288 {strides = array<i32>} : memref<1x8x8x8xf32, #tpu.memory_space<vmem>>, vector<1x8x1x8xf32>,
    %289 = vector.extract_strided_slice %280 {offsets = [0, 4, 0], sizes = [8, 1, 8], strides = [1, 1, 1]} : vector<8x16x8xf32> to vector<8x1x8xf32>
    %c0_186 = arith.constant 0 : index
    %c0_187 = arith.constant 0 : index
    %c2_188 = arith.constant 2 : index
    %c0_189 = arith.constant 0 : index
    %290 = vector.load %arg13[%c0_186, %c0_187, %c2_188, %c0_189] : memref<1x8x8x8xf32, #tpu.memory_space<vmem>>, vector<1x8x1x8xf32>
    %291 = vector.shape_cast %290 : vector<1x8x1x8xf32> to vector<8x1x8xf32>
    %292 = vector.shape_cast %289 : vector<8x1x8xf32> to vector<1x8x1x8xf32>
    tpu.vector_store %arg13[%c0_186, %c0_187, %c2_188, %c0_189], %292 {strides = array<i32>} : memref<1x8x8x8xf32, #tpu.memory_space<vmem>>, vector<1x8x1x8xf32>,
    %293 = vector.extract_strided_slice %280 {offsets = [0, 6, 0], sizes = [8, 1, 8], strides = [1, 1, 1]} : vector<8x16x8xf32> to vector<8x1x8xf32>
    %c0_190 = arith.constant 0 : index
    %c0_191 = arith.constant 0 : index
    %c3_192 = arith.constant 3 : index
    %c0_193 = arith.constant 0 : index
    %294 = vector.load %arg13[%c0_190, %c0_191, %c3_192, %c0_193] : memref<1x8x8x8xf32, #tpu.memory_space<vmem>>, vector<1x8x1x8xf32>
    %295 = vector.shape_cast %294 : vector<1x8x1x8xf32> to vector<8x1x8xf32>
    %296 = vector.shape_cast %293 : vector<8x1x8xf32> to vector<1x8x1x8xf32>
    tpu.vector_store %arg13[%c0_190, %c0_191, %c3_192, %c0_193], %296 {strides = array<i32>} : memref<1x8x8x8xf32, #tpu.memory_space<vmem>>, vector<1x8x1x8xf32>,
    %297 = vector.extract_strided_slice %280 {offsets = [0, 8, 0], sizes = [8, 1, 8], strides = [1, 1, 1]} : vector<8x16x8xf32> to vector<8x1x8xf32>
    %c0_194 = arith.constant 0 : index
    %c0_195 = arith.constant 0 : index
    %c4_196 = arith.constant 4 : index
    %c0_197 = arith.constant 0 : index
    %298 = vector.load %arg13[%c0_194, %c0_195, %c4_196, %c0_197] : memref<1x8x8x8xf32, #tpu.memory_space<vmem>>, vector<1x8x1x8xf32>
    %299 = vector.shape_cast %298 : vector<1x8x1x8xf32> to vector<8x1x8xf32>
    %300 = vector.shape_cast %297 : vector<8x1x8xf32> to vector<1x8x1x8xf32>
    tpu.vector_store %arg13[%c0_194, %c0_195, %c4_196, %c0_197], %300 {strides = array<i32>} : memref<1x8x8x8xf32, #tpu.memory_space<vmem>>, vector<1x8x1x8xf32>,
    %301 = vector.extract_strided_slice %280 {offsets = [0, 10, 0], sizes = [8, 1, 8], strides = [1, 1, 1]} : vector<8x16x8xf32> to vector<8x1x8xf32>
    %c0_198 = arith.constant 0 : index
    %c0_199 = arith.constant 0 : index
    %c5_200 = arith.constant 5 : index
    %c0_201 = arith.constant 0 : index
    %302 = vector.load %arg13[%c0_198, %c0_199, %c5_200, %c0_201] : memref<1x8x8x8xf32, #tpu.memory_space<vmem>>, vector<1x8x1x8xf32>
    %303 = vector.shape_cast %302 : vector<1x8x1x8xf32> to vector<8x1x8xf32>
    %304 = vector.shape_cast %301 : vector<8x1x8xf32> to vector<1x8x1x8xf32>
    tpu.vector_store %arg13[%c0_198, %c0_199, %c5_200, %c0_201], %304 {strides = array<i32>} : memref<1x8x8x8xf32, #tpu.memory_space<vmem>>, vector<1x8x1x8xf32>,
    %305 = vector.extract_strided_slice %280 {offsets = [0, 12, 0], sizes = [8, 1, 8], strides = [1, 1, 1]} : vector<8x16x8xf32> to vector<8x1x8xf32>
    %c0_202 = arith.constant 0 : index
    %c0_203 = arith.constant 0 : index
    %c6_204 = arith.constant 6 : index
    %c0_205 = arith.constant 0 : index
    %306 = vector.load %arg13[%c0_202, %c0_203, %c6_204, %c0_205] : memref<1x8x8x8xf32, #tpu.memory_space<vmem>>, vector<1x8x1x8xf32>
    %307 = vector.shape_cast %306 : vector<1x8x1x8xf32> to vector<8x1x8xf32>
    %308 = vector.shape_cast %305 : vector<8x1x8xf32> to vector<1x8x1x8xf32>
    tpu.vector_store %arg13[%c0_202, %c0_203, %c6_204, %c0_205], %308 {strides = array<i32>} : memref<1x8x8x8xf32, #tpu.memory_space<vmem>>, vector<1x8x1x8xf32>,
    %309 = vector.extract_strided_slice %280 {offsets = [0, 14, 0], sizes = [8, 1, 8], strides = [1, 1, 1]} : vector<8x16x8xf32> to vector<8x1x8xf32>
    %c0_206 = arith.constant 0 : index
    %c0_207 = arith.constant 0 : index
    %c7_208 = arith.constant 7 : index
    %c0_209 = arith.constant 0 : index
    %310 = vector.load %arg13[%c0_206, %c0_207, %c7_208, %c0_209] : memref<1x8x8x8xf32, #tpu.memory_space<vmem>>, vector<1x8x1x8xf32>
    %311 = vector.shape_cast %310 : vector<1x8x1x8xf32> to vector<8x1x8xf32>
    %312 = vector.shape_cast %309 : vector<8x1x8xf32> to vector<1x8x1x8xf32>
    tpu.vector_store %arg13[%c0_206, %c0_207, %c7_208, %c0_209], %312 {strides = array<i32>} : memref<1x8x8x8xf32, #tpu.memory_space<vmem>>, vector<1x8x1x8xf32>,
    return
  }
  func.func @transform_0(%arg0: i32) -> (i32, i32, i32, i32) {
    %c0_i32 = arith.constant 0 : i32
    %c0_i32_0 = arith.constant 0 : i32
    %c0_i32_1 = arith.constant 0 : i32
    %c0_i32_2 = arith.constant 0 : i32
    return %arg0, %c0_i32, %c0_i32_0, %c0_i32_1 : i32, i32, i32, i32
  }
  func.func @transform_1(%arg0: i32) -> (i32, i32) {
    %c0_i32 = arith.constant 0 : i32
    %c0_i32_0 = arith.constant 0 : i32
    %c0_i32_1 = arith.constant 0 : i32
    return %c0_i32, %c0_i32_0 : i32, i32
  }
  func.func @transform_2(%arg0: i32) -> (i32, i32) {
    %c0_i32 = arith.constant 0 : i32
    %c0_i32_0 = arith.constant 0 : i32
    %c0_i32_1 = arith.constant 0 : i32
    return %c0_i32, %c0_i32_0 : i32, i32
  }
  func.func @transform_3(%arg0: i32) -> (i32, i32) {
    %c0_i32 = arith.constant 0 : i32
    %c0_i32_0 = arith.constant 0 : i32
    %c0_i32_1 = arith.constant 0 : i32
    return %c0_i32, %c0_i32_0 : i32, i32
  }
  func.func @transform_4(%arg0: i32) -> (i32, i32) {
    %c0_i32 = arith.constant 0 : i32
    %c0_i32_0 = arith.constant 0 : i32
    %c0_i32_1 = arith.constant 0 : i32
    return %c0_i32, %c0_i32_0 : i32, i32
  }
  func.func @transform_5(%arg0: i32) -> (i32, i32) {
    %c0_i32 = arith.constant 0 : i32
    %c0_i32_0 = arith.constant 0 : i32
    %c0_i32_1 = arith.constant 0 : i32
    return %c0_i32, %c0_i32_0 : i32, i32
  }
  func.func @transform_6(%arg0: i32) -> (i32, i32) {
    %c0_i32 = arith.constant 0 : i32
    %c0_i32_0 = arith.constant 0 : i32
    %c0_i32_1 = arith.constant 0 : i32
    return %c0_i32, %c0_i32_0 : i32, i32
  }
  func.func @transform_7(%arg0: i32) -> (i32, i32) {
    %c0_i32 = arith.constant 0 : i32
    %c0_i32_0 = arith.constant 0 : i32
    %c0_i32_1 = arith.constant 0 : i32
    return %c0_i32, %c0_i32_0 : i32, i32
  }
  func.func @transform_8(%arg0: i32) -> (i32, i32) {
    %c0_i32 = arith.constant 0 : i32
    %c0_i32_0 = arith.constant 0 : i32
    %c0_i32_1 = arith.constant 0 : i32
    return %c0_i32, %c0_i32_0 : i32, i32
  }
  func.func @transform_9(%arg0: i32) -> (i32, i32) {
    %c0_i32 = arith.constant 0 : i32
    %c0_i32_0 = arith.constant 0 : i32
    %c0_i32_1 = arith.constant 0 : i32
    return %c0_i32, %c0_i32_0 : i32, i32
  }
  func.func @transform_10(%arg0: i32) -> (i32, i32) {
    %c0_i32 = arith.constant 0 : i32
    %c0_i32_0 = arith.constant 0 : i32
    %c0_i32_1 = arith.constant 0 : i32
    return %c0_i32, %c0_i32_0 : i32, i32
  }
  func.func @transform_11(%arg0: i32) -> (i32, i32) {
    %c0_i32 = arith.constant 0 : i32
    %c0_i32_0 = arith.constant 0 : i32
    %c0_i32_1 = arith.constant 0 : i32
    return %c0_i32, %c0_i32_0 : i32, i32
  }
  func.func @transform_12(%arg0: i32) -> (i32, i32, i32, i32) {
    %c0_i32 = arith.constant 0 : i32
    %c0_i32_0 = arith.constant 0 : i32
    %c0_i32_1 = arith.constant 0 : i32
    %c0_i32_2 = arith.constant 0 : i32
    return %arg0, %c0_i32, %c0_i32_0, %c0_i32_1 : i32, i32, i32, i32
  }
}

</mosaic_0001>

<bundles_post_ra>
// kernel: tpu_custom_call.1
= control target key start
LH: loop header
LB: loop body
LE: loop exit
PB: predicated region body
PF: predicated region fallthrough
CT: control target
= control target key end

     0   :  { %s11360_s0 = inlined_call_operand.vmem [shape: f32[2,16,16,4], index: 0, kind: input, shape index: {}]   ;;  %s11361_s1 = inlined_call_operand.vmem [shape: f32[9,4], index: 1, kind: input, shape index: {}]   ;;  %s11362_s2 = inlined_call_operand.vmem [shape: f32[4,8], index: 2, kind: input, shape index: {}]   ;;  %s11363_s3 = inlined_call_operand.vmem [shape: f32[1,8], index: 3, kind: input, shape index: {}]   ;;  %s11364_s4 = inlined_call_operand.vmem [shape: f32[1,8], index: 4, kind: input, shape index: {}]   ;;  %s11365_s5 = inlined_call_operand.vmem [shape: f32[9,8], index: 5, kind: input, shape index: {}]   ;;  %s11366_s6 = inlined_call_operand.vmem [shape: f32[8,8], index: 6, kind: input, shape index: {}]   ;;  %s11367_s7 = inlined_call_operand.vmem [shape: f32[1,8], index: 7, kind: input, shape index: {}]   ;;  %s11368_s8 = inlined_call_operand.vmem [shape: f32[1,8], index: 8, kind: input, shape index: {}]   ;;  %s11369_s9 = inlined_call_operand.vmem [shape: f32[4,8], index: 9, kind: input, shape index: {}]   ;;  %s11370_s10 = inlined_call_operand.vmem [shape: f32[1,8], index: 10, kind: input, shape index: {}]   ;;  %s11371_s11 = inlined_call_operand.vmem [shape: f32[1,8], index: 11, kind: input, shape index: {}]   ;;  %s11372_s12 = inlined_call_operand.hbm [shape: f32[2,8,8,8], index: 12, kind: output, shape index: {}]  }
   0x1   :  { %11485 = sst [smem:[#allocation186_spill]] %s11360_s0 }
   0x2   :  { %11486 = sst [smem:[#allocation187_spill]] %s11361_s1 }
   0x3   :  { %17 = vsyncpa [#allocation4], 0 }
   0x4   :  { %19 = vsyncpa [#allocation4 + $0x1], 0  ;;  %s6136_s21 = smov 0   ;;  %s6138_s22 = smov 0  }
   0x5   :  { %s6140_s23 = smov 0   ;;  %s6142_s24 = smov 0  }
   0x6 LB: > { %s6157_s25 = sadd.s32 4294967295, %s6057_s24   ;;  %s5809_s26 = sadd.s32 4294967294, %s6057_s24   ;;  %s6057_s24 = sphi %s6142_s24, %s12171_s24   ;;  %s6053_s23 = sphi %s6140_s23, %s12170_s23   ;;  %s6049_s22 = sphi %s6138_s22, %s12169_s22   ;;  %s6045_s21 = sphi %s6136_s21, %s12168_s21  }
   0x7   : > { %s6161_s27 = sadd.s32 1, %s6057_s24   ;;  %s289_s28 = sadd.s32 1, %s6053_s23 }
   0x8   : > { %s286_s29 = ssub.s32 %s6057_s24, %s6161_s27  ;;  %p299_p0 = scmp.ne.s32.totalorder %s6053_s23, %s6049_s22 }
   0x9   : > { %p287_p1 = scmp.eq.s32.totalorder %s286_s29, 0  ;;  %p300_p2 = scmp.eq.s32.totalorder %s6157_s25, 1 }
   0xa   : > { %p305_p3 = scmp.ne.s32.totalorder %s6049_s22, %s6045_s21  ;;  %p306_p4 = scmp.eq.s32.totalorder %s5809_s26, 1 }
   0xb   : > { %s6172_s30 = scalar_select %p287_p1, %s6053_s23, %s289_s28  }
   0xc   : > { %p6174_p5 = por %p300_p2, %p299_p0  ;;  %p6178_p6 = por %p306_p4, %p305_p3 }
   0xd   : > { %p5812_p7 = scmp.ge.s32.totalorder %s6057_s24, 1  ;;  %p365_p8 = scmp.lt.s32.totalorder %s6057_s24, 3 }
   0xf   : > { %p366_p9 = pnand %p5812_p7, %p365_p8 }
  0x11   : > { %369 = sbr.rel (%p366_p9) target bundleno = 1619 (0x653), region = 68 }
  0x16   : > { %p407_p10 = scmp.lt.s32.totalorder %s6157_s25, 1  ;;  %vm908_vm0 = vcmask 64512   ;;  %v11373_v0 = vmov 1   ;;  %v11375_v1 = vmov 0   ;;  %v11377_v2 = vmov 0.0   ;;  %s11489_s0 = sld [smem:[#allocation186_spill]] }
  0x17   : > { %5878 = vset.pattern.permute.xlu0 %v11373_v0  ;;  %5875 = vset.pattern.permute.xlu2 %v11375_v1  ;;  %925 = vst.msk [vmem:[#allocation2 + $0x78] sm:$0xff] %vm908_vm0, %v11377_v2  ;;  %vm965_vm1 = vcmask 31744   ;;  %vm911_vm2 = vcmask 58368   ;;  %s11490_s1 = sld [smem:[#allocation187_spill]]  ;;  %s404_s20 = sand.u32 1, %s6049_s22   ;;  %vm5663_vm3 = vcmask 57344  }
  0x18   : > { %5874 = vset.pattern.permute.xlu1 %v11375_v1  ;;  %s408_s15 = scalar_select %p407_p10, %s6157_s25, 1  ;;  %926 = vst.msk [vmem:[#allocation2 + $0x80] sm:$0xff] %vm908_vm0, %v11377_v2  ;;  %vm5672_vm4 = vcmask 59394   ;;  %vm5681_vm5 = vcmask 61444   ;;  %vm5690_vm6 = vcmask 63494  }
  0x19   : > { %909 = vst.msk [vmem:[#allocation2] sm:$0xff] %vm908_vm0, %v11377_v2  ;;  %s10915_s29 = sshll.u32 %s404_s20, 6  ;;  %s5732_s28 = scalar_lea.sflag [#allocation4], %s404_s20 }
  0x1a   : > { %s5821_s16 = sshll.u32 %s408_s15, 8  ;;  %910 = vst.msk [vmem:[#allocation2 + $0x8] sm:$0xff] %vm908_vm0, %v11377_v2  ;;  %s5822_s15 = sshll.u32 %s6157_s25, 6 }
  0x1b   : > { %913 = vst.msk [vmem:[#allocation2 + $0x18] sm:$0xff] %vm908_vm0, %v11377_v2  ;;  %s5743_s18 = scalar_lea.hbm %s11372_s12, %s5822_s15 }
  0x1c   : > { %s6200_s19 = scalar_lea.vmem %s11489_s0, %s5821_s16  ;;  %914 = vst.msk [vmem:[#allocation2 + $0x20] sm:$0xff] %vm908_vm0, %v11377_v2  ;;  %s5746_s26 = sshll.u32 %s5743_s18, 4  ;;  %s5747_s26 = int_to_ptr.hbm [resolvable:$true] %s5746_s26 }
  0x1d   : > { %v6205_v3 = vld [vmem:[%s6200_s19 + $0x40] sm:$0xff]  ;;  %916 = vst.msk [vmem:[#allocation2 + $0x30] sm:$0xff] %vm908_vm0, %v11377_v2  ;;  %v6226_v6 = vld [vmem:[%s6200_s19 + $0x48] sm:$0xff]  ;;  %v414_v29 = vld [vmem:[%s6200_s19 + $0x10] sm:$0xff]  ;;  %s6015_s18 = scalar_lea.hbm %s11372_s12, 128 }
  0x1e   : > { %v6210_v4 = vld [vmem:[%s6200_s19 + $0x20] sm:$0xff]  ;;  %467 = vperm.xlu2 %5875, %v6205_v3   ;;  %v884_v5 = vmax.f32 %v6205_v3, 0.0  ;;  %917 = vst.msk [vmem:[#allocation2 + $0x38] sm:$0xff] %vm908_vm0, %v11377_v2  ;;  %v6231_v7 = vld [vmem:[%s6200_s19 + $0x68] sm:$0xff]  ;;  %v885_v14 = vmax.f32 %v6226_v6, 0.0  ;;  %v415_v30 = vld [vmem:[%s6200_s19 + $0x18] sm:$0xff] }
  0x1f   : > { %552 = vperm.xlu0 %5878, %v6210_v4   ;;  %457 = vperm.xlu1 %5874, %v6210_v4   ;;  %919 = vst.msk [vmem:[#allocation2 + $0x48] sm:$0xff] %vm908_vm0, %v11377_v2  ;;  %v6236_v8 = vld [vmem:[%s6200_s19 + $0x28] sm:$0xff]  ;;  %v6273_v9 = vld [vmem:[%s6200_s19 + $0x80] sm:$0xff]  ;;  %v880_v11 = vmax.f32 %v6210_v4, 0.0  ;;  %v889_v20 = vmax.f32 %v6231_v7, 0.0  ;;  %v418_v33 = vld [vmem:[%s6200_s19 + $0x30] sm:$0xff] }
  0x20   : > { %974 = vst.msk [vmem:[#allocation2 + $0x79] sm:$0xff] %vm965_vm1, %v884_v5  ;;  %v6279_v10 = vld [vmem:[%s6200_s19 + $0xa0] sm:$0xff]  ;;  %v6295_v12 = vld [vmem:[%s6200_s19 + $0xa8] sm:$0xff]  ;;  %v881_v22 = vmax.f32 %v6236_v8, 0.0  ;;  %v892_v23 = vmax.f32 %v6273_v9, 0.0  ;;  %v878_v34 = vmax.f32 %v414_v29, 0.0 }
  0x21   : > { %920 = vst.msk [vmem:[#allocation2 + $0x50] sm:$0xff] %vm908_vm0, %v11377_v2  ;;  %v6300_v13 = vld [vmem:[%s6200_s19 + $0xc8] sm:$0xff]  ;;  %v6319_v15 = vld [vmem:[%s6200_s19 + $0xe0] sm:$0xff]  ;;  %v896_v25 = vmax.f32 %v6279_v10, 0.0  ;;  %v897_v26 = vmax.f32 %v6295_v12, 0.0  ;;  %v419_v35 = vld [vmem:[%s6200_s19 + $0x38] sm:$0xff] }
  0x22   : > { %922 = vst.msk [vmem:[#allocation2 + $0x60] sm:$0xff] %vm908_vm0, %v11377_v2  ;;  %v6335_v16 = vld [vmem:[%s6200_s19] sm:$0xff]  ;;  %v6353_v18 = vld [vmem:[%s6200_s19 + $0x8] sm:$0xff]  ;;  %v901_v27 = vmax.f32 %v6300_v13, 0.0  ;;  %v904_v28 = vmax.f32 %v6319_v15, 0.0  ;;  %v879_v36 = vmax.f32 %v415_v30, 0.0 }
  0x23   : > { %923 = vst.msk [vmem:[#allocation2 + $0x68] sm:$0xff] %vm908_vm0, %v11377_v2  ;;  %v6346_v17 = vld [vmem:[%s6200_s19 + $0x60] sm:$0xff]  ;;  %v6364_v21 = vld [vmem:[%s6200_s19 + $0x88] sm:$0xff]  ;;  %v876_v31 = vmax.f32 %v6335_v16, 0.0  ;;  %v877_v32 = vmax.f32 %v6353_v18, 0.0  ;;  %v422_v38 = vld [vmem:[%s6200_s19 + $0x50] sm:$0xff] }
  0x24   : > { %928 = vst.msk [vmem:[#allocation2 + $0x90] sm:$0xff] %vm908_vm0, %v11377_v2  ;;  %v888_v19 = vmax.f32 %v6346_v17, 0.0  ;;  %v893_v24 = vmax.f32 %v6364_v21, 0.0  ;;  %v6398_v37 = vld [vmem:[%s11490_s1] ss:$0 sm:$0xff]  ;;  %v882_v39 = vmax.f32 %v418_v33, 0.0 }
  0x25   : > { %929 = vst.msk [vmem:[#allocation2 + $0x98] sm:$0xff] %vm908_vm0, %v11377_v2  ;;  %v423_v42 = vld [vmem:[%s6200_s19 + $0x58] sm:$0xff]  ;;  %v6407_v43 = vld [vmem:[%s11490_s1 + $0x1] ss:$0 sm:$0xff]  ;;  %v883_v44 = vmax.f32 %v419_v35, 0.0  ;;  %v426_v45 = vld [vmem:[%s6200_s19 + $0x70] sm:$0xff] }
  0x26   : > { %472 = vperm.xlu2 %5875, %v6226_v6   ;;  %931 = vst.msk [vmem:[#allocation2 + $0xa8] sm:$0xff] %vm908_vm0, %v11377_v2  ;;  %v886_v46 = vmax.f32 %v422_v38, 0.0  ;;  %v427_v49 = vld [vmem:[%s6200_s19 + $0x78] sm:$0xff]  ;;  %v887_v52 = vmax.f32 %v423_v42, 0.0  ;;  %v890_v54 = vmax.f32 %v426_v45, 0.0 }
  0x27   : > { %572 = vperm.xlu0 %5878, %v6231_v7   ;;  %462 = vperm.xlu1 %5874, %v6236_v8   ;;  %932 = vst.msk [vmem:[#allocation2 + $0xb0] sm:$0xff] %vm908_vm0, %v11377_v2  ;;  %v1008_v47 = vld [vmem:[#allocation2 + $0x78] sm:$0xff]  ;;  %v6420_v55 = vld [vmem:[%s11490_s1 + $0x2] ss:$0 sm:$0xff]  ;;  %v891_v58 = vmax.f32 %v427_v49, 0.0 }
  0x28   : > { %934 = vst.msk [vmem:[#allocation2 + $0xc0] sm:$0xff] %vm908_vm0, %v11377_v2  ;;  %v1074_v48 = vld [vmem:[#allocation2 + $0x79] sm:$0xff]  ;;  %v1042_v56 = vmul.f32 %v6398_v37, %v1008_v47  ;;  %v6428_v59 = vld [vmem:[%s11490_s1 + $0x3] ss:$0 sm:$0xff]  ;;  %v6479_v38 = vld [vmem:[%s11490_s1 + $0x7] ss:$0 sm:$0xff] }
  0x29   : > { %935 = vst.msk [vmem:[#allocation2 + $0xc8] sm:$0xff] %vm908_vm0, %v11377_v2  ;;  %v1108_v57 = vmul.f32 %v6407_v43, %v1074_v48 }
  0x2a   : > { %937 = vst.msk [vmem:[#allocation2 + $0xd8] sm:$0xff] %vm908_vm0, %v11377_v2 }
  0x2b   : > { %938 = vst.msk [vmem:[#allocation2 + $0xe0] sm:$0xff] %vm908_vm0, %v11377_v2 }
  0x2c   : > { %940 = vst.msk [vmem:[#allocation2 + $0xf0] sm:$0xff] %vm908_vm0, %v11377_v2 }
  0x2d   : > { %941 = vst.msk [vmem:[#allocation2 + $0xf8] sm:$0xff] %vm908_vm0, %v11377_v2 }
  0x2e   : > { %943 = vst.msk [vmem:[#allocation2 + $0x108] sm:$0xff] %vm908_vm0, %v11377_v2  ;;  %487 = vperm.xlu2 %5875, %v6273_v9  }
  0x2f   : > { %482 = vperm.xlu1 %5874, %v6231_v7   ;;  %944 = vst.msk [vmem:[#allocation2 + $0x110] sm:$0xff] %vm908_vm0, %v11377_v2  ;;  %584 = vperm.xlu0 %5878, %v6279_v10  }
  0x30   : > { %946 = vst.msk [vmem:[#allocation2 + $0x120] sm:$0xff] %vm908_vm0, %v11377_v2 }
  0x31   : > { %947 = vst.msk [vmem:[#allocation2 + $0x128] sm:$0xff] %vm908_vm0, %v11377_v2 }
  0x32   : > { %949 = vst.msk [vmem:[#allocation2 + $0x138] sm:$0xff] %vm908_vm0, %v11377_v2 }
  0x33   : > { %950 = vst.msk [vmem:[#allocation2 + $0x140] sm:$0xff] %vm908_vm0, %v11377_v2 }
  0x34   : > { %952 = vst.msk [vmem:[#allocation2 + $0x150] sm:$0xff] %vm908_vm0, %v11377_v2 }
  0x35   : > { %953 = vst.msk [vmem:[#allocation2 + $0x158] sm:$0xff] %vm908_vm0, %v11377_v2 }
  0x36   : > { %955 = vst.msk [vmem:[#allocation2 + $0x168] sm:$0xff] %vm908_vm0, %v11377_v2  ;;  %502 = vperm.xlu2 %5875, %v6295_v12  }
  0x37   : > { %497 = vperm.xlu1 %5874, %v6279_v10   ;;  %956 = vst.msk [vmem:[#allocation2 + $0x170] sm:$0xff] %vm908_vm0, %v11377_v2  ;;  %596 = vperm.xlu0 %5878, %v6300_v13  }
  0x38   : > { %958 = vst.msk [vmem:[#allocation2 + $0x180] sm:$0xff] %vm908_vm0, %v11377_v2 }
  0x39   : > { %959 = vst.msk [vmem:[#allocation2 + $0x188] sm:$0xff] %vm908_vm0, %v11377_v2 }
  0x3a   : > { %961 = vst.msk [vmem:[#allocation2 + $0x198] sm:$0xff] %vm908_vm0, %v11377_v2 }
  0x3b   : > { %962 = vst.msk [vmem:[#allocation2 + $0x1a0] sm:$0xff] %vm908_vm0, %v11377_v2 }
  0x3c   : > { %970 = vst.msk [vmem:[#allocation2 + $0x49] sm:$0xff] %vm965_vm1, %v880_v11 }
  0x3d   : > { %927 = vst.msk [vmem:[#allocation2 + $0x88] sm:$0x3] %vm911_vm2, %v11377_v2 }
  0x3e   : > { %975 = vst.msk [vmem:[#allocation2 + $0x81] sm:$0xff] %vm965_vm1, %v885_v14  ;;  %517 = vperm.xlu2 %5875, %v6319_v15  }
  0x3f   : > { %512 = vperm.xlu1 %5874, %v6300_v13   ;;  %912 = vst.msk [vmem:[#allocation2 + $0x10] sm:$0x3] %vm911_vm2, %v11377_v2 }
  0x40   : > { %915 = vst.msk [vmem:[#allocation2 + $0x28] sm:$0x3] %vm911_vm2, %v11377_v2 }
  0x41   : > { %918 = vst.msk [vmem:[#allocation2 + $0x40] sm:$0x3] %vm911_vm2, %v11377_v2 }
  0x42   : > { %921 = vst.msk [vmem:[#allocation2 + $0x58] sm:$0x3] %vm911_vm2, %v11377_v2 }
  0x43   : > { %924 = vst.msk [vmem:[#allocation2 + $0x70] sm:$0x3] %vm911_vm2, %v11377_v2 }
  0x44   : > { %930 = vst.msk [vmem:[#allocation2 + $0xa0] sm:$0x3] %vm911_vm2, %v11377_v2 }
  0x45   : > { %933 = vst.msk [vmem:[#allocation2 + $0xb8] sm:$0x3] %vm911_vm2, %v11377_v2  ;;  %v1172_v5 = vld [vmem:[#allocation2 + $0x7a] sm:$0xff] }
  0x46   : > { %936 = vst.msk [vmem:[#allocation2 + $0xd0] sm:$0x3] %vm911_vm2, %v11377_v2  ;;  %5877 = vset.pattern.permute.xlu2 %v11373_v0  ;;  %v1206_v33 = vmul.f32 %v6420_v55, %v1172_v5  ;;  %v1562_v49 = vld [vmem:[#allocation2 + $0x80] sm:$0xff] }
  0x47   : > { %5876 = vset.pattern.permute.xlu1 %v11373_v0  ;;  %939 = vst.msk [vmem:[#allocation2 + $0xe8] sm:$0x3] %vm911_vm2, %v11377_v2  ;;  %548 = vperm.xlu2 %5877, %v6353_v18  }
  0x48   : > { %544 = vperm.xlu1 %5876, %v6335_v16   ;;  %942 = vst.msk [vmem:[#allocation2 + $0x100] sm:$0x3] %vm911_vm2, %v11377_v2 }
  0x49   : > { %945 = vst.msk [vmem:[#allocation2 + $0x118] sm:$0x3] %vm911_vm2, %v11377_v2 }
  0x4a   : > { %948 = vst.msk [vmem:[#allocation2 + $0x130] sm:$0x3] %vm911_vm2, %v11377_v2 }
  0x4b   : > { %951 = vst.msk [vmem:[#allocation2 + $0x148] sm:$0x3] %vm911_vm2, %v11377_v2 }
  0x4c   : > { %954 = vst.msk [vmem:[#allocation2 + $0x160] sm:$0x3] %vm911_vm2, %v11377_v2 }
  0x4d   : > { %957 = vst.msk [vmem:[#allocation2 + $0x178] sm:$0x3] %vm911_vm2, %v11377_v2 }
  0x4e   : > { %960 = vst.msk [vmem:[#allocation2 + $0x190] sm:$0x3] %vm911_vm2, %v11377_v2 }
  0x4f   : > { %963 = vst.msk [vmem:[#allocation2 + $0x1a8] sm:$0x3] %vm911_vm2, %v11377_v2  ;;  %560 = vperm.xlu2 %5877, %v6205_v3  }
  0x50   : > { %556 = vperm.xlu1 %5876, %v6236_v8   ;;  %978 = vst.msk [vmem:[#allocation2 + $0xa9] sm:$0xff] %vm965_vm1, %v888_v19 }
  0x51   : > { %979 = vst.msk [vmem:[#allocation2 + $0xb1] sm:$0xff] %vm965_vm1, %v889_v20  ;;  %v6447_v20 = vld [vmem:[%s11490_s1 + $0x4] ss:$0 sm:$0xff] }
  0x52   : > { %971 = vst.msk [vmem:[#allocation2 + $0x51] sm:$0xff] %vm965_vm1, %v881_v22  ;;  %v430_v22 = vld [vmem:[%s6200_s19 + $0x90] sm:$0xff] }
  0x53   : > { %982 = vst.msk [vmem:[#allocation2 + $0xd9] sm:$0xff] %vm965_vm1, %v892_v23 }
  0x54   : > { %983 = vst.msk [vmem:[#allocation2 + $0xe1] sm:$0xff] %vm965_vm1, %v893_v24 }
  0x55   : > { %986 = vst.msk [vmem:[#allocation2 + $0x109] sm:$0xff] %vm965_vm1, %v896_v25 }
  0x56   : > { %987 = vst.msk [vmem:[#allocation2 + $0x111] sm:$0xff] %vm965_vm1, %v897_v26  ;;  %v1140_v26 = vadd.f32 %v1108_v57, %v1042_v56 }
  0x57   : > { %991 = vst.msk [vmem:[#allocation2 + $0x141] sm:$0xff] %vm965_vm1, %v901_v27  ;;  %568 = vperm.xlu2 %5877, %v6346_v17   ;;  %v431_v27 = vld [vmem:[%s6200_s19 + $0x98] sm:$0xff] }
  0x58   : > { %564 = vperm.xlu1 %5876, %v6226_v6   ;;  %994 = vst.msk [vmem:[#allocation2 + $0x169] sm:$0xff] %vm965_vm1, %v904_v28  ;;  %v894_v28 = vmax.f32 %v430_v22, 0.0 }
  0x59   : > { %966 = vst.msk [vmem:[#allocation2 + $0x19] sm:$0xff] %vm965_vm1, %v876_v31  ;;  %v1005_v40 = vld [vmem:[#allocation2 + $0x50] sm:$0xff]  ;;  %v6464_v31 = vld [vmem:[%s11490_s1 + $0x5] ss:$0 sm:$0xff] }
  0x5a   : > { %v1071_v41 = vld [vmem:[#allocation2 + $0x51] sm:$0xff]  ;;  %967 = vst.msk [vmem:[#allocation2 + $0x21] sm:$0xff] %vm965_vm1, %v877_v32  ;;  %v1039_v50 = vmul.f32 %v6398_v37, %v1005_v40  ;;  %v6469_v32 = vld [vmem:[%s11490_s1 + $0x6] ss:$0 sm:$0xff] }
  0x5b   : > { %968 = vst.msk [vmem:[#allocation2 + $0x31] sm:$0xff] %vm965_vm1, %v878_v34  ;;  %v1105_v51 = vmul.f32 %v6407_v43, %v1071_v41  ;;  %v1169_v53 = vld [vmem:[#allocation2 + $0x52] sm:$0xff]  ;;  %v895_v34 = vmax.f32 %v431_v27, 0.0 }
  0x5c   : > { %969 = vst.msk [vmem:[#allocation2 + $0x39] sm:$0xff] %vm965_vm1, %v879_v36  ;;  %v1203_v63 = vmul.f32 %v6420_v55, %v1169_v53  ;;  %v1557_v36 = vld [vmem:[#allocation2 + $0x48] sm:$0xff]  ;;  %v1238_v53 = vadd.f32 %v1206_v33, %v1140_v26 }
  0x5d   : > { %972 = vst.msk [vmem:[#allocation2 + $0x61] sm:$0xff] %vm965_vm1, %v882_v39  ;;  %v1137_v62 = vadd.f32 %v1105_v51, %v1039_v50  ;;  %v6499_v26 = vld [vmem:[%s11490_s1 + $0x8] ss:$0 sm:$0xff] }
  0x5e   : > { %973 = vst.msk [vmem:[#allocation2 + $0x69] sm:$0xff] %vm965_vm1, %v883_v44  ;;  %v1660_v33 = vld [vmem:[#allocation2 + $0x81] sm:$0xff] }
  0x5f   : > { %976 = vst.msk [vmem:[#allocation2 + $0x91] sm:$0xff] %vm965_vm1, %v886_v46  ;;  %v1235_v39 = vadd.f32 %v1203_v63, %v1137_v62  ;;  %580 = vperm.xlu2 %5877, %v6364_v21   ;;  %v1655_v46 = vld [vmem:[#allocation2 + $0x49] sm:$0xff] }
  0x60   : > { %576 = vperm.xlu1 %5876, %v6273_v9   ;;  %v6432_v60 = vld [vmem:[#allocation2 + $0x18] sm:$0xff]  ;;  %977 = vst.msk [vmem:[#allocation2 + $0x99] sm:$0xff] %vm965_vm1, %v887_v52  ;;  %v1689_v27 = vmul.f32 %v6479_v38, %v1655_v46 }
  0x61   : > { %v6434_v61 = vld [vmem:[#allocation2 + $0x19] sm:$0xff]  ;;  %v1034_v11 = vmul.f32 %v6398_v37, %v6432_v60  ;;  %980 = vst.msk [vmem:[#allocation2 + $0xc1] sm:$0xff] %vm965_vm1, %v890_v54 }
  0x62   : > { %v1100_v14 = vmul.f32 %v6407_v43, %v6434_v61  ;;  %v6442_v19 = vld [vmem:[#allocation2 + $0x1a] sm:$0xff]  ;;  %v6453_v24 = vld [vmem:[#allocation2 + $0x30] sm:$0xff]  ;;  %981 = vst.msk [vmem:[#allocation2 + $0xc9] sm:$0xff] %vm965_vm1, %v891_v58 }
  0x63   : > { %v1198_v23 = vmul.f32 %v6420_v55, %v6442_v19  ;;  %v6455_v25 = vld [vmem:[#allocation2 + $0x31] sm:$0xff]  ;;  %v1296_v30 = vmul.f32 %v6428_v59, %v6453_v24  ;;  %2732 = vst.msk [vmem:[#allocation2 + $0x18] sm:$0xff] %vm908_vm0, %v11377_v2 }
  0x64   : > { %v1132_v29 = vadd.f32 %v1100_v14, %v1034_v11  ;;  %v6474_v35 = vld [vmem:[#allocation2 + $0x32] sm:$0xff]  ;;  %984 = vst.msk [vmem:[#allocation2 + $0xf1] sm:$0xff] %vm965_vm1, %v894_v28  ;;  %v1394_v41 = vmul.f32 %v6447_v20, %v6455_v25  ;;  %v1753_v28 = vld [vmem:[#allocation2 + $0x4a] sm:$0xff] }
  0x65   : > { %v1267_v42 = vld [vmem:[#allocation2 + $0x68] sm:$0xff]  ;;  %985 = vst.msk [vmem:[#allocation2 + $0xf9] sm:$0xff] %vm965_vm1, %v895_v34  ;;  %v1492_v52 = vmul.f32 %v6464_v31, %v6474_v35  ;;  %v1787_v46 = vmul.f32 %v6499_v26, %v1753_v28 }
  0x66   : > { %v1230_v40 = vadd.f32 %v1198_v23, %v1132_v29  ;;  %v1365_v44 = vld [vmem:[#allocation2 + $0x69] sm:$0xff]  ;;  %v1301_v47 = vmul.f32 %v6428_v59, %v1267_v42  ;;  %v1368_v56 = vld [vmem:[#allocation2 + $0x91] sm:$0xff]  ;;  %v1591_v23 = vmul.f32 %v6469_v32, %v1557_v36 }
  0x67   : > { %v1463_v45 = vld [vmem:[#allocation2 + $0x6a] sm:$0xff]  ;;  %v1399_v48 = vmul.f32 %v6447_v20, %v1365_v44  ;;  %v1011_v57 = vld [vmem:[#allocation2 + $0x98] sm:$0xff]  ;;  %v1402_v34 = vmul.f32 %v6447_v20, %v1368_v56 }
  0x68   : > { %v1270_v50 = vld [vmem:[#allocation2 + $0x90] sm:$0xff]  ;;  %v1328_v51 = vadd.f32 %v1296_v30, %v1230_v40  ;;  %v1077_v58 = vld [vmem:[#allocation2 + $0x99] sm:$0xff]  ;;  %588 = vperm.xlu1 %5876, %v6295_v12   ;;  %v1333_v62 = vadd.f32 %v1301_v47, %v1235_v39  ;;  %v1497_v63 = vmul.f32 %v6464_v31, %v1463_v45  ;;  %v1045_v5 = vmul.f32 %v6398_v37, %v1011_v57  ;;  %v1080_v47 = vld [vmem:[#allocation2 + $0xc1] sm:$0xff] }
  0x69   : > { %v1304_v54 = vmul.f32 %v6428_v59, %v1270_v50  ;;  %v1111_v11 = vmul.f32 %v6407_v43, %v1077_v58  ;;  %v1175_v14 = vld [vmem:[#allocation2 + $0x9a] sm:$0xff]  ;;  %v1596_v30 = vmul.f32 %v6469_v32, %v1562_v49  ;;  %v1273_v39 = vld [vmem:[#allocation2 + $0xb0] sm:$0xff]  ;;  %v1758_v58 = vld [vmem:[#allocation2 + $0x82] sm:$0xff] }
  0x6a   : > { %v1426_v22 = vadd.f32 %v1394_v41, %v1328_v51  ;;  %v1431_v29 = vadd.f32 %v1399_v48, %v1333_v62  ;;  %v1466_v41 = vld [vmem:[#allocation2 + $0x92] sm:$0xff]  ;;  %v1209_v36 = vmul.f32 %v6420_v55, %v1175_v14  ;;  %v1014_v45 = vld [vmem:[#allocation2 + $0xc0] sm:$0xff]  ;;  %v1694_v48 = vmul.f32 %v6479_v38, %v1660_v33  ;;  %v1663_v28 = vld [vmem:[#allocation2 + $0xa9] sm:$0xff] }
  0x6b   : > { %v1336_v42 = vadd.f32 %v1304_v54, %v1238_v53  ;;  %v1143_v44 = vadd.f32 %v1111_v11, %v1045_v5  ;;  %v1500_v49 = vmul.f32 %v6464_v31, %v1466_v41  ;;  %v1307_v56 = vmul.f32 %v6428_v59, %v1273_v39  ;;  %v1178_v11 = vld [vmem:[#allocation2 + $0xc2] sm:$0xff]  ;;  %v1371_v14 = vld [vmem:[#allocation2 + $0xb1] sm:$0xff] }
  0x6c   : > { %v1524_v40 = vadd.f32 %v1492_v52, %v1426_v22  ;;  %v1529_v50 = vadd.f32 %v1497_v63, %v1431_v29  ;;  %v1048_v52 = vmul.f32 %v6398_v37, %v1014_v45  ;;  %v1114_v53 = vmul.f32 %v6407_v43, %v1080_v47  ;;  %v1565_v63 = vld [vmem:[#allocation2 + $0xa8] sm:$0xff]  ;;  %v6513_v22 = vld [vmem:[%s6200_s19 + $0xc0] sm:$0xff]  ;;  %v434_v39 = vld [vmem:[%s6200_s19 + $0xb0] sm:$0xff] }
  0x6d   : > { %v1434_v62 = vadd.f32 %v1402_v34, %v1336_v42  ;;  %v1241_v5 = vadd.f32 %v1209_v36, %v1143_v44  ;;  %592 = vperm.xlu2 %5877, %v6513_v22   ;;  %v1599_v29 = vmul.f32 %v6469_v32, %v1565_v63  ;;  %v1212_v34 = vmul.f32 %v6420_v55, %v1178_v11  ;;  %v1276_v45 = vld [vmem:[#allocation2 + $0xd8] sm:$0xff]  ;;  %v1017_v47 = vld [vmem:[#allocation2 + $0xe0] sm:$0xff] }
  0x6e   : > { %v1623_v51 = vadd.f32 %v1591_v23, %v1524_v40  ;;  %v1628_v57 = vadd.f32 %v1596_v30, %v1529_v50  ;;  %v1469_v30 = vld [vmem:[#allocation2 + $0xb2] sm:$0xff]  ;;  %v1146_v33 = vadd.f32 %v1114_v53, %v1048_v52  ;;  %v1405_v36 = vmul.f32 %v6447_v20, %v1371_v14  ;;  %v1083_v50 = vld [vmem:[#allocation2 + $0xe1] sm:$0xff] }
  0x6f   : > { %v435_v40 = vld [vmem:[%s6200_s19 + $0xb8] sm:$0xff]  ;;  %v1532_v41 = vadd.f32 %v1500_v49, %v1434_v62  ;;  %v1339_v44 = vadd.f32 %v1307_v56, %v1241_v5  ;;  %v900_v52 = vmax.f32 %v6513_v22, 0.0  ;;  %v898_v53 = vmax.f32 %v434_v39, 0.0  ;;  %v1568_v39 = vld [vmem:[#allocation2 + $0xc8] sm:$0xff] }
  0x70   : > { %v1721_v54 = vadd.f32 %v1689_v27, %v1623_v51  ;;  %600 = vperm.xlu1 %5876, %v6319_v15   ;;  %v1792_v27 = vmul.f32 %v6499_v26, %v1758_v58  ;;  %v1726_v42 = vadd.f32 %v1694_v48, %v1628_v57  ;;  %v1697_v51 = vmul.f32 %v6479_v38, %v1663_v28  ;;  %v1761_v58 = vld [vmem:[#allocation2 + $0xaa] sm:$0xff]  ;;  %v1374_v14 = vld [vmem:[#allocation2 + $0xd9] sm:$0xff]  ;;  %v1181_v28 = vld [vmem:[#allocation2 + $0xe2] sm:$0xff] }
  0x71   : > { %v1244_v63 = vadd.f32 %v1212_v34, %v1146_v33  ;;  %v1310_v48 = vmul.f32 %v6428_v59, %v1276_v45  ;;  %v1051_v49 = vmul.f32 %v6398_v37, %v1017_v47  ;;  %v1117_v56 = vmul.f32 %v6407_v43, %v1083_v50  ;;  %v438_v57 = vld [vmem:[%s6200_s19 + $0xd0] sm:$0xff]  ;;  %990 = vst.msk [vmem:[#allocation2 + $0x139] sm:$0xff] %vm965_vm1, %v900_v52  ;;  %v439_v33 = vld [vmem:[%s6200_s19 + $0xd8] sm:$0xff]  ;;  %v1020_v52 = vld [vmem:[#allocation2 + $0x108] sm:$0xff] }
  0x72   : > { %v6515_v23 = vadd.f32 %v1787_v46, %v1721_v54  ;;  %v1503_v46 = vmul.f32 %v6464_v31, %v1469_v30  ;;  %v899_v54 = vmax.f32 %v435_v40, 0.0  ;;  %v6532_v62 = vadd.f32 %v1792_v27, %v1726_v42  ;;  %988 = vst.msk [vmem:[#allocation2 + $0x121] sm:$0xff] %vm965_vm1, %v898_v53  ;;  %v1472_v42 = vld [vmem:[#allocation2 + $0xda] sm:$0xff]  ;;  %v1086_v53 = vld [vmem:[#allocation2 + $0x109] sm:$0xff] }
  0x73   : > { %v1631_v5 = vadd.f32 %v1599_v29, %v1532_v41  ;;  %v1437_v11 = vadd.f32 %v1405_v36, %v1339_v44  ;;  %v902_v30 = vmax.f32 %v438_v57, 0.0  ;;  %v1795_v34 = vmul.f32 %v6499_v26, %v1761_v58  ;;  %v1279_v44 = vld [vmem:[#allocation2 + $0xf8] sm:$0xff] }
  0x74   : > { %2053 = vperm.xlu0 %5878, %v6515_v23   ;;  %989 = vst.msk [vmem:[#allocation2 + $0x129] sm:$0xff] %vm965_vm1, %v899_v54  ;;  %v903_v40 = vmax.f32 %v439_v33, 0.0  ;;  %v1342_v45 = vadd.f32 %v1310_v48, %v1244_v63  ;;  %v1408_v27 = vmul.f32 %v6447_v20, %v1374_v14  ;;  %v1149_v29 = vadd.f32 %v1117_v56, %v1051_v49  ;;  %v1666_v54 = vld [vmem:[#allocation2 + $0xc9] sm:$0xff]  ;;  %v1377_v57 = vld [vmem:[#allocation2 + $0xf9] sm:$0xff] }
  0x75   : > { %v1215_v41 = vmul.f32 %v6420_v55, %v1181_v28  ;;  %992 = vst.msk [vmem:[#allocation2 + $0x151] sm:$0xff] %vm965_vm1, %v902_v30  ;;  %v1729_v36 = vadd.f32 %v1697_v51, %v1631_v5  ;;  %v1535_v47 = vadd.f32 %v1503_v46, %v1437_v11  ;;  %v1602_v50 = vmul.f32 %v6469_v32, %v1568_v39  ;;  %v1571_v49 = vld [vmem:[#allocation2 + $0xf0] sm:$0xff]  ;;  %v6553_v30 = vld [vmem:[%s6200_s19 + $0xe8] sm:$0xff] }
  0x76   : > { %993 = vst.msk [vmem:[#allocation2 + $0x159] sm:$0xff] %vm965_vm1, %v903_v40  ;;  %v1506_v58 = vmul.f32 %v6464_v31, %v1472_v42  ;;  %v1313_v63 = vmul.f32 %v6428_v59, %v1279_v44  ;;  %v1440_v48 = vadd.f32 %v1408_v27, %v1342_v45  ;;  %v1054_v14 = vmul.f32 %v6398_v37, %v1020_v52  ;;  %v1184_v28 = vld [vmem:[#allocation2 + $0x10a] sm:$0xff] }
  0x77   : > { %v1247_v56 = vadd.f32 %v1215_v41, %v1149_v29  ;;  %v1120_v51 = vmul.f32 %v6407_v43, %v1086_v53  ;;  %v6549_v46 = vadd.f32 %v1795_v34, %v1729_v36  ;;  %v1634_v5 = vadd.f32 %v1602_v50, %v1535_v47  ;;  %v1764_v39 = vld [vmem:[#allocation2 + $0xca] sm:$0xff]  ;;  %604 = vperm.xlu2 %5877, %v6553_v30   ;;  %v1475_v29 = vld [vmem:[#allocation2 + $0xfa] sm:$0xff] }
  0x78   : > { %v1700_v11 = vmul.f32 %v6479_v38, %v1666_v54  ;;  %v905_v33 = vmax.f32 %v6553_v30, 0.0  ;;  %v1605_v40 = vmul.f32 %v6469_v32, %v1571_v49  ;;  %v1411_v45 = vmul.f32 %v6447_v20, %v1377_v57  ;;  %v1669_v34 = vld [vmem:[#allocation2 + $0xf1] sm:$0xff] }
  0x79   : > { %11491 = vst [vmem:[#allocation6_spill] sm:$0xff] %v6549_v46  ;;  %v1538_v27 = vadd.f32 %v1506_v58, %v1440_v48  ;;  %v1345_v42 = vadd.f32 %v1313_v63, %v1247_v56  ;;  %v1152_v41 = vadd.f32 %v1120_v51, %v1054_v14  ;;  %v1218_v44 = vmul.f32 %v6420_v55, %v1184_v28  ;;  %v442_v36 = vld [vmem:[%s6200_s19 + $0xf0] sm:$0xff]  ;;  %v1282_v52 = vld [vmem:[#allocation2 + $0x120] sm:$0xff]  ;;  %v443_v53 = vld [vmem:[%s6200_s19 + $0xf8] sm:$0xff] }
  0x7a   : > { %995 = vst.msk [vmem:[#allocation2 + $0x171] sm:$0xff] %vm965_vm1, %v905_v33  ;;  %v1732_v47 = vadd.f32 %v1700_v11, %v1634_v5  ;;  %v1798_v50 = vmul.f32 %v6499_v26, %v1764_v39  ;;  %v906_v54 = vmax.f32 %v442_v36, 0.0  ;;  %v907_v58 = vmax.f32 %v443_v53, 0.0  ;;  %v1767_v14 = vld [vmem:[#allocation2 + $0xf2] sm:$0xff]  ;;  %v1380_v39 = vld [vmem:[#allocation2 + $0x121] sm:$0xff] }
  0x7b   : > { %v1023_v49 = vld [vmem:[#allocation2 + $0x128] sm:$0xff]  ;;  %v1703_v63 = vmul.f32 %v6479_v38, %v1669_v34  ;;  %v1509_v48 = vmul.f32 %v6464_v31, %v1475_v29  ;;  %v1637_v56 = vadd.f32 %v1605_v40, %v1538_v27  ;;  %v1443_v51 = vadd.f32 %v1411_v45, %v1345_v42  ;;  %v1574_v28 = vld [vmem:[#allocation2 + $0x110] sm:$0xff] }
  0x7c   : > { %2073 = vperm.xlu0 %5878, %v6532_v62   ;;  %v1089_v57 = vld [vmem:[#allocation2 + $0x129] sm:$0xff]  ;;  %996 = vst.msk [vmem:[#allocation2 + $0x181] sm:$0xff] %vm965_vm1, %v906_v54  ;;  %v1250_v33 = vadd.f32 %v1218_v44, %v1152_v41  ;;  %v1316_v5 = vmul.f32 %v6428_v59, %v1282_v52  ;;  %v6570_v11 = vadd.f32 %v1798_v50, %v1732_v47  ;;  %v1672_v42 = vld [vmem:[#allocation2 + $0x111] sm:$0xff]  ;;  %v6579_v54 = vpop.permute.xlu2 %467 }
  0x7d   : > { %997 = vst.msk [vmem:[#allocation2 + $0x189] sm:$0xff] %vm965_vm1, %v907_v58  ;;  %v1057_v36 = vmul.f32 %v6398_v37, %v1023_v49  ;;  %v1123_v34 = vmul.f32 %v6407_v43, %v1089_v57  ;;  %v1187_v53 = vld [vmem:[#allocation2 + $0x12a] sm:$0xff]  ;;  %v1801_v29 = vmul.f32 %v6499_v26, %v1767_v14  ;;  %v1608_v40 = vmul.f32 %v6469_v32, %v1574_v28  ;;  %v1478_v47 = vld [vmem:[#allocation2 + $0x122] sm:$0xff]  ;;  %v1190_v0 = vld [vmem:[#allocation2 + $0x152] sm:$0xff] }
  0x7e   : > { %11492 = vst [vmem:[#allocation7_spill] sm:$0xff] %v6570_v11  ;;  %v1735_v27 = vadd.f32 %v1703_v63, %v1637_v56  ;;  %v1541_v45 = vadd.f32 %v1509_v48, %v1443_v51  ;;  %v1348_v41 = vadd.f32 %v1316_v5, %v1250_v33  ;;  %v1414_v44 = vmul.f32 %v6447_v20, %v1380_v39  ;;  %v1285_v49 = vld [vmem:[#allocation2 + $0x140] sm:$0xff]  ;;  %v1026_v58 = vld [vmem:[#allocation2 + $0x150] sm:$0xff]  ;;  %v1577_v5 = vld [vmem:[#allocation2 + $0x138] sm:$0xff] }
  0x7f   : > { %v1155_v50 = vadd.f32 %v1123_v34, %v1057_v36  ;;  %v1221_v52 = vmul.f32 %v6420_v55, %v1187_v53  ;;  %11493 = vst [vmem:[#allocation8_spill] sm:$0xff] %v6579_v54  ;;  %v11379_v57 = vmov 2   ;;  %v1092_v63 = vld [vmem:[#allocation2 + $0x151] sm:$0xff]  ;;  %v1706_v48 = vmul.f32 %v6479_v38, %v1672_v42  ;;  %v1383_v42 = vld [vmem:[#allocation2 + $0x141] sm:$0xff] }
  0x80   : > { %5880 = vset.pattern.permute.xlu2 %v11379_v57  ;;  %5879 = vset.pattern.permute.xlu1 %v11379_v57  ;;  %v6586_v56 = vadd.f32 %v1801_v29, %v1735_v27  ;;  %v1640_v14 = vadd.f32 %v1608_v40, %v1541_v45  ;;  %v1446_v51 = vadd.f32 %v1414_v44, %v1348_v41  ;;  %v1770_v33 = vld [vmem:[#allocation2 + $0x112] sm:$0xff]  ;;  %v1481_v45 = vld [vmem:[#allocation2 + $0x142] sm:$0xff] }
  0x81   : > { %650 = vperm.xlu2 %5880, %v6210_v4   ;;  %646 = vperm.xlu1 %5879, %v6353_v18   ;;  %v1512_v28 = vmul.f32 %v6464_v31, %v1478_v47  ;;  %v1253_v39 = vadd.f32 %v1221_v52, %v1155_v50  ;;  %v1319_v36 = vmul.f32 %v6428_v59, %v1285_v49  ;;  %v1675_v27 = vld [vmem:[#allocation2 + $0x139] sm:$0xff]  ;;  %v1288_v52 = vld [vmem:[#allocation2 + $0x168] sm:$0xff]  ;;  %v6935_v54 = vld [vmem:[%s11490_s1 + $0x4] ss:$0 sm:$0xff] }
  0x82   : > { %11494 = vst [vmem:[#allocation9_spill] sm:$0xff] %v6586_v56  ;;  %v1060_v34 = vmul.f32 %v6398_v37, %v1026_v58  ;;  %v1126_v53 = vmul.f32 %v6407_v43, %v1092_v63  ;;  %v1738_v4 = vadd.f32 %v1706_v48, %v1640_v14  ;;  %v1804_v18 = vmul.f32 %v6499_v26, %v1770_v33  ;;  %v6599_v58 = vld [vmem:[#allocation2 + $0x1a1] sm:$0xff]  ;;  %v1029_v48 = vld [vmem:[#allocation2 + $0x170] sm:$0xff] }
  0x83   : > { %v1544_v29 = vadd.f32 %v1512_v28, %v1446_v51  ;;  %v1611_v40 = vmul.f32 %v6469_v32, %v1577_v5  ;;  %v1351_v41 = vadd.f32 %v1319_v36, %v1253_v39  ;;  %v1417_v44 = vmul.f32 %v6447_v20, %v1383_v42  ;;  %v6601_v63 = vld [vmem:[#allocation2 + $0x1a2] sm:$0xff]  ;;  %v1095_v14 = vld [vmem:[#allocation2 + $0x171] sm:$0xff]  ;;  %v1773_v39 = vld [vmem:[#allocation2 + $0x13a] sm:$0xff] }
  0x84   : > { %2085 = vperm.xlu0 %5878, %v6549_v46   ;;  %v1158_v47 = vadd.f32 %v1126_v53, %v1060_v34  ;;  %v1224_v50 = vmul.f32 %v6420_v55, %v1190_v0  ;;  %v6597_v49 = vpop.permute.xlu2 %472  ;;  %2782 = vst.msk [vmem:[#allocation2 + $0x1a8] sm:$0x3] %vm911_vm2, %v11377_v2  ;;  %v1709_v51 = vmul.f32 %v6479_v38, %v1675_v27  ;;  %v1580_v34 = vld [vmem:[#allocation2 + $0x158] sm:$0xff]  ;;  %v1386_v42 = vld [vmem:[#allocation2 + $0x169] sm:$0xff] }
  0x85   : > { %11495 = vst [vmem:[#allocation10_spill] sm:$0xff] %v6597_v49  ;;  %v6608_v28 = vadd.f32 %v1804_v18, %v1738_v4  ;;  %v1643_v0 = vadd.f32 %v1611_v40, %v1544_v29  ;;  %v1515_v33 = vmul.f32 %v6464_v31, %v1481_v45  ;;  %v1322_v5 = vmul.f32 %v6428_v59, %v1288_v52  ;;  %v1193_v2 = vld [vmem:[#allocation2 + $0x172] sm:$0xff]  ;;  %v1291_v52 = vld [vmem:[#allocation2 + $0x188] sm:$0xff] }
  0x86   : > { %v1449_v36 = vadd.f32 %v1417_v44, %v1351_v41  ;;  %v1256_v53 = vadd.f32 %v1224_v50, %v1158_v47  ;;  %v1063_v1 = vmul.f32 %v6398_v37, %v1029_v48  ;;  %v1129_v27 = vmul.f32 %v6407_v43, %v1095_v14  ;;  %v1678_v40 = vld [vmem:[#allocation2 + $0x159] sm:$0xff]  ;;  %v1484_v41 = vld [vmem:[#allocation2 + $0x16a] sm:$0xff] }
  0x87   : > { %11496 = vst [vmem:[#allocation11_spill] sm:$0xff] %v6608_v28  ;;  %v1807_v57 = vmul.f32 %v6499_v26, %v1773_v39  ;;  %v1614_v4 = vmul.f32 %v6469_v32, %v1580_v34  ;;  %v1420_v18 = vmul.f32 %v6447_v20, %v1386_v42  ;;  %v1227_v47 = vmul.f32 %v6420_v55, %v1193_v2  ;;  %v1583_v39 = vld [vmem:[#allocation2 + $0x180] sm:$0xff]  ;;  %v6919_v49 = vld [vmem:[#allocation2 + $0x92] sm:$0xff] }
  0x88   : > { %v1547_v29 = vadd.f32 %v1515_v33, %v1449_v36  ;;  %v1354_v45 = vadd.f32 %v1322_v5, %v1256_v53  ;;  %v1161_v44 = vadd.f32 %v1129_v27, %v1063_v1  ;;  %v1712_v14 = vmul.f32 %v6479_v38, %v1678_v40  ;;  %v1776_v33 = vld [vmem:[#allocation2 + $0x15a] sm:$0xff]  ;;  %v1389_v36 = vld [vmem:[#allocation2 + $0x189] sm:$0xff] }
  0x89   : > { %658 = vperm.xlu2 %5880, %v6205_v3   ;;  %654 = vperm.xlu1 %5879, %v6236_v8   ;;  %v1741_v3 = vadd.f32 %v1709_v51, %v1643_v0  ;;  %v1518_v51 = vmul.f32 %v6464_v31, %v1484_v41  ;;  %v1325_v2 = vmul.f32 %v6428_v59, %v1291_v52  ;;  %v1681_v42 = vld [vmem:[#allocation2 + $0x181] sm:$0xff] }
  0x8a   : > { %v1646_v0 = vadd.f32 %v1614_v4, %v1547_v29  ;;  %v1452_v5 = vadd.f32 %v1420_v18, %v1354_v45  ;;  %v1259_v1 = vadd.f32 %v1227_v47, %v1161_v44  ;;  %v1810_v34 = vmul.f32 %v6499_v26, %v1776_v33  ;;  %v1487_v4 = vld [vmem:[#allocation2 + $0x18a] sm:$0xff]  ;;  %v1779_v52 = vld [vmem:[#allocation2 + $0x182] sm:$0xff] }
  0x8b   : > { %v6623_v48 = vadd.f32 %v1807_v57, %v1741_v3  ;;  %v1617_v53 = vmul.f32 %v6469_v32, %v1583_v39  ;;  %v1423_v3 = vmul.f32 %v6447_v20, %v1389_v36  ;;  %v1715_v40 = vmul.f32 %v6479_v38, %v1681_v42 }
  0x8c   : > { %2097 = vperm.xlu0 %5878, %v6570_v11   ;;  %v6619_v50 = vpop.permute.xlu2 %487  ;;  %v1550_v57 = vadd.f32 %v1518_v51, %v1452_v5  ;;  %v1357_v27 = vadd.f32 %v1325_v2, %v1259_v1  ;;  %v1521_v47 = vmul.f32 %v6464_v31, %v1487_v4  ;;  %v1718_v36 = vmul.f32 %v6479_v38, %v6599_v58 }
  0x8d   : > { %11497 = vst [vmem:[#allocation12_spill] sm:$0xff] %v6619_v50  ;;  %v11381_v42 = vmov 3   ;;  %v1558_v50 = vld [vmem:[#allocation2 + $0x50] sm:$0xff] }
  0x8e   : > { %11498 = vst [vmem:[#allocation13_spill] sm:$0xff] %v6623_v48  ;;  %v1649_v41 = vadd.f32 %v1617_v53, %v1550_v57  ;;  %v1455_v44 = vadd.f32 %v1423_v3, %v1357_v27  ;;  %v1816_v53 = vmul.f32 %v6499_v26, %v6601_v63  ;;  %v5957_v3 = vld [vmem:[%s6200_s19 + $0x20] sm:$0xff] }
  0x90   : > { %v1747_v51 = vadd.f32 %v1715_v40, %v1649_v41  ;;  %v1553_v33 = vadd.f32 %v1521_v47, %v1455_v44  ;;  %v5958_v41 = vld [vmem:[%s6200_s19 + $0x40] sm:$0xff] }
  0x91   : > { %670 = vperm.xlu2 %5880, %v6231_v7   ;;  %666 = vperm.xlu1 %5879, %v6346_v17   ;;  %v1744_v17 = vadd.f32 %v1712_v14, %v1646_v0  ;;  %v6634_v18 = vpop.permute.xlu1 %457  ;;  %v1586_v14 = vld [vmem:[#allocation2 + $0x1a0] sm:$0xff]  ;;  %v1813_v0 = vmul.f32 %v6499_v26, %v1779_v52  ;;  %v6670_v27 = vpop.permute.xlu0 %552  ;;  %v999_v52 = vld [vmem:[#allocation2 + $0x8] sm:$0xff] }
  0x92   : > { %11500 = vst [vmem:[#allocation15_spill] sm:$0xff] %v6634_v18  ;;  %v1620_v5 = vmul.f32 %v6469_v32, %v1586_v14  ;;  %v1065_v14 = vld [vmem:[#allocation2 + $0x9] sm:$0xff] }
  0x93   : > { %v6639_v45 = vadd.f32 %v1810_v34, %v1744_v17  ;;  %v6651_v1 = vadd.f32 %v1813_v0, %v1747_v51  ;;  %11508 = vst [vmem:[#allocation23_spill] sm:$0xff] %v6670_v27  ;;  %v998_v51 = vld [vmem:[#allocation2] sm:$0xff]  ;;  %v1033_v0 = vmul.f32 %v6398_v37, %v999_v52 }
  0x94   : > { %2109 = vperm.xlu0 %5878, %v6586_v56   ;;  %v6632_v29 = vpop.permute.xlu2 %502  ;;  %v1652_v2 = vadd.f32 %v1620_v5, %v1553_v33  ;;  %v1099_v33 = vmul.f32 %v6407_v43, %v1065_v14  ;;  %v1064_v5 = vld [vmem:[#allocation2 + $0x1] sm:$0xff] }
  0x95   : > { %11499 = vst [vmem:[#allocation14_spill] sm:$0xff] %v6632_v29  ;;  %v1261_v52 = vld [vmem:[#allocation2 + $0x20] sm:$0xff] }
  0x96   : > { %11501 = vst [vmem:[#allocation16_spill] sm:$0xff] %v6639_v45  ;;  %v1750_v34 = vadd.f32 %v1718_v36, %v1652_v2  ;;  %v1163_v36 = vld [vmem:[#allocation2 + $0xa] sm:$0xff] }
  0x97   : > { %11504 = vst [vmem:[#allocation19_spill] sm:$0xff] %v6651_v1 }
  0x99   : > { %682 = vperm.xlu2 %5880, %v6279_v10   ;;  %678 = vperm.xlu1 %5879, %v6364_v21   ;;  %v6647_v21 = vpop.permute.xlu1 %462  ;;  %v6685_v44 = vpop.permute.xlu0 %572 }
  0x9a   : > { %11503 = vst [vmem:[#allocation18_spill] sm:$0xff] %v6647_v21  ;;  %v1563_v21 = vld [vmem:[#allocation2 + $0x90] sm:$0xff] }
  0x9b   : > { %11513 = vst [vmem:[#allocation27_spill] sm:$0xff] %v6685_v44  ;;  %v6917_v44 = vld [vmem:[#allocation2 + $0x91] sm:$0xff] }
  0x9c   : > { %2121 = vperm.xlu0 %5878, %v6608_v28   ;;  %v6645_v39 = vpop.permute.xlu2 %517 }
  0x9d   : > { %11502 = vst [vmem:[#allocation17_spill] sm:$0xff] %v6645_v39 }
  0xa1   : > { %694 = vperm.xlu2 %5880, %v6300_v13   ;;  %690 = vperm.xlu1 %5879, %v6513_v22   ;;  %v6660_v57 = vpop.permute.xlu1 %482  ;;  %v6665_v22 = vadd.f32 %v1816_v53, %v1750_v34  ;;  %v1162_v34 = vld [vmem:[#allocation2 + $0x2] sm:$0xff]  ;;  %v1131_v53 = vadd.f32 %v1099_v33, %v1033_v0 }
  0xa2   : > { %11506 = vst [vmem:[#allocation21_spill] sm:$0xff] %v6660_v57  ;;  %v1359_v0 = vld [vmem:[#allocation2 + $0x21] sm:$0xff]  ;;  %v1592_v57 = vmul.f32 %v6469_v32, %v1558_v50 }
  0xa4   : > { %2133 = vperm.xlu0 %5878, %v6623_v48   ;;  %v6658_v17 = vpop.permute.xlu2 %548 }
  0xa5   : > { %11505 = vst [vmem:[#allocation20_spill] sm:$0xff] %v6658_v17 }
  0xa9   : > { %5881 = vset.pattern.permute.xlu2 %v11381_v42  ;;  %702 = vperm.xlu1 %5879, %v6553_v30   ;;  %v6672_v63 = vpop.permute.xlu1 %497  ;;  %v11510_v30 = vmov 2  }
  0xaa   : > { %740 = vperm.xlu2 %5881, %v6335_v16   ;;  %11509 = vst [vmem:[#allocation24_spill] sm:$0xff] %v6672_v63  ;;  %v6804_v63 = vld [vmem:[#allocation2 + $0x60] sm:$0xff] }
  0xac   : > { %2145 = vperm.xlu0 %5878, %v6639_v45   ;;  %v6668_v58 = vpop.permute.xlu2 %560 }
  0xad   : > { %11507 = vst [vmem:[#allocation22_spill] sm:$0xff] %v6668_v58 }
  0xb1   : > { %5882 = vset.pattern.permute.xlu1 %v11381_v42  ;;  %v6679_v4 = vpop.permute.xlu1 %512  ;;  %v1295_v42 = vmul.f32 %v6428_v59, %v1261_v52 }
  0xb2   : > { %752 = vperm.xlu2 %5881, %v6236_v8   ;;  %748 = vperm.xlu1 %5882, %v5957_v3   ;;  %11511 = vst [vmem:[#allocation25_spill] sm:$0xff] %v6679_v4  ;;  %v1197_v3 = vmul.f32 %v6420_v55, %v1163_v36  ;;  %v1068_v4 = vld [vmem:[#allocation2 + $0x31] sm:$0xff] }
  0xb4   : > { %2157 = vperm.xlu0 %5878, %v6651_v1   ;;  %v6681_v40 = vpop.permute.xlu2 %568 }
  0xb5   : > { %11512 = vst [vmem:[#allocation26_spill] sm:$0xff] %v6681_v40  ;;  %v1754_v40 = vld [vmem:[#allocation2 + $0x52] sm:$0xff] }
  0xba   : > { %760 = vperm.xlu2 %5881, %v6226_v6   ;;  %756 = vperm.xlu1 %5882, %v5958_v41   ;;  %v6692_v8 = vpop.permute.xlu1 %544  ;;  %v11519_v41 = vmov 0.0  }
  0xbb   : > { %11515 = vst [vmem:[#allocation29_spill] sm:$0xff] %v6692_v8 }
  0xbc   : > { %2169 = vperm.xlu0 %5878, %v6665_v22   ;;  %v6688_v47 = vpop.permute.xlu2 %580  ;;  %2731 = vst.msk [vmem:[#allocation2 + $0x10] sm:$0x3] %vm911_vm2, %v11519_v41 }
  0xbd   : > { %11514 = vst [vmem:[#allocation28_spill] sm:$0xff] %v6688_v47  ;;  %v11524_v47 = vmov 0  }
  0xbe   : > { %2729 = vst.msk [vmem:[#allocation2] sm:$0xff] %vm908_vm0, %v11519_v41 }
  0xbf   : > { %2730 = vst.msk [vmem:[#allocation2 + $0x8] sm:$0xff] %vm908_vm0, %v11519_v41 }
  0xc0   : > { %2747 = vst.msk [vmem:[#allocation2 + $0x90] sm:$0xff] %vm908_vm0, %v11519_v41 }
  0xc2   : > { %772 = vperm.xlu2 %5881, %v6273_v9   ;;  %768 = vperm.xlu1 %5882, %v6231_v7   ;;  %v6704_v7 = vpop.permute.xlu1 %556 }
  0xc3   : > { %11518 = vst [vmem:[#allocation32_spill] sm:$0xff] %v6704_v7 }
  0xc4   : > { %5887 = vset.pattern.permute.xlu0 %v11510_v30  ;;  %v7124_v30 = vld [vmem:[#allocation2 + $0xf2] sm:$0xff] }
  0xc5   : > { %642 = vperm.xlu0 %5887, %v6335_v16   ;;  %v6694_v16 = vpop.permute.xlu0 %584 }
  0xc6   : > { %11516 = vst [vmem:[#allocation30_spill] sm:$0xff] %v6694_v16  ;;  %v6806_v16 = vld [vmem:[#allocation2 + $0x61] sm:$0xff] }
  0xc7   : > { %v6700_v2 = vpop.permute.xlu2 %592  ;;  %v1398_v17 = vmul.f32 %v6447_v20, %v6806_v16 }
  0xc8   : > { %11517 = vst [vmem:[#allocation31_spill] sm:$0xff] %v6700_v2 }
  0xca   : > { %784 = vperm.xlu2 %5881, %v6295_v12   ;;  %780 = vperm.xlu1 %5882, %v6279_v10   ;;  %v1229_v10 = vadd.f32 %v1197_v3, %v1131_v53  ;;  %v1002_v3 = vld [vmem:[#allocation2 + $0x30] sm:$0xff] }
  0xcc   : > { %v1327_v39 = vadd.f32 %v1295_v42, %v1229_v10  ;;  %v1102_v10 = vmul.f32 %v6407_v43, %v1068_v4 }
  0xcd   : > { %662 = vperm.xlu0 %5887, %v6226_v6   ;;  %v1032_v6 = vmul.f32 %v6398_v37, %v998_v51  ;;  %v1196_v51 = vmul.f32 %v6420_v55, %v1162_v34  ;;  %v6718_v36 = vpop.permute.xlu0 %596  ;;  %v1457_v34 = vld [vmem:[#allocation2 + $0x22] sm:$0xff] }
  0xce   : > { %11520 = vst [vmem:[#allocation33_spill] sm:$0xff] %v6718_v36  ;;  %v1491_v2 = vmul.f32 %v6464_v31, %v1457_v34  ;;  %v6755_v36 = vld [vmem:[#allocation2 + $0x3a] sm:$0xff] }
  0xcf   : > { %2734 = vst.msk [vmem:[#allocation2 + $0x28] sm:$0x3] %vm911_vm2, %v11519_v41 }
  0xd0   : > { %2733 = vst.msk [vmem:[#allocation2 + $0x20] sm:$0xff] %vm908_vm0, %v11519_v41 }
  0xd1   : > { %v6730_v42 = vpop.permute.xlu2 %604 }
  0xd2   : > { %11521 = vst [vmem:[#allocation34_spill] sm:$0xff] %v6730_v42  ;;  %796 = vperm.xlu2 %5881, %v6319_v15   ;;  %792 = vperm.xlu1 %5882, %v6300_v13   ;;  %v1035_v13 = vmul.f32 %v6398_v37, %v1261_v52  ;;  %v6746_v15 = vld [vmem:[#allocation2 + $0x39] sm:$0xff]  ;;  %v1687_v42 = vmul.f32 %v6479_v38, %v6455_v25 }
  0xd3   : > { %2737 = vst.msk [vmem:[#allocation2 + $0x40] sm:$0x3] %vm911_vm2, %v11519_v41  ;;  %v5959_v25 = vld [vmem:[%s6200_s19 + $0xe0] sm:$0xff] }
  0xd5   : > { %674 = vperm.xlu0 %5887, %v6273_v9   ;;  %v1098_v9 = vmul.f32 %v6407_v43, %v1064_v5  ;;  %v1294_v5 = vmul.f32 %v6428_v59, %v6432_v60 }
  0xd7   : > { %v1130_v14 = vadd.f32 %v1098_v9, %v1032_v6  ;;  %v1393_v6 = vmul.f32 %v6447_v20, %v1359_v0  ;;  %v1392_v9 = vmul.f32 %v6447_v20, %v6434_v61  ;;  %v6736_v61 = vld [vmem:[#allocation2 + $0x38] sm:$0xff] }
  0xd9   : > { %v1228_v33 = vadd.f32 %v1196_v51, %v1130_v14  ;;  %v1425_v60 = vadd.f32 %v1393_v6, %v1327_v39  ;;  %v1490_v14 = vmul.f32 %v6464_v31, %v6442_v19  ;;  %v1036_v51 = vmul.f32 %v6398_v37, %v1002_v3  ;;  %v1264_v3 = vld [vmem:[#allocation2 + $0x48] sm:$0xff] }
  0xda   : > { %5884 = vset.pattern.permute.xlu2 %v11524_v47  ;;  %5883 = vset.pattern.permute.xlu1 %v11524_v47 }
  0xdb   : > { %v1326_v53 = vadd.f32 %v1294_v5, %v1228_v33  ;;  %v1166_v5 = vld [vmem:[#allocation2 + $0x32] sm:$0xff]  ;;  %v1523_v19 = vadd.f32 %v1491_v2, %v1425_v60  ;;  %v1590_v33 = vmul.f32 %v6469_v32, %v6736_v61  ;;  %v1134_v4 = vadd.f32 %v1102_v10, %v1036_v51 }
  0xdc   : > { %2735 = vst.msk [vmem:[#allocation2 + $0x30] sm:$0xff] %vm908_vm0, %v11519_v41  ;;  %v1688_v60 = vmul.f32 %v6479_v38, %v6746_v15  ;;  %v1786_v10 = vmul.f32 %v6499_v26, %v6755_v36 }
  0xdd   : > { %686 = vperm.xlu0 %5887, %v6295_v12   ;;  %v6734_v12 = vpop.permute.xlu1 %564  ;;  %v1424_v39 = vadd.f32 %v1392_v9, %v1326_v53  ;;  %v1589_v9 = vmul.f32 %v6469_v32, %v6453_v24  ;;  %v1200_v53 = vmul.f32 %v6420_v55, %v1166_v5  ;;  %v1622_v2 = vadd.f32 %v1590_v33, %v1523_v19 }
  0xde   : > { %11522 = vst [vmem:[#allocation35_spill] sm:$0xff] %v6734_v12  ;;  %v1101_v24 = vmul.f32 %v6407_v43, %v1359_v0  ;;  %v1785_v5 = vmul.f32 %v6499_v26, %v6474_v35  ;;  %v1199_v0 = vmul.f32 %v6420_v55, %v1457_v34  ;;  %v1297_v35 = vmul.f32 %v6428_v59, %v6736_v61  ;;  %v6783_v34 = vld [vmem:[#allocation2] sm:$0xff] }
  0xdf   : > { %v1522_v6 = vadd.f32 %v1490_v14, %v1424_v39  ;;  %v1232_v29 = vadd.f32 %v1200_v53, %v1134_v4  ;;  %v1298_v14 = vmul.f32 %v6428_v59, %v1264_v3  ;;  %v1362_v39 = vld [vmem:[#allocation2 + $0x49] sm:$0xff]  ;;  %v1720_v51 = vadd.f32 %v1688_v60, %v1622_v2  ;;  %11526 = vst [vmem:[#allocation38_spill] sm:$0xff] %v6783_v34 }
  0xe0   : > { %v1396_v19 = vmul.f32 %v6447_v20, %v1362_v39  ;;  %v1133_v4 = vadd.f32 %v1101_v24, %v1035_v13  ;;  %v6785_v13 = vld [vmem:[#allocation2 + $0x1] sm:$0xff]  ;;  %2736 = vst.msk [vmem:[#allocation2 + $0x38] sm:$0xff] %vm908_vm0, %v11519_v41  ;;  %v6792_v24 = vld [vmem:[#allocation2 + $0x9] sm:$0xff] }
  0xe1   : > { %v1621_v52 = vadd.f32 %v1589_v9, %v1522_v6  ;;  %v1330_v6 = vadd.f32 %v1298_v14, %v1232_v29  ;;  %v1460_v9 = vld [vmem:[#allocation2 + $0x4a] sm:$0xff]  ;;  %v6770_v2 = vadd.f32 %v1786_v10, %v1720_v51  ;;  %11527 = vst [vmem:[#allocation39_spill] sm:$0xff] %v6785_v13  ;;  %v6789_v14 = vpop.permute.xlu2 %650  ;;  %v6794_v51 = vld [vmem:[#allocation2 + $0x2] sm:$0xff] }
  0xe2   : > { %v1494_v60 = vmul.f32 %v6464_v31, %v1460_v9  ;;  %2738 = vst.msk [vmem:[#allocation2 + $0x48] sm:$0xff] %vm908_vm0, %v11519_v41  ;;  %v6796_v10 = vld [vmem:[#allocation2 + $0xa] sm:$0xff]  ;;  %v7032_v13 = vld [vmem:[#allocation2 + $0xc1] sm:$0xff] }
  0xe3   : > { %v1719_v33 = vadd.f32 %v1687_v42, %v1621_v52  ;;  %v1428_v52 = vadd.f32 %v1396_v19, %v1330_v6  ;;  %11528 = vst [vmem:[#allocation40_spill] sm:$0xff] %v6789_v14  ;;  %1857 = vperm.xlu2 %5884, %v6770_v2   ;;  %v11383_v19 = vmov -inf   ;;  %v1656_v14 = vld [vmem:[#allocation2 + $0x51] sm:$0xff]  ;;  %v7034_v34 = vld [vmem:[#allocation2 + $0xc2] sm:$0xff] }
  0xe4   : > { %11529 = vst [vmem:[#allocation41_spill] sm:$0xff] %v6792_v24  ;;  %v7030_v24 = vld [vmem:[#allocation2 + $0xc0] sm:$0xff] }
  0xe5   : > { %698 = vperm.xlu0 %5887, %v5959_v25   ;;  %v6779_v29 = vpop.permute.xlu1 %576  ;;  %v6781_v42 = vadd.f32 %v1785_v5, %v1719_v33  ;;  %11530 = vst [vmem:[#allocation42_spill] sm:$0xff] %v6794_v51  ;;  %v1231_v5 = vadd.f32 %v1199_v0, %v1133_v4  ;;  %v1395_v25 = vmul.f32 %v6447_v20, %v6746_v15 }
  0xe6   : > { %v6768_v53 = vpop.permute.xlu0 %2053  ;;  %11525 = vst [vmem:[#allocation37_spill] sm:$0xff] %v6779_v29  ;;  %v1038_v33 = vmul.f32 %v6398_v37, %v1264_v3  ;;  %v1526_v6 = vadd.f32 %v1494_v60, %v1428_v52  ;;  %v1104_v29 = vmul.f32 %v6407_v43, %v1362_v39  ;;  %v1593_v3 = vmul.f32 %v6469_v32, %v6804_v63  ;;  %v6817_v52 = vld [vmem:[#allocation2 + $0x62] sm:$0xff] }
  0xe7   : > { %11523 = vst [vmem:[#allocation36_spill] sm:$0xff] %v6768_v53  ;;  %1852 = vperm.xlu1 %5883, %v6781_v42   ;;  %v1691_v4 = vmul.f32 %v6479_v38, %v6806_v16  ;;  %v1329_v0 = vadd.f32 %v1297_v35, %v1231_v5  ;;  %v1493_v60 = vmul.f32 %v6464_v31, %v6755_v36 }
  0xe8   : > { %11531 = vst [vmem:[#allocation43_spill] sm:$0xff] %v6796_v10  ;;  %v1136_v12 = vadd.f32 %v1104_v29, %v1038_v33  ;;  %v1625_v7 = vadd.f32 %v1593_v3, %v1526_v6  ;;  %v1789_v39 = vmul.f32 %v6499_v26, %v6817_v52  ;;  %v1202_v35 = vmul.f32 %v6420_v55, %v1460_v9 }
  0xe9   : > { %5289 = vst.msk [vmem:[#allocation2] sm:$0xff] %vm908_vm0, %v11383_v19  ;;  %v1300_v5 = vmul.f32 %v6428_v59, %v6804_v63  ;;  %v1037_v29 = vmul.f32 %v6398_v37, %v6736_v61  ;;  %v1201_v37 = vmul.f32 %v6420_v55, %v6755_v36  ;;  %v1658_v61 = vld [vmem:[#allocation2 + $0x69] sm:$0xff]  ;;  %v1496_v36 = vmul.f32 %v6464_v31, %v6817_v52 }
  0xea   : > { %5291 = vst.msk [vmem:[#allocation2 + $0x10] sm:$0x3] %vm911_vm2, %v11383_v19  ;;  %v1427_v19 = vadd.f32 %v1395_v25, %v1329_v0  ;;  %v1723_v6 = vadd.f32 %v1691_v4, %v1625_v7  ;;  %v1690_v25 = vmul.f32 %v6479_v38, %v1656_v14  ;;  %v1103_v0 = vmul.f32 %v6407_v43, %v6746_v15  ;;  %v6843_v7 = vld [vmem:[#allocation2 + $0x6a] sm:$0xff] }
  0xeb   : > { %2740 = vst.msk [vmem:[#allocation2 + $0x58] sm:$0x3] %vm911_vm2, %v11519_v41  ;;  %v1234_v9 = vadd.f32 %v1202_v35, %v1136_v12  ;;  %v1788_v4 = vmul.f32 %v6499_v26, %v1754_v40  ;;  %v6852_v12 = vld [vmem:[#allocation2 + $0x78] sm:$0xff] }
  0xec   : > { %v1525_v3 = vadd.f32 %v1493_v60, %v1427_v19  ;;  %2739 = vst.msk [vmem:[#allocation2 + $0x50] sm:$0xff] %vm908_vm0, %v11519_v41  ;;  %v6847_v19 = vpop.permute.xlu2 %658  ;;  %v6849_v43 = vadd.f32 %v1789_v39, %v1723_v6  ;;  %v1560_v60 = vld [vmem:[#allocation2 + $0x68] sm:$0xff]  ;;  %v6858_v35 = vld [vmem:[#allocation2 + $0x79] sm:$0xff]  ;;  %v1595_v6 = vmul.f32 %v6469_v32, %v6852_v12 }
  0xed   : > { %2247 = vperm.xlu0 %5887, %v6515_v23   ;;  %v6837_v58 = vpop.permute.xlu1 %588  ;;  %2741 = vst.msk [vmem:[#allocation2 + $0x60] sm:$0xff] %vm908_vm0, %v11519_v41  ;;  %v1332_v55 = vadd.f32 %v1300_v5, %v1234_v9  ;;  %v1397_v9 = vmul.f32 %v6447_v20, %v1656_v14  ;;  %v6882_v20 = vld [vmem:[%s11490_s1] ss:$0 sm:$0xff] }
  0xee   : > { %v6830_v33 = vpop.permute.xlu0 %2073  ;;  %11533 = vst [vmem:[#allocation45_spill] sm:$0xff] %v6837_v58  ;;  %v1624_v15 = vadd.f32 %v1592_v57, %v1525_v3  ;;  %v1135_v58 = vadd.f32 %v1103_v0, %v1037_v29  ;;  %1872 = vperm.xlu2 %5884, %v6849_v43   ;;  %v6866_v3 = vld [vmem:[#allocation2 + $0x7a] sm:$0xff] }
  0xef   : > { %11532 = vst [vmem:[#allocation44_spill] sm:$0xff] %v6830_v33  ;;  %v1430_v39 = vadd.f32 %v1398_v17, %v1332_v55  ;;  %v6874_v29 = vld [vmem:[#allocation2 + $0x80] sm:$0xff]  ;;  %v1791_v0 = vmul.f32 %v6499_v26, %v6866_v3 }
  0xf0   : > { %11534 = vst [vmem:[#allocation46_spill] sm:$0xff] %v6847_v19  ;;  %v1299_v19 = vmul.f32 %v6428_v59, %v1558_v50  ;;  %v1722_v57 = vadd.f32 %v1690_v25, %v1624_v15  ;;  %v1233_v5 = vadd.f32 %v1201_v37, %v1135_v58  ;;  %v1693_v59 = vmul.f32 %v6479_v38, %v6858_v35  ;;  %v6906_v55 = vld [vmem:[#allocation2 + $0x82] sm:$0xff] }
  0xf1   : > { %2743 = vst.msk [vmem:[#allocation2 + $0x70] sm:$0x3] %vm911_vm2, %v11519_v41  ;;  %v1495_v50 = vmul.f32 %v6464_v31, %v1754_v40  ;;  %v1528_v17 = vadd.f32 %v1496_v36, %v1430_v39  ;;  %v1041_v58 = vmul.f32 %v6882_v20, %v1560_v60  ;;  %v6888_v31 = vld [vmem:[%s11490_s1 + $0x1] ss:$0 sm:$0xff]  ;;  %v1594_v37 = vmul.f32 %v6469_v32, %v1560_v60  ;;  %v6913_v32 = vld [vmem:[%s11490_s1 + $0x3] ss:$0 sm:$0xff] }
  0xf2   : > { %2742 = vst.msk [vmem:[#allocation2 + $0x68] sm:$0xff] %vm908_vm0, %v11519_v41  ;;  %v6869_v8 = vadd.f32 %v1788_v4, %v1722_v57  ;;  %v1331_v25 = vadd.f32 %v1299_v19, %v1233_v5  ;;  %v1107_v40 = vmul.f32 %v6888_v31, %v1658_v61  ;;  %v6900_v19 = vld [vmem:[%s11490_s1 + $0x2] ss:$0 sm:$0xff]  ;;  %v1303_v60 = vmul.f32 %v6913_v32, %v6874_v29 }
  0xf3   : > { %2744 = vst.msk [vmem:[#allocation2 + $0x78] sm:$0xff] %vm908_vm0, %v11519_v41  ;;  %v1205_v15 = vmul.f32 %v6900_v19, %v6843_v7  ;;  %v6904_v4 = vld [vmem:[#allocation2 + $0x81] sm:$0xff]  ;;  %v1627_v57 = vadd.f32 %v1595_v6, %v1528_v17  ;;  %v1692_v6 = vmul.f32 %v6479_v38, %v1658_v61  ;;  %v1106_v17 = vmul.f32 %v6888_v31, %v6806_v16  ;;  %v6943_v16 = vld [vmem:[#allocation2 + $0x98] sm:$0xff] }
  0xf4   : > { %1867 = vperm.xlu1 %5883, %v6869_v8   ;;  %v1429_v39 = vadd.f32 %v1397_v9, %v1331_v25  ;;  %v1139_v5 = vadd.f32 %v1107_v40, %v1041_v58  ;;  %2746 = vst.msk [vmem:[#allocation2 + $0x88] sm:$0x3] %vm911_vm2, %v11519_v41  ;;  %v1040_v9 = vmul.f32 %v6882_v20, %v6804_v63  ;;  %v7098_v33 = vld [vmem:[#allocation2 + $0xe2] sm:$0xff] }
  0xf5   : > { %2267 = vperm.xlu0 %5887, %v6532_v62   ;;  %v6908_v36 = vpop.permute.xlu1 %600  ;;  %v1725_v25 = vadd.f32 %v1693_v59, %v1627_v57  ;;  %v1401_v38 = vmul.f32 %v6935_v54, %v6904_v4  ;;  %2745 = vst.msk [vmem:[#allocation2 + $0x80] sm:$0xff] %vm908_vm0, %v11519_v41  ;;  %v1790_v63 = vmul.f32 %v6499_v26, %v6843_v7  ;;  %v6958_v26 = vld [vmem:[#allocation2 + $0x9a] sm:$0xff] }
  0xf6   : > { %v6891_v14 = vpop.permute.xlu0 %2085  ;;  %11536 = vst [vmem:[#allocation48_spill] sm:$0xff] %v6908_v36  ;;  %v6923_v36 = vpop.permute.xlu2 %670  ;;  %v1527_v58 = vadd.f32 %v1495_v50, %v1429_v39  ;;  %v1237_v40 = vadd.f32 %v1205_v15, %v1139_v5  ;;  %v1138_v61 = vadd.f32 %v1106_v17, %v1040_v9  ;;  %v1204_v59 = vmul.f32 %v6900_v19, %v6817_v52  ;;  %v6952_v39 = vld [vmem:[%s11490_s1 + $0x5] ss:$0 sm:$0xff]  ;;  %v6971_v9 = vld [vmem:[%s11490_s1 + $0x6] ss:$0 sm:$0xff]  ;;  %v6975_v17 = vld [vmem:[#allocation2 + $0xa8] sm:$0xff] }
  0xf7   : > { %11535 = vst [vmem:[#allocation47_spill] sm:$0xff] %v6891_v14  ;;  %v6947_v50 = vadd.f32 %v1791_v0, %v1725_v25  ;;  %v1499_v5 = vmul.f32 %v6952_v39, %v6906_v55  ;;  %v1302_v52 = vmul.f32 %v6913_v32, %v6852_v12  ;;  %v1400_v0 = vmul.f32 %v6935_v54, %v6858_v35  ;;  %v6977_v35 = vld [vmem:[#allocation2 + $0xa9] sm:$0xff] }
  0xf8   : > { %11537 = vst [vmem:[#allocation49_spill] sm:$0xff] %v6923_v36  ;;  %v1626_v15 = vadd.f32 %v1594_v37, %v1527_v58  ;;  %v1335_v57 = vadd.f32 %v1303_v60, %v1237_v40  ;;  %v6956_v36 = vld [vmem:[#allocation2 + $0x99] sm:$0xff]  ;;  %v1236_v7 = vadd.f32 %v1204_v59, %v1138_v61  ;;  %v1598_v12 = vmul.f32 %v6971_v9, %v6943_v16  ;;  %v6979_v25 = vld [vmem:[#allocation2 + $0xaa] sm:$0xff]  ;;  %v6994_v59 = vld [vmem:[%s11490_s1 + $0x7] ss:$0 sm:$0xff] }
  0xf9   : > { %2749 = vst.msk [vmem:[#allocation2 + $0xa0] sm:$0x3] %vm911_vm2, %v11519_v41  ;;  %1882 = vperm.xlu2 %5884, %v6947_v50   ;;  %v1498_v40 = vmul.f32 %v6952_v39, %v6866_v3  ;;  %v1306_v51 = vmul.f32 %v6913_v32, %v6975_v17  ;;  %v7079_v14 = vld [vmem:[#allocation2 + $0xc8] sm:$0xff] }
  0xfa   : > { %v1724_v37 = vadd.f32 %v1692_v6, %v1626_v15  ;;  %v1433_v60 = vadd.f32 %v1401_v38, %v1335_v57  ;;  %2748 = vst.msk [vmem:[#allocation2 + $0x98] sm:$0xff] %vm908_vm0, %v11519_v41  ;;  %v1334_v6 = vadd.f32 %v1302_v52, %v1236_v7  ;;  %v1696_v15 = vmul.f32 %v6994_v59, %v6956_v36  ;;  %v6999_v7 = vld [vmem:[#allocation2 + $0xb1] sm:$0xff] }
  0xfb   : > { %2750 = vst.msk [vmem:[#allocation2 + $0xa8] sm:$0xff] %vm908_vm0, %v11519_v41  ;;  %v1044_v57 = vmul.f32 %v6882_v20, %v1563_v21  ;;  %v7001_v52 = vld [vmem:[#allocation2 + $0xb2] sm:$0xff] }
  0xfc   : > { %v6989_v38 = vadd.f32 %v1790_v63, %v1724_v37  ;;  %v1531_v61 = vadd.f32 %v1499_v5, %v1433_v60  ;;  %v1432_v63 = vadd.f32 %v1400_v0, %v1334_v6  ;;  %v1597_v5 = vmul.f32 %v6971_v9, %v1563_v21  ;;  %2752 = vst.msk [vmem:[#allocation2 + $0xb8] sm:$0x3] %vm911_vm2, %v11519_v41  ;;  %v1566_v0 = vld [vmem:[#allocation2 + $0xb0] sm:$0xff] }
  0xfd   : > { %2279 = vperm.xlu0 %5887, %v6549_v46   ;;  %v7005_v18 = vpop.permute.xlu1 %646  ;;  %v1110_v37 = vmul.f32 %v6888_v31, %v6917_v44  ;;  %v1208_v60 = vmul.f32 %v6900_v19, %v6919_v49  ;;  %2751 = vst.msk [vmem:[#allocation2 + $0xb0] sm:$0xff] %vm908_vm0, %v11519_v41 }
  0xfe   : > { %v6983_v58 = vpop.permute.xlu0 %2097  ;;  %v7003_v3 = vpop.permute.xlu2 %682  ;;  %11540 = vst [vmem:[#allocation52_spill] sm:$0xff] %v7005_v18  ;;  %1877 = vperm.xlu1 %5883, %v6989_v38   ;;  %v1630_v27 = vadd.f32 %v1598_v12, %v1531_v61  ;;  %v1530_v6 = vadd.f32 %v1498_v40, %v1432_v63  ;;  %v1695_v18 = vmul.f32 %v6994_v59, %v6917_v44 }
  0xff   : > { %11538 = vst [vmem:[#allocation50_spill] sm:$0xff] %v6983_v58  ;;  %v1142_v10 = vadd.f32 %v1110_v37, %v1044_v57  ;;  %v1043_v44 = vmul.f32 %v6882_v20, %v6874_v29  ;;  %v1404_v63 = vmul.f32 %v6935_v54, %v6977_v35  ;;  %v1207_v29 = vmul.f32 %v6900_v19, %v6906_v55 }
 0x100   : > { %11539 = vst [vmem:[#allocation51_spill] sm:$0xff] %v7003_v3  ;;  %v7018_v3 = vld [vmem:[%s11490_s1 + $0x8] ss:$0 sm:$0xff]  ;;  %v1728_v12 = vadd.f32 %v1696_v15, %v1630_v27  ;;  %v1629_v40 = vadd.f32 %v1597_v5, %v1530_v6  ;;  %v1109_v27 = vmul.f32 %v6888_v31, %v6904_v4  ;;  %v1502_v15 = vmul.f32 %v6952_v39, %v6979_v25  ;;  %v7053_v5 = vld [vmem:[#allocation2 + $0xca] sm:$0xff] }
 0x101   : > { %v1794_v21 = vmul.f32 %v7018_v3, %v6958_v26  ;;  %v1793_v61 = vmul.f32 %v7018_v3, %v6919_v49  ;;  %v1240_v57 = vadd.f32 %v1208_v60, %v1142_v10  ;;  %2753 = vst.msk [vmem:[#allocation2 + $0xc0] sm:$0xff] %vm908_vm0, %v11519_v41  ;;  %v7051_v10 = vld [vmem:[#allocation2 + $0xc9] sm:$0xff]  ;;  %v1305_v58 = vmul.f32 %v6913_v32, %v6943_v16 }
 0x102   : > { %v1727_v4 = vadd.f32 %v1695_v18, %v1629_v40  ;;  %v1141_v6 = vadd.f32 %v1109_v27, %v1043_v44  ;;  %2755 = vst.msk [vmem:[#allocation2 + $0xd0] sm:$0x3] %vm911_vm2, %v11519_v41  ;;  %v1601_v55 = vmul.f32 %v6971_v9, %v7030_v24  ;;  %v7070_v18 = vld [vmem:[#allocation2 + $0xda] sm:$0xff]  ;;  %v1047_v27 = vmul.f32 %v6882_v20, %v1566_v0 }
 0x103   : > { %v7045_v49 = vadd.f32 %v1794_v21, %v1728_v12  ;;  %v1338_v60 = vadd.f32 %v1306_v51, %v1240_v57  ;;  %v1403_v21 = vmul.f32 %v6935_v54, %v6956_v36  ;;  %v7066_v12 = vld [vmem:[#allocation2 + $0xd8] sm:$0xff]  ;;  %v1113_v36 = vmul.f32 %v6888_v31, %v6999_v7  ;;  %2754 = vst.msk [vmem:[#allocation2 + $0xc8] sm:$0xff] %vm908_vm0, %v11519_v41 }
 0x104   : > { %v7072_v51 = vadd.f32 %v1793_v61, %v1727_v4  ;;  %v1239_v57 = vadd.f32 %v1207_v29, %v1141_v6  ;;  %v1211_v61 = vmul.f32 %v6900_v19, %v7001_v52  ;;  %v1699_v29 = vmul.f32 %v6994_v59, %v7032_v13 }
 0x105   : > { %2291 = vperm.xlu0 %5887, %v6570_v11   ;;  %1897 = vperm.xlu2 %5884, %v7045_v49   ;;  %v7076_v44 = vpop.permute.xlu1 %654  ;;  %v1436_v40 = vadd.f32 %v1404_v63, %v1338_v60  ;;  %v1501_v60 = vmul.f32 %v6952_v39, %v6958_v26  ;;  %v1145_v6 = vadd.f32 %v1113_v36, %v1047_v27 }
 0x106   : > { %v7055_v37 = vpop.permute.xlu0 %2109  ;;  %v7074_v16 = vpop.permute.xlu2 %694  ;;  %11543 = vst [vmem:[#allocation55_spill] sm:$0xff] %v7076_v44  ;;  %1892 = vperm.xlu1 %5883, %v7072_v51   ;;  %v1337_v4 = vadd.f32 %v1305_v58, %v1239_v57  ;;  %v7096_v44 = vld [vmem:[#allocation2 + $0xe1] sm:$0xff]  ;;  %v1797_v47 = vmul.f32 %v7018_v3, %v7034_v34  ;;  %v1407_v58 = vmul.f32 %v6935_v54, %v7051_v10 }
 0x107   : > { %11541 = vst [vmem:[#allocation53_spill] sm:$0xff] %v7055_v37  ;;  %v7068_v37 = vld [vmem:[#allocation2 + $0xd9] sm:$0xff]  ;;  %v1534_v63 = vadd.f32 %v1502_v15, %v1436_v40  ;;  %v1600_v40 = vmul.f32 %v6971_v9, %v1566_v0  ;;  %v1243_v26 = vadd.f32 %v1211_v61, %v1145_v6  ;;  %v1112_v27 = vmul.f32 %v6888_v31, %v6977_v35  ;;  %v7122_v6 = vld [vmem:[#allocation2 + $0xf1] sm:$0xff] }
 0x108   : > { %11542 = vst [vmem:[#allocation54_spill] sm:$0xff] %v7074_v16  ;;  %v1309_v16 = vmul.f32 %v6913_v32, %v7079_v14  ;;  %v1435_v15 = vadd.f32 %v1403_v21, %v1337_v4  ;;  %v7108_v57 = vld [vmem:[#allocation2 + $0xe0] sm:$0xff]  ;;  %v1210_v61 = vmul.f32 %v6900_v19, %v6979_v25  ;;  %v7120_v4 = vld [vmem:[#allocation2 + $0xf0] sm:$0xff] }
 0x109   : > { %2756 = vst.msk [vmem:[#allocation2 + $0xd8] sm:$0xff] %vm908_vm0, %v11519_v41  ;;  %v1633_v53 = vadd.f32 %v1601_v55, %v1534_v63  ;;  %v1046_v55 = vmul.f32 %v6882_v20, %v6975_v17  ;;  %v1698_v63 = vmul.f32 %v6994_v59, %v6999_v7  ;;  %v1308_v7 = vmul.f32 %v6913_v32, %v7030_v24  ;;  %v7134_v25 = vld [vmem:[#allocation2 + $0xfa] sm:$0xff] }
 0x10a   : > { %2758 = vst.msk [vmem:[#allocation2 + $0xe8] sm:$0x3] %vm911_vm2, %v11519_v41  ;;  %v1533_v36 = vadd.f32 %v1501_v60, %v1435_v15  ;;  %v1341_v17 = vadd.f32 %v1309_v16, %v1243_v26  ;;  %v1796_v16 = vmul.f32 %v7018_v3, %v7001_v52 }
 0x10b   : > { %v1731_v0 = vadd.f32 %v1699_v29, %v1633_v53  ;;  %2757 = vst.msk [vmem:[#allocation2 + $0xe0] sm:$0xff] %vm908_vm0, %v11519_v41  ;;  %v1505_v53 = vmul.f32 %v6952_v39, %v7053_v5  ;;  %v1144_v35 = vadd.f32 %v1112_v27, %v1046_v55  ;;  %v7132_v29 = vld [vmem:[#allocation2 + $0xf9] sm:$0xff]  ;;  %v1604_v55 = vmul.f32 %v6971_v9, %v7108_v57 }
 0x10c   : > { %2759 = vst.msk [vmem:[#allocation2 + $0xf0] sm:$0xff] %vm908_vm0, %v11519_v41  ;;  %v1632_v15 = vadd.f32 %v1600_v40, %v1533_v36  ;;  %v1439_v24 = vadd.f32 %v1407_v58, %v1341_v17  ;;  %v1702_v40 = vmul.f32 %v6994_v59, %v7096_v44  ;;  %v1504_v58 = vmul.f32 %v6952_v39, %v7034_v34 }
 0x10d   : > { %2303 = vperm.xlu0 %5887, %v6586_v56   ;;  %v7138_v60 = vadd.f32 %v1797_v47, %v1731_v0  ;;  %v7142_v26 = vpop.permute.xlu1 %666  ;;  %2761 = vst.msk [vmem:[#allocation2 + $0x100] sm:$0x3] %vm911_vm2, %v11519_v41  ;;  %v1242_v27 = vadd.f32 %v1210_v61, %v1144_v35  ;;  %v1406_v47 = vmul.f32 %v6935_v54, %v7032_v13 }
 0x10e   : > { %v7114_v21 = vpop.permute.xlu0 %2121  ;;  %11546 = vst [vmem:[#allocation58_spill] sm:$0xff] %v7142_v26  ;;  %v7152_v0 = vpop.permute.xlu2 %740  ;;  %v1730_v52 = vadd.f32 %v1698_v63, %v1632_v15  ;;  %v1050_v36 = vmul.f32 %v6882_v20, %v7066_v12  ;;  %v1537_v61 = vadd.f32 %v1505_v53, %v1439_v24  ;;  %v1116_v13 = vmul.f32 %v6888_v31, %v7068_v37  ;;  %v7167_v26 = vld [vmem:[#allocation2 + $0x108] sm:$0xff] }
 0x10f   : > { %11544 = vst [vmem:[#allocation56_spill] sm:$0xff] %v7114_v21  ;;  %v7144_v21 = vld [vmem:[#allocation2 + $0xf8] sm:$0xff]  ;;  %1912 = vperm.xlu2 %5884, %v7138_v60   ;;  %v1340_v17 = vadd.f32 %v1308_v7, %v1242_v27  ;;  %v1214_v35 = vmul.f32 %v6900_v19, %v7070_v18  ;;  %v7169_v63 = vld [vmem:[#allocation2 + $0x109] sm:$0xff]  ;;  %v1800_v34 = vmul.f32 %v7018_v3, %v7098_v33 }
 0x110   : > { %11545 = vst [vmem:[#allocation57_spill] sm:$0xff] %v7138_v60  ;;  %v7171_v15 = vld [vmem:[#allocation2 + $0x10a] sm:$0xff]  ;;  %v1603_v53 = vmul.f32 %v6971_v9, %v7066_v12  ;;  %v1636_v7 = vadd.f32 %v1604_v55, %v1537_v61  ;;  %v1148_v27 = vadd.f32 %v1116_v13, %v1050_v36  ;;  %v1312_v56 = vmul.f32 %v6913_v32, %v7120_v4  ;;  %v7195_v55 = vld [vmem:[#allocation2 + $0x112] sm:$0xff]  ;;  %v7199_v13 = vld [vmem:[#allocation2 + $0x120] sm:$0xff] }
 0x111   : > { %11547 = vst [vmem:[#allocation59_spill] sm:$0xff] %v7152_v0  ;;  %v7173_v0 = vadd.f32 %v1796_v16, %v1730_v52  ;;  %v1438_v24 = vadd.f32 %v1406_v47, %v1340_v17  ;;  %v1701_v16 = vmul.f32 %v6994_v59, %v7068_v37  ;;  %v1049_v12 = vmul.f32 %v6882_v20, %v7079_v14  ;;  %v7203_v37 = vld [vmem:[#allocation2 + $0x122] sm:$0xff]  ;;  %v7369_v60 = vld [vmem:[#allocation2 + $0x171] sm:$0xff] }
 0x112   : > { %2760 = vst.msk [vmem:[#allocation2 + $0xf8] sm:$0xff] %vm908_vm0, %v11519_v41  ;;  %v1115_v52 = vmul.f32 %v6888_v31, %v7051_v10  ;;  %v1734_v47 = vadd.f32 %v1702_v40, %v1636_v7  ;;  %v1246_v61 = vadd.f32 %v1214_v35, %v1148_v27  ;;  %v1410_v17 = vmul.f32 %v6935_v54, %v7122_v6  ;;  %v7215_v7 = vld [vmem:[#allocation2 + $0x110] sm:$0xff] }
 0x113   : > { %11548 = vst [vmem:[#allocation60_spill] sm:$0xff] %v7173_v0  ;;  %1907 = vperm.xlu1 %5883, %v7173_v0   ;;  %v1536_v36 = vadd.f32 %v1504_v58, %v1438_v24  ;;  %v1799_v14 = vmul.f32 %v7018_v3, %v7070_v18  ;;  %v1213_v58 = vmul.f32 %v6900_v19, %v7053_v5 }
 0x114   : > { %2762 = vst.msk [vmem:[#allocation2 + $0x108] sm:$0xff] %vm908_vm0, %v11519_v41  ;;  %v1147_v40 = vadd.f32 %v1115_v52, %v1049_v12  ;;  %v1311_v35 = vmul.f32 %v6913_v32, %v7108_v57  ;;  %v7219_v24 = vadd.f32 %v1800_v34, %v1734_v47  ;;  %v1344_v0 = vadd.f32 %v1312_v56, %v1246_v61  ;;  %v7236_v47 = vld [vmem:[#allocation2 + $0x12a] sm:$0xff] }
 0x115   : > { %2315 = vperm.xlu0 %5887, %v6608_v28   ;;  %v7193_v28 = vld [vmem:[#allocation2 + $0x111] sm:$0xff]  ;;  %v7209_v10 = vpop.permute.xlu1 %678  ;;  %v1635_v27 = vadd.f32 %v1603_v53, %v1536_v36  ;;  %v1508_v18 = vmul.f32 %v6952_v39, %v7124_v30  ;;  %v1409_v57 = vmul.f32 %v6935_v54, %v7096_v44  ;;  %v1607_v34 = vmul.f32 %v6971_v9, %v7167_v26  ;;  %v7234_v53 = vld [vmem:[#allocation2 + $0x129] sm:$0xff] }
 0x116   : > { %v7184_v11 = vpop.permute.xlu0 %2133  ;;  %2764 = vst.msk [vmem:[#allocation2 + $0x118] sm:$0x3] %vm911_vm2, %v11519_v41  ;;  %v1245_v5 = vadd.f32 %v1213_v58, %v1147_v40  ;;  %v1442_v52 = vadd.f32 %v1410_v17, %v1344_v0  ;;  %v1507_v56 = vmul.f32 %v6952_v39, %v7098_v33  ;;  %v1053_v61 = vmul.f32 %v6882_v20, %v7144_v21  ;;  %v7251_v40 = vld [vmem:[#allocation2 + $0x128] sm:$0xff] }
 0x117   : > { %11549 = vst [vmem:[#allocation61_spill] sm:$0xff] %v7184_v11  ;;  %v7201_v11 = vld [vmem:[#allocation2 + $0x121] sm:$0xff]  ;;  %1927 = vperm.xlu2 %5884, %v7219_v24   ;;  %v1733_v12 = vadd.f32 %v1701_v16, %v1635_v27  ;;  %v1119_v44 = vmul.f32 %v6888_v31, %v7132_v29  ;;  %v1217_v0 = vmul.f32 %v6900_v19, %v7134_v25 }
 0x118   : > { %11550 = vst [vmem:[#allocation62_spill] sm:$0xff] %v7209_v10  ;;  %v7223_v10 = vpop.permute.xlu2 %752  ;;  %v1343_v36 = vadd.f32 %v1311_v35, %v1245_v5  ;;  %v1540_v16 = vadd.f32 %v1508_v18, %v1442_v52  ;;  %v1705_v17 = vmul.f32 %v6994_v59, %v7169_v63  ;;  %v1606_v27 = vmul.f32 %v6971_v9, %v7144_v21  ;;  %v7266_v52 = vld [vmem:[#allocation2 + $0x142] sm:$0xff] }
 0x119   : > { %2765 = vst.msk [vmem:[#allocation2 + $0x120] sm:$0xff] %vm908_vm0, %v11519_v41  ;;  %v7247_v33 = vadd.f32 %v1799_v14, %v1733_v12  ;;  %v1151_v5 = vadd.f32 %v1119_v44, %v1053_v61  ;;  %v1803_v18 = vmul.f32 %v7018_v3, %v7171_v15  ;;  %v7264_v12 = vld [vmem:[#allocation2 + $0x141] sm:$0xff]  ;;  %v1704_v21 = vmul.f32 %v6994_v59, %v7132_v29 }
 0x11a   : > { %11551 = vst [vmem:[#allocation63_spill] sm:$0xff] %v7219_v24  ;;  %v1441_v35 = vadd.f32 %v1409_v57, %v1343_v36  ;;  %v1639_v14 = vadd.f32 %v1607_v34, %v1540_v16  ;;  %v1413_v44 = vmul.f32 %v6935_v54, %v7193_v28  ;;  %v7276_v34 = vld [vmem:[#allocation2 + $0x139] sm:$0xff]  ;;  %v1511_v29 = vmul.f32 %v6952_v39, %v7195_v55  ;;  %v7306_v24 = vld [vmem:[#allocation2 + $0x151] sm:$0xff] }
 0x11b   : > { %11552 = vst [vmem:[#allocation64_spill] sm:$0xff] %v7223_v10  ;;  %v1315_v10 = vmul.f32 %v6913_v32, %v7215_v7  ;;  %1922 = vperm.xlu1 %5883, %v7247_v33   ;;  %v1249_v61 = vadd.f32 %v1217_v0, %v1151_v5  ;;  %v7278_v16 = vld [vmem:[#allocation2 + $0x13a] sm:$0xff]  ;;  %v1052_v0 = vmul.f32 %v6882_v20, %v7120_v4 }
 0x11c   : > { %2763 = vst.msk [vmem:[#allocation2 + $0x110] sm:$0xff] %vm908_vm0, %v11519_v41  ;;  %v1539_v57 = vadd.f32 %v1507_v56, %v1441_v35  ;;  %v1802_v56 = vmul.f32 %v7018_v3, %v7134_v25  ;;  %v7290_v5 = vld [vmem:[#allocation2 + $0x140] sm:$0xff]  ;;  %v1216_v25 = vmul.f32 %v6900_v19, %v7124_v30  ;;  %v1610_v4 = vmul.f32 %v6971_v9, %v7251_v40 }
 0x11d   : > { %2767 = vst.msk [vmem:[#allocation2 + $0x130] sm:$0x3] %vm911_vm2, %v11519_v41  ;;  %2327 = vperm.xlu0 %5887, %v6623_v48   ;;  %v7270_v36 = vpop.permute.xlu1 %690  ;;  %v1737_v48 = vadd.f32 %v1705_v17, %v1639_v14  ;;  %v1118_v17 = vmul.f32 %v6888_v31, %v7122_v6  ;;  %v1314_v30 = vmul.f32 %v6913_v32, %v7167_v26 }
 0x11e   : > { %11553 = vst [vmem:[#allocation65_spill] sm:$0xff] %v7247_v33  ;;  %v7253_v58 = vpop.permute.xlu0 %2145  ;;  %v1347_v33 = vadd.f32 %v1315_v10, %v1249_v61  ;;  %v7320_v61 = vld [vmem:[#allocation2 + $0x159] sm:$0xff] }
 0x11f   : > { %11554 = vst [vmem:[#allocation66_spill] sm:$0xff] %v7253_v58  ;;  %v7274_v58 = vld [vmem:[#allocation2 + $0x138] sm:$0xff]  ;;  %v7300_v14 = vadd.f32 %v1803_v18, %v1737_v48  ;;  %v1150_v6 = vadd.f32 %v1118_v17, %v1052_v0  ;;  %v1708_v48 = vmul.f32 %v6994_v59, %v7234_v53  ;;  %v1412_v18 = vmul.f32 %v6935_v54, %v7169_v63 }
 0x120   : > { %2766 = vst.msk [vmem:[#allocation2 + $0x128] sm:$0xff] %vm908_vm0, %v11519_v41  ;;  %v7288_v35 = vpop.permute.xlu2 %760  ;;  %v1056_v0 = vmul.f32 %v6882_v20, %v7199_v13  ;;  %v7330_v17 = vld [vmem:[#allocation2 + $0x158] sm:$0xff]  ;;  %v1122_v63 = vmul.f32 %v6888_v31, %v7201_v11 }
 0x121   : > { %11555 = vst [vmem:[#allocation67_spill] sm:$0xff] %v7270_v36  ;;  %v1638_v36 = vadd.f32 %v1606_v27, %v1539_v57  ;;  %v7308_v27 = vld [vmem:[#allocation2 + $0x152] sm:$0xff]  ;;  %v1445_v57 = vadd.f32 %v1413_v44, %v1347_v33  ;;  %1942 = vperm.xlu2 %5884, %v7300_v14   ;;  %v7322_v33 = vld [vmem:[#allocation2 + $0x15a] sm:$0xff]  ;;  %v1248_v44 = vadd.f32 %v1216_v25, %v1150_v6  ;;  %v7347_v6 = vld [vmem:[#allocation2 + $0x168] sm:$0xff] }
 0x122   : > { %2770 = vst.msk [vmem:[#allocation2 + $0x148] sm:$0x3] %vm911_vm2, %v11519_v41  ;;  %v1154_v46 = vadd.f32 %v1122_v63, %v1056_v0  ;;  %v1416_v0 = vmul.f32 %v6935_v54, %v7276_v34  ;;  %v1121_v63 = vmul.f32 %v6888_v31, %v7193_v28  ;;  %v1514_v28 = vmul.f32 %v6952_v39, %v7278_v16 }
 0x123   : > { %11556 = vst [vmem:[#allocation68_spill] sm:$0xff] %v7288_v35  ;;  %v7304_v35 = vld [vmem:[#allocation2 + $0x150] sm:$0xff]  ;;  %v1736_v10 = vadd.f32 %v1704_v21, %v1638_v36  ;;  %v1543_v36 = vadd.f32 %v1511_v29, %v1445_v57  ;;  %v1806_v29 = vmul.f32 %v7018_v3, %v7236_v47  ;;  %v1346_v25 = vadd.f32 %v1314_v30, %v1248_v44 }
 0x124   : > { %2768 = vst.msk [vmem:[#allocation2 + $0x138] sm:$0xff] %vm908_vm0, %v11519_v41  ;;  %v1055_v44 = vmul.f32 %v6882_v20, %v7215_v7  ;;  %v1707_v7 = vmul.f32 %v6994_v59, %v7201_v11  ;;  %v1805_v11 = vmul.f32 %v7018_v3, %v7203_v37 }
 0x125   : > { %2769 = vst.msk [vmem:[#allocation2 + $0x140] sm:$0xff] %vm908_vm0, %v11519_v41  ;;  %2339 = vperm.xlu0 %5887, %v6639_v45   ;;  %v7326_v26 = vadd.f32 %v1802_v56, %v1736_v10  ;;  %v1220_v45 = vmul.f32 %v6900_v19, %v7203_v37  ;;  %v1642_v56 = vadd.f32 %v1610_v4, %v1543_v36  ;;  %v7345_v57 = vpop.permute.xlu1 %702 }
 0x126   : > { %11557 = vst [vmem:[#allocation69_spill] sm:$0xff] %v7300_v14  ;;  %v7324_v21 = vpop.permute.xlu0 %2157  ;;  %v1510_v10 = vmul.f32 %v6952_v39, %v7171_v15  ;;  %v7351_v14 = vld [vmem:[#allocation2 + $0x16a] sm:$0xff]  ;;  %v1444_v36 = vadd.f32 %v1412_v18, %v1346_v25  ;;  %v1609_v15 = vmul.f32 %v6971_v9, %v7199_v13  ;;  %v1613_v25 = vmul.f32 %v6971_v9, %v7304_v35 }
 0x127   : > { %2771 = vst.msk [vmem:[#allocation2 + $0x150] sm:$0xff] %vm908_vm0, %v11519_v41  ;;  %1937 = vperm.xlu1 %5883, %v7326_v26   ;;  %v1740_v30 = vadd.f32 %v1708_v48, %v1642_v56  ;;  %v7371_v48 = vld [vmem:[#allocation2 + $0x172] sm:$0xff]  ;;  %v1125_v37 = vmul.f32 %v6888_v31, %v7264_v12 }
 0x128   : > { %11558 = vst [vmem:[#allocation70_spill] sm:$0xff] %v7324_v21  ;;  %v7349_v21 = vld [vmem:[#allocation2 + $0x169] sm:$0xff]  ;;  %v7355_v4 = vpop.permute.xlu2 %772  ;;  %v1542_v13 = vadd.f32 %v1510_v10, %v1444_v36  ;;  %v7393_v10 = vld [vmem:[#allocation2 + $0x180] sm:$0xff] }
 0x129   : > { %11559 = vst [vmem:[#allocation71_spill] sm:$0xff] %v7326_v26  ;;  %v1318_v26 = vmul.f32 %v6913_v32, %v7274_v58  ;;  %v7373_v18 = vadd.f32 %v1806_v29, %v1740_v30  ;;  %v7397_v30 = vld [vmem:[#allocation2 + $0x182] sm:$0xff] }
 0x12a   : > { %2773 = vst.msk [vmem:[#allocation2 + $0x160] sm:$0x3] %vm911_vm2, %v11519_v41  ;;  %v1641_v29 = vadd.f32 %v1609_v15, %v1542_v13  ;;  %v1415_v15 = vmul.f32 %v6935_v54, %v7234_v53  ;;  %v1711_v13 = vmul.f32 %v6994_v59, %v7306_v24 }
 0x12b   : > { %2772 = vst.msk [vmem:[#allocation2 + $0x158] sm:$0xff] %vm908_vm0, %v11519_v41  ;;  %1957 = vperm.xlu2 %5884, %v7373_v18  }
 0x12c   : > { %11560 = vst [vmem:[#allocation72_spill] sm:$0xff] %v7345_v57  ;;  %v1252_v57 = vadd.f32 %v1220_v45, %v1154_v46  ;;  %v1153_v45 = vadd.f32 %v1121_v63, %v1055_v44  ;;  %v7403_v44 = vld [vmem:[#allocation2 + $0x170] sm:$0xff]  ;;  %v1739_v63 = vadd.f32 %v1707_v7, %v1641_v29 }
 0x12d   : > { %11561 = vst [vmem:[#allocation73_spill] sm:$0xff] %v7355_v4  ;;  %v1219_v4 = vmul.f32 %v6900_v19, %v7195_v55  ;;  %2351 = vperm.xlu0 %5887, %v6651_v1   ;;  %v1317_v55 = vmul.f32 %v6913_v32, %v7251_v40  ;;  %v7419_v7 = vpop.permute.xlu1 %748 }
 0x12e   : > { %2774 = vst.msk [vmem:[#allocation2 + $0x168] sm:$0xff] %vm908_vm0, %v11519_v41  ;;  %v1350_v46 = vadd.f32 %v1318_v26, %v1252_v57  ;;  %v7384_v56 = vpop.permute.xlu0 %2169  ;;  %v1059_v26 = vmul.f32 %v6882_v20, %v7290_v5  ;;  %v7395_v57 = vld [vmem:[#allocation2 + $0x181] sm:$0xff]  ;;  %v7421_v29 = vadd.f32 %v1805_v11, %v1739_v63  ;;  %v1710_v11 = vmul.f32 %v6994_v59, %v7264_v12 }
 0x12f   : > { %11562 = vst [vmem:[#allocation74_spill] sm:$0xff] %v7373_v18  ;;  %v1251_v36 = vadd.f32 %v1219_v4, %v1153_v45  ;;  %v1223_v4 = vmul.f32 %v6900_v19, %v7266_v52  ;;  %v1321_v45 = vmul.f32 %v6913_v32, %v7330_v17  ;;  %v1612_v18 = vmul.f32 %v6971_v9, %v7290_v5 }
 0x130   : > { %2776 = vst.msk [vmem:[#allocation2 + $0x178] sm:$0x3] %vm911_vm2, %v11519_v41  ;;  %v1448_v40 = vadd.f32 %v1416_v0, %v1350_v46  ;;  %v1157_v46 = vadd.f32 %v1125_v37, %v1059_v26  ;;  %v7417_v1 = vpop.permute.xlu2 %784  ;;  %1952 = vperm.xlu1 %5883, %v7421_v29   ;;  %v1124_v37 = vmul.f32 %v6888_v31, %v7276_v34 }
 0x131   : > { %11563 = vst [vmem:[#allocation75_spill] sm:$0xff] %v7384_v56  ;;  %v1513_v56 = vmul.f32 %v6952_v39, %v7236_v47  ;;  %v1349_v0 = vadd.f32 %v1317_v55, %v1251_v36  ;;  %v1809_v47 = vmul.f32 %v7018_v3, %v7308_v27  ;;  %v1058_v36 = vmul.f32 %v6882_v20, %v7274_v58  ;;  %v7441_v58 = vld [vmem:[#allocation2 + $0x198] sm:$0xff] }
 0x132   : > { %2777 = vst.msk [vmem:[#allocation2 + $0x180] sm:$0xff] %vm908_vm0, %v11519_v41  ;;  %v1546_v53 = vadd.f32 %v1514_v28, %v1448_v40  ;;  %v1419_v28 = vmul.f32 %v6935_v54, %v7320_v61  ;;  %v1255_v40 = vadd.f32 %v1223_v4, %v1157_v46  ;;  %v1222_v5 = vmul.f32 %v6900_v19, %v7278_v16 }
 0x133   : > { %2775 = vst.msk [vmem:[#allocation2 + $0x170] sm:$0xff] %vm908_vm0, %v11519_v41  ;;  %v1447_v26 = vadd.f32 %v1415_v15, %v1349_v0  ;;  %v1517_v4 = vmul.f32 %v6952_v39, %v7322_v33  ;;  %v7445_v0 = vld [vmem:[#allocation2 + $0x19a] sm:$0xff]  ;;  %v1808_v12 = vmul.f32 %v7018_v3, %v7266_v52  ;;  %v1156_v34 = vadd.f32 %v1124_v37, %v1058_v36  ;;  %v7461_v52 = vld [vmem:[#allocation2 + $0x189] sm:$0xff] }
 0x134   : > { %11564 = vst [vmem:[#allocation76_spill] sm:$0xff] %v7417_v1  ;;  %v1645_v55 = vadd.f32 %v1613_v25, %v1546_v53  ;;  %v1353_v15 = vadd.f32 %v1321_v45, %v1255_v40  ;;  %v7443_v53 = vld [vmem:[#allocation2 + $0x199] sm:$0xff]  ;;  %v1320_v16 = vmul.f32 %v6913_v32, %v7304_v35  ;;  %v1714_v35 = vmul.f32 %v6994_v59, %v7369_v60 }
 0x135   : > { %11565 = vst [vmem:[#allocation77_spill] sm:$0xff] %v7419_v7  ;;  %2363 = vperm.xlu0 %5887, %v6665_v22   ;;  %v1545_v25 = vadd.f32 %v1513_v56, %v1447_v26  ;;  %v7463_v26 = vld [vmem:[#allocation2 + $0x18a] sm:$0xff]  ;;  %v1254_v40 = vadd.f32 %v1222_v5, %v1156_v34  ;;  %v1128_v37 = vmul.f32 %v6888_v31, %v7349_v21 }
 0x136   : > { %v1743_v63 = vadd.f32 %v1711_v13, %v1645_v55  ;;  %2780 = vst.msk [vmem:[#allocation2 + $0x198] sm:$0xff] %vm908_vm0, %v11519_v41  ;;  %v1451_v45 = vadd.f32 %v1419_v28, %v1353_v15  ;;  %v1616_v55 = vmul.f32 %v6971_v9, %v7403_v44  ;;  %v1584_v5 = vld [vmem:[#allocation2 + $0x188] sm:$0xff]  ;;  %v1516_v34 = vmul.f32 %v6952_v39, %v7308_v27 }
 0x137   : > { %v7453_v56 = vpop.permute.xlu0 %642  ;;  %v1644_v46 = vadd.f32 %v1612_v18, %v1545_v25  ;;  %2781 = vst.msk [vmem:[#allocation2 + $0x1a0] sm:$0xff] %vm908_vm0, %v11519_v41  ;;  %v1062_v18 = vmul.f32 %v6882_v20, %v7347_v6  ;;  %v7478_v25 = vpop.permute.xlu1 %756  ;;  %v1352_v15 = vadd.f32 %v1320_v16, %v1254_v40  ;;  %v1324_v1 = vmul.f32 %v6913_v32, %v7393_v10 }
 0x138   : > { %11566 = vst [vmem:[#allocation78_spill] sm:$0xff] %v7453_v56  ;;  %v7455_v13 = vadd.f32 %v1809_v47, %v1743_v63  ;;  %v1418_v47 = vmul.f32 %v6935_v54, %v7306_v24  ;;  %v1549_v36 = vadd.f32 %v1517_v4, %v1451_v45  ;;  %v1226_v63 = vmul.f32 %v6900_v19, %v7351_v14 }
 0x139   : > { %2779 = vst.msk [vmem:[#allocation2 + $0x190] sm:$0x3] %vm911_vm2, %v11519_v41  ;;  %v1742_v28 = vadd.f32 %v1710_v11, %v1644_v46  ;;  %v1812_v24 = vmul.f32 %v7018_v3, %v7371_v48  ;;  %v7486_v11 = vpop.permute.xlu2 %796  ;;  %v1160_v45 = vadd.f32 %v1128_v37, %v1062_v18  ;;  %v1615_v7 = vmul.f32 %v6971_v9, %v7347_v6 }
 0x13a   : > { %1972 = vperm.xlu2 %5884, %v7455_v13   ;;  %11567 = vst [vmem:[#allocation79_spill] sm:$0xff] %v7478_v25  ;;  %v1648_v46 = vadd.f32 %v1616_v55, %v1549_v36  ;;  %v1450_v25 = vadd.f32 %v1418_v47, %v1352_v15  ;;  %v11569_v16 = vmov 3   ;;  %v1713_v10 = vmul.f32 %v6994_v59, %v7349_v21 }
 0x13b   : > { %2778 = vst.msk [vmem:[#allocation2 + $0x188] sm:$0xff] %vm908_vm0, %v11519_v41  ;;  %v7488_v4 = vadd.f32 %v1808_v12, %v1742_v28  ;;  %v1258_v40 = vadd.f32 %v1226_v63, %v1160_v45  ;;  %v1422_v41 = vmul.f32 %v6935_v54, %v7395_v57  ;;  %v7499_v12 = vld [vmem:[%s6200_s19 + $0x8] sm:$0xff]  ;;  %v1127_v57 = vmul.f32 %v6888_v31, %v7320_v61 }
 0x13c   : > { %11568 = vst [vmem:[#allocation80_spill] sm:$0xff] %v7486_v11  ;;  %v1746_v27 = vadd.f32 %v1714_v35, %v1648_v46  ;;  %v1548_v55 = vadd.f32 %v1516_v34, %v1450_v25  ;;  %v1061_v35 = vmul.f32 %v6882_v20, %v7330_v17  ;;  %v1520_v21 = vmul.f32 %v6952_v39, %v7397_v30 }
 0x13d   : > { %5890 = vset.pattern.permute.xlu0 %v11569_v16  ;;  %1967 = vperm.xlu1 %5883, %v7488_v4   ;;  %v7504_v47 = vld [vmem:[#allocation2 + $0x198] sm:$0xff]  ;;  %v1356_v37 = vadd.f32 %v1324_v1, %v1258_v40  ;;  %v11576_v15 = vmov -inf   ;;  %v1225_v20 = vmul.f32 %v6900_v19, %v7322_v33  ;;  %v1811_v31 = vmul.f32 %v7018_v3, %v7351_v14 }
 0x13e   : > { %744 = vperm.xlu0 %5890, %v7499_v12   ;;  %11570 = vst [vmem:[#allocation81_spill] sm:$0xff] %v7504_v47  ;;  %v7506_v6 = vld [vmem:[#allocation2 + $0x199] sm:$0xff]  ;;  %v7516_v36 = vadd.f32 %v1812_v24, %v1746_v27  ;;  %v7520_v63 = vld [vmem:[#allocation2 + $0x1a1] sm:$0xff]  ;;  %v1647_v17 = vadd.f32 %v1615_v7, %v1548_v55  ;;  %v1159_v1 = vadd.f32 %v1127_v57, %v1061_v35 }
 0x13f   : > { %11571 = vst [vmem:[#allocation82_spill] sm:$0xff] %v7506_v6  ;;  %v7508_v18 = vld [vmem:[#allocation2 + $0x19a] sm:$0xff]  ;;  %v7514_v28 = vpop.permute.xlu0 %662  ;;  %v7522_v25 = vld [vmem:[#allocation2 + $0x1a2] sm:$0xff]  ;;  %v1323_v61 = vmul.f32 %v6913_v32, %v7403_v44  ;;  %v1454_v30 = vadd.f32 %v1422_v41, %v1356_v37  ;;  %v1619_v24 = vmul.f32 %v6971_v9, %v7441_v58  ;;  %v1421_v33 = vmul.f32 %v6935_v54, %v7369_v60  ;;  %v7539_v14 = vpop.permute.xlu1 %768 }
 0x140   : > { %11572 = vst [vmem:[#allocation83_spill] sm:$0xff] %v7508_v18  ;;  %v1745_v34 = vadd.f32 %v1713_v10, %v1647_v17  ;;  %v1257_v19 = vadd.f32 %v1225_v20, %v1159_v1  ;;  %v1717_v46 = vmul.f32 %v6994_v59, %v7443_v53  ;;  %v1519_v44 = vmul.f32 %v6952_v39, %v7371_v48  ;;  %v7552_v54 = vld [vmem:[%s6200_s19 + $0x60] sm:$0xff] }
 0x141   : > { %11573 = vst [vmem:[#allocation84_spill] sm:$0xff] %v7514_v28  ;;  %v1552_v7 = vadd.f32 %v1520_v21, %v1454_v30  ;;  %v7547_v27 = vpop.permute.xlu2 %1857  ;;  %v1815_v40 = vmul.f32 %v7018_v3, %v7445_v0  ;;  %v1618_v53 = vmul.f32 %v6971_v9, %v1584_v5  ;;  %v1716_v48 = vmul.f32 %v6994_v59, %v7461_v52  ;;  %v7569_v9 = vld [vmem:[%s6200_s19 + $0x88] sm:$0xff]  ;;  %v11604_v6 = vld [vmem:[#allocation16_spill] sm:$0xff] }
 0x142   : > { %11574 = vst [vmem:[#allocation85_spill] sm:$0xff] %v7520_v63  ;;  %1987 = vperm.xlu2 %5884, %v7516_v36   ;;  %v7543_v45 = vadd.f32 %v1811_v31, %v1745_v34  ;;  %v1355_v32 = vadd.f32 %v1323_v61, %v1257_v19  ;;  %v1814_v35 = vmul.f32 %v7018_v3, %v7463_v26  ;;  %v11581_v52 = vmov 1   ;;  %v7582_v3 = vld [vmem:[%s6200_s19 + $0xc0] sm:$0xff]  ;;  %v7595_v31 = vld [vmem:[%s6200_s19 + $0xe8] sm:$0xff] }
 0x143   : > { %11575 = vst [vmem:[#allocation86_spill] sm:$0xff] %v7522_v25  ;;  %v1651_v58 = vadd.f32 %v1619_v24, %v1552_v7  ;;  %v11584_v7 = vld [vmem:[#allocation57_spill] sm:$0xff] }
 0x144   : > { %5340 = vst.msk [vmem:[#allocation2 + $0x198] sm:$0xff] %vm908_vm0, %v11576_v15  ;;  %v1453_v60 = vadd.f32 %v1421_v33, %v1355_v32 }
 0x145   : > { %5342 = vst.msk [vmem:[#allocation2 + $0x1a8] sm:$0x3] %vm911_vm2, %v11576_v15  ;;  %1982 = vperm.xlu1 %5883, %v7543_v45   ;;  %v1749_v55 = vadd.f32 %v1717_v46, %v1651_v58 }
 0x146   : > { %11577 = vst [vmem:[#allocation87_spill] sm:$0xff] %v7539_v14  ;;  %764 = vperm.xlu0 %5890, %v7552_v54   ;;  %v1551_v39 = vadd.f32 %v1519_v44, %v1453_v60  ;;  %v11585_v44 = vld [vmem:[#allocation6_spill] sm:$0xff]  ;;  %v11587_v60 = vld [vmem:[#allocation63_spill] sm:$0xff] }
 0x147   : > { %v7557_v41 = vpop.permute.xlu0 %674  ;;  %v7561_v10 = vadd.f32 %v1815_v40, %v1749_v55  ;;  %v7566_v37 = vpop.permute.xlu1 %780  ;;  %v11586_v40 = vld [vmem:[#allocation60_spill] sm:$0xff] }
 0x148   : > { %11578 = vst [vmem:[#allocation88_spill] sm:$0xff] %v7557_v41  ;;  %v1650_v0 = vadd.f32 %v1618_v53, %v1551_v39  ;;  %v11588_v53 = vld [vmem:[#allocation7_spill] sm:$0xff] }
 0x149   : > { %11579 = vst [vmem:[#allocation89_spill] sm:$0xff] %v7566_v37  ;;  %v7574_v21 = vpop.permute.xlu2 %1872  ;;  %v11596_v41 = vld [vmem:[#allocation11_spill] sm:$0xff] }
 0x14a   : > { %2002 = vperm.xlu2 %5884, %v7561_v10   ;;  %v1748_v57 = vadd.f32 %v1716_v48, %v1650_v0  ;;  %v11589_v0 = vld [vmem:[#allocation65_spill] sm:$0xff] }
 0x14c   : > { %v7572_v5 = vadd.f32 %v1814_v35, %v1748_v57  ;;  %v11590_v35 = vld [vmem:[#allocation69_spill] sm:$0xff] }
 0x14d   : > { %v11591_v57 = vld [vmem:[#allocation9_spill] sm:$0xff] }
 0x14e   : > { %776 = vperm.xlu0 %5890, %v7569_v9   ;;  %1997 = vperm.xlu1 %5883, %v7572_v5  }
 0x14f   : > { %v7576_v59 = vpop.permute.xlu0 %686  ;;  %v7585_v26 = vpop.permute.xlu1 %792 }
 0x150   : > { %11580 = vst [vmem:[#allocation90_spill] sm:$0xff] %v7576_v59  ;;  %v11595_v59 = vld [vmem:[#allocation74_spill] sm:$0xff] }
 0x151   : > { %11582 = vst [vmem:[#allocation91_spill] sm:$0xff] %v7585_v26 }
 0x152   : > { %5886 = vset.pattern.permute.xlu2 %v11581_v52 }
 0x153   : > { %2049 = vperm.xlu2 %5886, %v6770_v2   ;;  %v7590_v17 = vpop.permute.xlu2 %1882 }
 0x156   : > { %788 = vperm.xlu0 %5890, %v7582_v3   ;;  %5885 = vset.pattern.permute.xlu1 %v11581_v52  ;;  %v11600_v52 = vld [vmem:[#allocation13_spill] sm:$0xff] }
 0x157   : > { %v7587_v20 = vpop.permute.xlu0 %698  ;;  %2045 = vperm.xlu1 %5885, %v6781_v42  }
 0x158   : > { %11583 = vst [vmem:[#allocation92_spill] sm:$0xff] %v7587_v20  ;;  %v11593_v20 = vld [vmem:[#allocation71_spill] sm:$0xff] }
 0x159   : > { %v7600_v61 = vpop.permute.xlu1 %1852 }
 0x15b   : > { %2061 = vperm.xlu2 %5886, %v6849_v43  }
 0x15e   : > { %800 = vperm.xlu0 %5890, %v7595_v31  }
 0x15f   : > { %v7598_v1 = vpop.permute.xlu0 %2247  ;;  %2057 = vperm.xlu1 %5885, %v6869_v8   ;;  %v7603_v30 = vpop.permute.xlu2 %1897 }
 0x163   : > { %2069 = vperm.xlu2 %5886, %v6947_v50  }
 0x166   : > { %2441 = vperm.xlu0 %5890, %v6515_v23   ;;  %v7610_v34 = vpop.permute.xlu1 %1867 }
 0x167   : > { %v7607_v24 = vpop.permute.xlu0 %2267  ;;  %2065 = vperm.xlu1 %5885, %v6989_v38  }
 0x169   : > { %v7613_v19 = vpop.permute.xlu2 %1912 }
 0x16b   : > { %2081 = vperm.xlu2 %5886, %v7045_v49  }
 0x16e   : > { %2461 = vperm.xlu0 %5890, %v6532_v62  }
 0x16f   : > { %v7616_v33 = vpop.permute.xlu0 %2279  ;;  %2077 = vperm.xlu1 %5885, %v7072_v51  }
 0x170   : > { %v7620_v46 = vpop.permute.xlu1 %1877 }
 0x171   : > { %v7622_v32 = vpop.permute.xlu2 %1927 }
 0x173   : > { %2093 = vperm.xlu2 %5886, %v11584_v7  }
 0x176   : > { %2473 = vperm.xlu0 %5890, %v11585_v44  }
 0x177   : > { %v7625_v58 = vpop.permute.xlu0 %2291  ;;  %2089 = vperm.xlu1 %5885, %v11586_v40  }
 0x178   : > { %v7630_v55 = vpop.permute.xlu1 %1892 }
 0x17b   : > { %2105 = vperm.xlu2 %5886, %v11587_v60   ;;  %v7634_v48 = vpop.permute.xlu2 %1942 }
 0x17e   : > { %2485 = vperm.xlu0 %5890, %v11588_v53  }
 0x17f   : > { %v7632_v39 = vpop.permute.xlu0 %2303  ;;  %2101 = vperm.xlu1 %5885, %v11589_v0  }
 0x183   : > { %2117 = vperm.xlu2 %5886, %v11590_v35  }
 0x185   : > { %v7641_v26 = vpop.permute.xlu1 %1907  ;;  %v7644_v37 = vpop.permute.xlu2 %1957 }
 0x186   : > { %2497 = vperm.xlu0 %5890, %v11591_v57   ;;  %11592 = vst [vmem:[#allocation57_spill] sm:$0xff] %v7641_v26  ;;  %v5974_v26 = vld [vmem:[%s6200_s19] sm:$0xff]  ;;  %s10932_s19 = scalar_lea.vmem [#allocation3], %s10915_s29  ;;  %s6009_s29 = sshra.s32 %s5747_s26, 4  ;;  %s6010_s29 = int_to_ptr.hbm [resolvable:$true] %s6009_s29 }
 0x187   : > { %v7639_v11 = vpop.permute.xlu0 %2315  ;;  %2113 = vperm.xlu1 %5885, %v11593_v20   ;;  %11594 = vst [vmem:[#allocation6_spill] sm:$0xff] %v7644_v37  ;;  %s5744_s25 = sshll.u32 %s10932_s19, 4  ;;  %s6011_s15 = scalar_lea.hbm %s6010_s29, 64  ;;  %s5745_s25 = int_to_ptr.vmem [resolvable:$true] %s5744_s25 }
 0x188   : > { %p6012_p11 = scmp.ne.s32.totalorder %s6010_s29, %s6011_s15  ;;  %p6016_p0 = scmp.lt.s32.totalorder %s6010_s29, %s11372_s12 }
 0x189   : > { %p6017_p1 = scmp.lt.s32.totalorder %s6015_s18, %s6011_s15 }
 0x18a   : > { %p6013_p12 = pnand %p6012_p11, %p6174_p5 }
 0x18b   : > { %2129 = vperm.xlu2 %5886, %v11595_v59   ;;  %p6018_p2 = por %p6017_p1, %p6016_p0 }
 0x18c   : > { %p6014_p13 = pneg %p6013_p12 }
 0x18d   : > { %v7651_v28 = vpop.permute.xlu1 %1922 }
 0x18e   : > { %2509 = vperm.xlu0 %5890, %v11596_v41   ;;  %11598 = vst [vmem:[#allocation63_spill] sm:$0xff] %v7651_v28  ;;  %p6019_p3 = pnand %p6018_p2, %p6014_p13 }
 0x18f   : > { %v7648_v14 = vpop.permute.xlu0 %2327  ;;  %2125 = vperm.xlu1 %5885, %v7421_v29  }
 0x190   : > { %11597 = vst [vmem:[#allocation60_spill] sm:$0xff] %v7648_v14 }
 0x193   : > { %2141 = vperm.xlu2 %5886, %v7455_v13  }
 0x194   : > { %v7653_v56 = vpop.permute.xlu2 %1972 }
 0x195   : > { %11599 = vst [vmem:[#allocation7_spill] sm:$0xff] %v7653_v56  ;;  %v11607_v56 = vld [vmem:[#allocation19_spill] sm:$0xff] }
 0x196   : > { %2521 = vperm.xlu0 %5890, %v11600_v52  }
 0x197   : > { %v7657_v25 = vpop.permute.xlu0 %2339  ;;  %2137 = vperm.xlu1 %5885, %v7488_v4  }
 0x198   : > { %11601 = vst [vmem:[#allocation65_spill] sm:$0xff] %v7657_v25 }
 0x199   : > { %v7663_v18 = vpop.permute.xlu1 %1937 }
 0x19a   : > { %11603 = vst [vmem:[#allocation9_spill] sm:$0xff] %v7663_v18  ;;  %v11610_v18 = vmov 2  }
 0x19b   : > { %2153 = vperm.xlu2 %5886, %v7516_v36  }
 0x19c   : > { %v7660_v63 = vpop.permute.xlu2 %1987 }
 0x19d   : > { %11602 = vst [vmem:[#allocation69_spill] sm:$0xff] %v7660_v63 }
 0x19e   : > { %2533 = vperm.xlu0 %5890, %v11604_v6  }
 0x19f   : > { %v7666_v47 = vpop.permute.xlu0 %2351  ;;  %2149 = vperm.xlu1 %5885, %v7543_v45  }
 0x1a0   : > { %11605 = vst [vmem:[#allocation71_spill] sm:$0xff] %v7666_v47 }
 0x1a2   : > { %v7673_v25 = vpop.permute.xlu1 %1952 }
 0x1a3   : > { %2165 = vperm.xlu2 %5886, %v7561_v10   ;;  %11608 = vst [vmem:[#allocation11_spill] sm:$0xff] %v7673_v25 }
 0x1a4   : > { %v7670_v15 = vpop.permute.xlu2 %2002 }
 0x1a5   : > { %11606 = vst [vmem:[#allocation74_spill] sm:$0xff] %v7670_v15 }
 0x1a6   : > { %2545 = vperm.xlu0 %5890, %v11607_v56  }
 0x1a7   : > { %v7675_v63 = vpop.permute.xlu0 %2363  ;;  %2161 = vperm.xlu1 %5885, %v7572_v5  }
 0x1a8   : > { %11609 = vst [vmem:[#allocation13_spill] sm:$0xff] %v7675_v63  ;;  %v11613_v63 = vmov 0  }
 0x1ab   : > { %5889 = vset.pattern.permute.xlu2 %v11610_v18 }
 0x1ac   : > { %2243 = vperm.xlu2 %5889, %v6770_v2  }
 0x1ad   : > { %v7681_v47 = vpop.permute.xlu2 %2049 }
 0x1ae   : > { %2557 = vperm.xlu0 %5890, %v6665_v22  }
 0x1af   : > { %v7683_v28 = vpop.permute.xlu1 %1967  ;;  %5888 = vset.pattern.permute.xlu1 %v11610_v18 }
 0x1b0   : > { %11611 = vst [vmem:[#allocation16_spill] sm:$0xff] %v7683_v28  ;;  %v7685_v15 = vpop.permute.xlu0 %744  ;;  %2239 = vperm.xlu1 %5888, %v6781_v42  }
 0x1b1   : > { %11612 = vst [vmem:[#allocation19_spill] sm:$0xff] %v7685_v15 }
 0x1b4   : > { %2255 = vperm.xlu2 %5889, %v6849_v43  }
 0x1b5   : > { %v7691_v25 = vpop.permute.xlu2 %2061 }
 0x1b6   : > { %5893 = vset.pattern.permute.xlu0 %v11613_v63 }
 0x1b7   : > { %447 = vperm.xlu0 %5893, %v5974_v26   ;;  %v7696_v37 = vpop.permute.xlu1 %1982 }
 0x1b8   : > { %v7694_v14 = vpop.permute.xlu0 %764  ;;  %11615 = vst [vmem:[#allocation94_spill] sm:$0xff] %v7696_v37  ;;  %2251 = vperm.xlu1 %5888, %v6869_v8  }
 0x1b9   : > { %11614 = vst [vmem:[#allocation93_spill] sm:$0xff] %v7694_v14 }
 0x1bc   : > { %2263 = vperm.xlu2 %5889, %v6947_v50  }
 0x1bd   : > { %v7700_v15 = vpop.permute.xlu2 %2069 }
 0x1bf   : > { %452 = vperm.xlu0 %5893, %v7499_v12  }
 0x1c0   : > { %v7703_v18 = vpop.permute.xlu0 %776  ;;  %2259 = vperm.xlu1 %5888, %v6989_v38   ;;  %v7706_v63 = vpop.permute.xlu1 %1997 }
 0x1c1   : > { %11616 = vst [vmem:[#allocation95_spill] sm:$0xff] %v7703_v18 }
 0x1c2   : > { %11617 = vst [vmem:[#allocation96_spill] sm:$0xff] %v7706_v63 }
 0x1c4   : > { %2275 = vperm.xlu2 %5889, %v7045_v49  }
 0x1c5   : > { %v7709_v26 = vpop.permute.xlu2 %2081 }
 0x1c7   : > { %477 = vperm.xlu0 %5893, %v7552_v54  }
 0x1c8   : > { %v7712_v14 = vpop.permute.xlu0 %788  ;;  %2271 = vperm.xlu1 %5888, %v7072_v51  }
 0x1c9   : > { %11618 = vst [vmem:[#allocation97_spill] sm:$0xff] %v7712_v14  ;;  %v7715_v37 = vpop.permute.xlu1 %2045 }
 0x1cc   : > { %2287 = vperm.xlu2 %5889, %v11584_v7  }
 0x1cd   : > { %v7718_v12 = vpop.permute.xlu2 %2093 }
 0x1cf   : > { %492 = vperm.xlu0 %5893, %v7569_v9  }
 0x1d0   : > { %v7721_v18 = vpop.permute.xlu0 %800  ;;  %2283 = vperm.xlu1 %5888, %v11586_v40  }
 0x1d1   : > { %11619 = vst [vmem:[#allocation98_spill] sm:$0xff] %v7721_v18  ;;  %v7724_v63 = vpop.permute.xlu1 %2057 }
 0x1d2   : > { %11620 = vst [vmem:[#allocation99_spill] sm:$0xff] %v7724_v63 }
 0x1d4   : > { %2299 = vperm.xlu2 %5889, %v11587_v60  }
 0x1d5   : > { %v7727_v54 = vpop.permute.xlu2 %2105 }
 0x1d7   : > { %507 = vperm.xlu0 %5893, %v7582_v3  }
 0x1d8   : > { %v7730_v14 = vpop.permute.xlu0 %2441  ;;  %2295 = vperm.xlu1 %5888, %v11589_v0  }
 0x1d9   : > { %11621 = vst [vmem:[#allocation100_spill] sm:$0xff] %v7730_v14  ;;  %v7733_v28 = vpop.permute.xlu1 %2065 }
 0x1da   : > { %11622 = vst [vmem:[#allocation101_spill] sm:$0xff] %v7733_v28 }
 0x1dc   : > { %2311 = vperm.xlu2 %5889, %v11590_v35  }
 0x1dd   : > { %v7736_v9 = vpop.permute.xlu2 %2117 }
 0x1df   : > { %522 = vperm.xlu0 %5893, %v7595_v31  }
 0x1e0   : > { %v7739_v18 = vpop.permute.xlu0 %2461  ;;  %2307 = vperm.xlu1 %5888, %v11593_v20  }
 0x1e1   : > { %11623 = vst [vmem:[#allocation102_spill] sm:$0xff] %v7739_v18  ;;  %v7742_v63 = vpop.permute.xlu1 %2077 }
 0x1e2   : > { %11624 = vst [vmem:[#allocation103_spill] sm:$0xff] %v7742_v63 }
 0x1e4   : > { %2323 = vperm.xlu2 %5889, %v11595_v59  }
 0x1e5   : > { %v7745_v3 = vpop.permute.xlu2 %2129 }
 0x1e7   : > { %1862 = vperm.xlu0 %5893, %v6515_v23  }
 0x1e8   : > { %v7748_v14 = vpop.permute.xlu0 %2473  ;;  %2319 = vperm.xlu1 %5888, %v7421_v29  }
 0x1e9   : > { %11625 = vst [vmem:[#allocation104_spill] sm:$0xff] %v7748_v14  ;;  %v7751_v28 = vpop.permute.xlu1 %2089 }
 0x1ea   : > { %11626 = vst [vmem:[#allocation105_spill] sm:$0xff] %v7751_v28 }
 0x1ec   : > { %2335 = vperm.xlu2 %5889, %v7455_v13  }
 0x1ed   : > { %v7754_v31 = vpop.permute.xlu2 %2141 }
 0x1ef   : > { %1887 = vperm.xlu0 %5893, %v6532_v62  }
 0x1f0   : > { %v7757_v18 = vpop.permute.xlu0 %2485  ;;  %2331 = vperm.xlu1 %5888, %v7488_v4  }
 0x1f1   : > { %11627 = vst [vmem:[#allocation106_spill] sm:$0xff] %v7757_v18  ;;  %v7760_v63 = vpop.permute.xlu1 %2101 }
 0x1f2   : > { %11628 = vst [vmem:[#allocation107_spill] sm:$0xff] %v7760_v63 }
 0x1f4   : > { %2347 = vperm.xlu2 %5889, %v7516_v36  }
 0x1f5   : > { %v7763_v23 = vpop.permute.xlu2 %2153 }
 0x1f7   : > { %1902 = vperm.xlu0 %5893, %v11585_v44  }
 0x1f8   : > { %v7766_v14 = vpop.permute.xlu0 %2497  ;;  %2343 = vperm.xlu1 %5888, %v7543_v45  }
 0x1f9   : > { %11629 = vst [vmem:[#allocation108_spill] sm:$0xff] %v7766_v14  ;;  %v7769_v28 = vpop.permute.xlu1 %2113 }
 0x1fc   : > { %2359 = vperm.xlu2 %5889, %v7561_v10  }
 0x1fd   : > { %v7772_v62 = vpop.permute.xlu2 %2165 }
 0x1ff   : > { %1917 = vperm.xlu0 %5893, %v11588_v53  }
 0x200   : > { %v7775_v18 = vpop.permute.xlu0 %2509  ;;  %2355 = vperm.xlu1 %5888, %v7572_v5  }
 0x201   : > { %11630 = vst [vmem:[#allocation109_spill] sm:$0xff] %v7775_v18  ;;  %v7778_v63 = vpop.permute.xlu1 %2125 }
 0x202   : > { %11631 = vst [vmem:[#allocation110_spill] sm:$0xff] %v7778_v63 }
 0x204   : > { %5892 = vset.pattern.permute.xlu2 %v11569_v16 }
 0x205   : > { %2437 = vperm.xlu2 %5892, %v6770_v2  }
 0x206   : > { %v7783_v44 = vpop.permute.xlu2 %2243 }
 0x207   : > { %1932 = vperm.xlu0 %5893, %v11591_v57  }
 0x208   : > { %v7785_v14 = vpop.permute.xlu0 %2521  ;;  %5891 = vset.pattern.permute.xlu1 %v11569_v16 }
 0x209   : > { %2433 = vperm.xlu1 %5891, %v6781_v42   ;;  %v7789_v53 = vpop.permute.xlu1 %2137 }
 0x20d   : > { %2449 = vperm.xlu2 %5892, %v6849_v43  }
 0x20e   : > { %v7793_v18 = vpop.permute.xlu2 %2255 }
 0x20f   : > { %1947 = vperm.xlu0 %5893, %v11596_v41  }
 0x210   : > { %v7795_v63 = vpop.permute.xlu0 %2533 }
 0x211   : > { %2445 = vperm.xlu1 %5891, %v6869_v8   ;;  %v7798_v2 = vpop.permute.xlu1 %2149 }
 0x215   : > { %2457 = vperm.xlu2 %5892, %v6947_v50  }
 0x216   : > { %v7802_v57 = vpop.permute.xlu2 %2263 }
 0x217   : > { %1962 = vperm.xlu0 %5893, %v11600_v52  }
 0x218   : > { %v7804_v42 = vpop.permute.xlu0 %2545 }
 0x219   : > { %2453 = vperm.xlu1 %5891, %v6989_v38   ;;  %v7807_v43 = vpop.permute.xlu1 %2161 }
 0x21d   : > { %2469 = vperm.xlu2 %5892, %v7045_v49  }
 0x21e   : > { %v7811_v41 = vpop.permute.xlu2 %2275 }
 0x21f   : > { %1977 = vperm.xlu0 %5893, %v11604_v6  }
 0x220   : > { %v7813_v8 = vpop.permute.xlu0 %2557 }
 0x221   : > { %11632 = vst [vmem:[#allocation111_spill] sm:$0xff] %v7813_v8  ;;  %2465 = vperm.xlu1 %5891, %v7072_v51  }
 0x222   : > { %v7816_v50 = vpop.permute.xlu1 %2239 }
 0x225   : > { %2481 = vperm.xlu2 %5892, %v11584_v7  }
 0x226   : > { %v7820_v52 = vpop.permute.xlu2 %2287 }
 0x227   : > { %1992 = vperm.xlu0 %5893, %v11607_v56   ;;  %11633 = vst [vmem:[#allocation112_spill] sm:$0xff] %v7820_v52 }
 0x229   : > { %v7822_v38 = vpop.permute.xlu0 %447  ;;  %2477 = vperm.xlu1 %5891, %v11586_v40  }
 0x22a   : > { %11634 = vst [vmem:[#allocation113_spill] sm:$0xff] %v7822_v38  ;;  %v7825_v49 = vpop.permute.xlu1 %2251 }
 0x22b   : > { %11635 = vst [vmem:[#allocation114_spill] sm:$0xff] %v7825_v49 }
 0x22d   : > { %2493 = vperm.xlu2 %5892, %v11587_v60  }
 0x22e   : > { %v7829_v6 = vpop.permute.xlu2 %2299 }
 0x22f   : > { %2007 = vperm.xlu0 %5893, %v6665_v22   ;;  %11636 = vst [vmem:[#allocation115_spill] sm:$0xff] %v7829_v6 }
 0x231   : > { %v7831_v51 = vpop.permute.xlu0 %452  ;;  %2489 = vperm.xlu1 %5891, %v11589_v0  }
 0x232   : > { %11637 = vst [vmem:[#allocation116_spill] sm:$0xff] %v7831_v51  ;;  %v7834_v7 = vpop.permute.xlu1 %2259  ;;  %v11648_v51 = vld [vmem:[#allocation44_spill] sm:$0xff] }
 0x233   : > { %11638 = vst [vmem:[#allocation117_spill] sm:$0xff] %v7834_v7 }
 0x235   : > { %2505 = vperm.xlu2 %5892, %v11590_v35  }
 0x236   : > { %v7837_v56 = vpop.permute.xlu2 %2311 }
 0x237   : > { %11639 = vst [vmem:[#allocation118_spill] sm:$0xff] %v7837_v56  ;;  %v11654_v56 = vld [vmem:[#allocation53_spill] sm:$0xff] }
 0x239   : > { %v7839_v38 = vpop.permute.xlu0 %477  ;;  %2501 = vperm.xlu1 %5891, %v11593_v20   ;;  %v7858_v20 = vld [vmem:[%s11362_s2 + $0x1] ss:$0 sm:$0xff] }
 0x23a   : > { %11640 = vst [vmem:[#allocation119_spill] sm:$0xff] %v7839_v38  ;;  %v7842_v40 = vpop.permute.xlu1 %2271  ;;  %v7879_v16 = vmul.f32 %v7858_v20, %v11648_v51  ;;  %v11658_v51 = vld [vmem:[#allocation61_spill] sm:$0xff] }
 0x23b   : > { %11641 = vst [vmem:[#allocation120_spill] sm:$0xff] %v7842_v40  ;;  %v7901_v8 = vmul.f32 %v7858_v20, %v11658_v51 }
 0x23d   : > { %2517 = vperm.xlu2 %5892, %v11595_v59   ;;  %v7865_v59 = vld [vmem:[%s11362_s2 + $0x2] ss:$0 sm:$0xff] }
 0x23e   : > { %v7845_v22 = vpop.permute.xlu2 %2323  ;;  %v7922_v51 = vmul.f32 %v7865_v59, %v7598_v1  ;;  %v7946_v1 = vmul.f32 %v7865_v59, %v7625_v58 }
 0x23f   : > { %11642 = vst [vmem:[#allocation121_spill] sm:$0xff] %v7845_v22 }
 0x240   : > { %11668 = vst [vmem:[#allocation127_spill] sm:$0xff] %v7946_v1 }
 0x241   : > { %v7847_v60 = vpop.permute.xlu0 %492  ;;  %2513 = vperm.xlu1 %5891, %v7421_v29   ;;  %v7870_v29 = vld [vmem:[%s11362_s2] ss:$0 sm:$0xff] }
 0x242   : > { %11643 = vst [vmem:[#allocation122_spill] sm:$0xff] %v7847_v60  ;;  %v7850_v0 = vpop.permute.xlu1 %2283  ;;  %v2029_v58 = vmul.f32 %v7870_v29, %v7634_v48 }
 0x243   : > { %11644 = vst [vmem:[#allocation123_spill] sm:$0xff] %v7850_v0  ;;  %v11651_v0 = vld [vmem:[#allocation50_spill] sm:$0xff] }
 0x244   : > { %v7887_v22 = vmul.f32 %v7858_v20, %v11651_v0  ;;  %v11662_v0 = vld [vmem:[#allocation70_spill] sm:$0xff] }
 0x245   : > { %2529 = vperm.xlu2 %5892, %v7455_v13   ;;  %v11647_v13 = vld [vmem:[#allocation36_spill] sm:$0xff] }
 0x246   : > { %v7853_v35 = vpop.permute.xlu2 %2335  ;;  %v7875_v60 = vmul.f32 %v7858_v20, %v11647_v13  ;;  %11652 = vst [vmem:[#allocation44_spill] sm:$0xff] %v7887_v22  ;;  %v11656_v13 = vld [vmem:[#allocation56_spill] sm:$0xff]  ;;  %v7909_v22 = vmul.f32 %v7858_v20, %v11662_v0  ;;  %v2020_v0 = vmul.f32 %v7870_v29, %v7603_v30  ;;  %v2016_v30 = vmul.f32 %v7870_v29, %v7620_v46 }
 0x247   : > { %11645 = vst [vmem:[#allocation124_spill] sm:$0xff] %v7853_v35  ;;  %v7897_v7 = vmul.f32 %v7858_v20, %v11656_v13  ;;  %v2012_v13 = vmul.f32 %v7870_v29, %v7547_v27  ;;  %v7934_v27 = vmul.f32 %v7865_v59, %v7607_v24  ;;  %v2019_v24 = vmul.f32 %v7870_v29, %v7630_v55  ;;  %v11673_v46 = vld [vmem:[#allocation60_spill] sm:$0xff]  ;;  %v11675_v55 = vld [vmem:[#allocation57_spill] sm:$0xff] }
 0x248   : > { %11659 = vst [vmem:[#allocation56_spill] sm:$0xff] %v7901_v8  ;;  %v11676_v8 = vld [vmem:[#allocation63_spill] sm:$0xff] }
 0x249   : > { %v7860_v38 = vpop.permute.xlu0 %507  ;;  %2525 = vperm.xlu1 %5891, %v7488_v4   ;;  %v7893_v4 = vmul.f32 %v7858_v20, %v11654_v56  ;;  %11657 = vst [vmem:[#allocation53_spill] sm:$0xff] %v7897_v7  ;;  %v2015_v7 = vmul.f32 %v7870_v29, %v7574_v21  ;;  %v2023_v21 = vmul.f32 %v7870_v29, %v7613_v19 }
 0x24a   : > { %11646 = vst [vmem:[#allocation125_spill] sm:$0xff] %v7860_v38  ;;  %v11649_v38 = vld [vmem:[#allocation47_spill] sm:$0xff]  ;;  %v7889_v40 = vpop.permute.xlu1 %2295  ;;  %v7958_v19 = vmul.f32 %v7865_v59, %v7632_v39  ;;  %v2025_v39 = vmul.f32 %v7870_v29, %v11676_v8 }
 0x24b   : > { %v7883_v35 = vmul.f32 %v7858_v20, %v11649_v38  ;;  %11653 = vst [vmem:[#allocation47_spill] sm:$0xff] %v7889_v40  ;;  %v11660_v38 = vld [vmem:[#allocation66_spill] sm:$0xff]  ;;  %v11664_v40 = vld [vmem:[#allocation75_spill] sm:$0xff] }
 0x24c   : > { %11655 = vst [vmem:[#allocation50_spill] sm:$0xff] %v7893_v4  ;;  %v7913_v56 = vmul.f32 %v7858_v20, %v11664_v40  ;;  %v2011_v40 = vmul.f32 %v7870_v29, %v7600_v61  ;;  %v2026_v61 = vmul.f32 %v7870_v29, %v7622_v32  ;;  %v11672_v32 = vld [vmem:[#allocation6_spill] sm:$0xff]  ;;  %v11681_v8 = vld [vmem:[#allocation71_spill] sm:$0xff] }
 0x24d   : > { %11650 = vst [vmem:[#allocation36_spill] sm:$0xff] %v7883_v35  ;;  %v7905_v35 = vmul.f32 %v7858_v20, %v11660_v38  ;;  %2541 = vperm.xlu2 %5892, %v7516_v36   ;;  %v2017_v38 = vmul.f32 %v7870_v29, %v7590_v17  ;;  %v7938_v36 = vmul.f32 %v7865_v59, %v7616_v33 }
 0x24e   : > { %11663 = vst [vmem:[#allocation66_spill] sm:$0xff] %v7909_v22  ;;  %v2014_v17 = vmul.f32 %v7870_v29, %v7610_v34  ;;  %v7962_v34 = vmul.f32 %v7865_v59, %v7639_v11  ;;  %v2032_v22 = vmul.f32 %v7870_v29, %v11672_v32  ;;  %v2174_v11 = vmul.f32 %v7858_v20, %v7681_v47  ;;  %v11679_v32 = vld [vmem:[#allocation7_spill] sm:$0xff] }
 0x24f   : > { %11661 = vst [vmem:[#allocation61_spill] sm:$0xff] %v7905_v35  ;;  %v7970_v35 = vmul.f32 %v7865_v59, %v11673_v46  ;;  %v2177_v46 = vmul.f32 %v7858_v20, %v7691_v25  ;;  %v7993_v47 = vmul.f32 %v7865_v59, %v11681_v8  ;;  %v11685_v25 = vld [vmem:[#allocation74_spill] sm:$0xff]  ;;  %v2173_v8 = vmul.f32 %v7858_v20, %v7715_v37  ;;  %v11690_v37 = vld [vmem:[#allocation99_spill] sm:$0xff] }
 0x250   : > { %11665 = vst [vmem:[#allocation70_spill] sm:$0xff] %v7913_v56  ;;  %v7930_v56 = vpop.permute.xlu2 %2347  ;;  %v8005_v1 = vmul.f32 %v7870_v29, %v11685_v25 }
 0x251   : > { %11666 = vst [vmem:[#allocation75_spill] sm:$0xff] %v7930_v56  ;;  %v7954_v33 = vpop.permute.xlu0 %522  ;;  %2537 = vperm.xlu1 %5891, %v7543_v45   ;;  %v11683_v45 = vld [vmem:[#allocation69_spill] sm:$0xff]  ;;  %v2206_v56 = vadd.f32 %v2174_v11, %v2012_v13  ;;  %v2188_v13 = vmul.f32 %v7858_v20, %v7727_v54  ;;  %v11693_v11 = vld [vmem:[#allocation96_spill] sm:$0xff] }
 0x252   : > { %11667 = vst [vmem:[#allocation126_spill] sm:$0xff] %v7938_v36  ;;  %v2038_v4 = vmul.f32 %v7870_v29, %v11683_v45  ;;  %v2185_v45 = vmul.f32 %v7858_v20, %v7718_v12  ;;  %v2176_v36 = vmul.f32 %v7858_v20, %v11690_v37  ;;  %v11695_v37 = vld [vmem:[#allocation101_spill] sm:$0xff] }
 0x253   : > { %11669 = vst [vmem:[#allocation128_spill] sm:$0xff] %v7954_v33  ;;  %v2022_v33 = vmul.f32 %v7870_v29, %v11675_v55  ;;  %v2179_v55 = vmul.f32 %v7858_v20, %v7700_v15  ;;  %v11686_v15 = vld [vmem:[#allocation11_spill] sm:$0xff] }
 0x254   : > { %11670 = vst [vmem:[#allocation129_spill] sm:$0xff] %v7958_v19  ;;  %v2035_v19 = vmul.f32 %v7870_v29, %v11679_v32  ;;  %v2182_v32 = vmul.f32 %v7858_v20, %v7709_v26  ;;  %v11689_v26 = vld [vmem:[#allocation16_spill] sm:$0xff] }
 0x255   : > { %11671 = vst [vmem:[#allocation130_spill] sm:$0xff] %v7962_v34  ;;  %v11677_v34 = vld [vmem:[#allocation65_spill] sm:$0xff]  ;;  %2553 = vperm.xlu2 %5892, %v7561_v10   ;;  %v8022_v25 = vmul.f32 %v7870_v29, %v11689_v26  ;;  %v11692_v10 = vld [vmem:[#allocation94_spill] sm:$0xff]  ;;  %v8045_v26 = vmul.f32 %v7870_v29, %v11693_v11  ;;  %v11697_v11 = vld [vmem:[#allocation100_spill] sm:$0xff] }
 0x256   : > { %11674 = vst [vmem:[#allocation6_spill] sm:$0xff] %v7970_v35  ;;  %v7981_v48 = vmul.f32 %v7865_v59, %v11677_v34  ;;  %v7989_v35 = vpop.permute.xlu1 %2307  ;;  %v11684_v34 = vld [vmem:[#allocation9_spill] sm:$0xff]  ;;  %v8035_v6 = vmul.f32 %v7870_v29, %v11692_v10  ;;  %v8047_v49 = vadd.f32 %v2182_v32, %v2020_v0  ;;  %v2191_v10 = vmul.f32 %v7858_v20, %v7736_v9 }
 0x257   : > { %11680 = vst [vmem:[#allocation57_spill] sm:$0xff] %v7989_v35  ;;  %v8009_v35 = vmul.f32 %v7870_v29, %v11686_v15  ;;  %v8027_v15 = vld [vmem:[%s11362_s2 + $0x3] ss:$0 sm:$0xff]  ;;  %v8062_v32 = vadd.f32 %v2176_v36, %v2014_v17  ;;  %v11700_v17 = vld [vmem:[#allocation102_spill] sm:$0xff] }
 0x258   : > { %11678 = vst [vmem:[#allocation60_spill] sm:$0xff] %v7981_v48  ;;  %v7999_v48 = vmul.f32 %v7870_v29, %v11684_v34  ;;  %v11687_v34 = vld [vmem:[#allocation13_spill] sm:$0xff]  ;;  %v8031_v12 = vpop.permute.xlu2 %2359  ;;  %v2563_v0 = vmul.f32 %v8027_v15, %v11697_v11 }
 0x259   : > { %11682 = vst [vmem:[#allocation63_spill] sm:$0xff] %v7993_v47  ;;  %v8018_v47 = vmul.f32 %v7865_v59, %v11687_v34  ;;  %v8037_v34 = vadd.f32 %v2177_v46, %v2015_v7  ;;  %v1863_v52 = vpop.permute.xlu0 %1862  ;;  %v8053_v7 = vadd.f32 %v2173_v8, %v2011_v40  ;;  %v11696_v46 = vld [vmem:[#allocation103_spill] sm:$0xff]  ;;  %2549 = vperm.xlu1 %5891, %v7572_v5  }
 0x25a   : > { %11691 = vst [vmem:[#allocation7_spill] sm:$0xff] %v8031_v12  ;;  %v2178_v12 = vmul.f32 %v7858_v20, %v11695_v37  ;;  %v2181_v54 = vmul.f32 %v7858_v20, %v11696_v46  ;;  %v2194_v37 = vmul.f32 %v7858_v20, %v7745_v3  ;;  %v8069_v40 = vadd.f32 %v2188_v13, %v2026_v61  ;;  %v11699_v8 = vld [vmem:[#allocation107_spill] sm:$0xff]  ;;  %v11701_v61 = vld [vmem:[#allocation104_spill] sm:$0xff] }
 0x25b   : > { %11688 = vst [vmem:[#allocation65_spill] sm:$0xff] %v8018_v47  ;;  %v8039_v47 = vadd.f32 %v2179_v55, %v2017_v38  ;;  %v8055_v38 = vadd.f32 %v2185_v45, %v2023_v21  ;;  %v2013_v55 = vmul.f32 %v7870_v29, %v1863_v52  ;;  %v2197_v21 = vmul.f32 %v7858_v20, %v7754_v31 }
 0x25c   : > { %11694 = vst [vmem:[#allocation71_spill] sm:$0xff] %v8047_v49  ;;  %v11698_v49 = vld [vmem:[#allocation105_spill] sm:$0xff]  ;;  %v2187_v52 = vmul.f32 %v7858_v20, %v11699_v8  ;;  %v2568_v3 = vmul.f32 %v8027_v15, %v11700_v17  ;;  %v8080_v46 = vadd.f32 %v2178_v12, %v2016_v30  ;;  %v2368_v5 = vmul.f32 %v7865_v59, %v7783_v44  ;;  %v11703_v12 = vld [vmem:[#allocation106_spill] sm:$0xff] }
 0x25d   : > { %v2184_v9 = vmul.f32 %v7858_v20, %v11698_v49  ;;  %v2207_v45 = vadd.f32 %v7875_v60, %v2013_v55  ;;  %v8082_v49 = vadd.f32 %v2191_v10, %v2029_v58  ;;  %v8088_v31 = vmul.f32 %v8027_v15, %v11701_v61  ;;  %v8097_v55 = vld [vmem:[%s11363_s3] ss:$0 sm:$0xff] }
 0x25e   : > { %v8076_v36 = vpop.permute.xlu1 %2319  ;;  %v8090_v13 = vadd.f32 %v2181_v54, %v2019_v24  ;;  %v2200_v60 = vmul.f32 %v7858_v20, %v7763_v23  ;;  %v11702_v58 = vmov 0   ;;  %v8103_v44 = vmul.f32 %v8027_v15, %v11703_v12  ;;  %v11704_v54 = vld [vmem:[#allocation108_spill] sm:$0xff] }
 0x25f   : > { %v2401_v30 = vadd.f32 %v7922_v51, %v2207_v45  ;;  %5895 = vset.pattern.permute.xlu2 %v11702_v58  ;;  %v8105_v10 = vadd.f32 %v2194_v37, %v2032_v22  ;;  %v8107_v24 = vadd.f32 %v2184_v9, %v2022_v33  ;;  %v2190_v23 = vmul.f32 %v7858_v20, %v7769_v28  ;;  %v8122_v45 = vld [vmem:[%s11364_s4] ss:$0 sm:$0xff]  ;;  %v11705_v9 = vld [vmem:[#allocation110_spill] sm:$0xff] }
 0x260   : > { %v8113_v11 = vmul.f32 %v8027_v15, %v11704_v54  ;;  %v8115_v8 = vadd.f32 %v2197_v21, %v2035_v19  ;;  %v8117_v51 = vadd.f32 %v2187_v52, %v2025_v39  ;;  %v2438_v37 = vpop.permute.xlu2 %2437  ;;  %v2203_v33 = vmul.f32 %v7858_v20, %v7772_v62 }
 0x261   : > { %v2595_v22 = vadd.f32 %v2563_v0, %v2401_v30  ;;  %v2193_v28 = vmul.f32 %v7858_v20, %v11705_v9  ;;  %v2400_v17 = vadd.f32 %v2368_v5, %v2206_v56  ;;  %v1888_v61 = vpop.permute.xlu0 %1887  ;;  %v2562_v19 = vmul.f32 %v8027_v15, %v2438_v37  ;;  %5894 = vset.pattern.permute.xlu1 %v11702_v58 }
 0x262   : > { %v8129_v21 = vadd.f32 %v2200_v60, %v2038_v4  ;;  %v2196_v39 = vmul.f32 %v7858_v20, %v7789_v53  ;;  %v2018_v0 = vmul.f32 %v7870_v29, %v1888_v61  ;;  %v8136_v30 = vadd.f32 %v2190_v23, %v7999_v48  ;;  %v11706_v4 = vld [vmem:[#allocation109_spill] sm:$0xff]  ;;  %v11708_v61 = vld [vmem:[#allocation114_spill] sm:$0xff] }
 0x263   : > { %v2631_v52 = vmul.f32 %v8097_v55, %v2595_v22  ;;  %v2199_v62 = vmul.f32 %v7858_v20, %v7798_v2  ;;  %v2371_v56 = vmul.f32 %v7865_v59, %v7793_v18  ;;  %v2594_v5 = vadd.f32 %v2562_v19, %v2400_v17  ;;  %v11709_v19 = vld [vmem:[#allocation115_spill] sm:$0xff] }
 0x264   : > { %v8145_v60 = vmul.f32 %v8027_v15, %v11706_v4  ;;  %v2373_v53 = vmul.f32 %v7865_v59, %v7802_v57  ;;  %v2212_v48 = vadd.f32 %v7879_v16, %v2018_v0  ;;  %v8155_v2 = vmul.f32 %v8027_v15, %v7785_v14  ;;  %v11713_v4 = vld [vmem:[#allocation118_spill] sm:$0xff] }
 0x265   : > { %v2667_v12 = vadd.f32 %v8122_v45, %v2631_v52  ;;  %v8158_v18 = vadd.f32 %v2203_v33, %v8005_v1  ;;  %v8161_v58 = vadd.f32 %v2193_v28, %v8009_v35  ;;  %v2630_v54 = vmul.f32 %v8097_v55, %v2594_v5  ;;  %v11707_v28 = vld [vmem:[#allocation112_spill] sm:$0xff]  ;;  %v11710_v52 = vld [vmem:[#allocation111_spill] sm:$0xff] }
 0x266   : > { %v8151_v23 = vpop.permute.xlu1 %2331  ;;  %v8166_v57 = vmul.f32 %v8027_v15, %v7795_v63  ;;  %v8169_v16 = vadd.f32 %v2196_v39, %v8022_v25  ;;  %v2406_v37 = vadd.f32 %v7934_v27, %v2212_v48  ;;  %v8173_v14 = vadd.f32 %v2199_v62, %v8035_v6  ;;  %v11712_v62 = vld [vmem:[#allocation117_spill] sm:$0xff] }
 0x267   : > { %v2699_v22 = vmax.f32 %v2667_v12, 0.0  ;;  %v2403_v1 = vadd.f32 %v2371_v56, %v8037_v34  ;;  %v2202_v35 = vmul.f32 %v7858_v20, %v7807_v43  ;;  %v2666_v33 = vadd.f32 %v8122_v45, %v2630_v54  ;;  %v11714_v12 = vld [vmem:[#allocation120_spill] sm:$0xff] }
 0x268   : > { %v8181_v63 = vmul.f32 %v8027_v15, %v7804_v42  ;;  %v2405_v25 = vadd.f32 %v2373_v53, %v8039_v47  ;;  %v2376_v9 = vmul.f32 %v7865_v59, %v7811_v41  ;;  %v2600_v6 = vadd.f32 %v2568_v3, %v2406_v37  ;;  %v2450_v27 = vpop.permute.xlu2 %2449 }
 0x269   : > { %2785 = vst.msk [vmem:[#allocation2 + $0x31] sm:$0xff] %vm908_vm0, %v2699_v22  ;;  %v2367_v34 = vmul.f32 %v7865_v59, %v7816_v50  ;;  %v2379_v43 = vmul.f32 %v7865_v59, %v11707_v28  ;;  %v1903_v20 = vpop.permute.xlu0 %1902  ;;  %v2698_v17 = vmax.f32 %v2666_v33, 0.0  ;;  %v2565_v42 = vmul.f32 %v8027_v15, %v2450_v27  ;;  %v11715_v22 = vld [vmem:[#allocation36_spill] sm:$0xff] }
 0x26a   : > { %v2370_v47 = vmul.f32 %v7865_v59, %v11708_v61  ;;  %v2382_v41 = vmul.f32 %v7865_v59, %v11709_v19  ;;  %v2636_v39 = vmul.f32 %v8097_v55, %v2600_v6  ;;  %v2021_v3 = vmul.f32 %v7870_v29, %v1903_v20  ;;  %v11716_v6 = vld [vmem:[#allocation71_spill] sm:$0xff]  ;;  %v11718_v19 = vld [vmem:[#allocation121_spill] sm:$0xff] }
 0x26b   : > { %v8200_v50 = vmul.f32 %v8027_v15, %v11710_v52  ;;  %v8203_v0 = vadd.f32 %v2202_v35, %v8045_v26  ;;  %v2372_v56 = vmul.f32 %v7865_v59, %v11712_v62  ;;  %2784 = vst.msk [vmem:[#allocation2 + $0x21] sm:$0xff] %vm908_vm0, %v2698_v17  ;;  %v2597_v5 = vadd.f32 %v2565_v42, %v2403_v1  ;;  %v11717_v42 = vld [vmem:[#allocation126_spill] sm:$0xff]  ;;  %v11722_v62 = vld [vmem:[#allocation75_spill] sm:$0xff] }
 0x26c   : > { %v2385_v53 = vmul.f32 %v7865_v59, %v11713_v4  ;;  %v2375_v48 = vmul.f32 %v7865_v59, %v11714_v12  ;;  %v2672_v54 = vadd.f32 %v8122_v45, %v2636_v39  ;;  %v2215_v37 = vadd.f32 %v11715_v22, %v2021_v3  ;;  %v11721_v3 = vld [vmem:[#allocation47_spill] sm:$0xff] }
 0x26d   : > { %11711 = vst [vmem:[#allocation69_spill] sm:$0xff] %v8203_v0  ;;  %v8215_v26 = vadd.f32 %v2376_v9, %v11716_v6  ;;  %v8218_v35 = vadd.f32 %v2367_v34, %v8053_v7  ;;  %v8221_v27 = vadd.f32 %v2379_v43, %v8055_v38  ;;  %v2633_v1 = vmul.f32 %v8097_v55, %v2597_v5  ;;  %v11719_v34 = vld [vmem:[#allocation123_spill] sm:$0xff] }
 0x26e   : > { %v2344_v33 = vpop.permute.xlu1 %2343  ;;  %v8225_v28 = vadd.f32 %v2370_v47, %v8062_v32  ;;  %v8228_v20 = vadd.f32 %v2382_v41, %v8069_v40  ;;  %v2704_v17 = vmax.f32 %v2672_v54, 0.0  ;;  %v2409_v61 = vadd.f32 %v11717_v42, %v2215_v37  ;;  %v11720_v47 = vld [vmem:[#allocation124_spill] sm:$0xff]  ;;  %v11724_v12 = vld [vmem:[#allocation7_spill] sm:$0xff] }
 0x26f   : > { %v8232_v9 = vadd.f32 %v2372_v56, %v8080_v46  ;;  %v2388_v7 = vmul.f32 %v7865_v59, %v11718_v19  ;;  %v2378_v38 = vmul.f32 %v7865_v59, %v11719_v34  ;;  %v2669_v43 = vadd.f32 %v8122_v45, %v2633_v1 }
 0x270   : > { %v8240_v32 = vadd.f32 %v2385_v53, %v8082_v49  ;;  %v8243_v40 = vadd.f32 %v2375_v48, %v8090_v13  ;;  %v2391_v41 = vmul.f32 %v7865_v59, %v11720_v47  ;;  %2790 = vst.msk [vmem:[#allocation2 + $0x69] sm:$0xff] %vm908_vm0, %v2704_v17  ;;  %v2603_v46 = vadd.f32 %v8088_v31, %v2409_v61  ;;  %v2458_v39 = vpop.permute.xlu2 %2457  ;;  %v11723_v13 = vld [vmem:[#allocation57_spill] sm:$0xff] }
 0x271   : > { %v2381_v52 = vmul.f32 %v7865_v59, %v11721_v3  ;;  %v2394_v56 = vmul.f32 %v7865_v59, %v11722_v62  ;;  %v1918_v5 = vpop.permute.xlu0 %1917  ;;  %v2701_v49 = vmax.f32 %v2669_v43, 0.0  ;;  %v2567_v4 = vmul.f32 %v8027_v15, %v2458_v39  ;;  %v2816_v17 = vld [vmem:[#allocation2 + $0x8] sm:$0xff]  ;;  %v3371_v3 = vld [vmem:[#allocation2 + $0x30] sm:$0xff] }
 0x272   : > { %v2384_v53 = vmul.f32 %v7865_v59, %v11723_v13  ;;  %v2397_v48 = vmul.f32 %v7865_v59, %v11724_v12  ;;  %v2639_v54 = vmul.f32 %v8097_v55, %v2603_v46  ;;  %v2024_v31 = vmul.f32 %v7870_v29, %v1918_v5  ;;  %v8305_v46 = vld [vmem:[%s11365_s5 + $0x6] ss:$0 sm:$0xff]  ;;  %v11733_v5 = vld [vmem:[#allocation38_spill] sm:$0xff] }
 0x273   : > { %v8261_v22 = vadd.f32 %v2388_v7, %v8105_v10  ;;  %v8264_v37 = vadd.f32 %v2378_v38, %v8107_v24  ;;  %v2387_v6 = vmul.f32 %v7865_v59, %v8076_v36  ;;  %2787 = vst.msk [vmem:[#allocation2 + $0x49] sm:$0xff] %vm908_vm0, %v2701_v49  ;;  %v2599_v1 = vadd.f32 %v2567_v4, %v2405_v25  ;;  %v11725_v10 = vld [vmem:[#allocation44_spill] sm:$0xff]  ;;  %v11734_v49 = vld [vmem:[#allocation39_spill] sm:$0xff] }
 0x274   : > { %v8270_v42 = vadd.f32 %v2391_v41, %v8115_v8  ;;  %v2675_v61 = vadd.f32 %v8122_v45, %v2639_v54  ;;  %v2390_v19 = vmul.f32 %v7865_v59, %v8151_v23  ;;  %v2218_v7 = vadd.f32 %v11725_v10, %v2024_v31  ;;  %v8281_v36 = vld [vmem:[%s11365_s5] ss:$0 sm:$0xff]  ;;  %v8283_v24 = vld [vmem:[#allocation2 + $0x21] sm:$0xff]  ;;  %v3469_v13 = vld [vmem:[#allocation2 + $0x31] sm:$0xff] }
 0x275   : > { %v8285_v25 = vld [vmem:[#allocation2 + $0x22] sm:$0xff]  ;;  %v11727_v8 = vmov -inf   ;;  %v8290_v38 = vadd.f32 %v2381_v52, %v8117_v51  ;;  %v8293_v23 = vadd.f32 %v2394_v56, %v8129_v21  ;;  %v2393_v43 = vmul.f32 %v7865_v59, %v2344_v33  ;;  %v8300_v41 = vld [vmem:[%s11365_s5 + $0x1] ss:$0 sm:$0xff]  ;;  %v11731_v33 = vld [vmem:[#allocation127_spill] sm:$0xff] }
 0x276   : > { %v8276_v34 = vpop.permute.xlu1 %2355  ;;  %5290 = vst.msk [vmem:[#allocation2 + $0x8] sm:$0xff] %vm908_vm0, %v11727_v8  ;;  %v2635_v47 = vmul.f32 %v8097_v55, %v2599_v1  ;;  %v8310_v51 = vadd.f32 %v2384_v53, %v8136_v30  ;;  %v8313_v59 = vadd.f32 %v2397_v48, %v8158_v18  ;;  %v2707_v21 = vmax.f32 %v2675_v61, 0.0  ;;  %v8319_v52 = vld [vmem:[%s11365_s5 + $0x7] ss:$0 sm:$0xff]  ;;  %v8332_v4 = vld [vmem:[%s11365_s5 + $0x3] ss:$0 sm:$0xff] }
 0x277   : > { %11726 = vst [vmem:[#allocation9_spill] sm:$0xff] %v8276_v34  ;;  %v2412_v39 = vadd.f32 %v11731_v33, %v2218_v7  ;;  %v8322_v62 = vadd.f32 %v2387_v6, %v8161_v58  ;;  %v2849_v30 = vmul.f32 %v8281_v36, %v11733_v5  ;;  %v2915_v18 = vmul.f32 %v8300_v41, %v11734_v49  ;;  %v8342_v48 = vld [vmem:[%s11365_s5 + $0x4] ss:$0 sm:$0xff]  ;;  %v11736_v31 = vld [vmem:[#allocation41_spill] sm:$0xff]  ;;  %v8358_v7 = vld [vmem:[%s11365_s5 + $0x2] ss:$0 sm:$0xff] }
 0x278   : > { %11728 = vst [vmem:[#allocation74_spill] sm:$0xff] %v8293_v23  ;;  %v2671_v56 = vadd.f32 %v8122_v45, %v2635_v47  ;;  %v8336_v53 = vadd.f32 %v2390_v19, %v8169_v16  ;;  %v2470_v12 = vpop.permute.xlu2 %2469  ;;  %v2850_v54 = vmul.f32 %v8281_v36, %v2816_v17  ;;  %v2916_v6 = vmul.f32 %v8300_v41, %v11736_v31  ;;  %v8347_v1 = vld [vmem:[#allocation2 + $0x69] sm:$0xff] }
 0x279   : > { %5294 = vst.msk [vmem:[#allocation2 + $0x28] sm:$0x3] %vm911_vm2, %v11727_v8  ;;  %v2606_v58 = vadd.f32 %v8103_v44, %v2412_v39  ;;  %v8349_v61 = vld [vmem:[#allocation2 + $0x6a] sm:$0xff]  ;;  %v8352_v16 = vadd.f32 %v2393_v43, %v8173_v14  ;;  %v1933_v19 = vpop.permute.xlu0 %1932  ;;  %v2570_v10 = vmul.f32 %v8027_v15, %v2470_v12  ;;  %v8361_v17 = vmul.f32 %v8305_v46, %v3371_v3 }
 0x27a   : > { %11729 = vst [vmem:[#allocation11_spill] sm:$0xff] %v8310_v51  ;;  %v2703_v44 = vmax.f32 %v2671_v56, 0.0  ;;  %v2027_v14 = vmul.f32 %v7870_v29, %v1933_v19  ;;  %v8368_v43 = vmul.f32 %v8319_v52, %v3469_v13  ;;  %v2947_v39 = vadd.f32 %v2915_v18, %v2849_v30  ;;  %v11738_v56 = vld [vmem:[#allocation42_spill] sm:$0xff]  ;;  %v8381_v19 = vld [vmem:[%s11365_s5 + $0x5] ss:$0 sm:$0xff] }
 0x27b   : > { %11730 = vst [vmem:[#allocation13_spill] sm:$0xff] %v8313_v59  ;;  %v2642_v47 = vmul.f32 %v8097_v55, %v2606_v58  ;;  %v2602_v33 = vadd.f32 %v2570_v10, %v8215_v26  ;;  %v3013_v5 = vmul.f32 %v8358_v7, %v11738_v56  ;;  %v2919_v49 = vmul.f32 %v8300_v41, %v3469_v13  ;;  %v11739_v58 = vld [vmem:[#allocation50_spill] sm:$0xff]  ;;  %v8389_v18 = vld [vmem:[%s11365_s5 + $0x8] ss:$0 sm:$0xff] }
 0x27c   : > { %11732 = vst [vmem:[#allocation16_spill] sm:$0xff] %v8322_v62  ;;  %v2221_v31 = vadd.f32 %v11739_v58, %v2027_v14  ;;  %v2948_v0 = vadd.f32 %v2916_v6, %v2850_v54  ;;  %v8393_v10 = vmul.f32 %v8342_v48, %v8283_v24  ;;  %v8399_v54 = vmul.f32 %v8342_v48, %v3469_v13 }
 0x27d   : > { %2793 = vst.msk [vmem:[#allocation2 + $0x91] sm:$0xff] %vm908_vm0, %v2707_v21  ;;  %v2853_v21 = vmul.f32 %v8281_v36, %v3371_v3  ;;  %v2678_v12 = vadd.f32 %v8122_v45, %v2642_v47  ;;  %v2638_v26 = vmul.f32 %v8097_v55, %v2602_v33  ;;  %v8396_v47 = vmul.f32 %v8332_v4, %v3371_v3 }
 0x27e   : > { %11735 = vst [vmem:[#allocation99_spill] sm:$0xff] %v8336_v53  ;;  %v2434_v30 = vpop.permute.xlu1 %2433  ;;  %v8405_v56 = vmul.f32 %v8381_v19, %v8285_v25  ;;  %v8408_v34 = vadd.f32 %v3013_v5, %v2947_v39  ;;  %v8412_v3 = vmul.f32 %v8300_v41, %v8283_v24  ;;  %v8416_v13 = vmul.f32 %v8358_v7, %v8285_v25  ;;  %v3471_v39 = vld [vmem:[#allocation2 + $0x49] sm:$0xff] }
 0x27f   : > { %11737 = vst [vmem:[#allocation94_spill] sm:$0xff] %v8352_v16  ;;  %v11740_v16 = vld [vmem:[#allocation43_spill] sm:$0xff]  ;;  %v2710_v6 = vmax.f32 %v2678_v12, 0.0  ;;  %v2561_v33 = vmul.f32 %v8027_v15, %v2434_v30  ;;  %v2674_v58 = vadd.f32 %v8122_v45, %v2638_v26  ;;  %v3373_v26 = vld [vmem:[#allocation2 + $0x48] sm:$0xff]  ;;  %v8423_v5 = vadd.f32 %v2919_v49, %v2853_v21 }
 0x280   : > { %5303 = vst.msk [vmem:[#allocation2 + $0x70] sm:$0x3] %vm911_vm2, %v11727_v8  ;;  %v2482_v30 = vpop.permute.xlu2 %2481  ;;  %v8428_v25 = vmul.f32 %v8319_v52, %v8347_v1  ;;  %v8439_v21 = vmul.f32 %v8342_v48, %v8347_v1  ;;  %v8462_v59 = vmul.f32 %v8332_v4, %v3373_v26  ;;  %v8465_v51 = vmul.f32 %v8342_v48, %v3471_v39 }
 0x281   : > { %2789 = vst.msk [vmem:[#allocation2 + $0x61] sm:$0xff] %vm908_vm0, %v2703_v44  ;;  %v3014_v44 = vmul.f32 %v8358_v7, %v11740_v16  ;;  %v11741_v16 = vld [vmem:[#allocation129_spill] sm:$0xff]  ;;  %v1948_v53 = vpop.permute.xlu0 %1947  ;;  %v2706_v24 = vmax.f32 %v2674_v58, 0.0  ;;  %v2573_v62 = vmul.f32 %v8027_v15, %v2482_v30 }
 0x282   : > { %v2415_v14 = vadd.f32 %v11741_v16, %v2221_v31  ;;  %2796 = vst.msk [vmem:[#allocation2 + $0xb1] sm:$0xff] %vm908_vm0, %v2710_v6  ;;  %v2593_v31 = vadd.f32 %v2561_v33, %v8218_v35  ;;  %v8444_v6 = vmul.f32 %v8305_v46, %v3373_v26  ;;  %v11746_v30 = vld [vmem:[#allocation53_spill] sm:$0xff] }
 0x283   : > { %v8421_v16 = vadd.f32 %v3014_v44, %v2948_v0  ;;  %11742 = vst [vmem:[#allocation96_spill] sm:$0xff] %v8423_v5  ;;  %v2030_v0 = vmul.f32 %v7870_v29, %v1948_v53  ;;  %v2605_v49 = vadd.f32 %v2573_v62, %v8221_v27  ;;  %v2855_v53 = vmul.f32 %v8281_v36, %v3373_v26 }
 0x284   : > { %v2609_v12 = vadd.f32 %v8113_v11, %v2415_v14  ;;  %11743 = vst [vmem:[#allocation101_spill] sm:$0xff] %v8428_v25  ;;  %v8432_v11 = vmul.f32 %v8389_v18, %v8349_v61  ;;  %v2629_v44 = vmul.f32 %v8097_v55, %v2593_v31  ;;  %v8456_v27 = vmul.f32 %v8319_v52, %v3471_v39 }
 0x285   : > { %11745 = vst [vmem:[#allocation100_spill] sm:$0xff] %v8439_v21  ;;  %v2641_v21 = vmul.f32 %v8097_v55, %v2605_v49  ;;  %v11752_v49 = vld [vmem:[#allocation130_spill] sm:$0xff] }
 0x286   : > { %11744 = vst [vmem:[#allocation103_spill] sm:$0xff] %v8432_v11  ;;  %v2645_v35 = vmul.f32 %v8097_v55, %v2609_v12  ;;  %v2921_v12 = vmul.f32 %v8300_v41, %v3471_v39  ;;  %v2224_v11 = vadd.f32 %v11746_v30, %v2030_v0  ;;  %v2446_v25 = vpop.permute.xlu1 %2445  ;;  %v8471_v0 = vld [vmem:[#allocation2 + $0x90] sm:$0xff] }
 0x287   : > { %2792 = vst.msk [vmem:[#allocation2 + $0x81] sm:$0xff] %vm908_vm0, %v2706_v24  ;;  %v2665_v24 = vadd.f32 %v8122_v45, %v2629_v44  ;;  %v8473_v44 = vld [vmem:[#allocation2 + $0x91] sm:$0xff]  ;;  %v2564_v26 = vmul.f32 %v8027_v15, %v2446_v25  ;;  %v2677_v39 = vadd.f32 %v8122_v45, %v2641_v21  ;;  %v8493_v25 = vmul.f32 %v8305_v46, %v8471_v0 }
 0x288   : > { %v3375_v14 = vld [vmem:[#allocation2 + $0x60] sm:$0xff]  ;;  %v2681_v31 = vadd.f32 %v8122_v45, %v2645_v35  ;;  %v3376_v62 = vld [vmem:[#allocation2 + $0x68] sm:$0xff]  ;;  %11747 = vst [vmem:[#allocation105_spill] sm:$0xff] %v8462_v59  ;;  %v8469_v35 = vmul.f32 %v8381_v19, %v8349_v61  ;;  %v2418_v23 = vadd.f32 %v11752_v49, %v2224_v11  ;;  %v8486_v59 = vmul.f32 %v8358_v7, %v8349_v61 }
 0x289   : > { %v8446_v33 = vld [vmem:[#allocation2 + $0x61] sm:$0xff]  ;;  %11748 = vst [vmem:[#allocation107_spill] sm:$0xff] %v8465_v51  ;;  %v2697_v5 = vmax.f32 %v2665_v24, 0.0  ;;  %v8480_v51 = vadd.f32 %v2921_v12, %v2855_v53  ;;  %v2596_v11 = vadd.f32 %v2564_v26, %v8225_v28  ;;  %v2494_v24 = vpop.permute.xlu2 %2493  ;;  %v8497_v21 = vmul.f32 %v8319_v52, %v8473_v44 }
 0x28a   : > { %v8448_v58 = vld [vmem:[#allocation2 + $0x62] sm:$0xff]  ;;  %11749 = vst [vmem:[#allocation102_spill] sm:$0xff] %v8469_v35  ;;  %v2713_v30 = vmax.f32 %v2681_v31, 0.0  ;;  %v2924_v35 = vmul.f32 %v8300_v41, %v8347_v1  ;;  %v2612_v31 = vadd.f32 %v8145_v60, %v2418_v23  ;;  %v1963_v1 = vpop.permute.xlu0 %1962  ;;  %v2709_v61 = vmax.f32 %v2677_v39, 0.0 }
 0x28b   : > { %5301 = vst.msk [vmem:[#allocation2 + $0x60] sm:$0xff] %vm908_vm0, %v11727_v8  ;;  %v2576_v53 = vmul.f32 %v8027_v15, %v2494_v24  ;;  %v2857_v12 = vmul.f32 %v8281_v36, %v3375_v14  ;;  %v2923_v60 = vmul.f32 %v8300_v41, %v8446_v33  ;;  %v2033_v23 = vmul.f32 %v7870_v29, %v1963_v1 }
 0x28c   : > { %11750 = vst [vmem:[#allocation104_spill] sm:$0xff] %v8471_v0  ;;  %v2648_v28 = vmul.f32 %v8097_v55, %v2612_v31  ;;  %v8509_v49 = vmul.f32 %v8332_v4, %v8471_v0  ;;  %v8514_v26 = vmul.f32 %v8305_v46, %v3375_v14  ;;  %v8518_v39 = vmul.f32 %v8319_v52, %v8446_v33 }
 0x28d   : > { %11751 = vst [vmem:[#allocation106_spill] sm:$0xff] %v8473_v44  ;;  %v8522_v31 = vmul.f32 %v8389_v18, %v8448_v58 }
 0x28e   : > { %5302 = vst.msk [vmem:[#allocation2 + $0x68] sm:$0xff] %vm908_vm0, %v11727_v8  ;;  %v8526_v24 = vld [vmem:[#allocation2 + $0x82] sm:$0xff]  ;;  %v2684_v1 = vadd.f32 %v8122_v45, %v2648_v28  ;;  %v2454_v44 = vpop.permute.xlu1 %2453 }
 0x28f   : > { %11753 = vst [vmem:[#allocation108_spill] sm:$0xff] %v8480_v51 }
 0x290   : > { %2799 = vst.msk [vmem:[#allocation2 + $0xd9] sm:$0xff] %vm908_vm0, %v2713_v30  ;;  %v2632_v30 = vmul.f32 %v8097_v55, %v2596_v11  ;;  %v8524_v11 = vld [vmem:[#allocation2 + $0x81] sm:$0xff]  ;;  %v2716_v28 = vmax.f32 %v2684_v1, 0.0 }
 0x291   : > { %11754 = vst [vmem:[#allocation110_spill] sm:$0xff] %v8493_v25  ;;  %v8539_v25 = vmul.f32 %v8332_v4, %v3375_v14  ;;  %v8553_v14 = vmul.f32 %v8332_v4, %v3376_v62 }
 0x292   : > { %11755 = vst [vmem:[#allocation109_spill] sm:$0xff] %v8497_v21  ;;  %v8536_v21 = vmul.f32 %v8305_v46, %v3376_v62  ;;  %v1978_v1 = vpop.permute.xlu0 %1977 }
 0x293   : > { %2783 = vst.msk [vmem:[#allocation2 + $0x19] sm:$0xff] %vm908_vm0, %v2697_v5  ;;  %v2608_v5 = vadd.f32 %v2576_v53, %v8228_v20  ;;  %v2668_v20 = vadd.f32 %v8122_v45, %v2632_v30  ;;  %v2858_v53 = vmul.f32 %v8281_v36, %v3376_v62  ;;  %v2566_v30 = vmul.f32 %v8027_v15, %v2454_v44  ;;  %v2506_v44 = vpop.permute.xlu2 %2505 }
 0x294   : > { %11756 = vst [vmem:[#allocation112_spill] sm:$0xff] %v8509_v49  ;;  %v2579_v62 = vmul.f32 %v8027_v15, %v2506_v44  ;;  %v11766_v44 = vld [vmem:[#allocation61_spill] sm:$0xff] }
 0x295   : > { %2795 = vst.msk [vmem:[#allocation2 + $0xa9] sm:$0xff] %vm908_vm0, %v2709_v61  ;;  %v11760_v61 = vld [vmem:[#allocation56_spill] sm:$0xff]  ;;  %v2644_v49 = vmul.f32 %v8097_v55, %v2608_v5  ;;  %v8550_v5 = vmul.f32 %v8381_v19, %v8448_v58 }
 0x296   : > { %11757 = vst [vmem:[#allocation114_spill] sm:$0xff] %v8514_v26  ;;  %v2227_v0 = vadd.f32 %v11760_v61, %v2033_v23  ;;  %v2700_v61 = vmax.f32 %v2668_v20, 0.0  ;;  %v8546_v26 = vmul.f32 %v8342_v48, %v8446_v33  ;;  %v3021_v33 = vmul.f32 %v8358_v7, %v8448_v58 }
 0x297   : > { %11758 = vst [vmem:[#allocation115_spill] sm:$0xff] %v8518_v39  ;;  %v11761_v39 = vld [vmem:[#allocation6_spill] sm:$0xff]  ;;  %v2680_v51 = vadd.f32 %v8122_v45, %v2644_v49 }
 0x298   : > { %11759 = vst [vmem:[#allocation111_spill] sm:$0xff] %v8522_v31  ;;  %v2955_v31 = vadd.f32 %v2923_v60, %v2857_v12  ;;  %v2421_v23 = vadd.f32 %v11761_v39, %v2227_v0  ;;  %v2598_v12 = vadd.f32 %v2566_v30, %v8232_v9  ;;  %v2956_v39 = vadd.f32 %v2924_v35, %v2858_v53 }
 0x299   : > { %5306 = vst.msk [vmem:[#allocation2 + $0x88] sm:$0x3] %vm911_vm2, %v11727_v8  ;;  %v2712_v20 = vmax.f32 %v2680_v51, 0.0  ;;  %v2611_v35 = vadd.f32 %v2579_v62, %v8240_v32 }
 0x29a   : > { %11762 = vst [vmem:[#allocation117_spill] sm:$0xff] %v8550_v5  ;;  %v2615_v0 = vadd.f32 %v8155_v2, %v2421_v23  ;;  %v3077_v60 = vld [vmem:[#allocation2 + $0x18] sm:$0xff]  ;;  %v3078_v5 = vld [vmem:[#allocation2 + $0x20] sm:$0xff]  ;;  %v8565_v2 = vmul.f32 %v8319_v52, %v8524_v11  ;;  %v2036_v23 = vmul.f32 %v7870_v29, %v1978_v1  ;;  %v2634_v58 = vmul.f32 %v8097_v55, %v2598_v12 }
 0x29b   : > { %11763 = vst [vmem:[#allocation118_spill] sm:$0xff] %v8553_v14  ;;  %v3175_v49 = vld [vmem:[#allocation2 + $0x19] sm:$0xff]  ;;  %v3111_v14 = vmul.f32 %v8332_v4, %v3077_v60  ;;  %v8572_v51 = vadd.f32 %v3021_v33, %v2955_v31  ;;  %v3112_v30 = vmul.f32 %v8332_v4, %v3078_v5  ;;  %v8585_v31 = vadd.f32 %v8486_v59, %v2956_v39  ;;  %v2466_v33 = vpop.permute.xlu1 %2465 }
 0x29c   : > { %2802 = vst.msk [vmem:[#allocation2 + $0xf9] sm:$0xff] %vm908_vm0, %v2716_v28  ;;  %v3273_v28 = vld [vmem:[#allocation2 + $0x1a] sm:$0xff]  ;;  %v2651_v9 = vmul.f32 %v8097_v55, %v2615_v0  ;;  %v2230_v1 = vadd.f32 %v11766_v44, %v2036_v23  ;;  %v2670_v12 = vadd.f32 %v8122_v45, %v2634_v58  ;;  %v2647_v32 = vmul.f32 %v8097_v55, %v2611_v35 }
 0x29d   : > { %2786 = vst.msk [vmem:[#allocation2 + $0x39] sm:$0xff] %vm908_vm0, %v2700_v61  ;;  %v3143_v53 = vadd.f32 %v3111_v14, %v8408_v34  ;;  %v3209_v61 = vmul.f32 %v8342_v48, %v3175_v49  ;;  %v3307_v14 = vmul.f32 %v8381_v19, %v3273_v28  ;;  %v2569_v58 = vmul.f32 %v8027_v15, %v2466_v33 }
 0x29e   : > { %11764 = vst [vmem:[#allocation120_spill] sm:$0xff] %v8565_v2  ;;  %v2687_v0 = vadd.f32 %v8122_v45, %v2651_v9  ;;  %v11767_v9 = vld [vmem:[#allocation60_spill] sm:$0xff]  ;;  %v2702_v23 = vmax.f32 %v2670_v12, 0.0  ;;  %v2683_v44 = vadd.f32 %v8122_v45, %v2647_v32  ;;  %v2851_v39 = vmul.f32 %v8281_v36, %v3077_v60 }
 0x29f   : > { %5292 = vst.msk [vmem:[#allocation2 + $0x18] sm:$0xff] %vm908_vm0, %v11727_v8  ;;  %v3241_v34 = vadd.f32 %v3209_v61, %v3143_v53  ;;  %v2424_v2 = vadd.f32 %v11767_v9, %v2230_v1  ;;  %v2601_v53 = vadd.f32 %v2569_v58, %v8243_v40  ;;  %v3015_v1 = vmul.f32 %v8358_v7, %v3273_v28 }
 0x2a0   : > { %11765 = vst [vmem:[#allocation36_spill] sm:$0xff] %v8572_v51  ;;  %v2719_v62 = vmax.f32 %v2687_v0, 0.0  ;;  %v2917_v0 = vmul.f32 %v8300_v41, %v3175_v49  ;;  %v2715_v12 = vmax.f32 %v2683_v44, 0.0  ;;  %v2852_v40 = vmul.f32 %v8281_v36, %v3078_v5 }
 0x2a1   : > { %2798 = vst.msk [vmem:[#allocation2 + $0xc9] sm:$0xff] %vm908_vm0, %v2712_v20  ;;  %v3144_v20 = vadd.f32 %v3112_v30, %v8421_v16  ;;  %v3339_v51 = vadd.f32 %v3307_v14, %v3241_v34  ;;  %v2618_v35 = vadd.f32 %v8166_v57, %v2424_v2  ;;  %v2518_v16 = vpop.permute.xlu2 %2517  ;;  %v2637_v49 = vmul.f32 %v8097_v55, %v2601_v53  ;;  %v11770_v53 = vld [vmem:[#allocation63_spill] sm:$0xff] }
 0x2a2   : > { %5293 = vst.msk [vmem:[#allocation2 + $0x20] sm:$0xff] %vm908_vm0, %v11727_v8  ;;  %v2582_v60 = vmul.f32 %v8027_v15, %v2518_v16 }
 0x2a3   : > { %v3242_v59 = vadd.f32 %v8393_v10, %v3144_v20  ;;  %2805 = vst.msk [vmem:[#allocation2 + $0x121] sm:$0xff] %vm908_vm0, %v2719_v62  ;;  %v1993_v10 = vpop.permute.xlu0 %1992  ;;  %v3437_v32 = vadd.f32 %v8361_v17, %v3339_v51  ;;  %v2654_v2 = vmul.f32 %v8097_v55, %v2618_v35  ;;  %v11768_v62 = vld [vmem:[#allocation66_spill] sm:$0xff] }
 0x2a4   : > { %v8598_v61 = vld [vmem:[#allocation2 + $0x32] sm:$0xff]  ;;  %2788 = vst.msk [vmem:[#allocation2 + $0x51] sm:$0xff] %vm908_vm0, %v2702_v23  ;;  %v2039_v33 = vmul.f32 %v7870_v29, %v1993_v10  ;;  %v2614_v17 = vadd.f32 %v2582_v60, %v8261_v22  ;;  %v8623_v14 = vld [vmem:[#allocation2 + $0x3a] sm:$0xff]  ;;  %v2673_v23 = vadd.f32 %v8122_v45, %v2637_v49 }
 0x2a5   : > { %v8600_v30 = vld [vmem:[#allocation2 + $0x38] sm:$0xff]  ;;  %v3601_v28 = vmul.f32 %v8389_v18, %v8598_v61  ;;  %5295 = vst.msk [vmem:[#allocation2 + $0x30] sm:$0xff] %vm908_vm0, %v11727_v8  ;;  %v3535_v51 = vadd.f32 %v8368_v43, %v3437_v32  ;;  %v3340_v5 = vadd.f32 %v8405_v56, %v3242_v59  ;;  %v2690_v20 = vadd.f32 %v8122_v45, %v2654_v2  ;;  %v2478_v43 = vpop.permute.xlu1 %2477 }
 0x2a6   : > { %v8607_v57 = vld [vmem:[#allocation2 + $0x39] sm:$0xff]  ;;  %2801 = vst.msk [vmem:[#allocation2 + $0xf1] sm:$0xff] %vm908_vm0, %v2715_v12  ;;  %v3406_v34 = vmul.f32 %v8305_v46, %v8600_v30  ;;  %v2233_v9 = vadd.f32 %v11768_v62, %v2039_v33  ;;  %v2650_v22 = vmul.f32 %v8097_v55, %v2614_v17  ;;  %v2949_v59 = vadd.f32 %v2917_v0, %v2851_v39 }
 0x2a7   : > { %v3504_v58 = vmul.f32 %v8319_v52, %v8607_v57  ;;  %5297 = vst.msk [vmem:[#allocation2 + $0x40] sm:$0x3] %vm911_vm2, %v11727_v8  ;;  %v8633_v56 = vadd.f32 %v3601_v28, %v3535_v51  ;;  %v2722_v35 = vmax.f32 %v2690_v20, 0.0  ;;  %v2705_v10 = vmax.f32 %v2673_v23, 0.0 }
 0x2a8   : > { %v3438_v44 = vadd.f32 %v3406_v34, %v3340_v5  ;;  %5296 = vst.msk [vmem:[#allocation2 + $0x38] sm:$0xff] %vm908_vm0, %v11727_v8  ;;  %v2427_v16 = vadd.f32 %v11770_v53, %v2233_v9  ;;  %v2572_v12 = vmul.f32 %v8027_v15, %v2478_v43  ;;  %v2686_v60 = vadd.f32 %v8122_v45, %v2650_v22  ;;  %v11772_v43 = vld [vmem:[#allocation70_spill] sm:$0xff] }
 0x2a9   : > { %11769 = vst [vmem:[#allocation71_spill] sm:$0xff] %v8633_v56  ;;  %3668 = vperm.xlu1 %5894, %v8633_v56   ;;  %v3602_v2 = vmul.f32 %v8389_v18, %v8623_v14  ;;  %v3047_v33 = vadd.f32 %v3015_v1, %v2949_v59  ;;  %v3309_v49 = vmul.f32 %v8381_v19, %v8598_v61  ;;  %v2530_v17 = vpop.permute.xlu2 %2529 }
 0x2aa   : > { %v3536_v32 = vadd.f32 %v3504_v58, %v3438_v44  ;;  %2808 = vst.msk [vmem:[#allocation2 + $0x141] sm:$0xff] %vm908_vm0, %v2722_v35  ;;  %v2621_v39 = vadd.f32 %v8181_v63, %v2427_v16  ;;  %v2604_v0 = vadd.f32 %v2572_v12, %v8264_v37  ;;  %v2950_v51 = vadd.f32 %v8412_v3, %v2852_v40 }
 0x2ab   : > { %v8648_v28 = vld [vmem:[#allocation2 + $0x4a] sm:$0xff]  ;;  %2791 = vst.msk [vmem:[#allocation2 + $0x79] sm:$0xff] %vm908_vm0, %v2705_v10  ;;  %v2008_v5 = vpop.permute.xlu0 %2007  ;;  %v2718_v34 = vmax.f32 %v2686_v60, 0.0  ;;  %v3145_v1 = vadd.f32 %v8396_v47, %v3047_v33  ;;  %v3114_v63 = vmul.f32 %v8332_v4, %v8600_v30  ;;  %v2585_v23 = vmul.f32 %v8027_v15, %v2530_v17 }
 0x2ac   : > { %v8652_v20 = vadd.f32 %v3602_v2, %v3536_v32  ;;  %v2657_v37 = vmul.f32 %v8097_v55, %v2621_v39  ;;  %v2042_v62 = vmul.f32 %v7870_v29, %v2008_v5  ;;  %v2640_v9 = vmul.f32 %v8097_v55, %v2604_v0  ;;  %5298 = vst.msk [vmem:[#allocation2 + $0x48] sm:$0xff] %vm908_vm0, %v11727_v8  ;;  %v8669_v58 = vld [vmem:[#allocation2 + $0x51] sm:$0xff]  ;;  %v8687_v60 = vld [vmem:[#allocation2 + $0xa8] sm:$0xff] }
 0x2ad   : > { %2804 = vst.msk [vmem:[#allocation2 + $0x111] sm:$0xff] %vm908_vm0, %v2718_v34  ;;  %v3243_v47 = vadd.f32 %v8399_v54, %v3145_v1  ;;  %v3603_v3 = vmul.f32 %v8389_v18, %v8648_v28  ;;  %v3048_v40 = vadd.f32 %v8416_v13, %v2950_v51  ;;  %v8671_v29 = vld [vmem:[#allocation2 + $0x52] sm:$0xff]  ;;  %v2617_v35 = vadd.f32 %v2585_v23, %v8270_v42  ;;  %v2490_v16 = vpop.permute.xlu1 %2489  ;;  %v8689_v42 = vld [vmem:[#allocation2 + $0xa9] sm:$0xff] }
 0x2ae   : > { %11771 = vst [vmem:[#allocation126_spill] sm:$0xff] %v8652_v20  ;;  %3673 = vperm.xlu2 %5895, %v8652_v20   ;;  %v2693_v22 = vadd.f32 %v8122_v45, %v2657_v37  ;;  %v2236_v44 = vadd.f32 %v11772_v43, %v2042_v62  ;;  %v2676_v59 = vadd.f32 %v8122_v45, %v2640_v9  ;;  %v8677_v53 = vld [vmem:[#allocation2 + $0x50] sm:$0xff]  ;;  %v11773_v33 = vld [vmem:[#allocation65_spill] sm:$0xff] }
 0x2af   : > { %5300 = vst.msk [vmem:[#allocation2 + $0x58] sm:$0x3] %vm911_vm2, %v11727_v8  ;;  %v3341_v54 = vadd.f32 %v3309_v49, %v3243_v47  ;;  %v3146_v13 = vadd.f32 %v3114_v63, %v3048_v40  ;;  %v3212_v10 = vmul.f32 %v8342_v48, %v8607_v57  ;;  %v3310_v12 = vmul.f32 %v8381_v19, %v8623_v14  ;;  %v8691_v32 = vld [vmem:[#allocation2 + $0xaa] sm:$0xff]  ;;  %v8697_v51 = vld [vmem:[#allocation2 + $0xb2] sm:$0xff] }
 0x2b0   : > { %5299 = vst.msk [vmem:[#allocation2 + $0x50] sm:$0xff] %vm908_vm0, %v11727_v8  ;;  %v2725_v2 = vmax.f32 %v2693_v22, 0.0  ;;  %v2430_v39 = vadd.f32 %v11773_v33, %v2236_v44  ;;  %v2708_v0 = vmax.f32 %v2676_v59, 0.0  ;;  %v2653_v49 = vmul.f32 %v8097_v55, %v2617_v35  ;;  %v8695_v17 = vld [vmem:[#allocation2 + $0xb1] sm:$0xff] }
 0x2b1   : > { %5310 = vst.msk [vmem:[#allocation2 + $0xa8] sm:$0xff] %vm908_vm0, %v11727_v8  ;;  %v3439_v5 = vadd.f32 %v8444_v6, %v3341_v54  ;;  %v2575_v34 = vmul.f32 %v8027_v15, %v2490_v16  ;;  %v3244_v1 = vadd.f32 %v3212_v10, %v3146_v13  ;;  %v3408_v63 = vmul.f32 %v8305_v46, %v8677_v53  ;;  %v2542_v23 = vpop.permute.xlu2 %2541  ;;  %v11774_v54 = vld [vmem:[#allocation96_spill] sm:$0xff] }
 0x2b2   : > { %5312 = vst.msk [vmem:[#allocation2 + $0xb8] sm:$0x3] %vm911_vm2, %v11727_v8  ;;  %v2624_v37 = vadd.f32 %v8200_v50, %v2430_v39  ;;  %v2689_v62 = vadd.f32 %v8122_v45, %v2653_v49  ;;  %v3506_v9 = vmul.f32 %v8319_v52, %v8669_v58  ;;  %v3017_v6 = vmul.f32 %v8358_v7, %v8598_v61  ;;  %v8719_v50 = vld [vmem:[#allocation2 + $0x78] sm:$0xff]  ;;  %v11775_v39 = vld [vmem:[#allocation105_spill] sm:$0xff]  ;;  %v11776_v49 = vld [vmem:[#allocation74_spill] sm:$0xff] }
 0x2b3   : > { %2811 = vst.msk [vmem:[#allocation2 + $0x169] sm:$0xff] %vm908_vm0, %v2725_v2  ;;  %v3537_v47 = vadd.f32 %v8456_v27, %v3439_v5  ;;  %v2607_v40 = vadd.f32 %v2575_v34, %v8290_v38  ;;  %v3342_v22 = vadd.f32 %v3310_v12, %v3244_v1  ;;  %v3311_v43 = vmul.f32 %v8381_v19, %v8648_v28  ;;  %v8721_v44 = vld [vmem:[#allocation2 + $0x79] sm:$0xff] }
 0x2b4   : > { %2794 = vst.msk [vmem:[#allocation2 + $0x99] sm:$0xff] %vm908_vm0, %v2708_v0  ;;  %v8723_v59 = vld [vmem:[#allocation2 + $0x7a] sm:$0xff]  ;;  %v2660_v35 = vmul.f32 %v8097_v55, %v2624_v37  ;;  %v2721_v61 = vmax.f32 %v2689_v62, 0.0  ;;  %v3049_v16 = vadd.f32 %v3017_v6, %v11774_v54  ;;  %v2588_v13 = vmul.f32 %v8027_v15, %v2542_v23  ;;  %v8751_v62 = vld [vmem:[#allocation2 + $0xb0] sm:$0xff] }
 0x2b5   : > { %v8728_v27 = vld [vmem:[#allocation2 + $0x80] sm:$0xff]  ;;  %5304 = vst.msk [vmem:[#allocation2 + $0x78] sm:$0xff] %vm908_vm0, %v11727_v8  ;;  %v8732_v38 = vadd.f32 %v3603_v3, %v3537_v47  ;;  %v2643_v10 = vmul.f32 %v8097_v55, %v2607_v40  ;;  %v3440_v12 = vadd.f32 %v3408_v63, %v3342_v22  ;;  %v2854_v2 = vmul.f32 %v8281_v36, %v8600_v30  ;;  %v2502_v63 = vpop.permute.xlu1 %2501  ;;  %v11777_v23 = vld [vmem:[#allocation107_spill] sm:$0xff] }
 0x2b6   : > { %5305 = vst.msk [vmem:[#allocation2 + $0x80] sm:$0xff] %vm908_vm0, %v11727_v8  ;;  %v2696_v33 = vadd.f32 %v8122_v45, %v2660_v35  ;;  %v3147_v0 = vadd.f32 %v11775_v39, %v3049_v16  ;;  %v2620_v5 = vadd.f32 %v2588_v13, %v11776_v49  ;;  %v2920_v3 = vmul.f32 %v8300_v41, %v8607_v57  ;;  %v11779_v16 = vld [vmem:[#allocation11_spill] sm:$0xff] }
 0x2b7   : > { %2807 = vst.msk [vmem:[#allocation2 + $0x139] sm:$0xff] %vm908_vm0, %v2721_v61  ;;  %3678 = vperm.xlu0 %5893, %v8732_v38   ;;  %v2679_v34 = vadd.f32 %v8122_v45, %v2643_v10  ;;  %v3538_v1 = vadd.f32 %v3506_v9, %v3440_v12  ;;  %v3604_v30 = vmul.f32 %v8389_v18, %v8671_v29 }
 0x2b8   : > { %v3018_v37 = vmul.f32 %v8358_v7, %v8623_v14  ;;  %v2728_v6 = vmax.f32 %v2696_v33, 0.0  ;;  %v3245_v47 = vadd.f32 %v11777_v23, %v3147_v0  ;;  %v2656_v40 = vmul.f32 %v8097_v55, %v2620_v5  ;;  %5311 = vst.msk [vmem:[#allocation2 + $0xb0] sm:$0xff] %vm908_vm0, %v11727_v8  ;;  %v11780_v33 = vld [vmem:[#allocation114_spill] sm:$0xff]  ;;  %v11782_v23 = vld [vmem:[#allocation115_spill] sm:$0xff] }
 0x2b9   : > { %v2578_v57 = vmul.f32 %v8027_v15, %v2502_v63  ;;  %v2711_v9 = vmax.f32 %v2679_v34, 0.0  ;;  %v8758_v22 = vadd.f32 %v3604_v30, %v3538_v1  ;;  %v2952_v35 = vadd.f32 %v2920_v3, %v2854_v2  ;;  %v2554_v3 = vpop.permute.xlu2 %2553  ;;  %v11781_v63 = vld [vmem:[#allocation108_spill] sm:$0xff] }
 0x2ba   : > { %v3116_v61 = vmul.f32 %v8332_v4, %v8677_v53  ;;  %2814 = vst.msk [vmem:[#allocation2 + $0x189] sm:$0xff] %vm908_vm0, %v2728_v6  ;;  %v3343_v14 = vadd.f32 %v3311_v43, %v3245_v47  ;;  %v2692_v54 = vadd.f32 %v8122_v45, %v2656_v40  ;;  %v8767_v15 = vmul.f32 %v8342_v48, %v8524_v11 }
 0x2bb   : > { %11778 = vst [vmem:[#allocation121_spill] sm:$0xff] %v8758_v22  ;;  %v2610_v13 = vadd.f32 %v2578_v57, %v11779_v16  ;;  %3683 = vperm.xlu1 %5894, %v8758_v22   ;;  %v3050_v10 = vadd.f32 %v3018_v37, %v2952_v35  ;;  %v3019_v12 = vmul.f32 %v8358_v7, %v8648_v28  ;;  %v8773_v2 = vld [vmem:[#allocation2 + $0x92] sm:$0xff]  ;;  %v8785_v1 = vld [vmem:[#allocation2 + $0x9a] sm:$0xff] }
 0x2bc   : > { %2797 = vst.msk [vmem:[#allocation2 + $0xc1] sm:$0xff] %vm908_vm0, %v2711_v9  ;;  %v8777_v43 = vmul.f32 %v8381_v19, %v8526_v24  ;;  %v3441_v39 = vadd.f32 %v11780_v33, %v3343_v14  ;;  %v2724_v0 = vmax.f32 %v2692_v54, 0.0  ;;  %v3214_v5 = vmul.f32 %v8342_v48, %v8669_v58  ;;  %v8783_v34 = vld [vmem:[#allocation2 + $0x99] sm:$0xff]  ;;  %v8811_v54 = vld [vmem:[%s11362_s2 + $0x3] ss:$0 sm:$0xff] }
 0x2bd   : > { %v2646_v49 = vmul.f32 %v8097_v55, %v2610_v13  ;;  %5307 = vst.msk [vmem:[#allocation2 + $0x90] sm:$0xff] %vm908_vm0, %v11727_v8  ;;  %v3148_v28 = vadd.f32 %v3116_v61, %v3050_v10  ;;  %v3312_v30 = vmul.f32 %v8381_v19, %v8671_v29  ;;  %v3051_v37 = vadd.f32 %v3019_v12, %v11781_v63  ;;  %v8803_v35 = vld [vmem:[#allocation2 + $0x98] sm:$0xff]  ;;  %v2514_v13 = vpop.permute.xlu1 %2513 }
 0x2be   : > { %v2856_v6 = vmul.f32 %v8281_v36, %v8677_v53  ;;  %5309 = vst.msk [vmem:[#allocation2 + $0xa0] sm:$0x3] %vm911_vm2, %v11727_v8  ;;  %v3539_v47 = vadd.f32 %v11782_v23, %v3441_v39  ;;  %v3411_v57 = vmul.f32 %v8305_v46, %v8719_v50  ;;  %v2922_v9 = vmul.f32 %v8300_v41, %v8669_v58  ;;  %v11783_v58 = vld [vmem:[#allocation111_spill] sm:$0xff] }
 0x2bf   : > { %2810 = vst.msk [vmem:[#allocation2 + $0x159] sm:$0xff] %vm908_vm0, %v2724_v0  ;;  %v2682_v40 = vadd.f32 %v8122_v45, %v2646_v49  ;;  %v3246_v61 = vadd.f32 %v3214_v5, %v3148_v28  ;;  %v3149_v53 = vadd.f32 %v8539_v25, %v3051_v37  ;;  %v3020_v14 = vmul.f32 %v8358_v7, %v8671_v29  ;;  %v11785_v0 = vld [vmem:[#allocation13_spill] sm:$0xff]  ;;  %v11786_v28 = vld [vmem:[#allocation16_spill] sm:$0xff] }
 0x2c0   : > { %v2591_v16 = vmul.f32 %v8811_v54, %v2554_v3  ;;  %5308 = vst.msk [vmem:[#allocation2 + $0x98] sm:$0xff] %vm908_vm0, %v11727_v8  ;;  %v8817_v10 = vadd.f32 %v11783_v58, %v3539_v47  ;;  %v2954_v33 = vadd.f32 %v2922_v9, %v2856_v6  ;;  %v2581_v25 = vmul.f32 %v8811_v54, %v2514_v13  ;;  %v11787_v47 = vld [vmem:[#allocation117_spill] sm:$0xff] }
 0x2c1   : > { %v2714_v12 = vmax.f32 %v2682_v40, 0.0  ;;  %v3344_v39 = vadd.f32 %v3312_v30, %v3246_v61  ;;  %v3247_v29 = vadd.f32 %v8546_v26, %v3149_v53  ;;  %v3119_v5 = vmul.f32 %v8332_v4, %v8719_v50  ;;  %v11788_v61 = vld [vmem:[#allocation36_spill] sm:$0xff] }
 0x2c2   : > { %11784 = vst [vmem:[#allocation123_spill] sm:$0xff] %v8817_v10  ;;  %v2623_v49 = vadd.f32 %v2591_v16, %v11785_v0  ;;  %3688 = vperm.xlu2 %5895, %v8817_v10   ;;  %v3052_v3 = vadd.f32 %v3020_v14, %v2954_v33  ;;  %v2613_v63 = vadd.f32 %v2581_v25, %v11786_v28  ;;  %v11789_v16 = vld [vmem:[#allocation118_spill] sm:$0xff]  ;;  %v11791_v28 = vld [vmem:[#allocation100_spill] sm:$0xff] }
 0x2c3   : > { %2800 = vst.msk [vmem:[#allocation2 + $0xe1] sm:$0xff] %vm908_vm0, %v2714_v12  ;;  %v3217_v37 = vmul.f32 %v8342_v48, %v8721_v44  ;;  %v8829_v6 = vld [vmem:[#allocation2 + $0xc0] sm:$0xff]  ;;  %v3442_v23 = vadd.f32 %v8536_v21, %v3344_v39  ;;  %v3345_v40 = vadd.f32 %v11787_v47, %v3247_v29  ;;  %v3151_v53 = vadd.f32 %v3119_v5, %v11788_v61  ;;  %v11790_v21 = vld [vmem:[#allocation101_spill] sm:$0xff]  ;;  %v11794_v61 = vld [vmem:[#allocation102_spill] sm:$0xff] }
 0x2c4   : > { %v8831_v30 = vld [vmem:[#allocation2 + $0xc1] sm:$0xff]  ;;  %v2659_v9 = vmul.f32 %v8097_v55, %v2623_v49  ;;  %v3509_v14 = vmul.f32 %v8319_v52, %v8721_v44  ;;  %v3150_v13 = vadd.f32 %v11789_v16, %v3052_v3  ;;  %v2649_v58 = vmul.f32 %v8097_v55, %v2613_v63  ;;  %v8849_v0 = vld [vmem:[#allocation2 + $0xc9] sm:$0xff] }
 0x2c5   : > { %v8833_v26 = vld [vmem:[#allocation2 + $0xc2] sm:$0xff]  ;;  %v3315_v12 = vmul.f32 %v8381_v19, %v8723_v59  ;;  %v3540_v33 = vadd.f32 %v11790_v21, %v3442_v23  ;;  %v3443_v25 = vadd.f32 %v3411_v57, %v3345_v40  ;;  %v3249_v29 = vadd.f32 %v3217_v37, %v3151_v53  ;;  %v8851_v49 = vld [vmem:[#allocation2 + $0xca] sm:$0xff]  ;;  %v11792_v57 = vld [vmem:[#allocation103_spill] sm:$0xff] }
 0x2c6   : > { %5313 = vst.msk [vmem:[#allocation2 + $0xc0] sm:$0xff] %vm908_vm0, %v11727_v8  ;;  %v2695_v39 = vadd.f32 %v8122_v45, %v2659_v9  ;;  %v3607_v5 = vmul.f32 %v8389_v18, %v8723_v59  ;;  %v3248_v3 = vadd.f32 %v11791_v28, %v3150_v13  ;;  %v2685_v55 = vadd.f32 %v8122_v45, %v2649_v58  ;;  %v8859_v47 = vld [vmem:[#allocation2 + $0xc8] sm:$0xff] }
 0x2c7   : > { %v3120_v63 = vmul.f32 %v8332_v4, %v8728_v27  ;;  %5315 = vst.msk [vmem:[#allocation2 + $0xd0] sm:$0x3] %vm911_vm2, %v11727_v8  ;;  %v8864_v37 = vadd.f32 %v11792_v57, %v3540_v33  ;;  %v3541_v23 = vadd.f32 %v3509_v14, %v3443_v25  ;;  %v3347_v9 = vadd.f32 %v3315_v12, %v3249_v29  ;;  %v11796_v14 = vld [vmem:[#allocation110_spill] sm:$0xff]  ;;  %v2526_v29 = vpop.permute.xlu1 %2525  ;;  %v11797_v28 = vld [vmem:[#allocation109_spill] sm:$0xff]  ;;  %v8893_v57 = vld [vmem:[#allocation2 + $0xd8] sm:$0xff] }
 0x2c8   : > { %v2727_v40 = vmax.f32 %v2695_v39, 0.0  ;;  %5314 = vst.msk [vmem:[#allocation2 + $0xc8] sm:$0xff] %vm908_vm0, %v11727_v8  ;;  %v3346_v53 = vadd.f32 %v11794_v61, %v3248_v3  ;;  %v3412_v45 = vmul.f32 %v8305_v46, %v8728_v27  ;;  %v2717_v16 = vmax.f32 %v2685_v55, 0.0 }
 0x2c9   : > { %11793 = vst [vmem:[#allocation124_spill] sm:$0xff] %v8864_v37  ;;  %v3152_v13 = vadd.f32 %v3120_v63, %v8585_v31  ;;  %3693 = vperm.xlu1 %5894, %v8864_v37   ;;  %v8873_v58 = vadd.f32 %v3607_v5, %v3541_v23  ;;  %v3445_v21 = vadd.f32 %v11796_v14, %v3347_v9  ;;  %v11798_v63 = vld [vmem:[#allocation106_spill] sm:$0xff] }
 0x2ca   : > { %2813 = vst.msk [vmem:[#allocation2 + $0x181] sm:$0xff] %vm908_vm0, %v2727_v40  ;;  %v3414_v12 = vmul.f32 %v8305_v46, %v8803_v35  ;;  %v3444_v33 = vadd.f32 %v3412_v45, %v3346_v53  ;;  %v2859_v39 = vmul.f32 %v8281_v36, %v8719_v50  ;;  %v2925_v31 = vmul.f32 %v8300_v41, %v8721_v44  ;;  %v8895_v50 = vld [vmem:[#allocation2 + $0xd9] sm:$0xff] }
 0x2cb   : > { %11795 = vst [vmem:[#allocation47_spill] sm:$0xff] %v8873_v58  ;;  %v3250_v25 = vadd.f32 %v8767_v15, %v3152_v13  ;;  %3698 = vperm.xlu2 %5895, %v8873_v58   ;;  %v3608_v5 = vmul.f32 %v8389_v18, %v8526_v24  ;;  %v3543_v3 = vadd.f32 %v11797_v28, %v3445_v21  ;;  %v8897_v23 = vld [vmem:[#allocation2 + $0xda] sm:$0xff]  ;;  %v8983_v58 = vld [vmem:[#allocation2 + $0xf1] sm:$0xff] }
 0x2cc   : > { %2803 = vst.msk [vmem:[#allocation2 + $0x109] sm:$0xff] %vm908_vm0, %v2717_v16  ;;  %v3609_v55 = vmul.f32 %v8389_v18, %v8773_v2  ;;  %v3219_v15 = vmul.f32 %v8342_v48, %v11798_v63  ;;  %v11799_v44 = vld [vmem:[#allocation120_spill] sm:$0xff]  ;;  %v2957_v61 = vadd.f32 %v2925_v31, %v2859_v39  ;;  %v3023_v53 = vmul.f32 %v8358_v7, %v8723_v59 }
 0x2cd   : > { %v3542_v40 = vadd.f32 %v11799_v44, %v3444_v33  ;;  %v3348_v9 = vadd.f32 %v8777_v43, %v3250_v25  ;;  %5316 = vst.msk [vmem:[#allocation2 + $0xd8] sm:$0xff] %vm908_vm0, %v11727_v8  ;;  %v3512_v45 = vmul.f32 %v8319_v52, %v8783_v34  ;;  %v3610_v16 = vmul.f32 %v8389_v18, %v8785_v1  ;;  %v8916_v25 = vld [vmem:[#allocation2 + $0xe1] sm:$0xff] }
 0x2ce   : > { %v2584_v13 = vmul.f32 %v8811_v54, %v2526_v29  ;;  %v2860_v14 = vmul.f32 %v8281_v36, %v8728_v27  ;;  %v3055_v33 = vadd.f32 %v3023_v53, %v2957_v61  ;;  %v2926_v59 = vmul.f32 %v8300_v41, %v8524_v11  ;;  %v8918_v39 = vld [vmem:[#allocation2 + $0xe2] sm:$0xff]  ;;  %v11802_v29 = vld [vmem:[#allocation99_spill] sm:$0xff] }
 0x2cf   : > { %v8912_v21 = vadd.f32 %v3608_v5, %v3542_v40  ;;  %v3446_v43 = vadd.f32 %v3414_v12, %v3348_v9  ;;  %v8920_v31 = vadd.f32 %v3609_v55, %v3543_v3  ;;  %v3317_v28 = vmul.f32 %v8381_v19, %v8773_v2  ;;  %5318 = vst.msk [vmem:[#allocation2 + $0xe8] sm:$0x3] %vm911_vm2, %v11727_v8  ;;  %v11803_v12 = vld [vmem:[#allocation112_spill] sm:$0xff]  ;;  %v11804_v9 = vld [vmem:[#allocation9_spill] sm:$0xff] }
 0x2d0   : > { %v2616_v44 = vadd.f32 %v2584_v13, %v11802_v29  ;;  %v3024_v27 = vmul.f32 %v8358_v7, %v8526_v24  ;;  %v3153_v5 = vadd.f32 %v11803_v12, %v3055_v33  ;;  %v2958_v40 = vadd.f32 %v2926_v59, %v2860_v14  ;;  %v5976_v55 = vld [vmem:[%s11362_s2 + $0x2] ss:$0 sm:$0xff] }
 0x2d1   : > { %11800 = vst [vmem:[#allocation75_spill] sm:$0xff] %v8912_v21  ;;  %3703 = vperm.xlu0 %5893, %v8912_v21   ;;  %v3544_v11 = vadd.f32 %v3512_v45, %v3446_v43  ;;  %v3122_v3 = vmul.f32 %v8332_v4, %v8803_v35  ;;  %v8937_v61 = vmul.f32 %v5976_v55, %v11804_v9  ;;  %v8947_v45 = vld [vmem:[%s11363_s3] ss:$0 sm:$0xff] }
 0x2d2   : > { %11801 = vst [vmem:[#allocation57_spill] sm:$0xff] %v8920_v31  ;;  %3708 = vperm.xlu1 %5894, %v8920_v31   ;;  %v3415_v24 = vmul.f32 %v8305_v46, %v8687_v60  ;;  %v3513_v53 = vmul.f32 %v8319_v52, %v8689_v42  ;;  %v2652_v13 = vmul.f32 %v8947_v45, %v2616_v44  ;;  %v8950_v14 = vld [vmem:[#allocation2 + $0xe0] sm:$0xff] }
 0x2d3   : > { %v8952_v43 = vadd.f32 %v3610_v16, %v3544_v11  ;;  %v3251_v33 = vadd.f32 %v3219_v15, %v3153_v5  ;;  %v3056_v59 = vadd.f32 %v3024_v27, %v2958_v40  ;;  %v11806_v29 = vld [vmem:[#allocation104_spill] sm:$0xff]  ;;  %5317 = vst.msk [vmem:[#allocation2 + $0xe0] sm:$0xff] %vm908_vm0, %v11727_v8  ;;  %v3611_v31 = vmul.f32 %v8389_v18, %v8691_v32 }
 0x2d4   : > { %v2861_v12 = vmul.f32 %v8281_v36, %v11806_v29  ;;  %v8956_v55 = vld [vmem:[#allocation2 + $0xf9] sm:$0xff]  ;;  %v2927_v44 = vmul.f32 %v8300_v41, %v11798_v63  ;;  %v3025_v27 = vmul.f32 %v8358_v7, %v8773_v2  ;;  %v3220_v40 = vmul.f32 %v8342_v48, %v8783_v34 }
 0x2d5   : > { %11805 = vst [vmem:[#allocation7_spill] sm:$0xff] %v8952_v43  ;;  %v8958_v9 = vld [vmem:[#allocation2 + $0xfa] sm:$0xff]  ;;  %3713 = vperm.xlu2 %5895, %v8952_v43   ;;  %v3349_v11 = vadd.f32 %v3317_v28, %v3251_v33  ;;  %v3154_v5 = vadd.f32 %v3122_v3, %v3056_v59  ;;  %v3318_v29 = vmul.f32 %v8381_v19, %v8785_v1  ;;  %v8985_v63 = vld [vmem:[#allocation2 + $0xf2] sm:$0xff] }
 0x2d6   : > { %v8967_v16 = vld [vmem:[%s11364_s4] ss:$0 sm:$0xff]  ;;  %5321 = vst.msk [vmem:[#allocation2 + $0x100] sm:$0x3] %vm911_vm2, %v11727_v8  ;;  %v3416_v21 = vmul.f32 %v8305_v46, %v8751_v62  ;;  %v3514_v28 = vmul.f32 %v8319_v52, %v8695_v17  ;;  %v2959_v3 = vadd.f32 %v2927_v44, %v2861_v12  ;;  %v3612_v43 = vmul.f32 %v8389_v18, %v8697_v51 }
 0x2d7   : > { %v2688_v15 = vadd.f32 %v8967_v16, %v2652_v13  ;;  %v8981_v13 = vld [vmem:[#allocation2 + $0xf0] sm:$0xff]  ;;  %v3447_v33 = vadd.f32 %v3415_v24, %v3349_v11  ;;  %v3252_v59 = vadd.f32 %v3220_v40, %v3154_v5  ;;  %v2862_v37 = vmul.f32 %v8281_v36, %v8803_v35  ;;  %v2538_v24 = vpop.permute.xlu1 %2537  ;;  %v9004_v11 = vld [vmem:[#allocation2 + $0xf8] sm:$0xff] }
 0x2d8   : > { %5319 = vst.msk [vmem:[#allocation2 + $0xf0] sm:$0xff] %vm908_vm0, %v11727_v8  ;;  %v3123_v10 = vmul.f32 %v8332_v4, %v8687_v60  ;;  %v3221_v12 = vmul.f32 %v8342_v48, %v8689_v42  ;;  %v2928_v44 = vmul.f32 %v8300_v41, %v8783_v34  ;;  %v3319_v36 = vmul.f32 %v8381_v19, %v8691_v32 }
 0x2d9   : > { %v2720_v2 = vmax.f32 %v2688_v15, 0.0  ;;  %v3057_v15 = vadd.f32 %v3025_v27, %v2959_v3  ;;  %v3545_v5 = vadd.f32 %v3513_v53, %v3447_v33  ;;  %v3350_v40 = vadd.f32 %v3318_v29, %v3252_v59  ;;  %5320 = vst.msk [vmem:[#allocation2 + $0xf8] sm:$0xff] %vm908_vm0, %v11727_v8 }
 0x2da   : > { %v3417_v35 = vmul.f32 %v8305_v46, %v8829_v6  ;;  %v2960_v3 = vadd.f32 %v2928_v44, %v2862_v37  ;;  %v3026_v41 = vmul.f32 %v8358_v7, %v8785_v1  ;;  %v3124_v29 = vmul.f32 %v8332_v4, %v8751_v62  ;;  %v9031_v1 = vld [vmem:[%s11365_s5 + $0x1] ss:$0 sm:$0xff]  ;;  %v9043_v44 = vld [vmem:[#allocation2 + $0x109] sm:$0xff] }
 0x2db   : > { %2806 = vst.msk [vmem:[#allocation2 + $0x129] sm:$0xff] %vm908_vm0, %v2720_v2  ;;  %v3155_v27 = vadd.f32 %v3123_v10, %v3057_v15  ;;  %v3515_v2 = vmul.f32 %v8319_v52, %v8831_v30  ;;  %v9016_v34 = vadd.f32 %v3611_v31, %v3545_v5  ;;  %v3448_v53 = vadd.f32 %v3416_v21, %v3350_v40  ;;  %v9024_v10 = vld [vmem:[%s11365_s5] ss:$0 sm:$0xff]  ;;  %v11808_v31 = vld [vmem:[#allocation94_spill] sm:$0xff] }
 0x2dc   : > { %v2587_v33 = vmul.f32 %v8811_v54, %v2538_v24  ;;  %v3058_v59 = vadd.f32 %v3026_v41, %v2960_v3  ;;  %v2863_v52 = vmul.f32 %v9024_v10, %v8687_v60  ;;  %v2929_v4 = vmul.f32 %v9031_v1, %v8689_v42  ;;  %v9041_v60 = vld [vmem:[#allocation2 + $0x108] sm:$0xff] }
 0x2dd   : > { %11807 = vst [vmem:[#allocation44_spill] sm:$0xff] %v9016_v34  ;;  %v3253_v46 = vadd.f32 %v3221_v12, %v3155_v27  ;;  %3718 = vperm.xlu0 %5893, %v9016_v34   ;;  %v3546_v37 = vadd.f32 %v3514_v28, %v3448_v53  ;;  %v3222_v21 = vmul.f32 %v8342_v48, %v8695_v17  ;;  %v9045_v24 = vld [vmem:[#allocation2 + $0x10a] sm:$0xff]  ;;  %v9050_v28 = vld [vmem:[%s11365_s5 + $0x3] ss:$0 sm:$0xff]  ;;  %v9066_v53 = vld [vmem:[%s11365_s5 + $0x6] ss:$0 sm:$0xff] }
 0x2de   : > { %v2619_v15 = vadd.f32 %v2587_v33, %v11808_v31  ;;  %v3027_v12 = vmul.f32 %v8358_v7, %v8691_v32  ;;  %v3156_v40 = vadd.f32 %v3124_v29, %v3058_v59  ;;  %v2961_v42 = vadd.f32 %v2929_v4, %v2863_v52  ;;  %5322 = vst.msk [vmem:[#allocation2 + $0x108] sm:$0xff] %vm908_vm0, %v11727_v8  ;;  %v9090_v31 = vld [vmem:[#allocation2 + $0x111] sm:$0xff] }
 0x2df   : > { %v3351_v5 = vadd.f32 %v3319_v36, %v3253_v46  ;;  %v3125_v48 = vmul.f32 %v9050_v28, %v8829_v6  ;;  %v9056_v7 = vadd.f32 %v3612_v43, %v3546_v37  ;;  %v3613_v32 = vmul.f32 %v8389_v18, %v8833_v26  ;;  %v9074_v18 = vld [vmem:[%s11365_s5 + $0x7] ss:$0 sm:$0xff]  ;;  %v9086_v37 = vld [vmem:[%s11365_s5 + $0x4] ss:$0 sm:$0xff] }
 0x2e0   : > { %v3320_v36 = vmul.f32 %v8381_v19, %v8697_v51  ;;  %v2655_v27 = vmul.f32 %v8947_v45, %v2619_v15  ;;  %v3254_v41 = vadd.f32 %v3222_v21, %v3156_v40  ;;  %v3418_v29 = vmul.f32 %v9066_v53, %v8859_v47  ;;  %v9092_v15 = vld [vmem:[#allocation2 + $0x112] sm:$0xff] }
 0x2e1   : > { %11809 = vst [vmem:[#allocation127_spill] sm:$0xff] %v9056_v7  ;;  %v3449_v3 = vadd.f32 %v3417_v35, %v3351_v5  ;;  %v3059_v43 = vadd.f32 %v3027_v12, %v2961_v42  ;;  %3723 = vperm.xlu1 %5894, %v9056_v7   ;;  %v3516_v19 = vmul.f32 %v9074_v18, %v8849_v0  ;;  %v9103_v40 = vld [vmem:[#allocation2 + $0x110] sm:$0xff] }
 0x2e2   : > { %v2691_v35 = vadd.f32 %v8967_v16, %v2655_v27  ;;  %v2864_v33 = vmul.f32 %v9024_v10, %v8751_v62  ;;  %v2930_v46 = vmul.f32 %v9031_v1, %v8695_v17  ;;  %v3352_v52 = vadd.f32 %v3320_v36, %v3254_v41  ;;  %v9097_v17 = vld [vmem:[%s11365_s5 + $0x2] ss:$0 sm:$0xff]  ;;  %5324 = vst.msk [vmem:[#allocation2 + $0x118] sm:$0x3] %vm911_vm2, %v11727_v8  ;;  %v9112_v27 = vld [vmem:[%s11365_s5 + $0x5] ss:$0 sm:$0xff] }
 0x2e3   : > { %v3547_v59 = vadd.f32 %v3515_v2, %v3449_v3  ;;  %v3157_v4 = vadd.f32 %v3125_v48, %v3059_v43  ;;  %v3223_v21 = vmul.f32 %v9086_v37, %v8831_v30  ;;  %v3028_v2 = vmul.f32 %v9097_v17, %v8697_v51  ;;  %5323 = vst.msk [vmem:[#allocation2 + $0x110] sm:$0xff] %vm908_vm0, %v11727_v8  ;;  %v11811_v3 = vld [vmem:[#allocation69_spill] sm:$0xff] }
 0x2e4   : > { %v2723_v12 = vmax.f32 %v2691_v35, 0.0  ;;  %v2962_v62 = vadd.f32 %v2930_v46, %v2864_v33  ;;  %v3126_v5 = vmul.f32 %v9050_v28, %v8859_v47  ;;  %v3450_v48 = vadd.f32 %v3418_v29, %v3352_v52  ;;  %v9135_v52 = vld [vmem:[#allocation2 + $0x120] sm:$0xff] }
 0x2e5   : > { %v9107_v42 = vadd.f32 %v3613_v32, %v3547_v59  ;;  %v3255_v36 = vadd.f32 %v3223_v21, %v3157_v4  ;;  %v3321_v51 = vmul.f32 %v9112_v27, %v8833_v26  ;;  %v2428_v41 = vadd.f32 %v8937_v61, %v11811_v3  ;;  %v9123_v32 = vld [vmem:[%s11365_s5 + $0x8] ss:$0 sm:$0xff] }
 0x2e6   : > { %v3614_v29 = vmul.f32 %v9123_v32, %v8851_v49  ;;  %2809 = vst.msk [vmem:[#allocation2 + $0x151] sm:$0xff] %vm908_vm0, %v2723_v12  ;;  %v3419_v43 = vmul.f32 %v9066_v53, %v8893_v57  ;;  %v3060_v35 = vadd.f32 %v3028_v2, %v2962_v62  ;;  %v3548_v33 = vadd.f32 %v3516_v19, %v3450_v48  ;;  %v9137_v4 = vld [vmem:[#allocation2 + $0x121] sm:$0xff] }
 0x2e7   : > { %11810 = vst [vmem:[#allocation38_spill] sm:$0xff] %v9107_v42  ;;  %3728 = vperm.xlu2 %5895, %v9107_v42   ;;  %v3353_v46 = vadd.f32 %v3321_v51, %v3255_v36  ;;  %v2865_v61 = vmul.f32 %v9024_v10, %v8829_v6  ;;  %v2931_v59 = vmul.f32 %v9031_v1, %v8831_v30  ;;  %v9139_v21 = vld [vmem:[#allocation2 + $0x122] sm:$0xff]  ;;  %v2550_v6 = vpop.permute.xlu1 %2549 }
 0x2e8   : > { %v3517_v12 = vmul.f32 %v9074_v18, %v8895_v50  ;;  %v3615_v62 = vmul.f32 %v9123_v32, %v8897_v23  ;;  %v3158_v19 = vadd.f32 %v3126_v5, %v3060_v35  ;;  %v3224_v2 = vmul.f32 %v9086_v37, %v8849_v0  ;;  %5325 = vst.msk [vmem:[#allocation2 + $0x120] sm:$0xff] %vm908_vm0, %v11727_v8 }
 0x2e9   : > { %v9149_v30 = vadd.f32 %v3614_v29, %v3548_v33  ;;  %v3451_v48 = vadd.f32 %v3419_v43, %v3353_v46  ;;  %v2963_v36 = vadd.f32 %v2931_v59, %v2865_v61  ;;  %v3029_v51 = vmul.f32 %v9097_v17, %v8833_v26  ;;  %v9163_v26 = vld [vmem:[#allocation2 + $0x129] sm:$0xff] }
 0x2ea   : > { %v3256_v3 = vadd.f32 %v3224_v2, %v3158_v19  ;;  %v3322_v42 = vmul.f32 %v9112_v27, %v8851_v49  ;;  %v3420_v5 = vmul.f32 %v9066_v53, %v8950_v14  ;;  %v3127_v35 = vmul.f32 %v9050_v28, %v8893_v57  ;;  %v9165_v46 = vld [vmem:[#allocation2 + $0x12a] sm:$0xff] }
 0x2eb   : > { %11812 = vst [vmem:[#allocation39_spill] sm:$0xff] %v9149_v30  ;;  %3733 = vperm.xlu0 %5893, %v9149_v30   ;;  %v3549_v7 = vadd.f32 %v3517_v12, %v3451_v48  ;;  %v3061_v29 = vadd.f32 %v3029_v51, %v2963_v36  ;;  %v2590_v43 = vmul.f32 %v8811_v54, %v2550_v6  ;;  %v9173_v2 = vld [vmem:[#allocation2 + $0x128] sm:$0xff] }
 0x2ec   : > { %v2866_v33 = vmul.f32 %v9024_v10, %v8859_v47  ;;  %v3354_v61 = vadd.f32 %v3322_v42, %v3256_v3  ;;  %v3518_v59 = vmul.f32 %v9074_v18, %v8916_v25  ;;  %v3225_v19 = vmul.f32 %v9086_v37, %v8895_v50  ;;  %5327 = vst.msk [vmem:[#allocation2 + $0x130] sm:$0x3] %vm911_vm2, %v11727_v8  ;;  %v9181_v48 = vld [vmem:[#allocation2 + $0x141] sm:$0xff] }
 0x2ed   : > { %v2932_v12 = vmul.f32 %v9031_v1, %v8849_v0  ;;  %v9177_v54 = vadd.f32 %v3615_v62, %v3549_v7  ;;  %v3159_v47 = vadd.f32 %v3127_v35, %v3061_v29  ;;  %v3323_v42 = vmul.f32 %v9112_v27, %v8897_v23  ;;  %v9183_v36 = vld [vmem:[#allocation2 + $0x142] sm:$0xff]  ;;  %5326 = vst.msk [vmem:[#allocation2 + $0x128] sm:$0xff] %vm908_vm0, %v11727_v8 }
 0x2ee   : > { %v2622_v6 = vadd.f32 %v2590_v43, %v2428_v41  ;;  %v3452_v0 = vadd.f32 %v3420_v5, %v3354_v61  ;;  %v3030_v3 = vmul.f32 %v9097_v17, %v8851_v49  ;;  %v3128_v7 = vmul.f32 %v9050_v28, %v8950_v14  ;;  %5330 = vst.msk [vmem:[#allocation2 + $0x148] sm:$0x3] %vm911_vm2, %v11727_v8  ;;  %v9203_v61 = vld [vmem:[#allocation2 + $0x138] sm:$0xff] }
 0x2ef   : > { %11813 = vst [vmem:[#allocation41_spill] sm:$0xff] %v9177_v54  ;;  %v2964_v51 = vadd.f32 %v2932_v12, %v2866_v33  ;;  %3738 = vperm.xlu1 %5894, %v9177_v54   ;;  %v3616_v41 = vmul.f32 %v9123_v32, %v8918_v39  ;;  %v3257_v62 = vadd.f32 %v3225_v19, %v3159_v47  ;;  %v9205_v12 = vld [vmem:[#allocation2 + $0x139] sm:$0xff] }
 0x2f0   : > { %v3421_v35 = vmul.f32 %v9066_v53, %v8981_v13  ;;  %v2658_v5 = vmul.f32 %v8947_v45, %v2622_v6  ;;  %v3550_v29 = vadd.f32 %v3518_v59, %v3452_v0  ;;  %v2867_v49 = vmul.f32 %v9024_v10, %v8893_v57  ;;  %v9207_v54 = vld [vmem:[#allocation2 + $0x13a] sm:$0xff] }
 0x2f1   : > { %v3062_v43 = vadd.f32 %v3030_v3, %v2964_v51  ;;  %v2933_v33 = vmul.f32 %v9031_v1, %v8895_v50  ;;  %v3355_v19 = vadd.f32 %v3323_v42, %v3257_v62  ;;  %v3519_v47 = vmul.f32 %v9074_v18, %v8983_v58  ;;  %5328 = vst.msk [vmem:[#allocation2 + $0x138] sm:$0xff] %vm908_vm0, %v11727_v8 }
 0x2f2   : > { %v2694_v45 = vadd.f32 %v8967_v16, %v2658_v5  ;;  %v3031_v59 = vmul.f32 %v9097_v17, %v8897_v23  ;;  %v9216_v57 = vadd.f32 %v3616_v41, %v3550_v29  ;;  %v3226_v6 = vmul.f32 %v9086_v37, %v8916_v25 }
 0x2f3   : > { %v3160_v50 = vadd.f32 %v3128_v7, %v3062_v43  ;;  %v2965_v0 = vadd.f32 %v2933_v33, %v2867_v49  ;;  %v3453_v51 = vadd.f32 %v3421_v35, %v3355_v19  ;;  %v3617_v42 = vmul.f32 %v9123_v32, %v8985_v63  ;;  %v9236_v49 = vld [vmem:[#allocation2 + $0x140] sm:$0xff] }
 0x2f4   : > { %11814 = vst [vmem:[#allocation42_spill] sm:$0xff] %v9216_v57  ;;  %v2726_v3 = vmax.f32 %v2694_v45, 0.0  ;;  %v3324_v16 = vmul.f32 %v9112_v27, %v8918_v39  ;;  %3743 = vperm.xlu2 %5895, %v9216_v57   ;;  %v3422_v41 = vmul.f32 %v9066_v53, %v9004_v11  ;;  %v3129_v7 = vmul.f32 %v9050_v28, %v8981_v13 }
 0x2f5   : > { %v3258_v23 = vadd.f32 %v3226_v6, %v3160_v50  ;;  %v3063_v62 = vadd.f32 %v3031_v59, %v2965_v0  ;;  %v3551_v5 = vadd.f32 %v3519_v47, %v3453_v51  ;;  %v3520_v35 = vmul.f32 %v9074_v18, %v8956_v55  ;;  %5329 = vst.msk [vmem:[#allocation2 + $0x140] sm:$0xff] %vm908_vm0, %v11727_v8 }
 0x2f6   : > { %2812 = vst.msk [vmem:[#allocation2 + $0x171] sm:$0xff] %vm908_vm0, %v2726_v3  ;;  %v2868_v29 = vmul.f32 %v9024_v10, %v8950_v14  ;;  %v2934_v43 = vmul.f32 %v9031_v1, %v8916_v25  ;;  %v3618_v19 = vmul.f32 %v9123_v32, %v8958_v9  ;;  %v3227_v47 = vmul.f32 %v9086_v37, %v8983_v58 }
 0x2f7   : > { %v3356_v33 = vadd.f32 %v3324_v16, %v3258_v23  ;;  %v3161_v45 = vadd.f32 %v3129_v7, %v3063_v62  ;;  %v9244_v59 = vadd.f32 %v3617_v42, %v3551_v5  ;;  %v3325_v14 = vmul.f32 %v9112_v27, %v8985_v63  ;;  %v9263_v62 = vld [vmem:[#allocation2 + $0x151] sm:$0xff] }
 0x2f8   : > { %v2966_v50 = vadd.f32 %v2934_v43, %v2868_v29  ;;  %v3032_v25 = vmul.f32 %v9097_v17, %v8918_v39  ;;  %v3423_v51 = vmul.f32 %v9066_v53, %v9041_v60  ;;  %v3521_v3 = vmul.f32 %v9074_v18, %v9043_v44  ;;  %v9265_v7 = vld [vmem:[#allocation2 + $0x152] sm:$0xff] }
 0x2f9   : > { %11815 = vst [vmem:[#allocation50_spill] sm:$0xff] %v9244_v59  ;;  %v3454_v6 = vadd.f32 %v3422_v41, %v3356_v33  ;;  %v3259_v0 = vadd.f32 %v3227_v47, %v3161_v45  ;;  %3748 = vperm.xlu0 %5893, %v9244_v59   ;;  %v3130_v42 = vmul.f32 %v9050_v28, %v9004_v11  ;;  %v9261_v41 = vld [vmem:[#allocation2 + $0x150] sm:$0xff] }
 0x2fa   : > { %v3064_v16 = vadd.f32 %v3032_v25, %v2966_v50  ;;  %v2869_v23 = vmul.f32 %v9024_v10, %v8981_v13  ;;  %v2935_v39 = vmul.f32 %v9031_v1, %v8983_v58  ;;  %v3619_v43 = vmul.f32 %v9123_v32, %v9045_v24  ;;  %5331 = vst.msk [vmem:[#allocation2 + $0x150] sm:$0xff] %vm908_vm0, %v11727_v8 }
 0x2fb   : > { %v3552_v5 = vadd.f32 %v3520_v35, %v3454_v6  ;;  %v3357_v29 = vadd.f32 %v3325_v14, %v3259_v0  ;;  %v3228_v33 = vmul.f32 %v9086_v37, %v8956_v55  ;;  %v3033_v58 = vmul.f32 %v9097_v17, %v8985_v63  ;;  %v9283_v6 = vld [vmem:[#allocation2 + $0x159] sm:$0xff] }
 0x2fc   : > { %v3162_v13 = vadd.f32 %v3130_v42, %v3064_v16  ;;  %v2967_v45 = vadd.f32 %v2935_v39, %v2869_v23  ;;  %v3131_v47 = vmul.f32 %v9050_v28, %v9041_v60  ;;  %v3326_v14 = vmul.f32 %v9112_v27, %v8958_v9  ;;  %v9285_v0 = vld [vmem:[#allocation2 + $0x15a] sm:$0xff] }
 0x2fd   : > { %v9277_v50 = vadd.f32 %v3618_v19, %v3552_v5  ;;  %v3455_v35 = vadd.f32 %v3423_v51, %v3357_v29  ;;  %v3424_v25 = vmul.f32 %v9066_v53, %v9103_v40  ;;  %v2870_v63 = vmul.f32 %v9024_v10, %v9004_v11  ;;  %5333 = vst.msk [vmem:[#allocation2 + $0x160] sm:$0x3] %vm911_vm2, %v11727_v8  ;;  %v9300_v29 = vld [vmem:[#allocation2 + $0x158] sm:$0xff] }
 0x2fe   : > { %v3260_v16 = vadd.f32 %v3228_v33, %v3162_v13  ;;  %v3065_v42 = vadd.f32 %v3033_v58, %v2967_v45  ;;  %v2936_v19 = vmul.f32 %v9031_v1, %v8956_v55  ;;  %v3522_v23 = vmul.f32 %v9074_v18, %v9090_v31  ;;  %5332 = vst.msk [vmem:[#allocation2 + $0x158] sm:$0xff] %vm908_vm0, %v11727_v8 }
 0x2ff   : > { %11816 = vst [vmem:[#allocation43_spill] sm:$0xff] %v9277_v50  ;;  %3753 = vperm.xlu1 %5894, %v9277_v50   ;;  %v3553_v51 = vadd.f32 %v3521_v3, %v3455_v35  ;;  %v3229_v39 = vmul.f32 %v9086_v37, %v9043_v44  ;;  %v3034_v5 = vmul.f32 %v9097_v17, %v8958_v9 }
 0x300   : > { %v3358_v11 = vadd.f32 %v3326_v14, %v3260_v16  ;;  %v3163_v33 = vadd.f32 %v3131_v47, %v3065_v42  ;;  %v2968_v55 = vadd.f32 %v2936_v19, %v2870_v63  ;;  %v3132_v13 = vmul.f32 %v9050_v28, %v9103_v40 }
 0x301   : > { %v9306_v3 = vadd.f32 %v3619_v43, %v3553_v51  ;;  %v3620_v45 = vmul.f32 %v9123_v32, %v9092_v15  ;;  %v3327_v58 = vmul.f32 %v9112_v27, %v9045_v24  ;;  %v3425_v9 = vmul.f32 %v9066_v53, %v9135_v52  ;;  %v9327_v51 = vld [vmem:[#allocation2 + $0x169] sm:$0xff] }
 0x302   : > { %v3456_v35 = vadd.f32 %v3424_v25, %v3358_v11  ;;  %v3261_v47 = vadd.f32 %v3229_v39, %v3163_v33  ;;  %v3066_v14 = vadd.f32 %v3034_v5, %v2968_v55  ;;  %v2871_v16 = vmul.f32 %v9024_v10, %v9041_v60  ;;  %v9325_v25 = vld [vmem:[#allocation2 + $0x168] sm:$0xff] }
 0x303   : > { %11817 = vst [vmem:[#allocation129_spill] sm:$0xff] %v9306_v3  ;;  %3758 = vperm.xlu2 %5895, %v9306_v3   ;;  %v3523_v43 = vmul.f32 %v9074_v18, %v9137_v4  ;;  %v3621_v42 = vmul.f32 %v9123_v32, %v9139_v21  ;;  %v3230_v63 = vmul.f32 %v9086_v37, %v9090_v31  ;;  %v9329_v39 = vld [vmem:[#allocation2 + $0x16a] sm:$0xff] }
 0x304   : > { %v2937_v19 = vmul.f32 %v9031_v1, %v9043_v44  ;;  %v3554_v60 = vadd.f32 %v3522_v23, %v3456_v35  ;;  %v3359_v5 = vadd.f32 %v3327_v58, %v3261_v47  ;;  %v3164_v11 = vadd.f32 %v3132_v13, %v3066_v14  ;;  %5334 = vst.msk [vmem:[#allocation2 + $0x168] sm:$0xff] %vm908_vm0, %v11727_v8  ;;  %v9345_v35 = vld [vmem:[#allocation2 + $0x171] sm:$0xff] }
 0x305   : > { %v3328_v33 = vmul.f32 %v9112_v27, %v9092_v15  ;;  %v3426_v55 = vmul.f32 %v9066_v53, %v9173_v2  ;;  %v3524_v44 = vmul.f32 %v9074_v18, %v9163_v26  ;;  %v3035_v50 = vmul.f32 %v9097_v17, %v9045_v24  ;;  %v9347_v47 = vld [vmem:[#allocation2 + $0x172] sm:$0xff] }
 0x306   : > { %v2969_v3 = vadd.f32 %v2937_v19, %v2871_v16  ;;  %v9341_v57 = vadd.f32 %v3620_v45, %v3554_v60  ;;  %v3457_v23 = vadd.f32 %v3425_v9, %v3359_v5  ;;  %v3262_v13 = vadd.f32 %v3230_v63, %v3164_v11  ;;  %5336 = vst.msk [vmem:[#allocation2 + $0x178] sm:$0x3] %vm911_vm2, %v11727_v8 }
 0x307   : > { %v2872_v58 = vmul.f32 %v9024_v10, %v9103_v40  ;;  %v3622_v14 = vmul.f32 %v9123_v32, %v9165_v46  ;;  %v3133_v16 = vmul.f32 %v9050_v28, %v9135_v52  ;;  %v2938_v24 = vmul.f32 %v9031_v1, %v9090_v31 }
 0x308   : > { %11818 = vst [vmem:[#allocation53_spill] sm:$0xff] %v9341_v57  ;;  %v3067_v59 = vadd.f32 %v3035_v50, %v2969_v3  ;;  %3763 = vperm.xlu0 %5893, %v9341_v57   ;;  %v3555_v40 = vadd.f32 %v3523_v43, %v3457_v23  ;;  %v3360_v45 = vadd.f32 %v3328_v33, %v3262_v13  ;;  %v9362_v50 = vld [vmem:[#allocation2 + $0x189] sm:$0xff]  ;;  %v9380_v13 = vld [vmem:[#allocation2 + $0x180] sm:$0xff] }
 0x309   : > { %v3231_v9 = vmul.f32 %v9086_v37, %v9137_v4  ;;  %v3329_v63 = vmul.f32 %v9112_v27, %v9139_v21  ;;  %v9364_v3 = vld [vmem:[#allocation2 + $0x18a] sm:$0xff]  ;;  %v2970_v60 = vadd.f32 %v2938_v24, %v2872_v58  ;;  %v3036_v31 = vmul.f32 %v9097_v17, %v9092_v15  ;;  %v9382_v15 = vld [vmem:[#allocation2 + $0x181] sm:$0xff] }
 0x30a   : > { %v3165_v19 = vadd.f32 %v3133_v16, %v3067_v59  ;;  %v3134_v5 = vmul.f32 %v9050_v28, %v9173_v2  ;;  %v9370_v43 = vld [vmem:[#allocation2 + $0x170] sm:$0xff]  ;;  %5339 = vst.msk [vmem:[#allocation2 + $0x190] sm:$0x3] %vm911_vm2, %v11727_v8  ;;  %v9374_v11 = vadd.f32 %v3621_v42, %v3555_v40  ;;  %v3458_v33 = vadd.f32 %v3426_v55, %v3360_v45  ;;  %v9384_v58 = vld [vmem:[#allocation2 + $0x182] sm:$0xff] }
 0x30b   : > { %v3427_v23 = vmul.f32 %v9066_v53, %v9203_v61  ;;  %v2873_v59 = vmul.f32 %v9024_v10, %v9135_v52  ;;  %5335 = vst.msk [vmem:[#allocation2 + $0x170] sm:$0xff] %vm908_vm0, %v11727_v8  ;;  %v3068_v24 = vadd.f32 %v3036_v31, %v2970_v60  ;;  %v2939_v42 = vmul.f32 %v9031_v1, %v9137_v4  ;;  %v9411_v57 = vld [vmem:[#allocation2 + $0x188] sm:$0xff] }
 0x30c   : > { %11819 = vst [vmem:[#allocation130_spill] sm:$0xff] %v9374_v11  ;;  %v3263_v16 = vadd.f32 %v3231_v9, %v3165_v19  ;;  %v3037_v55 = vmul.f32 %v9097_v17, %v9139_v21  ;;  %3768 = vperm.xlu1 %5894, %v9374_v11   ;;  %v3556_v52 = vadd.f32 %v3524_v44, %v3458_v33 }
 0x30d   : > { %5337 = vst.msk [vmem:[#allocation2 + $0x180] sm:$0xff] %vm908_vm0, %v11727_v8  ;;  %v3525_v40 = vmul.f32 %v9074_v18, %v9205_v12  ;;  %v3623_v45 = vmul.f32 %v9123_v32, %v9207_v54  ;;  %v3232_v9 = vmul.f32 %v9086_v37, %v9163_v26  ;;  %v3166_v4 = vadd.f32 %v3134_v5, %v3068_v24 }
 0x30e   : > { %v3361_v19 = vadd.f32 %v3329_v63, %v3263_v16  ;;  %v3330_v21 = vmul.f32 %v9112_v27, %v9165_v46  ;;  %v2971_v60 = vadd.f32 %v2939_v42, %v2873_v59  ;;  %v9403_v31 = vadd.f32 %v3622_v14, %v3556_v52  ;;  %5338 = vst.msk [vmem:[#allocation2 + $0x188] sm:$0xff] %vm908_vm0, %v11727_v8 }
 0x30f   : > { %v3428_v44 = vmul.f32 %v9066_v53, %v9236_v49  ;;  %v3135_v33 = vmul.f32 %v9050_v28, %v9203_v61  ;;  %v2874_v11 = vmul.f32 %v9024_v10, %v9173_v2  ;;  %v3264_v63 = vadd.f32 %v3232_v9, %v3166_v4 }
 0x310   : > { %11820 = vst [vmem:[#allocation56_spill] sm:$0xff] %v9403_v31  ;;  %v3459_v30 = vadd.f32 %v3427_v23, %v3361_v19  ;;  %v3069_v5 = vadd.f32 %v3037_v55, %v2971_v60  ;;  %v2940_v16 = vmul.f32 %v9031_v1, %v9163_v26  ;;  %3773 = vperm.xlu2 %5895, %v9403_v31  }
 0x311   : > { %v3526_v14 = vmul.f32 %v9074_v18, %v9181_v48  ;;  %v3624_v59 = vmul.f32 %v9123_v32, %v9183_v36  ;;  %v3233_v2 = vmul.f32 %v9086_v37, %v9205_v12  ;;  %v3038_v23 = vmul.f32 %v9097_v17, %v9165_v46 }
 0x312   : > { %v3557_v24 = vadd.f32 %v3525_v40, %v3459_v30  ;;  %v3362_v42 = vadd.f32 %v3330_v21, %v3264_v63  ;;  %v3167_v26 = vadd.f32 %v3135_v33, %v3069_v5  ;;  %v2972_v55 = vadd.f32 %v2940_v16, %v2874_v11 }
 0x313   : > { %v3331_v52 = vmul.f32 %v9112_v27, %v9207_v54  ;;  %v3429_v9 = vmul.f32 %v9066_v53, %v9261_v41  ;;  %v3136_v19 = vmul.f32 %v9050_v28, %v9236_v49  ;;  %v2875_v4 = vmul.f32 %v9024_v10, %v9203_v61 }
 0x314   : > { %v9434_v60 = vadd.f32 %v3623_v45, %v3557_v24  ;;  %v3460_v31 = vadd.f32 %v3428_v44, %v3362_v42  ;;  %v3265_v46 = vadd.f32 %v3233_v2, %v3167_v26  ;;  %v3070_v30 = vadd.f32 %v3038_v23, %v2972_v55 }
 0x315   : > { %v3527_v11 = vmul.f32 %v9074_v18, %v9263_v62  ;;  %v3625_v40 = vmul.f32 %v9123_v32, %v9265_v7  ;;  %v3234_v21 = vmul.f32 %v9086_v37, %v9181_v48  ;;  %v2941_v33 = vmul.f32 %v9031_v1, %v9205_v12 }
 0x316   : > { %11821 = vst [vmem:[#allocation6_spill] sm:$0xff] %v9434_v60  ;;  %3778 = vperm.xlu0 %5893, %v9434_v60   ;;  %v3558_v61 = vadd.f32 %v3526_v14, %v3460_v31  ;;  %v3363_v45 = vadd.f32 %v3331_v52, %v3265_v46  ;;  %v3168_v63 = vadd.f32 %v3136_v19, %v3070_v30  ;;  %v9457_v14 = vld [vmem:[#allocation2 + $0x1a0] sm:$0xff] }
 0x317   : > { %v3332_v44 = vmul.f32 %v9112_v27, %v9183_v36  ;;  %v3430_v5 = vmul.f32 %v9066_v53, %v9300_v29  ;;  %v2973_v16 = vadd.f32 %v2941_v33, %v2875_v4  ;;  %v3039_v2 = vmul.f32 %v9097_v17, %v9207_v54  ;;  %5341 = vst.msk [vmem:[#allocation2 + $0x1a0] sm:$0xff] %vm908_vm0, %v11727_v8 }
 0x318   : > { %v3137_v23 = vmul.f32 %v9050_v28, %v9261_v41  ;;  %v9453_v24 = vadd.f32 %v3624_v59, %v3558_v61  ;;  %v3461_v12 = vadd.f32 %v3429_v9, %v3363_v45  ;;  %v3266_v42 = vadd.f32 %v3234_v21, %v3168_v63 }
 0x319   : > { %v2876_v31 = vmul.f32 %v9024_v10, %v9236_v49  ;;  %v3528_v26 = vmul.f32 %v9074_v18, %v9283_v6  ;;  %v3626_v55 = vmul.f32 %v9123_v32, %v9285_v0  ;;  %v3071_v52 = vadd.f32 %v3039_v2, %v2973_v16 }
 0x31a   : > { %11822 = vst [vmem:[#allocation61_spill] sm:$0xff] %v9453_v24  ;;  %v2942_v54 = vmul.f32 %v9031_v1, %v9181_v48  ;;  %3783 = vperm.xlu1 %5894, %v9453_v24   ;;  %v3559_v59 = vadd.f32 %v3527_v11, %v3461_v12  ;;  %v3364_v9 = vadd.f32 %v3332_v44, %v3266_v42 }
 0x31b   : > { %v3235_v49 = vmul.f32 %v9086_v37, %v9263_v62  ;;  %v3333_v19 = vmul.f32 %v9112_v27, %v9265_v7  ;;  %v3169_v4 = vadd.f32 %v3137_v23, %v3071_v52  ;;  %v3040_v30 = vmul.f32 %v9097_v17, %v9183_v36 }
 0x31c   : > { %v2974_v46 = vadd.f32 %v2942_v54, %v2876_v31  ;;  %v3138_v48 = vmul.f32 %v9050_v28, %v9300_v29  ;;  %v9476_v21 = vadd.f32 %v3625_v40, %v3559_v59  ;;  %v3462_v8 = vadd.f32 %v3430_v5, %v3364_v9 }
 0x31d   : > { %v3431_v11 = vmul.f32 %v9066_v53, %v9325_v25  ;;  %v2877_v33 = vmul.f32 %v9024_v10, %v9261_v41  ;;  %v3267_v61 = vadd.f32 %v3235_v49, %v3169_v4  ;;  %v3529_v45 = vmul.f32 %v9074_v18, %v9327_v51 }
 0x31e   : > { %11823 = vst [vmem:[#allocation60_spill] sm:$0xff] %v9476_v21  ;;  %v3072_v63 = vadd.f32 %v3040_v30, %v2974_v46  ;;  %v2943_v36 = vmul.f32 %v9031_v1, %v9263_v62  ;;  %3788 = vperm.xlu2 %5895, %v9476_v21   ;;  %v3560_v44 = vadd.f32 %v3528_v26, %v3462_v8 }
 0x31f   : > { %v3627_v40 = vmul.f32 %v9123_v32, %v9329_v39  ;;  %v3236_v5 = vmul.f32 %v9086_v37, %v9283_v6  ;;  %v3334_v41 = vmul.f32 %v9112_v27, %v9285_v0  ;;  %v3365_v16 = vadd.f32 %v3333_v19, %v3267_v61 }
 0x320   : > { %v3170_v2 = vadd.f32 %v3138_v48, %v3072_v63  ;;  %v2975_v23 = vadd.f32 %v2943_v36, %v2877_v33  ;;  %v3041_v12 = vmul.f32 %v9097_v17, %v9265_v7  ;;  %v9495_v42 = vadd.f32 %v3626_v55, %v3560_v44 }
 0x321   : > { %v3432_v62 = vmul.f32 %v9066_v53, %v9370_v43  ;;  %v3139_v31 = vmul.f32 %v9050_v28, %v9325_v25  ;;  %v2878_v26 = vmul.f32 %v9024_v10, %v9300_v29  ;;  %v3463_v52 = vadd.f32 %v3431_v11, %v3365_v16 }
 0x322   : > { %11824 = vst [vmem:[#allocation66_spill] sm:$0xff] %v9495_v42  ;;  %v3268_v54 = vadd.f32 %v3236_v5, %v3170_v2  ;;  %v3073_v59 = vadd.f32 %v3041_v12, %v2975_v23  ;;  %v2944_v9 = vmul.f32 %v9031_v1, %v9283_v6  ;;  %3793 = vperm.xlu0 %5893, %v9495_v42  }
 0x323   : > { %v3237_v7 = vmul.f32 %v9086_v37, %v9327_v51  ;;  %v3335_v55 = vmul.f32 %v9112_v27, %v9329_v39  ;;  %v3042_v49 = vmul.f32 %v9097_v17, %v9285_v0  ;;  %v3140_v29 = vmul.f32 %v9050_v28, %v9370_v43 }
 0x324   : > { %v3561_v19 = vadd.f32 %v3529_v45, %v3463_v52  ;;  %v3366_v4 = vadd.f32 %v3334_v41, %v3268_v54  ;;  %v3171_v46 = vadd.f32 %v3139_v31, %v3073_v59  ;;  %v2976_v30 = vadd.f32 %v2944_v9, %v2878_v26 }
 0x325   : > { %v3530_v6 = vmul.f32 %v9074_v18, %v9345_v35  ;;  %v2879_v48 = vmul.f32 %v9024_v10, %v9325_v25  ;;  %v3628_v0 = vmul.f32 %v9123_v32, %v9347_v47  ;;  %v3433_v45 = vmul.f32 %v9066_v53, %v9380_v13 }
 0x326   : > { %v9518_v8 = vadd.f32 %v3627_v40, %v3561_v19  ;;  %v3464_v11 = vadd.f32 %v3432_v62, %v3366_v4  ;;  %v3269_v33 = vadd.f32 %v3237_v7, %v3171_v46  ;;  %v3074_v61 = vadd.f32 %v3042_v49, %v2976_v30  ;;  %v11827_v19 = vld [vmem:[#allocation81_spill] sm:$0xff] }
 0x327   : > { %v2945_v63 = vmul.f32 %v9031_v1, %v9327_v51  ;;  %v3043_v36 = vmul.f32 %v9097_v17, %v9329_v39  ;;  %v3238_v5 = vmul.f32 %v9086_v37, %v9345_v35  ;;  %v3531_v41 = vmul.f32 %v9074_v18, %v9382_v15 }
 0x328   : > { %11825 = vst [vmem:[#allocation63_spill] sm:$0xff] %v9518_v8  ;;  %3798 = vperm.xlu1 %5894, %v9518_v8   ;;  %v3562_v25 = vadd.f32 %v3530_v6, %v3464_v11  ;;  %v3367_v44 = vadd.f32 %v3335_v55, %v3269_v33  ;;  %v3172_v40 = vadd.f32 %v3140_v29, %v3074_v61  ;;  %v11828_v6 = vld [vmem:[#allocation82_spill] sm:$0xff]  ;;  %v9569_v33 = vpop.permute.xlu2 %3673 }
 0x329   : > { %v3336_v16 = vmul.f32 %v9112_v27, %v9347_v47  ;;  %v2977_v2 = vadd.f32 %v2945_v63, %v2879_v48  ;;  %v2880_v39 = vmul.f32 %v9024_v10, %v9370_v43  ;;  %v3141_v31 = vmul.f32 %v9050_v28, %v9380_v13  ;;  %11829 = vst [vmem:[#allocation65_spill] sm:$0xff] %v9569_v33 }
 0x32a   : > { %v9535_v23 = vadd.f32 %v3628_v0, %v3562_v25  ;;  %v3465_v51 = vadd.f32 %v3433_v45, %v3367_v44  ;;  %v3270_v12 = vadd.f32 %v3238_v5, %v3172_v40  ;;  %v2946_v26 = vmul.f32 %v9031_v1, %v9345_v35  ;;  %v11831_v0 = vld [vmem:[#allocation83_spill] sm:$0xff] }
 0x32b   : > { %v3075_v62 = vadd.f32 %v3043_v36, %v2977_v2  ;;  %v3629_v54 = vmul.f32 %v9123_v32, %v9384_v58  ;;  %v3434_v9 = vmul.f32 %v9066_v53, %v9411_v57  ;;  %v3239_v10 = vmul.f32 %v9086_v37, %v9382_v15 }
 0x32c   : > { %11826 = vst [vmem:[#allocation70_spill] sm:$0xff] %v9535_v23  ;;  %3803 = vperm.xlu2 %5895, %v9535_v23   ;;  %v3563_v52 = vadd.f32 %v3531_v41, %v3465_v51  ;;  %v3368_v59 = vadd.f32 %v3336_v16, %v3270_v12  ;;  %v2978_v43 = vadd.f32 %v2946_v26, %v2880_v39  ;;  %v11834_v41 = vld [vmem:[#allocation86_spill] sm:$0xff]  ;;  %v11841_v12 = vld [vmem:[#allocation124_spill] sm:$0xff]  ;;  %v11845_v26 = vld [vmem:[#allocation57_spill] sm:$0xff] }
 0x32d   : > { %v3173_v7 = vadd.f32 %v3141_v31, %v3075_v62  ;;  %v3044_v13 = vmul.f32 %v9097_v17, %v9347_v47  ;;  %v3532_v35 = vmul.f32 %v9074_v18, %v9362_v50  ;;  %v3337_v49 = vmul.f32 %v9112_v27, %v9384_v58  ;;  %v11843_v62 = vld [vmem:[#allocation75_spill] sm:$0xff] }
 0x32e   : > { %v9552_v55 = vadd.f32 %v3629_v54, %v3563_v52  ;;  %v3466_v1 = vadd.f32 %v3434_v9, %v3368_v59  ;;  %v3435_v4 = vmul.f32 %v9066_v53, %v11827_v19  ;;  %v3142_v15 = vmul.f32 %v9050_v28, %v9411_v57  ;;  %v11844_v31 = vld [vmem:[#allocation47_spill] sm:$0xff]  ;;  %v9615_v54 = vpop.permute.xlu0 %3678 }
 0x32f   : > { %v3271_v29 = vadd.f32 %v3239_v10, %v3173_v7  ;;  %v3076_v46 = vadd.f32 %v3044_v13, %v2978_v43  ;;  %v3630_v47 = vmul.f32 %v9123_v32, %v9364_v3  ;;  %v3533_v48 = vmul.f32 %v9074_v18, %v11828_v6  ;;  %11847 = vst [vmem:[#allocation111_spill] sm:$0xff] %v9615_v54  ;;  %v11849_v9 = vld [vmem:[#allocation7_spill] sm:$0xff] }
 0x330   : > { %3808 = vperm.xlu0 %5893, %v9552_v55   ;;  %v3564_v17 = vadd.f32 %v3532_v35, %v3466_v1  ;;  %v3240_v58 = vmul.f32 %v9086_v37, %v9362_v50  ;;  %v3631_v28 = vmul.f32 %v9123_v32, %v11831_v0  ;;  %v3338_v63 = vmul.f32 %v9112_v27, %v9364_v3  ;;  %v11832_v37 = vld [vmem:[#allocation85_spill] sm:$0xff]  ;;  %v9587_v27 = vpop.permute.xlu2 %3688  ;;  %v11850_v7 = vld [vmem:[#allocation127_spill] sm:$0xff]  ;;  %v11854_v35 = vld [vmem:[#allocation38_spill] sm:$0xff] }
 0x331   : > { %v3369_v30 = vadd.f32 %v3337_v49, %v3271_v29  ;;  %v3174_v11 = vadd.f32 %v3142_v15, %v3076_v46  ;;  %v3436_v36 = vmul.f32 %v9066_v53, %v9457_v14  ;;  %v3534_v50 = vmul.f32 %v9074_v18, %v11832_v37  ;;  %11835 = vst [vmem:[#allocation74_spill] sm:$0xff] %v9587_v27  ;;  %v11839_v14 = vld [vmem:[#allocation123_spill] sm:$0xff]  ;;  %v11855_v49 = vld [vmem:[#allocation41_spill] sm:$0xff]  ;;  %v11856_v29 = vld [vmem:[#allocation50_spill] sm:$0xff] }
 0x332   : > { %v9571_v61 = vadd.f32 %v3630_v47, %v3564_v17  ;;  %v3632_v16 = vmul.f32 %v9123_v32, %v11834_v41  ;;  %v11836_v53 = vmov 1   ;;  %v9598_v32 = vpop.permute.xlu1 %3668  ;;  %v11851_v10 = vld [vmem:[#allocation39_spill] sm:$0xff]  ;;  %v11860_v47 = vld [vmem:[#allocation53_spill] sm:$0xff]  ;;  %v11865_v0 = vld [vmem:[#allocation56_spill] sm:$0xff] }
 0x333   : > { %v3467_v57 = vadd.f32 %v3435_v4, %v3369_v30  ;;  %v3272_v45 = vadd.f32 %v3240_v58, %v3174_v11  ;;  %11838 = vst [vmem:[#allocation11_spill] sm:$0xff] %v9598_v32  ;;  %v11857_v4 = vld [vmem:[#allocation42_spill] sm:$0xff]  ;;  %v11859_v17 = vld [vmem:[#allocation43_spill] sm:$0xff]  ;;  %v11861_v30 = vld [vmem:[#allocation129_spill] sm:$0xff] }
 0x334   : > { %11830 = vst [vmem:[#allocation96_spill] sm:$0xff] %v9571_v61  ;;  %3813 = vperm.xlu1 %5894, %v9571_v61   ;;  %v11863_v11 = vld [vmem:[#allocation130_spill] sm:$0xff] }
 0x335   : > { %v3565_v25 = vadd.f32 %v3533_v48, %v3467_v57  ;;  %v3370_v44 = vadd.f32 %v3338_v63, %v3272_v45 }
 0x337   : > { %v9582_v40 = vadd.f32 %v3631_v28, %v3565_v25  ;;  %v3468_v5 = vadd.f32 %v3436_v36, %v3370_v44 }
 0x338   : > { %v9596_v18 = vpop.permute.xlu2 %3698 }
 0x339   : > { %11833 = vst [vmem:[#allocation105_spill] sm:$0xff] %v9582_v40  ;;  %3818 = vperm.xlu2 %5895, %v9582_v40   ;;  %v3566_v2 = vadd.f32 %v3534_v50, %v3468_v5  ;;  %v11872_v5 = vmov 2  }
 0x33a   : > { %11837 = vst [vmem:[#allocation107_spill] sm:$0xff] %v9596_v18  ;;  %v9604_v51 = vpop.permute.xlu1 %3683 }
 0x33b   : > { %v9589_v3 = vadd.f32 %v3632_v16, %v3566_v2  ;;  %11840 = vst [vmem:[#allocation114_spill] sm:$0xff] %v9604_v51 }
 0x33c   : > { %5896 = vset.pattern.permute.xlu1 %v11836_v53 }
 0x33d   : > { %3823 = vperm.xlu0 %5893, %v9589_v3   ;;  %3861 = vperm.xlu1 %5896, %v8633_v56  }
 0x340   : > { %v9607_v39 = vpop.permute.xlu2 %3713 }
 0x341   : > { %5897 = vset.pattern.permute.xlu2 %v11836_v53  ;;  %11842 = vst [vmem:[#allocation108_spill] sm:$0xff] %v9607_v39 }
 0x342   : > { %3865 = vperm.xlu2 %5897, %v8652_v20   ;;  %v9613_v52 = vpop.permute.xlu1 %3693 }
 0x343   : > { %11846 = vst [vmem:[#allocation115_spill] sm:$0xff] %v9613_v52  ;;  %v9622_v43 = vpop.permute.xlu0 %3703 }
 0x345   : > { %5898 = vset.pattern.permute.xlu0 %v11836_v53  ;;  %3873 = vperm.xlu1 %5896, %v8758_v22  }
 0x346   : > { %3869 = vperm.xlu0 %5898, %v8732_v38  }
 0x348   : > { %v9617_v59 = vpop.permute.xlu2 %3728 }
 0x349   : > { %11848 = vst [vmem:[#allocation13_spill] sm:$0xff] %v9617_v59 }
 0x34a   : > { %3877 = vperm.xlu2 %5897, %v11839_v14   ;;  %v9624_v13 = vpop.permute.xlu1 %3708 }
 0x34b   : > { %11852 = vst [vmem:[#allocation16_spill] sm:$0xff] %v9624_v13 }
 0x34d   : > { %3881 = vperm.xlu1 %5896, %v11841_v12  }
 0x34e   : > { %3889 = vperm.xlu0 %5898, %v11843_v62  }
 0x34f   : > { %v9631_v19 = vpop.permute.xlu0 %3718 }
 0x350   : > { %v9626_v1 = vpop.permute.xlu2 %3743 }
 0x351   : > { %11853 = vst [vmem:[#allocation117_spill] sm:$0xff] %v9626_v1 }
 0x352   : > { %3885 = vperm.xlu2 %5897, %v11844_v31  }
 0x353   : > { %v9634_v46 = vpop.permute.xlu1 %3723 }
 0x354   : > { %11858 = vst [vmem:[#allocation36_spill] sm:$0xff] %v9634_v46 }
 0x355   : > { %3893 = vperm.xlu1 %5896, %v11845_v26  }
 0x356   : > { %3901 = vperm.xlu0 %5898, %v9016_v34  }
 0x35a   : > { %3897 = vperm.xlu2 %5897, %v11849_v9  }
 0x35d   : > { %3905 = vperm.xlu1 %5896, %v11850_v7   ;;  %v9636_v15 = vpop.permute.xlu2 %3758  ;;  %v9641_v6 = vpop.permute.xlu0 %3733 }
 0x35e   : > { %3913 = vperm.xlu0 %5898, %v11851_v10  }
 0x361   : > { %v9643_v48 = vpop.permute.xlu1 %3738 }
 0x362   : > { %3909 = vperm.xlu2 %5897, %v11854_v35   ;;  %11862 = vst [vmem:[#allocation118_spill] sm:$0xff] %v9643_v48 }
 0x365   : > { %3917 = vperm.xlu1 %5896, %v11855_v49  }
 0x366   : > { %3925 = vperm.xlu0 %5898, %v11856_v29  }
 0x36a   : > { %3921 = vperm.xlu2 %5897, %v11857_v4   ;;  %v9646_v58 = vpop.permute.xlu2 %3773 }
 0x36b   : > { %11864 = vst [vmem:[#allocation101_spill] sm:$0xff] %v9646_v58  ;;  %v9651_v28 = vpop.permute.xlu0 %3748 }
 0x36d   : > { %3929 = vperm.xlu1 %5896, %v11859_v17  }
 0x36e   : > { %3937 = vperm.xlu0 %5898, %v11860_v47  }
 0x371   : > { %v9654_v57 = vpop.permute.xlu1 %3753 }
 0x372   : > { %3933 = vperm.xlu2 %5897, %v11861_v30   ;;  %11866 = vst [vmem:[#allocation100_spill] sm:$0xff] %v9654_v57 }
 0x375   : > { %3941 = vperm.xlu1 %5896, %v11863_v11  }
 0x376   : > { %3949 = vperm.xlu0 %5898, %v9434_v60  }
 0x378   : > { %v9656_v45 = vpop.permute.xlu2 %3788 }
 0x379   : > { %11867 = vst [vmem:[#allocation103_spill] sm:$0xff] %v9656_v45 }
 0x37a   : > { %3945 = vperm.xlu2 %5897, %v11865_v0   ;;  %v9661_v63 = vpop.permute.xlu0 %3763 }
 0x37d   : > { %3953 = vperm.xlu1 %5896, %v9453_v24  }
 0x37e   : > { %3961 = vperm.xlu0 %5898, %v9495_v42   ;;  %v9663_v36 = vpop.permute.xlu1 %3768 }
 0x37f   : > { %11868 = vst [vmem:[#allocation102_spill] sm:$0xff] %v9663_v36 }
 0x382   : > { %3957 = vperm.xlu2 %5897, %v9476_v21  }
 0x385   : > { %3965 = vperm.xlu1 %5896, %v9518_v8  }
 0x386   : > { %3973 = vperm.xlu0 %5898, %v9552_v55   ;;  %v9665_v25 = vpop.permute.xlu2 %3803 }
 0x387   : > { %11869 = vst [vmem:[#allocation110_spill] sm:$0xff] %v9665_v25 }
 0x388   : > { %v9670_v44 = vpop.permute.xlu0 %3778 }
 0x38a   : > { %3969 = vperm.xlu2 %5897, %v9535_v23  }
 0x38c   : > { %v9673_v37 = vpop.permute.xlu1 %3783 }
 0x38d   : > { %3977 = vperm.xlu1 %5896, %v9571_v61   ;;  %11870 = vst [vmem:[#allocation109_spill] sm:$0xff] %v9673_v37 }
 0x38e   : > { %3985 = vperm.xlu0 %5898, %v9589_v3  }
 0x392   : > { %3981 = vperm.xlu2 %5897, %v9582_v40  }
 0x393   : > { %v9675_v50 = vpop.permute.xlu2 %3818 }
 0x394   : > { %11871 = vst [vmem:[#allocation106_spill] sm:$0xff] %v9675_v50  ;;  %v9683_v41 = vpop.permute.xlu0 %3793 }
 0x395   : > { %5899 = vset.pattern.permute.xlu1 %v11872_v5  ;;  %11873 = vst [vmem:[#allocation120_spill] sm:$0xff] %v9683_v41 }
 0x396   : > { %5901 = vset.pattern.permute.xlu0 %v11872_v5  ;;  %4055 = vperm.xlu1 %5899, %v8633_v56  }
 0x397   : > { %4063 = vperm.xlu0 %5901, %v8732_v38  }
 0x39a   : > { %5900 = vset.pattern.permute.xlu2 %v11872_v5  ;;  %v9687_v2 = vpop.permute.xlu1 %3798 }
 0x39b   : > { %4059 = vperm.xlu2 %5900, %v8652_v20   ;;  %11875 = vst [vmem:[#allocation112_spill] sm:$0xff] %v9687_v2 }
 0x39c   : > { %v9685_v16 = vpop.permute.xlu2 %3865 }
 0x39d   : > { %11874 = vst [vmem:[#allocation99_spill] sm:$0xff] %v9685_v16 }
 0x39e   : > { %4067 = vperm.xlu1 %5899, %v8758_v22  }
 0x39f   : > { %4083 = vperm.xlu0 %5901, %v11843_v62  }
 0x3a2   : > { %v9694_v48 = vpop.permute.xlu0 %3808 }
 0x3a3   : > { %4071 = vperm.xlu2 %5900, %v11839_v14   ;;  %11877 = vst [vmem:[#allocation104_spill] sm:$0xff] %v9694_v48 }
 0x3a4   : > { %v9692_v53 = vpop.permute.xlu2 %3877 }
 0x3a5   : > { %11876 = vst [vmem:[#allocation9_spill] sm:$0xff] %v9692_v53 }
 0x3a6   : > { %4075 = vperm.xlu1 %5899, %v11841_v12   ;;  %v9697_v5 = vpop.permute.xlu1 %3813 }
 0x3a7   : > { %11878 = vst [vmem:[#allocation94_spill] sm:$0xff] %v9697_v5  ;;  %4095 = vperm.xlu0 %5901, %v9016_v34  }
 0x3ab   : > { %4079 = vperm.xlu2 %5900, %v11844_v31  }
 0x3ac   : > { %v9701_v46 = vpop.permute.xlu2 %3885 }
 0x3ad   : > { %11879 = vst [vmem:[#allocation69_spill] sm:$0xff] %v9701_v46 }
 0x3ae   : > { %4087 = vperm.xlu1 %5899, %v11845_v26  }
 0x3af   : > { %4107 = vperm.xlu0 %5901, %v11851_v10   ;;  %v9705_v13 = vpop.permute.xlu0 %3823  ;;  %v9707_v1 = vpop.permute.xlu1 %3861 }
 0x3b0   : > { %11880 = vst [vmem:[#allocation81_spill] sm:$0xff] %v9705_v13 }
 0x3b1   : > { %11881 = vst [vmem:[#allocation82_spill] sm:$0xff] %v9707_v1 }
 0x3b3   : > { %4091 = vperm.xlu2 %5900, %v11849_v9  }
 0x3b4   : > { %v9710_v52 = vpop.permute.xlu2 %3897 }
 0x3b5   : > { %11882 = vst [vmem:[#allocation83_spill] sm:$0xff] %v9710_v52 }
 0x3b6   : > { %4099 = vperm.xlu1 %5899, %v11850_v7  }
 0x3b7   : > { %4119 = vperm.xlu0 %5901, %v11856_v29   ;;  %v9714_v59 = vpop.permute.xlu1 %3873 }
 0x3b8   : > { %11883 = vst [vmem:[#allocation85_spill] sm:$0xff] %v9714_v59  ;;  %v9716_v51 = vpop.permute.xlu0 %3869 }
 0x3b9   : > { %11884 = vst [vmem:[#allocation86_spill] sm:$0xff] %v9716_v51 }
 0x3bb   : > { %4103 = vperm.xlu2 %5900, %v11854_v35  }
 0x3bc   : > { %v9719_v39 = vpop.permute.xlu2 %3909 }
 0x3bd   : > { %11885 = vst [vmem:[#allocation47_spill] sm:$0xff] %v9719_v39 }
 0x3be   : > { %4111 = vperm.xlu1 %5899, %v11855_v49  }
 0x3bf   : > { %4131 = vperm.xlu0 %5901, %v11860_v47   ;;  %v9723_v32 = vpop.permute.xlu1 %3881 }
 0x3c0   : > { %11886 = vst [vmem:[#allocation57_spill] sm:$0xff] %v9723_v32  ;;  %v9725_v1 = vpop.permute.xlu0 %3889 }
 0x3c3   : > { %4115 = vperm.xlu2 %5900, %v11857_v4  }
 0x3c4   : > { %v9728_v52 = vpop.permute.xlu2 %3921 }
 0x3c5   : > { %11887 = vst [vmem:[#allocation7_spill] sm:$0xff] %v9728_v52 }
 0x3c6   : > { %4123 = vperm.xlu1 %5899, %v11859_v17  }
 0x3c7   : > { %4143 = vperm.xlu0 %5901, %v9434_v60   ;;  %v9732_v59 = vpop.permute.xlu1 %3893 }
 0x3c8   : > { %11888 = vst [vmem:[#allocation127_spill] sm:$0xff] %v9732_v59  ;;  %v9734_v18 = vpop.permute.xlu0 %3901 }
 0x3cb   : > { %4127 = vperm.xlu2 %5900, %v11861_v30  }
 0x3cc   : > { %v9737_v39 = vpop.permute.xlu2 %3933 }
 0x3ce   : > { %4135 = vperm.xlu1 %5899, %v11863_v11  }
 0x3cf   : > { %4155 = vperm.xlu0 %5901, %v9495_v42   ;;  %v9741_v32 = vpop.permute.xlu1 %3905 }
 0x3d0   : > { %11889 = vst [vmem:[#allocation38_spill] sm:$0xff] %v9741_v32  ;;  %v9743_v46 = vpop.permute.xlu0 %3913 }
 0x3d3   : > { %4139 = vperm.xlu2 %5900, %v11865_v0  }
 0x3d4   : > { %v9746_v52 = vpop.permute.xlu2 %3945 }
 0x3d5   : > { %11890 = vst [vmem:[#allocation41_spill] sm:$0xff] %v9746_v52 }
 0x3d6   : > { %4147 = vperm.xlu1 %5899, %v9453_v24  }
 0x3d7   : > { %4167 = vperm.xlu0 %5901, %v9552_v55   ;;  %v9750_v59 = vpop.permute.xlu1 %3917 }
 0x3d8   : > { %11891 = vst [vmem:[#allocation42_spill] sm:$0xff] %v9750_v59  ;;  %v9752_v5 = vpop.permute.xlu0 %3925  ;;  %v11895_v59 = vmov 3  }
 0x3db   : > { %4151 = vperm.xlu2 %5900, %v9476_v21  }
 0x3dc   : > { %v9755_v27 = vpop.permute.xlu2 %3957 }
 0x3dd   : > { %11892 = vst [vmem:[#allocation43_spill] sm:$0xff] %v9755_v27 }
 0x3de   : > { %4159 = vperm.xlu1 %5899, %v9518_v8  }
 0x3df   : > { %4179 = vperm.xlu0 %5901, %v9589_v3   ;;  %v9759_v32 = vpop.permute.xlu1 %3929 }
 0x3e0   : > { %11893 = vst [vmem:[#allocation53_spill] sm:$0xff] %v9759_v32  ;;  %v9761_v53 = vpop.permute.xlu0 %3937 }
 0x3e3   : > { %4163 = vperm.xlu2 %5900, %v9535_v23  }
 0x3e4   : > { %v9764_v2 = vpop.permute.xlu2 %3969 }
 0x3e5   : > { %11894 = vst [vmem:[#allocation129_spill] sm:$0xff] %v9764_v2 }
 0x3e6   : > { %4171 = vperm.xlu1 %5899, %v9571_v61  }
 0x3e7   : > { %5904 = vset.pattern.permute.xlu0 %v11895_v59  ;;  %v9768_v33 = vpop.permute.xlu1 %3941 }
 0x3e8   : > { %11896 = vst [vmem:[#allocation131_spill] sm:$0xff] %v9768_v33  ;;  %4257 = vperm.xlu0 %5904, %v8732_v38   ;;  %v9771_v16 = vpop.permute.xlu0 %3949 }
 0x3eb   : > { %4175 = vperm.xlu2 %5900, %v9582_v40  }
 0x3ec   : > { %v9774_v37 = vpop.permute.xlu2 %3981 }
 0x3ed   : > { %11897 = vst [vmem:[#allocation132_spill] sm:$0xff] %v9774_v37 }
 0x3ee   : > { %5902 = vset.pattern.permute.xlu1 %v11895_v59 }
 0x3ef   : > { %4249 = vperm.xlu1 %5902, %v8633_v56   ;;  %v9778_v51 = vpop.permute.xlu1 %3953 }
 0x3f0   : > { %11898 = vst [vmem:[#allocation133_spill] sm:$0xff] %v9778_v51  ;;  %4277 = vperm.xlu0 %5904, %v11843_v62   ;;  %v9781_v50 = vpop.permute.xlu0 %3961 }
 0x3f1   : > { %11899 = vst [vmem:[#allocation134_spill] sm:$0xff] %v9781_v50 }
 0x3f3   : > { %5903 = vset.pattern.permute.xlu2 %v11895_v59 }
 0x3f4   : > { %4253 = vperm.xlu2 %5903, %v8652_v20  }
 0x3f5   : > { %v9785_v54 = vpop.permute.xlu2 %4059 }
 0x3f6   : > { %11900 = vst [vmem:[#allocation135_spill] sm:$0xff] %v9785_v54 }
 0x3f7   : > { %4261 = vperm.xlu1 %5902, %v8758_v22   ;;  %v9788_v13 = vpop.permute.xlu1 %3965 }
 0x3f8   : > { %11901 = vst [vmem:[#allocation136_spill] sm:$0xff] %v9788_v13  ;;  %4289 = vperm.xlu0 %5904, %v9016_v34   ;;  %v9791_v37 = vpop.permute.xlu0 %3973 }
 0x3f9   : > { %11902 = vst [vmem:[#allocation137_spill] sm:$0xff] %v9791_v37 }
 0x3fc   : > { %4265 = vperm.xlu2 %5903, %v11839_v14  }
 0x3fd   : > { %v9794_v51 = vpop.permute.xlu2 %4071 }
 0x3fe   : > { %11903 = vst [vmem:[#allocation138_spill] sm:$0xff] %v9794_v51 }
 0x3ff   : > { %4269 = vperm.xlu1 %5902, %v11841_v12   ;;  %v9797_v36 = vpop.permute.xlu1 %3977 }
 0x400   : > { %11904 = vst [vmem:[#allocation139_spill] sm:$0xff] %v9797_v36  ;;  %4301 = vperm.xlu0 %5904, %v11851_v10   ;;  %v9800_v59 = vpop.permute.xlu0 %3985 }
 0x401   : > { %11905 = vst [vmem:[#allocation140_spill] sm:$0xff] %v9800_v59 }
 0x404   : > { %4273 = vperm.xlu2 %5903, %v11844_v31  }
 0x405   : > { %v9803_v54 = vpop.permute.xlu2 %4079 }
 0x406   : > { %11906 = vst [vmem:[#allocation141_spill] sm:$0xff] %v9803_v54 }
 0x407   : > { %4281 = vperm.xlu1 %5902, %v11845_v26  }
 0x408   : > { %4313 = vperm.xlu0 %5904, %v11856_v29   ;;  %v9807_v13 = vpop.permute.xlu1 %4055 }
 0x409   : > { %11907 = vst [vmem:[#allocation142_spill] sm:$0xff] %v9807_v13  ;;  %v9809_v33 = vpop.permute.xlu0 %4063 }
 0x40a   : > { %11908 = vst [vmem:[#allocation143_spill] sm:$0xff] %v9809_v33 }
 0x40c   : > { %4285 = vperm.xlu2 %5903, %v11849_v9  }
 0x40d   : > { %v9812_v51 = vpop.permute.xlu2 %4091 }
 0x40e   : > { %11909 = vst [vmem:[#allocation144_spill] sm:$0xff] %v9812_v51 }
 0x40f   : > { %4293 = vperm.xlu1 %5902, %v11850_v7  }
 0x410   : > { %4325 = vperm.xlu0 %5904, %v11860_v47   ;;  %v9816_v36 = vpop.permute.xlu1 %4067 }
 0x411   : > { %11910 = vst [vmem:[#allocation145_spill] sm:$0xff] %v9816_v36  ;;  %v9818_v59 = vpop.permute.xlu0 %4083 }
 0x414   : > { %4297 = vperm.xlu2 %5903, %v11854_v35  }
 0x415   : > { %v9821_v54 = vpop.permute.xlu2 %4103 }
 0x416   : > { %11911 = vst [vmem:[#allocation146_spill] sm:$0xff] %v9821_v54 }
 0x417   : > { %4305 = vperm.xlu1 %5902, %v11855_v49  }
 0x418   : > { %4337 = vperm.xlu0 %5904, %v9434_v60   ;;  %v9825_v13 = vpop.permute.xlu1 %4075 }
 0x419   : > { %11912 = vst [vmem:[#allocation147_spill] sm:$0xff] %v9825_v13  ;;  %v9827_v33 = vpop.permute.xlu0 %4095 }
 0x41c   : > { %4309 = vperm.xlu2 %5903, %v11857_v4  }
 0x41d   : > { %v9830_v51 = vpop.permute.xlu2 %4115 }
 0x41e   : > { %11913 = vst [vmem:[#allocation148_spill] sm:$0xff] %v9830_v51 }
 0x41f   : > { %4317 = vperm.xlu1 %5902, %v11859_v17  }
 0x420   : > { %4349 = vperm.xlu0 %5904, %v9495_v42   ;;  %v9834_v36 = vpop.permute.xlu1 %4087 }
 0x421   : > { %11914 = vst [vmem:[#allocation149_spill] sm:$0xff] %v9834_v36  ;;  %v9836_v25 = vpop.permute.xlu0 %4107 }
 0x424   : > { %4321 = vperm.xlu2 %5903, %v11861_v30  }
 0x425   : > { %v9839_v54 = vpop.permute.xlu2 %4127 }
 0x427   : > { %4329 = vperm.xlu1 %5902, %v11863_v11  }
 0x428   : > { %4361 = vperm.xlu0 %5904, %v9552_v55   ;;  %v9843_v13 = vpop.permute.xlu1 %4099 }
 0x429   : > { %11915 = vst [vmem:[#allocation150_spill] sm:$0xff] %v9843_v13  ;;  %v9845_v2 = vpop.permute.xlu0 %4119  ;;  %v6065_v13 = vmov 4  }
 0x42c   : > { %4333 = vperm.xlu2 %5903, %v11865_v0  }
 0x42d   : > { %v9848_v51 = vpop.permute.xlu2 %4139 }
 0x42e   : > { %11916 = vst [vmem:[#allocation151_spill] sm:$0xff] %v9848_v51 }
 0x42f   : > { %4341 = vperm.xlu1 %5902, %v9453_v24  }
 0x430   : > { %4373 = vperm.xlu0 %5904, %v9589_v3   ;;  %v9852_v36 = vpop.permute.xlu1 %4111 }
 0x431   : > { %11917 = vst [vmem:[#allocation152_spill] sm:$0xff] %v9852_v36  ;;  %v9854_v48 = vpop.permute.xlu0 %4131 }
 0x434   : > { %4345 = vperm.xlu2 %5903, %v9476_v21  }
 0x435   : > { %v9857_v57 = vpop.permute.xlu2 %4151 }
 0x436   : > { %11918 = vst [vmem:[#allocation153_spill] sm:$0xff] %v9857_v57 }
 0x437   : > { %4353 = vperm.xlu1 %5902, %v9518_v8  }
 0x438   : > { %5907 = vset.pattern.permute.xlu0 %v6065_v13  ;;  %v9860_v37 = vpop.permute.xlu1 %4123 }
 0x439   : > { %11919 = vst [vmem:[#allocation154_spill] sm:$0xff] %v9860_v37  ;;  %4451 = vperm.xlu0 %5907, %v8732_v38   ;;  %v9863_v32 = vpop.permute.xlu0 %4143 }
 0x43c   : > { %4357 = vperm.xlu2 %5903, %v9535_v23  }
 0x43d   : > { %v9866_v45 = vpop.permute.xlu2 %4163 }
 0x43e   : > { %11920 = vst [vmem:[#allocation155_spill] sm:$0xff] %v9866_v45 }
 0x43f   : > { %4365 = vperm.xlu1 %5902, %v9571_v61  }
 0x440   : > { %v9869_v36 = vpop.permute.xlu1 %4135 }
 0x441   : > { %11921 = vst [vmem:[#allocation156_spill] sm:$0xff] %v9869_v36  ;;  %4471 = vperm.xlu0 %5907, %v11843_v62   ;;  %v9872_v57 = vpop.permute.xlu0 %4155 }
 0x442   : > { %11922 = vst [vmem:[#allocation157_spill] sm:$0xff] %v9872_v57 }
 0x444   : > { %4369 = vperm.xlu2 %5903, %v9582_v40  }
 0x445   : > { %v9875_v27 = vpop.permute.xlu2 %4175 }
 0x446   : > { %11923 = vst [vmem:[#allocation158_spill] sm:$0xff] %v9875_v27 }
 0x447   : > { %5905 = vset.pattern.permute.xlu1 %v6065_v13 }
 0x448   : > { %4443 = vperm.xlu1 %5905, %v8633_v56   ;;  %v9878_v37 = vpop.permute.xlu1 %4147 }
 0x449   : > { %11924 = vst [vmem:[#allocation159_spill] sm:$0xff] %v9878_v37  ;;  %4483 = vperm.xlu0 %5907, %v9016_v34   ;;  %v9881_v45 = vpop.permute.xlu0 %4167 }
 0x44a   : > { %11925 = vst [vmem:[#allocation160_spill] sm:$0xff] %v9881_v45 }
 0x44c   : > { %5906 = vset.pattern.permute.xlu2 %v6065_v13 }
 0x44d   : > { %4447 = vperm.xlu2 %5906, %v8652_v20  }
 0x44e   : > { %v9884_v36 = vpop.permute.xlu2 %4253 }
 0x44f   : > { %11926 = vst [vmem:[#allocation161_spill] sm:$0xff] %v9884_v36 }
 0x450   : > { %4455 = vperm.xlu1 %5905, %v8758_v22   ;;  %v9887_v57 = vpop.permute.xlu1 %4159 }
 0x451   : > { %11927 = vst [vmem:[#allocation162_spill] sm:$0xff] %v9887_v57  ;;  %4495 = vperm.xlu0 %5907, %v11851_v10   ;;  %v9890_v27 = vpop.permute.xlu0 %4179 }
 0x452   : > { %11928 = vst [vmem:[#allocation163_spill] sm:$0xff] %v9890_v27 }
 0x455   : > { %4459 = vperm.xlu2 %5906, %v11839_v14  }
 0x456   : > { %v9893_v37 = vpop.permute.xlu2 %4265 }
 0x457   : > { %11929 = vst [vmem:[#allocation164_spill] sm:$0xff] %v9893_v37 }
 0x458   : > { %4463 = vperm.xlu1 %5905, %v11841_v12   ;;  %v9896_v45 = vpop.permute.xlu1 %4171 }
 0x459   : > { %11930 = vst [vmem:[#allocation165_spill] sm:$0xff] %v9896_v45  ;;  %4507 = vperm.xlu0 %5907, %v11856_v29  }
 0x45a   : > { %v9899_v13 = vpop.permute.xlu0 %4257 }
 0x45b   : > { %11931 = vst [vmem:[#allocation166_spill] sm:$0xff] %v9899_v13 }
 0x45d   : > { %4467 = vperm.xlu2 %5906, %v11844_v31  }
 0x45e   : > { %v9902_v36 = vpop.permute.xlu2 %4273 }
 0x45f   : > { %11932 = vst [vmem:[#allocation167_spill] sm:$0xff] %v9902_v36 }
 0x460   : > { %4475 = vperm.xlu1 %5905, %v11845_v26  }
 0x461   : > { %4519 = vperm.xlu0 %5907, %v11860_v47   ;;  %v9906_v57 = vpop.permute.xlu1 %4249 }
 0x462   : > { %11933 = vst [vmem:[#allocation168_spill] sm:$0xff] %v9906_v57  ;;  %v9908_v27 = vpop.permute.xlu0 %4277 }
 0x465   : > { %4479 = vperm.xlu2 %5906, %v11849_v9  }
 0x466   : > { %v9911_v37 = vpop.permute.xlu2 %4285 }
 0x467   : > { %11934 = vst [vmem:[#allocation169_spill] sm:$0xff] %v9911_v37 }
 0x468   : > { %4487 = vperm.xlu1 %5905, %v11850_v7  }
 0x469   : > { %4531 = vperm.xlu0 %5907, %v9434_v60   ;;  %v9915_v45 = vpop.permute.xlu1 %4261 }
 0x46a   : > { %11935 = vst [vmem:[#allocation170_spill] sm:$0xff] %v9915_v45  ;;  %v9917_v13 = vpop.permute.xlu0 %4289 }
 0x46d   : > { %4491 = vperm.xlu2 %5906, %v11854_v35  }
 0x46e   : > { %v9920_v36 = vpop.permute.xlu2 %4297 }
 0x46f   : > { %11936 = vst [vmem:[#allocation171_spill] sm:$0xff] %v9920_v36 }
 0x470   : > { %4499 = vperm.xlu1 %5905, %v11855_v49  }
 0x471   : > { %4543 = vperm.xlu0 %5907, %v9495_v42   ;;  %v9924_v57 = vpop.permute.xlu1 %4269 }
 0x472   : > { %11937 = vst [vmem:[#allocation172_spill] sm:$0xff] %v9924_v57  ;;  %v9926_v41 = vpop.permute.xlu0 %4301 }
 0x475   : > { %4503 = vperm.xlu2 %5906, %v11857_v4  }
 0x476   : > { %v9929_v37 = vpop.permute.xlu2 %4309 }
 0x477   : > { %11938 = vst [vmem:[#allocation173_spill] sm:$0xff] %v9929_v37 }
 0x478   : > { %4511 = vperm.xlu1 %5905, %v11859_v17  }
 0x479   : > { %4555 = vperm.xlu0 %5907, %v9552_v55   ;;  %v9933_v45 = vpop.permute.xlu1 %4281 }
 0x47a   : > { %11939 = vst [vmem:[#allocation174_spill] sm:$0xff] %v9933_v45  ;;  %v9935_v50 = vpop.permute.xlu0 %4313  ;;  %v6066_v45 = vmov 5  }
 0x47d   : > { %4515 = vperm.xlu2 %5906, %v11861_v30  }
 0x47e   : > { %v9938_v36 = vpop.permute.xlu2 %4321 }
 0x480   : > { %4523 = vperm.xlu1 %5905, %v11863_v11  }
 0x481   : > { %4567 = vperm.xlu0 %5907, %v9589_v3   ;;  %v9942_v57 = vpop.permute.xlu1 %4293 }
 0x482   : > { %11940 = vst [vmem:[#allocation175_spill] sm:$0xff] %v9942_v57  ;;  %v9944_v51 = vpop.permute.xlu0 %4325 }
 0x485   : > { %4527 = vperm.xlu2 %5906, %v11865_v0  }
 0x486   : > { %v9947_v37 = vpop.permute.xlu2 %4333 }
 0x488   : > { %4535 = vperm.xlu1 %5905, %v9453_v24  }
 0x489   : > { %5910 = vset.pattern.permute.xlu0 %v6066_v45  ;;  %v9950_v58 = vpop.permute.xlu1 %4305 }
 0x48a   : > { %11941 = vst [vmem:[#allocation176_spill] sm:$0xff] %v9950_v58  ;;  %4645 = vperm.xlu0 %5910, %v8732_v38   ;;  %v9953_v52 = vpop.permute.xlu0 %4337 }
 0x48d   : > { %4539 = vperm.xlu2 %5906, %v9476_v21  }
 0x48e   : > { %v9956_v11 = vpop.permute.xlu2 %4345 }
 0x490   : > { %4547 = vperm.xlu1 %5905, %v9518_v8  }
 0x491   : > { %v9959_v57 = vpop.permute.xlu1 %4317 }
 0x492   : > { %11942 = vst [vmem:[#allocation177_spill] sm:$0xff] %v9959_v57  ;;  %4665 = vperm.xlu0 %5910, %v11843_v62   ;;  %v9962_v0 = vpop.permute.xlu0 %4349 }
 0x495   : > { %4551 = vperm.xlu2 %5906, %v9535_v23  }
 0x496   : > { %v9965_v24 = vpop.permute.xlu2 %4357 }
 0x498   : > { %4559 = vperm.xlu1 %5905, %v9571_v61  }
 0x499   : > { %v9968_v58 = vpop.permute.xlu1 %4329 }
 0x49a   : > { %11943 = vst [vmem:[#allocation178_spill] sm:$0xff] %v9968_v58  ;;  %4677 = vperm.xlu0 %5910, %v9016_v34   ;;  %v9971_v21 = vpop.permute.xlu0 %4361 }
 0x49d   : > { %4563 = vperm.xlu2 %5906, %v9582_v40   ;;  %v9991_v40 = vld [vmem:[%s11366_s6 + $0x1] ss:$0 sm:$0xff] }
 0x49e   : > { %v9974_v8 = vpop.permute.xlu2 %4369 }
 0x49f   : > { %11944 = vst [vmem:[#allocation179_spill] sm:$0xff] %v9974_v8 }
 0x4a0   : > { %5908 = vset.pattern.permute.xlu1 %v6066_v45 }
 0x4a1   : > { %4637 = vperm.xlu1 %5908, %v8633_v56   ;;  %v9977_v57 = vpop.permute.xlu1 %4341 }
 0x4a2   : > { %11945 = vst [vmem:[#allocation180_spill] sm:$0xff] %v9977_v57  ;;  %4689 = vperm.xlu0 %5910, %v11851_v10   ;;  %v9980_v23 = vpop.permute.xlu0 %4373 }
 0x4a5   : > { %5909 = vset.pattern.permute.xlu2 %v6066_v45  ;;  %v9999_v45 = vld [vmem:[%s11366_s6] ss:$0 sm:$0xff] }
 0x4a6   : > { %4641 = vperm.xlu2 %5909, %v8652_v20   ;;  %v3996_v20 = vmul.f32 %v9991_v40, %v9725_v1 }
 0x4a7   : > { %v9983_v61 = vpop.permute.xlu2 %4447 }
 0x4a8   : > { %11946 = vst [vmem:[#allocation181_spill] sm:$0xff] %v9983_v61 }
 0x4a9   : > { %4649 = vperm.xlu1 %5908, %v8758_v22   ;;  %v9986_v58 = vpop.permute.xlu1 %4353  ;;  %v10006_v22 = vld [vmem:[%s11366_s6 + $0x2] ss:$0 sm:$0xff] }
 0x4aa   : > { %11947 = vst [vmem:[#allocation182_spill] sm:$0xff] %v9986_v58  ;;  %4701 = vperm.xlu0 %5910, %v11856_v29   ;;  %v3834_v58 = vmul.f32 %v9999_v45, %v9622_v43  ;;  %v4190_v61 = vmul.f32 %v10006_v22, %v9818_v59  ;;  %v10015_v29 = vld [vmem:[%s11366_s6 + $0x3] ss:$0 sm:$0xff]  ;;  %v10028_v59 = vld [vmem:[%s11366_s6 + $0x4] ss:$0 sm:$0xff] }
 0x4ab   : > { %v9994_v56 = vpop.permute.xlu0 %4451  ;;  %v4384_v57 = vmul.f32 %v10015_v29, %v9908_v27  ;;  %v3837_v27 = vmul.f32 %v9999_v45, %v9631_v19 }
 0x4ac   : > { %11948 = vst [vmem:[#allocation183_spill] sm:$0xff] %v9994_v56  ;;  %v4028_v1 = vadd.f32 %v3996_v20, %v3834_v58 }
 0x4ae   : > { %4653 = vperm.xlu2 %5909, %v11839_v14   ;;  %v4222_v43 = vadd.f32 %v4190_v61, %v4028_v1  ;;  %v3999_v14 = vmul.f32 %v9991_v40, %v9734_v18  ;;  %v4193_v61 = vmul.f32 %v10006_v22, %v9827_v33  ;;  %v4002_v33 = vmul.f32 %v9991_v40, %v9743_v46 }
 0x4af   : > { %v10018_v56 = vpop.permute.xlu2 %4459 }
 0x4b0   : > { %11949 = vst [vmem:[#allocation184_spill] sm:$0xff] %v10018_v56  ;;  %v4416_v20 = vadd.f32 %v4384_v57, %v4222_v43  ;;  %v4387_v56 = vmul.f32 %v10015_v29, %v9917_v13  ;;  %v4196_v13 = vmul.f32 %v10006_v22, %v9836_v25  ;;  %v4005_v25 = vmul.f32 %v9991_v40, %v9752_v5 }
 0x4b1   : > { %4657 = vperm.xlu1 %5908, %v11841_v12   ;;  %v10023_v8 = vpop.permute.xlu1 %4365 }
 0x4b2   : > { %11950 = vst [vmem:[#allocation185_spill] sm:$0xff] %v10023_v8  ;;  %4713 = vperm.xlu0 %5910, %v11860_v47   ;;  %v4031_v8 = vadd.f32 %v3999_v14, %v3837_v27  ;;  %v3840_v14 = vmul.f32 %v9999_v45, %v9641_v6  ;;  %v4390_v27 = vmul.f32 %v10015_v29, %v9926_v41 }
 0x4b3   : > { %v4472_v10 = vpop.permute.xlu0 %4471  ;;  %v4199_v41 = vmul.f32 %v10006_v22, %v9845_v2  ;;  %v4008_v2 = vmul.f32 %v9991_v40, %v9761_v53  ;;  %v4396_v53 = vmul.f32 %v10015_v29, %v9944_v51  ;;  %v4395_v51 = vmul.f32 %v10015_v29, %v9938_v36 }
 0x4b4   : > { %v4578_v58 = vmul.f32 %v10028_v59, %v4472_v10  ;;  %v4225_v18 = vadd.f32 %v4193_v61, %v4031_v8 }
 0x4b6   : > { %v10038_v1 = vadd.f32 %v4578_v58, %v4416_v20  ;;  %4661 = vperm.xlu2 %5909, %v11844_v31   ;;  %v4419_v57 = vadd.f32 %v4387_v56, %v4225_v18  ;;  %v4034_v58 = vadd.f32 %v4002_v33, %v3840_v14  ;;  %v4393_v14 = vmul.f32 %v10015_v29, %v9935_v50 }
 0x4b7   : > { %v10041_v12 = vpop.permute.xlu2 %4467  ;;  %v4202_v50 = vmul.f32 %v10006_v22, %v9854_v48  ;;  %v4201_v48 = vmul.f32 %v10006_v22, %v9839_v54 }
 0x4b8   : > { %v4228_v56 = vadd.f32 %v4196_v13, %v4034_v58 }
 0x4b9   : > { %4669 = vperm.xlu1 %5908, %v11845_v26  }
 0x4ba   : > { %4725 = vperm.xlu0 %5910, %v9434_v60   ;;  %v10047_v10 = vpop.permute.xlu1 %4443  ;;  %v4422_v61 = vadd.f32 %v4390_v27, %v4228_v56  ;;  %v3846_v56 = vmul.f32 %v9999_v45, %v9661_v63 }
 0x4bb   : > { %v4484_v19 = vpop.permute.xlu0 %4483 }
 0x4bc   : > { %v4581_v43 = vmul.f32 %v10028_v59, %v4484_v19  ;;  %v3843_v19 = vmul.f32 %v9999_v45, %v9651_v28 }
 0x4be   : > { %v10056_v20 = vadd.f32 %v4581_v43, %v4419_v57  ;;  %4673 = vperm.xlu2 %5909, %v11849_v9   ;;  %v4037_v43 = vadd.f32 %v4005_v25, %v3843_v19  ;;  %v4007_v25 = vmul.f32 %v9991_v40, %v9737_v39  ;;  %v3845_v19 = vmul.f32 %v9999_v45, %v9636_v15 }
 0x4bf   : > { %v10059_v8 = vpop.permute.xlu2 %4479 }
 0x4c0   : > { %v4231_v5 = vadd.f32 %v4199_v41, %v4037_v43  ;;  %v4039_v39 = vadd.f32 %v4007_v25, %v3845_v19  ;;  %v4399_v25 = vmul.f32 %v10015_v29, %v9953_v52  ;;  %v11953_v19 = vld [vmem:[#allocation130_spill] sm:$0xff] }
 0x4c1   : > { %4681 = vperm.xlu1 %5908, %v11850_v7  }
 0x4c2   : > { %4737 = vperm.xlu0 %5910, %v9495_v42   ;;  %v10065_v46 = vpop.permute.xlu1 %4455  ;;  %v4425_v58 = vadd.f32 %v4393_v14, %v4231_v5  ;;  %v4011_v14 = vmul.f32 %v9991_v40, %v9771_v16  ;;  %v4233_v54 = vadd.f32 %v4201_v48, %v4039_v39  ;;  %v11479_v39 = vmov 6  }
 0x4c3   : > { %v4496_v6 = vpop.permute.xlu0 %4495 }
 0x4c4   : > { %v4584_v18 = vmul.f32 %v10028_v59, %v4496_v6  ;;  %v4427_v36 = vadd.f32 %v4395_v51, %v4233_v54 }
 0x4c6   : > { %v10074_v33 = vadd.f32 %v4584_v18, %v4422_v61  ;;  %4685 = vperm.xlu2 %5909, %v11854_v35   ;;  %v4040_v18 = vadd.f32 %v4008_v2, %v3846_v56  ;;  %v4205_v2 = vmul.f32 %v10006_v22, %v9863_v32  ;;  %v11954_v32 = vld [vmem:[#allocation151_spill] sm:$0xff] }
 0x4c7   : > { %v10077_v57 = vpop.permute.xlu2 %4491  ;;  %v4204_v48 = vmul.f32 %v10006_v22, %v11954_v32 }
 0x4c8   : > { %v4234_v63 = vadd.f32 %v4202_v50, %v4040_v18 }
 0x4c9   : > { %4693 = vperm.xlu1 %5908, %v11855_v49  }
 0x4ca   : > { %4749 = vperm.xlu0 %5910, %v9552_v55   ;;  %v10083_v13 = vpop.permute.xlu1 %4463  ;;  %v4428_v5 = vadd.f32 %v4396_v53, %v4234_v63 }
 0x4cb   : > { %v4508_v28 = vpop.permute.xlu0 %4507 }
 0x4cc   : > { %v4587_v27 = vmul.f32 %v10028_v59, %v4508_v28  ;;  %v3849_v28 = vmul.f32 %v9999_v45, %v9670_v44  ;;  %v11952_v44 = vld [vmem:[#allocation101_spill] sm:$0xff] }
 0x4cd   : > { %v3848_v53 = vmul.f32 %v9999_v45, %v11952_v44  ;;  %v11959_v44 = vld [vmem:[#allocation56_spill] sm:$0xff] }
 0x4ce   : > { %v10092_v6 = vadd.f32 %v4587_v27, %v4425_v58  ;;  %4697 = vperm.xlu2 %5909, %v11857_v4   ;;  %v11951_v27 = vld [vmem:[#allocation41_spill] sm:$0xff]  ;;  %v4043_v50 = vadd.f32 %v4011_v14, %v3849_v28  ;;  %v4398_v28 = vmul.f32 %v10015_v29, %v9947_v37 }
 0x4cf   : > { %v10097_v61 = vpop.permute.xlu2 %4503  ;;  %v4010_v16 = vmul.f32 %v9991_v40, %v11951_v27  ;;  %v11957_v27 = vld [vmem:[#allocation120_spill] sm:$0xff] }
 0x4d0   : > { %v4237_v63 = vadd.f32 %v4205_v2, %v4043_v50 }
 0x4d1   : > { %4705 = vperm.xlu1 %5908, %v11859_v17   ;;  %v4042_v51 = vadd.f32 %v4010_v16, %v3848_v53  ;;  %v11960_v53 = vld [vmem:[#allocation43_spill] sm:$0xff] }
 0x4d2   : > { %4761 = vperm.xlu0 %5910, %v9589_v3   ;;  %v10107_v41 = vpop.permute.xlu1 %4475  ;;  %v4431_v54 = vadd.f32 %v4399_v25, %v4237_v63  ;;  %v4013_v32 = vmul.f32 %v9991_v40, %v11960_v53  ;;  %v4402_v25 = vmul.f32 %v10015_v29, %v9962_v0 }
 0x4d3   : > { %v4520_v43 = vpop.permute.xlu0 %4519  ;;  %v4236_v50 = vadd.f32 %v4204_v48, %v4042_v51  ;;  %v11962_v51 = vld [vmem:[#allocation61_spill] sm:$0xff] }
 0x4d4   : > { %v4590_v15 = vmul.f32 %v10028_v59, %v4520_v43 }
 0x4d5   : > { %v4430_v37 = vadd.f32 %v4398_v28, %v4236_v50  ;;  %v11966_v28 = vld [vmem:[#allocation53_spill] sm:$0xff] }
 0x4d6   : > { %v10118_v58 = vadd.f32 %v4590_v15, %v4428_v5  ;;  %4709 = vperm.xlu2 %5909, %v11861_v30   ;;  %v11956_v5 = vld [vmem:[#allocation134_spill] sm:$0xff]  ;;  %v11967_v50 = vld [vmem:[#allocation137_spill] sm:$0xff] }
 0x4d7   : > { %v4516_v56 = vpop.permute.xlu2 %4515  ;;  %v4014_v15 = vmul.f32 %v9991_v40, %v11956_v5 }
 0x4d8   : > { %v4589_v18 = vmul.f32 %v10028_v59, %v4516_v56  ;;  %v3852_v56 = vmul.f32 %v9999_v45, %v11957_v27 }
 0x4d9   : > { %4717 = vperm.xlu1 %5908, %v11953_v19  }
 0x4da   : > { %5913 = vset.pattern.permute.xlu0 %v11479_v39  ;;  %v10132_v43 = vadd.f32 %v4589_v18, %v4427_v36  ;;  %v10134_v14 = vpop.permute.xlu1 %4487  ;;  %v11958_v36 = vld [vmem:[#allocation157_spill] sm:$0xff]  ;;  %v4046_v39 = vadd.f32 %v4014_v15, %v3852_v56  ;;  %v4006_v56 = vmul.f32 %v9991_v40, %v11966_v28 }
 0x4db   : > { %4839 = vperm.xlu0 %5913, %v8732_v38   ;;  %v4532_v52 = vpop.permute.xlu0 %4531  ;;  %v4208_v18 = vmul.f32 %v10006_v22, %v11958_v36 }
 0x4dc   : > { %11955 = vst [vmem:[#allocation41_spill] sm:$0xff] %v10132_v43  ;;  %v4593_v2 = vmul.f32 %v10028_v59, %v4532_v52  ;;  %v11961_v52 = vld [vmem:[#allocation103_spill] sm:$0xff] }
 0x4dd   : > { %v3851_v48 = vmul.f32 %v9999_v45, %v11961_v52  ;;  %v4240_v27 = vadd.f32 %v4208_v18, %v4046_v39  ;;  %v4401_v52 = vmul.f32 %v10015_v29, %v9956_v11  ;;  %v11968_v18 = vld [vmem:[#allocation100_spill] sm:$0xff] }
 0x4de   : > { %v10146_v16 = vadd.f32 %v4593_v2, %v4431_v54  ;;  %4721 = vperm.xlu2 %5909, %v11959_v44   ;;  %v11963_v54 = vld [vmem:[#allocation153_spill] sm:$0xff]  ;;  %v11972_v44 = vld [vmem:[#allocation60_spill] sm:$0xff] }
 0x4df   : > { %v4528_v5 = vpop.permute.xlu2 %4527  ;;  %v4207_v2 = vmul.f32 %v10006_v22, %v11963_v54  ;;  %v4045_v15 = vadd.f32 %v4013_v32, %v3851_v48  ;;  %v11970_v48 = vld [vmem:[#allocation104_spill] sm:$0xff] }
 0x4e0   : > { %v4592_v63 = vmul.f32 %v10028_v59, %v4528_v5  ;;  %v4017_v5 = vmul.f32 %v9991_v40, %v11967_v50  ;;  %v3855_v54 = vmul.f32 %v9999_v45, %v11970_v48  ;;  %v11976_v48 = vld [vmem:[#allocation63_spill] sm:$0xff] }
 0x4e1   : > { %4729 = vperm.xlu1 %5908, %v11962_v51   ;;  %v4434_v51 = vadd.f32 %v4402_v25, %v4240_v27  ;;  %v4239_v28 = vadd.f32 %v4207_v2, %v4045_v15  ;;  %v11973_v25 = vld [vmem:[#allocation129_spill] sm:$0xff]  ;;  %v4405_v2 = vmul.f32 %v10015_v29, %v9971_v21 }
 0x4e2   : > { %v10159_v36 = vadd.f32 %v4592_v63, %v4430_v37  ;;  %v10161_v53 = vpop.permute.xlu1 %4499  ;;  %v3844_v37 = vmul.f32 %v9999_v45, %v11968_v18  ;;  %v11969_v63 = vld [vmem:[#allocation154_spill] sm:$0xff]  ;;  %v4016_v27 = vmul.f32 %v9991_v40, %v11973_v25 }
 0x4e3   : > { %11965 = vst [vmem:[#allocation130_spill] sm:$0xff] %v10161_v53  ;;  %4859 = vperm.xlu0 %5913, %v11843_v62   ;;  %v4544_v0 = vpop.permute.xlu0 %4543  ;;  %v4200_v32 = vmul.f32 %v10006_v22, %v11969_v63  ;;  %v4049_v63 = vadd.f32 %v4017_v5, %v3855_v54  ;;  %v4433_v43 = vadd.f32 %v4401_v52, %v4239_v28  ;;  %v11979_v52 = vld [vmem:[#allocation131_spill] sm:$0xff] }
 0x4e4   : > { %11964 = vst [vmem:[#allocation101_spill] sm:$0xff] %v10159_v36  ;;  %v4596_v39 = vmul.f32 %v10028_v59, %v4544_v0  ;;  %v11971_v36 = vld [vmem:[#allocation160_spill] sm:$0xff]  ;;  %v4038_v11 = vadd.f32 %v4006_v56, %v3844_v37  ;;  %v11974_v0 = vld [vmem:[#allocation177_spill] sm:$0xff]  ;;  %v11977_v56 = vld [vmem:[#allocation155_spill] sm:$0xff]  ;;  %v4009_v54 = vmul.f32 %v9991_v40, %v11979_v52 }
 0x4e5   : > { %v4211_v53 = vmul.f32 %v10006_v22, %v11971_v36  ;;  %v4394_v18 = vmul.f32 %v10015_v29, %v11974_v0  ;;  %v11975_v36 = vld [vmem:[#allocation110_spill] sm:$0xff]  ;;  %v4210_v37 = vmul.f32 %v10006_v22, %v11977_v56  ;;  %v11985_v52 = vld [vmem:[#allocation163_spill] sm:$0xff] }
 0x4e6   : > { %v10179_v50 = vadd.f32 %v4596_v39, %v4434_v51  ;;  %4733 = vperm.xlu2 %5909, %v11972_v44   ;;  %v3854_v51 = vmul.f32 %v9999_v45, %v11975_v36  ;;  %v4232_v39 = vadd.f32 %v4200_v32, %v4038_v11  ;;  %v11980_v32 = vld [vmem:[#allocation140_spill] sm:$0xff]  ;;  %v4404_v36 = vmul.f32 %v10015_v29, %v9965_v24  ;;  %v11987_v24 = vld [vmem:[#allocation70_spill] sm:$0xff] }
 0x4e7   : > { %v4540_v62 = vpop.permute.xlu2 %4539  ;;  %v4243_v25 = vadd.f32 %v4211_v53, %v4049_v63  ;;  %v4020_v11 = vmul.f32 %v9991_v40, %v11980_v32  ;;  %v11981_v63 = vld [vmem:[#allocation102_spill] sm:$0xff]  ;;  %v4214_v32 = vmul.f32 %v10006_v22, %v11985_v52  ;;  %v11991_v52 = vld [vmem:[#allocation96_spill] sm:$0xff] }
 0x4e8   : > { %v4595_v15 = vmul.f32 %v10028_v59, %v4540_v62  ;;  %v4048_v5 = vadd.f32 %v4016_v27, %v3854_v51  ;;  %v4426_v21 = vadd.f32 %v4394_v18, %v4232_v39  ;;  %v3847_v27 = vmul.f32 %v9999_v45, %v11981_v63  ;;  %v11984_v39 = vld [vmem:[#allocation81_spill] sm:$0xff]  ;;  %v11989_v63 = vld [vmem:[#allocation178_spill] sm:$0xff] }
 0x4e9   : > { %4741 = vperm.xlu1 %5908, %v11976_v48   ;;  %v4437_v53 = vadd.f32 %v4405_v2, %v4243_v25  ;;  %v3858_v56 = vmul.f32 %v9999_v45, %v11984_v39  ;;  %v11988_v25 = vld [vmem:[#allocation132_spill] sm:$0xff]  ;;  %v11990_v39 = vld [vmem:[#allocation111_spill] sm:$0xff] }
 0x4ea   : > { %v10194_v44 = vadd.f32 %v4595_v15, %v4433_v43  ;;  %v4512_v0 = vpop.permute.xlu1 %4511  ;;  %v11982_v15 = vld [vmem:[#allocation156_spill] sm:$0xff]  ;;  %v4041_v2 = vadd.f32 %v4009_v54, %v3847_v27  ;;  %v11992_v54 = vld [vmem:[#allocation106_spill] sm:$0xff]  ;;  %v11998_v48 = vld [vmem:[#allocation179_spill] sm:$0xff] }
 0x4eb   : > { %4871 = vperm.xlu0 %5913, %v9016_v34   ;;  %v4556_v62 = vpop.permute.xlu0 %4555  ;;  %v4588_v28 = vmul.f32 %v10028_v59, %v4512_v0  ;;  %v4203_v18 = vmul.f32 %v10006_v22, %v11982_v15  ;;  %v4242_v0 = vadd.f32 %v4210_v37, %v4048_v5  ;;  %v4397_v15 = vmul.f32 %v10015_v29, %v11989_v63 }
 0x4ec   : > { %11978 = vst [vmem:[#allocation151_spill] sm:$0xff] %v10194_v44  ;;  %v4599_v43 = vmul.f32 %v10028_v59, %v4556_v62  ;;  %v4019_v62 = vmul.f32 %v9991_v40, %v11988_v25  ;;  %v4408_v37 = vmul.f32 %v10015_v29, %v9980_v23  ;;  %v3857_v27 = vmul.f32 %v9999_v45, %v11992_v54  ;;  %v11993_v25 = vld [vmem:[#allocation158_spill] sm:$0xff] }
 0x4ed   : > { %v10209_v51 = vadd.f32 %v4588_v28, %v4426_v21  ;;  %v4052_v28 = vadd.f32 %v4020_v11, %v3858_v56  ;;  %v4213_v63 = vmul.f32 %v10006_v22, %v11993_v25  ;;  %v11995_v56 = vld [vmem:[#allocation86_spill] sm:$0xff]  ;;  %v4407_v25 = vmul.f32 %v10015_v29, %v11998_v48  ;;  %v12004_v48 = vld [vmem:[#allocation105_spill] sm:$0xff] }
 0x4ee   : > { %v10215_v44 = vadd.f32 %v4599_v43, %v4437_v53  ;;  %4745 = vperm.xlu2 %5909, %v11987_v24   ;;  %v3829_v53 = vmul.f32 %v9999_v45, %v11990_v39  ;;  %v4235_v43 = vadd.f32 %v4203_v18, %v4041_v2  ;;  %v3991_v23 = vmul.f32 %v9991_v40, %v11995_v56  ;;  %v11997_v18 = vld [vmem:[#allocation39_spill] sm:$0xff] }
 0x4ef   : > { %11983 = vst [vmem:[#allocation134_spill] sm:$0xff] %v10209_v51  ;;  %v4552_v21 = vpop.permute.xlu2 %4551  ;;  %v4436_v51 = vadd.f32 %v4404_v36, %v4242_v0  ;;  %v4246_v24 = vadd.f32 %v4214_v32, %v4052_v28  ;;  %v11996_v0 = vld [vmem:[#allocation133_spill] sm:$0xff]  ;;  %v4051_v54 = vadd.f32 %v4019_v62, %v3857_v27  ;;  %v12000_v56 = vld [vmem:[#allocation143_spill] sm:$0xff] }
 0x4f0   : > { %11986 = vst [vmem:[#allocation120_spill] sm:$0xff] %v10215_v44  ;;  %v4598_v5 = vmul.f32 %v10028_v59, %v4552_v21  ;;  %v4012_v21 = vmul.f32 %v9991_v40, %v11996_v0  ;;  %v4429_v39 = vadd.f32 %v4397_v15, %v4235_v43  ;;  %v11999_v28 = vld [vmem:[#allocation109_spill] sm:$0xff]  ;;  %v12001_v0 = vld [vmem:[#allocation159_spill] sm:$0xff]  ;;  %v12006_v44 = vld [vmem:[#allocation180_spill] sm:$0xff] }
 0x4f1   : > { %4753 = vperm.xlu1 %5908, %v11991_v52   ;;  %v4440_v32 = vadd.f32 %v4408_v37, %v4246_v24  ;;  %v4206_v15 = vmul.f32 %v10006_v22, %v12001_v0  ;;  %v4245_v27 = vadd.f32 %v4213_v63, %v4051_v54  ;;  %v4023_v24 = vadd.f32 %v3991_v23, %v3829_v53  ;;  %v12007_v0 = vld [vmem:[#allocation65_spill] sm:$0xff]  ;;  %v12009_v53 = vld [vmem:[#allocation183_spill] sm:$0xff] }
 0x4f2   : > { %v10232_v11 = vadd.f32 %v4598_v5, %v4436_v51  ;;  %v4524_v36 = vpop.permute.xlu1 %4523  ;;  %v3850_v5 = vmul.f32 %v9999_v45, %v11999_v28  ;;  %v4573_v23 = vmul.f32 %v10028_v59, %v12009_v53 }
 0x4f3   : > { %4883 = vperm.xlu0 %5913, %v11997_v18   ;;  %v4568_v2 = vpop.permute.xlu0 %4567  ;;  %v4591_v52 = vmul.f32 %v10028_v59, %v4524_v36  ;;  %v12003_v18 = vld [vmem:[#allocation99_spill] sm:$0xff]  ;;  %v4439_v63 = vadd.f32 %v4407_v25, %v4245_v27 }
 0x4f4   : > { %11994 = vst [vmem:[#allocation157_spill] sm:$0xff] %v10232_v11  ;;  %v4602_v51 = vmul.f32 %v10028_v59, %v4568_v2  ;;  %v4185_v11 = vmul.f32 %v10006_v22, %v12000_v56  ;;  %v3990_v62 = vmul.f32 %v9991_v40, %v12003_v18  ;;  %v4044_v37 = vadd.f32 %v4012_v21, %v3850_v5  ;;  %v12005_v2 = vld [vmem:[#allocation166_spill] sm:$0xff]  ;;  %v10270_v21 = vld [vmem:[%s11366_s6 + $0x5] ss:$0 sm:$0xff]  ;;  %v12013_v25 = vld [vmem:[#allocation71_spill] sm:$0xff] }
 0x4f5   : > { %v10249_v43 = vadd.f32 %v4591_v52, %v4429_v39  ;;  %v4379_v28 = vmul.f32 %v10015_v29, %v12005_v2  ;;  %v4400_v56 = vmul.f32 %v10015_v29, %v12006_v44  ;;  %v3828_v52 = vmul.f32 %v9999_v45, %v12007_v0  ;;  %v12008_v39 = vld [vmem:[#allocation135_spill] sm:$0xff]  ;;  %v12011_v2 = vld [vmem:[#allocation136_spill] sm:$0xff] }
 0x4f6   : > { %v10253_v36 = vadd.f32 %v4602_v51, %v4440_v32  ;;  %4757 = vperm.xlu2 %5909, %v12004_v48   ;;  %v4184_v18 = vmul.f32 %v10006_v22, %v12008_v39  ;;  %v4217_v32 = vadd.f32 %v4185_v11, %v4023_v24  ;;  %v4238_v51 = vadd.f32 %v4206_v15, %v4044_v37  ;;  %v12014_v11 = vld [vmem:[#allocation161_spill] sm:$0xff]  ;;  %v12015_v37 = vld [vmem:[#allocation50_spill] sm:$0xff]  ;;  %v12016_v48 = vld [vmem:[#allocation112_spill] sm:$0xff] }
 0x4f7   : > { %12002 = vst [vmem:[#allocation43_spill] sm:$0xff] %v10249_v43  ;;  %v4564_v34 = vpop.permute.xlu2 %4563  ;;  %v12010_v44 = vmov 6   ;;  %v4022_v5 = vadd.f32 %v3990_v62, %v3828_v52  ;;  %v4015_v0 = vmul.f32 %v9991_v40, %v12011_v2  ;;  %v4378_v15 = vmul.f32 %v10015_v29, %v12014_v11  ;;  %v12017_v43 = vld [vmem:[#allocation162_spill] sm:$0xff]  ;;  %v12018_v2 = vld [vmem:[#allocation181_spill] sm:$0xff] }
 0x4f8   : > { %v4601_v54 = vmul.f32 %v10028_v59, %v4564_v34  ;;  %v4411_v27 = vadd.f32 %v4379_v28, %v4217_v32  ;;  %v4432_v24 = vadd.f32 %v4400_v56, %v4238_v51  ;;  %v3853_v62 = vmul.f32 %v9999_v45, %v12016_v48  ;;  %v12019_v56 = vld [vmem:[#allocation9_spill] sm:$0xff] }
 0x4f9   : > { %5911 = vset.pattern.permute.xlu1 %v12010_v44  ;;  %v4216_v52 = vadd.f32 %v4184_v18, %v4022_v5  ;;  %v3993_v32 = vmul.f32 %v9991_v40, %v12019_v56  ;;  %v12020_v18 = vld [vmem:[#allocation182_spill] sm:$0xff] }
 0x4fa   : > { %v10275_v39 = vadd.f32 %v4601_v54, %v4439_v63  ;;  %4831 = vperm.xlu1 %5911, %v12013_v25   ;;  %v4536_v34 = vpop.permute.xlu1 %4535  ;;  %v4209_v63 = vmul.f32 %v10006_v22, %v12017_v43  ;;  %v4572_v25 = vmul.f32 %v10028_v59, %v12018_v2  ;;  %v4047_v51 = vadd.f32 %v4015_v0, %v3853_v62  ;;  %v12022_v2 = vld [vmem:[#allocation74_spill] sm:$0xff] }
 0x4fb   : > { %4895 = vperm.xlu0 %5913, %v12015_v37   ;;  %v4594_v53 = vmul.f32 %v10028_v59, %v4536_v34  ;;  %v4410_v48 = vadd.f32 %v4378_v15, %v4216_v52  ;;  %v4403_v5 = vmul.f32 %v10015_v29, %v12020_v18  ;;  %v12021_v34 = vld [vmem:[#allocation126_spill] sm:$0xff]  ;;  %v12024_v15 = vld [vmem:[#allocation139_spill] sm:$0xff]  ;;  %v12025_v52 = vld [vmem:[#allocation121_spill] sm:$0xff] }
 0x4fc   : > { %12012 = vst [vmem:[#allocation103_spill] sm:$0xff] %v10275_v39  ;;  %v4646_v54 = vpop.permute.xlu0 %4645  ;;  %v4605_v39 = vadd.f32 %v4573_v23, %v4411_v27  ;;  %v3831_v23 = vmul.f32 %v9999_v45, %v12022_v2  ;;  %v12023_v27 = vld [vmem:[#allocation138_spill] sm:$0xff]  ;;  %v4018_v62 = vmul.f32 %v9991_v40, %v12024_v15 }
 0x4fd   : > { %v4767_v11 = vmul.f32 %v10270_v21, %v4646_v54  ;;  %v10289_v28 = vadd.f32 %v4594_v53, %v4432_v24  ;;  %v4187_v24 = vmul.f32 %v10006_v22, %v12023_v27  ;;  %v4241_v54 = vadd.f32 %v4209_v63, %v4047_v51 }
 0x4fe   : > { %5912 = vset.pattern.permute.xlu2 %v12010_v44  ;;  %v4604_v56 = vadd.f32 %v4572_v25, %v4410_v48  ;;  %v4025_v0 = vadd.f32 %v3993_v32, %v3831_v23  ;;  %v12028_v25 = vld [vmem:[#allocation94_spill] sm:$0xff]  ;;  %v12029_v23 = vld [vmem:[#allocation165_spill] sm:$0xff] }
 0x4ff   : > { %v10296_v43 = vadd.f32 %v4767_v11, %v4605_v39  ;;  %4835 = vperm.xlu2 %5912, %v12021_v34   ;;  %v12026_v11 = vld [vmem:[#allocation164_spill] sm:$0xff]  ;;  %v4435_v34 = vadd.f32 %v4403_v5, %v4241_v54  ;;  %v3856_v51 = vmul.f32 %v9999_v45, %v12028_v25  ;;  %v4212_v27 = vmul.f32 %v10006_v22, %v12029_v23  ;;  %v12032_v54 = vld [vmem:[#allocation69_spill] sm:$0xff]  ;;  %v12035_v23 = vld [vmem:[#allocation107_spill] sm:$0xff] }
 0x500   : > { %v4642_v53 = vpop.permute.xlu2 %4641  ;;  %v4381_v18 = vmul.f32 %v10015_v29, %v12026_v11  ;;  %v4219_v32 = vadd.f32 %v4187_v24, %v4025_v0  ;;  %v12034_v0 = vld [vmem:[#allocation123_spill] sm:$0xff] }
 0x501   : > { %v4766_v44 = vmul.f32 %v10270_v21, %v4642_v53  ;;  %v12030_v53 = vld [vmem:[#allocation184_spill] sm:$0xff] }
 0x502   : > { %4843 = vperm.xlu1 %5911, %v12025_v52   ;;  %v4548_v39 = vpop.permute.xlu1 %4547  ;;  %v4575_v15 = vmul.f32 %v10028_v59, %v12030_v53  ;;  %v3833_v53 = vmul.f32 %v9999_v45, %v12035_v23 }
 0x503   : > { %4907 = vperm.xlu0 %5913, %v11860_v47   ;;  %v10310_v2 = vadd.f32 %v4766_v44, %v4604_v56  ;;  %v4597_v63 = vmul.f32 %v10028_v59, %v4548_v39  ;;  %v3995_v56 = vmul.f32 %v9991_v40, %v12032_v54  ;;  %v4050_v44 = vadd.f32 %v4018_v62, %v3856_v51  ;;  %v12037_v51 = vld [vmem:[#allocation82_spill] sm:$0xff] }
 0x504   : > { %v4666_v48 = vpop.permute.xlu0 %4665  ;;  %v4413_v39 = vadd.f32 %v4381_v18, %v4219_v32  ;;  %v12038_v32 = vld [vmem:[#allocation124_spill] sm:$0xff] }
 0x505   : > { %12027 = vst [vmem:[#allocation153_spill] sm:$0xff] %v10310_v2  ;;  %v4772_v11 = vmul.f32 %v10270_v21, %v4666_v48  ;;  %v10320_v5 = vadd.f32 %v4597_v63, %v4435_v34  ;;  %v12033_v2 = vld [vmem:[#allocation185_spill] sm:$0xff]  ;;  %v4244_v63 = vadd.f32 %v4212_v27, %v4050_v44  ;;  %v4027_v18 = vadd.f32 %v3995_v56, %v3833_v53  ;;  %v12041_v56 = vld [vmem:[#allocation142_spill] sm:$0xff] }
 0x506   : > { %v4406_v25 = vmul.f32 %v10015_v29, %v12033_v2  ;;  %v12036_v48 = vld [vmem:[#allocation141_spill] sm:$0xff]  ;;  %v3989_v2 = vmul.f32 %v9991_v40, %v12037_v51  ;;  %v4183_v44 = vmul.f32 %v10006_v22, %v12041_v56 }
 0x507   : > { %12031 = vst [vmem:[#allocation53_spill] sm:$0xff] %v10320_v5  ;;  %v10327_v24 = vadd.f32 %v4772_v11, %v10038_v1  ;;  %4847 = vperm.xlu2 %5912, %v12034_v0   ;;  %v4189_v34 = vmul.f32 %v10006_v22, %v12036_v48  ;;  %v4607_v5 = vadd.f32 %v4575_v15, %v4413_v39  ;;  %v12039_v11 = vld [vmem:[#allocation167_spill] sm:$0xff] }
 0x508   : > { %v4654_v52 = vpop.permute.xlu2 %4653  ;;  %v4383_v54 = vmul.f32 %v10015_v29, %v12039_v11  ;;  %v4438_v0 = vadd.f32 %v4406_v25, %v4244_v63  ;;  %v12040_v15 = vld [vmem:[#allocation11_spill] sm:$0xff]  ;;  %v4577_v48 = vmul.f32 %v10028_v59, %v10041_v12  ;;  %v4571_v12 = vmul.f32 %v10028_v59, %v10047_v10 }
 0x509   : > { %v4769_v62 = vmul.f32 %v10270_v21, %v4654_v52  ;;  %v3827_v52 = vmul.f32 %v9999_v45, %v12040_v15  ;;  %v4221_v53 = vadd.f32 %v4189_v34, %v4027_v18 }
 0x50a   : > { %4851 = vperm.xlu1 %5911, %v12038_v32   ;;  %v4560_v1 = vpop.permute.xlu1 %4559 }
 0x50b   : > { %4919 = vperm.xlu0 %5913, %v9434_v60   ;;  %v10341_v23 = vadd.f32 %v4769_v62, %v4607_v5  ;;  %v4600_v27 = vmul.f32 %v10028_v59, %v4560_v1  ;;  %v4021_v63 = vadd.f32 %v3989_v2, %v3827_v52  ;;  %v12042_v5 = vld [vmem:[#allocation168_spill] sm:$0xff]  ;;  %v12043_v1 = vld [vmem:[#allocation83_spill] sm:$0xff]  ;;  %v4415_v15 = vadd.f32 %v4383_v54, %v4221_v53  ;;  %v12046_v54 = vld [vmem:[#allocation85_spill] sm:$0xff] }
 0x50c   : > { %v4678_v39 = vpop.permute.xlu0 %4677  ;;  %v4377_v62 = vmul.f32 %v10015_v29, %v12042_v5  ;;  %v3998_v11 = vmul.f32 %v9991_v40, %v12043_v1  ;;  %v12048_v1 = vld [vmem:[#allocation114_spill] sm:$0xff] }
 0x50d   : > { %v4775_v51 = vmul.f32 %v10270_v21, %v4678_v39  ;;  %v10351_v25 = vadd.f32 %v4600_v27, %v4438_v0  ;;  %v4215_v34 = vadd.f32 %v4183_v44, %v4021_v63  ;;  %v12044_v0 = vld [vmem:[#allocation108_spill] sm:$0xff]  ;;  %v4609_v56 = vadd.f32 %v4577_v48, %v4415_v15  ;;  %v12049_v15 = vld [vmem:[#allocation145_spill] sm:$0xff] }
 0x50e   : > { %v3836_v2 = vmul.f32 %v9999_v45, %v12044_v0  ;;  %v12045_v27 = vld [vmem:[#allocation144_spill] sm:$0xff]  ;;  %v3830_v48 = vmul.f32 %v9999_v45, %v12048_v1  ;;  %v12051_v1 = vld [vmem:[#allocation47_spill] sm:$0xff] }
 0x50f   : > { %v10358_v60 = vadd.f32 %v4775_v51, %v10056_v20  ;;  %4855 = vperm.xlu2 %5912, %v11844_v31   ;;  %v4192_v52 = vmul.f32 %v10006_v22, %v12045_v27  ;;  %v3992_v20 = vmul.f32 %v9991_v40, %v12046_v54  ;;  %v4409_v53 = vadd.f32 %v4377_v62, %v4215_v34  ;;  %v12047_v51 = vld [vmem:[#allocation169_spill] sm:$0xff] }
 0x510   : > { %v4662_v18 = vpop.permute.xlu2 %4661  ;;  %v4030_v44 = vadd.f32 %v3998_v11, %v3836_v2  ;;  %v4386_v10 = vmul.f32 %v10015_v29, %v12047_v51  ;;  %v4580_v11 = vmul.f32 %v10028_v59, %v10059_v8  ;;  %v4574_v8 = vmul.f32 %v10028_v59, %v10065_v46 }
 0x511   : > { %v4771_v39 = vmul.f32 %v10270_v21, %v4662_v18  ;;  %v4186_v18 = vmul.f32 %v10006_v22, %v12049_v15  ;;  %v4603_v0 = vadd.f32 %v4571_v12, %v4409_v53  ;;  %v4024_v54 = vadd.f32 %v3992_v20, %v3830_v48  ;;  %v12052_v20 = vld [vmem:[#allocation13_spill] sm:$0xff] }
 0x512   : > { %4863 = vperm.xlu1 %5911, %v11845_v26   ;;  %v4224_v34 = vadd.f32 %v4192_v52, %v4030_v44  ;;  %v3839_v44 = vmul.f32 %v9999_v45, %v12052_v20 }
 0x513   : > { %4931 = vperm.xlu0 %5913, %v9495_v42   ;;  %v10374_v63 = vadd.f32 %v4771_v39, %v4609_v56  ;;  %v4638_v5 = vpop.permute.xlu1 %4637  ;;  %v12050_v56 = vld [vmem:[#allocation170_spill] sm:$0xff]  ;;  %v4001_v42 = vmul.f32 %v9991_v40, %v12051_v1  ;;  %v4218_v52 = vadd.f32 %v4186_v18, %v4024_v54  ;;  %v12057_v1 = vld [vmem:[#allocation147_spill] sm:$0xff] }
 0x514   : > { %v4690_v27 = vpop.permute.xlu0 %4689  ;;  %v4765_v62 = vmul.f32 %v10270_v21, %v4638_v5  ;;  %v4380_v39 = vmul.f32 %v10015_v29, %v12050_v56  ;;  %v4418_v15 = vadd.f32 %v4386_v10, %v4224_v34  ;;  %v12053_v5 = vld [vmem:[#allocation146_spill] sm:$0xff]  ;;  %v12054_v10 = vld [vmem:[#allocation57_spill] sm:$0xff]  ;;  %v12055_v34 = vld [vmem:[#allocation171_spill] sm:$0xff] }
 0x515   : > { %v4778_v2 = vmul.f32 %v10270_v21, %v4690_v27  ;;  %v4195_v48 = vmul.f32 %v10006_v22, %v12053_v5  ;;  %v4033_v18 = vadd.f32 %v4001_v42, %v3839_v44  ;;  %v4389_v46 = vmul.f32 %v10015_v29, %v12055_v34  ;;  %v12056_v56 = vld [vmem:[#allocation115_spill] sm:$0xff] }
 0x516   : > { %v10386_v51 = vadd.f32 %v4765_v62, %v4603_v0  ;;  %v4612_v0 = vadd.f32 %v4580_v11, %v4418_v15  ;;  %v4412_v62 = vadd.f32 %v4380_v39, %v4218_v52  ;;  %v3832_v11 = vmul.f32 %v9999_v45, %v12056_v56  ;;  %v12059_v34 = vld [vmem:[#allocation7_spill] sm:$0xff] }
 0x517   : > { %v10391_v12 = vadd.f32 %v4778_v2, %v10074_v33  ;;  %4867 = vperm.xlu2 %5912, %v11849_v9   ;;  %v3994_v33 = vmul.f32 %v9991_v40, %v12054_v10  ;;  %v4188_v15 = vmul.f32 %v10006_v22, %v12057_v1  ;;  %v4227_v52 = vadd.f32 %v4195_v48, %v4033_v18 }
 0x518   : > { %v4674_v53 = vpop.permute.xlu2 %4673  ;;  %v4583_v42 = vmul.f32 %v10028_v59, %v10077_v57  ;;  %v4004_v56 = vmul.f32 %v9991_v40, %v12059_v34  ;;  %v4576_v57 = vmul.f32 %v10028_v59, %v10083_v13  ;;  %v12065_v34 = vld [vmem:[#allocation149_spill] sm:$0xff] }
 0x519   : > { %v4774_v27 = vmul.f32 %v10270_v21, %v4674_v53  ;;  %v4606_v53 = vadd.f32 %v4574_v8, %v4412_v62  ;;  %v4026_v5 = vadd.f32 %v3994_v33, %v3832_v11  ;;  %v4421_v1 = vadd.f32 %v4389_v46, %v4227_v52  ;;  %v12060_v33 = vld [vmem:[#allocation117_spill] sm:$0xff]  ;;  %v12062_v46 = vld [vmem:[#allocation127_spill] sm:$0xff] }
 0x51a   : > { %4875 = vperm.xlu1 %5911, %v11850_v7   ;;  %v3842_v18 = vmul.f32 %v9999_v45, %v12060_v33  ;;  %v12063_v52 = vld [vmem:[#allocation173_spill] sm:$0xff] }
 0x51b   : > { %4943 = vperm.xlu0 %5913, %v9552_v55   ;;  %v10407_v2 = vadd.f32 %v4774_v27, %v4612_v0  ;;  %v4650_v54 = vpop.permute.xlu1 %4649  ;;  %v12058_v0 = vld [vmem:[#allocation172_spill] sm:$0xff]  ;;  %v4220_v48 = vadd.f32 %v4188_v15, %v4026_v5  ;;  %v4392_v13 = vmul.f32 %v10015_v29, %v12063_v52 }
 0x51c   : > { %v4702_v20 = vpop.permute.xlu0 %4701  ;;  %v4768_v39 = vmul.f32 %v10270_v21, %v4650_v54  ;;  %v4382_v27 = vmul.f32 %v10015_v29, %v12058_v0  ;;  %v12061_v54 = vld [vmem:[#allocation148_spill] sm:$0xff]  ;;  %v4036_v15 = vadd.f32 %v4004_v56, %v3842_v18  ;;  %v4586_v56 = vmul.f32 %v10028_v59, %v10097_v61 }
 0x51d   : > { %v4781_v44 = vmul.f32 %v10270_v21, %v4702_v20  ;;  %v4198_v11 = vmul.f32 %v10006_v22, %v12061_v54  ;;  %v12064_v0 = vld [vmem:[#allocation16_spill] sm:$0xff] }
 0x51e   : > { %v10419_v10 = vadd.f32 %v4768_v39, %v4606_v53  ;;  %v4615_v53 = vadd.f32 %v4583_v42, %v4421_v1  ;;  %v4414_v39 = vadd.f32 %v4382_v27, %v4220_v48  ;;  %v3835_v42 = vmul.f32 %v9999_v45, %v12064_v0 }
 0x51f   : > { %v10424_v8 = vadd.f32 %v4781_v44, %v10092_v6  ;;  %4879 = vperm.xlu2 %5912, %v11854_v35   ;;  %v3997_v6 = vmul.f32 %v9991_v40, %v12062_v46  ;;  %v4191_v1 = vmul.f32 %v10006_v22, %v12065_v34  ;;  %v4230_v48 = vadd.f32 %v4198_v11, %v4036_v15 }
 0x520   : > { %v4686_v62 = vpop.permute.xlu2 %4685  ;;  %v4579_v11 = vmul.f32 %v10028_v59, %v10107_v41  ;;  %v12069_v41 = vld [vmem:[#allocation150_spill] sm:$0xff] }
 0x521   : > { %v4777_v20 = vmul.f32 %v10270_v21, %v4686_v62  ;;  %v4608_v62 = vadd.f32 %v4576_v57, %v4414_v39  ;;  %v4029_v54 = vadd.f32 %v3997_v6, %v3835_v42  ;;  %v4424_v52 = vadd.f32 %v4392_v13, %v4230_v48  ;;  %v12067_v6 = vld [vmem:[#allocation38_spill] sm:$0xff] }
 0x522   : > { %4887 = vperm.xlu1 %5911, %v11855_v49   ;;  %v6068_v13 = vmov 7  }
 0x523   : > { %4955 = vperm.xlu0 %5913, %v9589_v3   ;;  %v10440_v44 = vadd.f32 %v4777_v20, %v4615_v53  ;;  %v4658_v5 = vpop.permute.xlu1 %4657  ;;  %v12066_v53 = vld [vmem:[#allocation174_spill] sm:$0xff]  ;;  %v4223_v57 = vadd.f32 %v4191_v1, %v4029_v54  ;;  %v4618_v61 = vadd.f32 %v4586_v56, %v4424_v52  ;;  %v12068_v1 = vld [vmem:[#allocation36_spill] sm:$0xff] }
 0x524   : > { %v4714_v33 = vpop.permute.xlu0 %4713  ;;  %v4770_v27 = vmul.f32 %v10270_v21, %v4658_v5  ;;  %v4385_v20 = vmul.f32 %v10015_v29, %v12066_v53  ;;  %v4000_v5 = vmul.f32 %v9991_v40, %v12067_v6  ;;  %v12070_v53 = vld [vmem:[#allocation175_spill] sm:$0xff] }
 0x525   : > { %v4784_v18 = vmul.f32 %v10270_v21, %v4714_v33  ;;  %v4194_v33 = vmul.f32 %v10006_v22, %v12069_v41  ;;  %v12074_v41 = vld [vmem:[#allocation152_spill] sm:$0xff] }
 0x526   : > { %v10452_v46 = vadd.f32 %v4770_v27, %v4608_v62  ;;  %v4417_v42 = vadd.f32 %v4385_v20, %v4223_v57  ;;  %v3838_v62 = vmul.f32 %v9999_v45, %v12068_v1  ;;  %v4388_v20 = vmul.f32 %v10015_v29, %v12070_v53  ;;  %v12073_v1 = vld [vmem:[#allocation118_spill] sm:$0xff] }
 0x527   : > { %v10455_v0 = vadd.f32 %v4784_v18, %v10118_v58  ;;  %4891 = vperm.xlu2 %5912, %v11857_v4  }
 0x528   : > { %v4698_v39 = vpop.permute.xlu2 %4697  ;;  %v4611_v27 = vadd.f32 %v4579_v11, %v4417_v42  ;;  %v4032_v54 = vadd.f32 %v4000_v5, %v3838_v62  ;;  %v12072_v42 = vld [vmem:[#allocation41_spill] sm:$0xff]  ;;  %v3841_v62 = vmul.f32 %v9999_v45, %v12073_v1  ;;  %v12077_v45 = vld [vmem:[#allocation56_spill] sm:$0xff] }
 0x529   : > { %v4780_v15 = vmul.f32 %v10270_v21, %v4698_v39 }
 0x52a   : > { %4899 = vperm.xlu1 %5911, %v11859_v17   ;;  %v4226_v39 = vadd.f32 %v4194_v33, %v4032_v54  ;;  %v4197_v33 = vmul.f32 %v10006_v22, %v12074_v41  ;;  %v12076_v54 = vld [vmem:[#allocation176_spill] sm:$0xff] }
 0x52b   : > { %5916 = vset.pattern.permute.xlu0 %v6068_v13  ;;  %v10465_v58 = vadd.f32 %v4780_v15, %v4618_v61  ;;  %v4670_v34 = vpop.permute.xlu1 %4669  ;;  %v12071_v15 = vld [vmem:[#allocation42_spill] sm:$0xff]  ;;  %v4391_v53 = vmul.f32 %v10015_v29, %v12076_v54  ;;  %v12085_v54 = vld [vmem:[#allocation151_spill] sm:$0xff] }
 0x52c   : > { %5033 = vperm.xlu0 %5916, %v8732_v38   ;;  %v4726_v48 = vpop.permute.xlu0 %4725  ;;  %v4773_v56 = vmul.f32 %v10270_v21, %v4670_v34  ;;  %v4582_v38 = vmul.f32 %v10028_v59, %v10134_v14  ;;  %v4003_v6 = vmul.f32 %v9991_v40, %v12071_v15  ;;  %v4420_v5 = vadd.f32 %v4388_v20, %v4226_v39 }
 0x52d   : > { %v4787_v18 = vmul.f32 %v10270_v21, %v4726_v48 }
 0x52e   : > { %v10476_v52 = vadd.f32 %v4773_v56, %v4611_v27  ;;  %v4614_v14 = vadd.f32 %v4582_v38, %v4420_v5  ;;  %v12075_v27 = vld [vmem:[#allocation75_spill] sm:$0xff]  ;;  %v12078_v38 = vld [vmem:[#allocation130_spill] sm:$0xff] }
 0x52f   : > { %v10479_v57 = vadd.f32 %v4787_v18, %v10146_v16  ;;  %4903 = vperm.xlu2 %5912, %v11861_v30   ;;  %v4035_v18 = vadd.f32 %v4003_v6, %v3841_v62  ;;  %v12080_v6 = vld [vmem:[#allocation101_spill] sm:$0xff]  ;;  %v12081_v62 = vld [vmem:[#allocation44_spill] sm:$0xff] }
 0x530   : > { %v4710_v11 = vpop.permute.xlu2 %4709 }
 0x531   : > { %v4783_v61 = vmul.f32 %v10270_v21, %v4710_v11  ;;  %v4229_v22 = vadd.f32 %v4197_v33, %v4035_v18  ;;  %v4585_v11 = vmul.f32 %v10028_v59, %v12078_v38  ;;  %v12082_v59 = vld [vmem:[#allocation120_spill] sm:$0xff]  ;;  %v12084_v18 = vld [vmem:[#allocation63_spill] sm:$0xff] }
 0x532   : > { %4911 = vperm.xlu1 %5911, %v11953_v19   ;;  %v12086_v38 = vld [vmem:[#allocation39_spill] sm:$0xff] }
 0x533   : > { %v10489_v34 = vadd.f32 %v4783_v61, %v12072_v42  ;;  %v4682_v16 = vpop.permute.xlu1 %4681  ;;  %v4423_v5 = vadd.f32 %v4391_v53, %v4229_v22  ;;  %v12079_v42 = vld [vmem:[#allocation61_spill] sm:$0xff] }
 0x534   : > { %5053 = vperm.xlu0 %5916, %v12075_v27   ;;  %v4738_v48 = vpop.permute.xlu0 %4737  ;;  %v4776_v56 = vmul.f32 %v10270_v21, %v4682_v16 }
 0x535   : > { %v4790_v40 = vmul.f32 %v10270_v21, %v4738_v48  ;;  %v4617_v1 = vadd.f32 %v4585_v11, %v4423_v5  ;;  %v12083_v48 = vld [vmem:[#allocation60_spill] sm:$0xff]  ;;  %v12087_v5 = vld [vmem:[#allocation134_spill] sm:$0xff] }
 0x536   : > { %v10500_v20 = vadd.f32 %v4776_v56, %v4614_v14 }
 0x537   : > { %v10503_v39 = vadd.f32 %v4790_v40, %v10179_v50  ;;  %4915 = vperm.xlu2 %5912, %v12077_v45  }
 0x538   : > { %v4722_v61 = vpop.permute.xlu2 %4721 }
 0x539   : > { %v4786_v15 = vmul.f32 %v10270_v21, %v4722_v61 }
 0x53a   : > { %4923 = vperm.xlu1 %5911, %v12079_v42  }
 0x53b   : > { %v10511_v16 = vadd.f32 %v4786_v15, %v12080_v6  ;;  %v4694_v29 = vpop.permute.xlu1 %4693 }
 0x53c   : > { %5065 = vperm.xlu0 %5916, %v12081_v62   ;;  %v4750_v50 = vpop.permute.xlu0 %4749  ;;  %v4779_v41 = vmul.f32 %v10270_v21, %v4694_v29 }
 0x53d   : > { %v4793_v33 = vmul.f32 %v10270_v21, %v4750_v50 }
 0x53e   : > { %v10516_v14 = vadd.f32 %v4779_v41, %v4617_v1  ;;  %v12088_v1 = vld [vmem:[#allocation70_spill] sm:$0xff]  ;;  %v10541_v41 = vld [vmem:[%s11366_s6 + $0x6] ss:$0 sm:$0xff] }
 0x53f   : > { %v10519_v27 = vadd.f32 %v4793_v33, %v12082_v59  ;;  %4927 = vperm.xlu2 %5912, %v12083_v48   ;;  %v12089_v33 = vld [vmem:[#allocation96_spill] sm:$0xff]  ;;  %v12090_v59 = vld [vmem:[#allocation157_spill] sm:$0xff] }
 0x540   : > { %v4734_v56 = vpop.permute.xlu2 %4733 }
 0x541   : > { %v4789_v40 = vmul.f32 %v10270_v21, %v4734_v56 }
 0x542   : > { %4935 = vperm.xlu1 %5911, %v12084_v18  }
 0x543   : > { %v10525_v53 = vadd.f32 %v4789_v40, %v12085_v54  ;;  %v4706_v22 = vpop.permute.xlu1 %4705 }
 0x544   : > { %5077 = vperm.xlu0 %5916, %v12086_v38   ;;  %v4762_v11 = vpop.permute.xlu0 %4761  ;;  %v4782_v61 = vmul.f32 %v10270_v21, %v4706_v22  ;;  %v12091_v38 = vld [vmem:[#allocation43_spill] sm:$0xff] }
 0x545   : > { %v4796_v15 = vmul.f32 %v10270_v21, %v4762_v11 }
 0x546   : > { %v10531_v6 = vadd.f32 %v4782_v61, %v12087_v5  ;;  %v12092_v61 = vld [vmem:[#allocation105_spill] sm:$0xff] }
 0x547   : > { %v10534_v29 = vadd.f32 %v4796_v15, %v10253_v36  ;;  %4939 = vperm.xlu2 %5912, %v12088_v1  }
 0x548   : > { %v4746_v62 = vpop.permute.xlu2 %4745 }
 0x549   : > { %v4792_v50 = vmul.f32 %v10270_v21, %v4746_v62 }
 0x54a   : > { %4947 = vperm.xlu1 %5911, %v12089_v33  }
 0x54b   : > { %v10545_v56 = vadd.f32 %v4792_v50, %v12090_v59  ;;  %v4718_v40 = vpop.permute.xlu1 %4717  ;;  %v12093_v50 = vld [vmem:[#allocation103_spill] sm:$0xff] }
 0x54c   : > { %5089 = vperm.xlu0 %5916, %v12015_v37   ;;  %v4785_v36 = vmul.f32 %v10270_v21, %v4718_v40  ;;  %v12094_v59 = vld [vmem:[#allocation71_spill] sm:$0xff] }
 0x54d   : > { %v4840_v54 = vpop.permute.xlu0 %4839 }
 0x54e   : > { %v4961_v22 = vmul.f32 %v10541_v41, %v4840_v54  ;;  %v10551_v11 = vadd.f32 %v4785_v36, %v12091_v38 }
 0x54f   : > { %4951 = vperm.xlu2 %5912, %v12092_v61  }
 0x550   : > { %v10555_v15 = vadd.f32 %v4961_v22, %v10296_v43  ;;  %v4758_v5 = vpop.permute.xlu2 %4757 }
 0x551   : > { %v4795_v62 = vmul.f32 %v10270_v21, %v4758_v5  ;;  %v12096_v5 = vld [vmem:[#allocation126_spill] sm:$0xff] }
 0x552   : > { %5914 = vset.pattern.permute.xlu1 %v6068_v13 }
 0x553   : > { %v10560_v37 = vadd.f32 %v4795_v62, %v12093_v50  ;;  %5025 = vperm.xlu1 %5914, %v12094_v59   ;;  %v4730_v40 = vpop.permute.xlu1 %4729  ;;  %v12097_v59 = vld [vmem:[#allocation121_spill] sm:$0xff] }
 0x554   : > { %5101 = vperm.xlu0 %5916, %v11860_v47   ;;  %v4788_v36 = vmul.f32 %v10270_v21, %v4730_v40  ;;  %v12098_v40 = vld [vmem:[#allocation153_spill] sm:$0xff] }
 0x555   : > { %v4860_v54 = vpop.permute.xlu0 %4859 }
 0x556   : > { %v4966_v38 = vmul.f32 %v10541_v41, %v4860_v54  ;;  %v10567_v43 = vadd.f32 %v4788_v36, %v10289_v28 }
 0x557   : > { %5915 = vset.pattern.permute.xlu2 %v6068_v13 }
 0x558   : > { %12095 = vst [vmem:[#allocation137_spill] sm:$0xff] %v10567_v43  ;;  %v10571_v22 = vadd.f32 %v4966_v38, %v10327_v24  ;;  %5029 = vperm.xlu2 %5915, %v12096_v5   ;;  %v12099_v24 = vld [vmem:[#allocation53_spill] sm:$0xff] }
 0x559   : > { %v4836_v62 = vpop.permute.xlu2 %4835 }
 0x55a   : > { %v4960_v50 = vmul.f32 %v10541_v41, %v4836_v62  ;;  %v12100_v62 = vld [vmem:[#allocation123_spill] sm:$0xff] }
 0x55b   : > { %5037 = vperm.xlu1 %5914, %v12097_v59   ;;  %v4742_v47 = vpop.permute.xlu1 %4741 }
 0x55c   : > { %5129 = vperm.xlu0 %5916, %v12084_v18   ;;  %v10578_v54 = vadd.f32 %v4960_v50, %v12098_v40  ;;  %v4791_v28 = vmul.f32 %v10270_v21, %v4742_v47 }
 0x55d   : > { %v4872_v36 = vpop.permute.xlu0 %4871 }
 0x55e   : > { %v4969_v13 = vmul.f32 %v10541_v41, %v4872_v36  ;;  %v10583_v38 = vadd.f32 %v4791_v28, %v12099_v24 }
 0x560   : > { %v10586_v5 = vadd.f32 %v4969_v13, %v10358_v60  ;;  %5041 = vperm.xlu2 %5915, %v12100_v62  }
 0x561   : > { %v4848_v59 = vpop.permute.xlu2 %4847 }
 0x562   : > { %v4963_v43 = vmul.f32 %v10541_v41, %v4848_v59 }
 0x563   : > { %5045 = vperm.xlu1 %5914, %v12038_v32   ;;  %v4754_v18 = vpop.permute.xlu1 %4753 }
 0x564   : > { %5109 = vperm.xlu0 %5916, %v12077_v45   ;;  %v10593_v50 = vadd.f32 %v4963_v43, %v10341_v23  ;;  %v4794_v47 = vmul.f32 %v10270_v21, %v4754_v18 }
 0x565   : > { %v4884_v40 = vpop.permute.xlu0 %4883 }
 0x566   : > { %v4972_v28 = vmul.f32 %v10541_v41, %v4884_v40  ;;  %v10598_v60 = vadd.f32 %v4794_v47, %v10351_v25 }
 0x568   : > { %v10601_v36 = vadd.f32 %v4972_v28, %v10391_v12  ;;  %5049 = vperm.xlu2 %5915, %v11844_v31  }
 0x569   : > { %v4856_v32 = vpop.permute.xlu2 %4855 }
 0x56a   : > { %v4965_v13 = vmul.f32 %v10541_v41, %v4856_v32 }
 0x56b   : > { %5057 = vperm.xlu1 %5914, %v11845_v26  }
 0x56c   : > { %5137 = vperm.xlu0 %5916, %v9552_v55   ;;  %v10608_v21 = vadd.f32 %v4965_v13, %v10374_v63  ;;  %v4832_v23 = vpop.permute.xlu1 %4831 }
 0x56d   : > { %v4896_v45 = vpop.permute.xlu0 %4895  ;;  %v4959_v25 = vmul.f32 %v10541_v41, %v4832_v23 }
 0x56e   : > { %v4975_v43 = vmul.f32 %v10541_v41, %v4896_v45 }
 0x56f   : > { %v10613_v12 = vadd.f32 %v4959_v25, %v10386_v51  ;;  %v12101_v25 = vld [vmem:[#allocation6_spill] sm:$0xff] }
 0x570   : > { %v10616_v31 = vadd.f32 %v4975_v43, %v10424_v8  ;;  %5061 = vperm.xlu2 %5915, %v11849_v9  }
 0x571   : > { %v4868_v26 = vpop.permute.xlu2 %4867 }
 0x572   : > { %v4968_v55 = vmul.f32 %v10541_v41, %v4868_v26 }
 0x573   : > { %5069 = vperm.xlu1 %5914, %v11850_v7  }
 0x574   : > { %5149 = vperm.xlu0 %5916, %v9589_v3   ;;  %v10623_v63 = vadd.f32 %v4968_v55, %v10407_v2  ;;  %v4844_v24 = vpop.permute.xlu1 %4843 }
 0x575   : > { %v4908_v62 = vpop.permute.xlu0 %4907  ;;  %v4962_v51 = vmul.f32 %v10541_v41, %v4844_v24 }
 0x576   : > { %v4978_v59 = vmul.f32 %v10541_v41, %v4908_v62 }
 0x577   : > { %v10628_v8 = vadd.f32 %v4962_v51, %v10419_v10 }
 0x578   : > { %v10631_v9 = vadd.f32 %v4978_v59, %v10455_v0  ;;  %5073 = vperm.xlu2 %5915, %v11854_v35  }
 0x579   : > { %v4880_v7 = vpop.permute.xlu2 %4879 }
 0x57a   : > { %v4971_v3 = vmul.f32 %v10541_v41, %v4880_v7 }
 0x57b   : > { %5081 = vperm.xlu1 %5914, %v11855_v49  }
 0x57c   : > { %v10637_v2 = vadd.f32 %v4971_v3, %v10440_v44  ;;  %v4852_v18 = vpop.permute.xlu1 %4851 }
 0x57d   : > { %v4920_v47 = vpop.permute.xlu0 %4919  ;;  %v4964_v40 = vmul.f32 %v10541_v41, %v4852_v18 }
 0x57e   : > { %v4981_v10 = vmul.f32 %v10541_v41, %v4920_v47 }
 0x57f   : > { %v10642_v28 = vadd.f32 %v4964_v40, %v10452_v46 }
 0x580   : > { %v10645_v0 = vadd.f32 %v4981_v10, %v10479_v57  ;;  %5085 = vperm.xlu2 %5915, %v11857_v4  }
 0x581   : > { %v4892_v35 = vpop.permute.xlu2 %4891 }
 0x582   : > { %v4974_v49 = vmul.f32 %v10541_v41, %v4892_v35  ;;  %v12102_v35 = vld [vmem:[#allocation66_spill] sm:$0xff] }
 0x583   : > { %5093 = vperm.xlu1 %5914, %v11859_v17  }
 0x584   : > { %v10651_v44 = vadd.f32 %v4974_v49, %v10465_v58  ;;  %v4864_v32 = vpop.permute.xlu1 %4863 }
 0x585   : > { %v4932_v13 = vpop.permute.xlu0 %4931  ;;  %v4967_v23 = vmul.f32 %v10541_v41, %v4864_v32 }
 0x586   : > { %v4984_v46 = vmul.f32 %v10541_v41, %v4932_v13 }
 0x587   : > { %v10656_v45 = vadd.f32 %v4967_v23, %v10476_v52 }
 0x588   : > { %v10659_v57 = vadd.f32 %v4984_v46, %v10503_v39  ;;  %5097 = vperm.xlu2 %5915, %v11861_v30  }
 0x589   : > { %v4904_v4 = vpop.permute.xlu2 %4903 }
 0x58a   : > { %v4977_v17 = vmul.f32 %v10541_v41, %v4904_v4 }
 0x58b   : > { %5113 = vperm.xlu1 %5914, %v12101_v25  }
 0x58c   : > { %v10665_v58 = vadd.f32 %v4977_v17, %v10489_v34  ;;  %v4876_v43 = vpop.permute.xlu1 %4875 }
 0x58d   : > { %v4944_v26 = vpop.permute.xlu0 %4943  ;;  %v4970_v55 = vmul.f32 %v10541_v41, %v4876_v43 }
 0x58e   : > { %v4987_v52 = vmul.f32 %v10541_v41, %v4944_v26 }
 0x58f   : > { %v10670_v24 = vadd.f32 %v4970_v55, %v10500_v20 }
 0x590   : > { %v10673_v39 = vadd.f32 %v4987_v52, %v10519_v27  ;;  %5117 = vperm.xlu2 %5915, %v12079_v42  }
 0x591   : > { %v4916_v30 = vpop.permute.xlu2 %4915 }
 0x592   : > { %v4980_v62 = vmul.f32 %v10541_v41, %v4916_v30 }
 0x593   : > { %5133 = vperm.xlu1 %5914, %v12088_v1  }
 0x594   : > { %v10679_v34 = vadd.f32 %v4980_v62, %v10511_v16  ;;  %v4888_v51 = vpop.permute.xlu1 %4887  ;;  %v10694_v16 = vld [vmem:[%s11366_s6 + $0x7] ss:$0 sm:$0xff] }
 0x595   : > { %v4956_v59 = vpop.permute.xlu0 %4955  ;;  %v4973_v7 = vmul.f32 %v10541_v41, %v4888_v51 }
 0x596   : > { %v4990_v20 = vmul.f32 %v10541_v41, %v4956_v59 }
 0x597   : > { %v10684_v3 = vadd.f32 %v4973_v7, %v10516_v14 }
 0x598   : > { %v10687_v27 = vadd.f32 %v4990_v20, %v10534_v29  ;;  %5105 = vperm.xlu2 %5915, %v11953_v19   ;;  %v10704_v19 = vld [vmem:[%s11367_s7] ss:$0 sm:$0xff] }
 0x599   : > { %v4928_v42 = vpop.permute.xlu2 %4927 }
 0x59a   : > { %v4983_v1 = vmul.f32 %v10541_v41, %v4928_v42 }
 0x59b   : > { %5121 = vperm.xlu1 %5914, %v12083_v48   ;;  %v10714_v48 = vld [vmem:[%s11368_s8] ss:$0 sm:$0xff] }
 0x59c   : > { %v10698_v18 = vadd.f32 %v4983_v1, %v10525_v53  ;;  %v4900_v14 = vpop.permute.xlu1 %4899 }
 0x59d   : > { %v4976_v47 = vmul.f32 %v10541_v41, %v4900_v14 }
 0x59e   : > { %v5034_v29 = vpop.permute.xlu0 %5033 }
 0x59f   : > { %v5155_v40 = vmul.f32 %v10694_v16, %v5034_v29  ;;  %v10708_v10 = vadd.f32 %v4976_v47, %v10531_v6 }
 0x5a0   : > { %5125 = vperm.xlu2 %5915, %v12102_v35  }
 0x5a1   : > { %v5187_v53 = vadd.f32 %v5155_v40, %v10555_v15  ;;  %v4940_v49 = vpop.permute.xlu2 %4939 }
 0x5a2   : > { %v4986_v32 = vmul.f32 %v10541_v41, %v4940_v49 }
 0x5a3   : > { %v5223_v13 = vmul.f32 %v10704_v19, %v5187_v53  ;;  %5141 = vperm.xlu1 %5914, %v12089_v33  }
 0x5a4   : > { %v10721_v23 = vadd.f32 %v4986_v32, %v10545_v56  ;;  %v4912_v6 = vpop.permute.xlu1 %4911 }
 0x5a5   : > { %v5259_v46 = vadd.f32 %v10714_v48, %v5223_v13  ;;  %v4979_v4 = vmul.f32 %v10541_v41, %v4912_v6 }
 0x5a6   : > { %v5054_v17 = vpop.permute.xlu0 %5053 }
 0x5a7   : > { %5345 = vst.msk [vmem:[#allocation2 + $0x31] sm:$0xff] %vm908_vm0, %v5259_v46  ;;  %v5160_v15 = vmul.f32 %v10694_v16, %v5054_v17  ;;  %v10728_v25 = vadd.f32 %v4979_v4, %v10551_v11 }
 0x5a8   : > { %5145 = vperm.xlu2 %5915, %v12092_v61  }
 0x5a9   : > { %v5192_v33 = vadd.f32 %v5160_v15, %v10571_v22  ;;  %v4952_v43 = vpop.permute.xlu2 %4951 }
 0x5aa   : > { %v4989_v56 = vmul.f32 %v10541_v41, %v4952_v43 }
 0x5ab   : > { %v5228_v26 = vmul.f32 %v10704_v19, %v5192_v33  ;;  %v10774_v33 = vld [vmem:[%s11369_s9 + $0x1] ss:$0 sm:$0xff] }
 0x5ac   : > { %v10735_v55 = vadd.f32 %v4989_v56, %v10560_v37  ;;  %v10737_v52 = vpop.permute.xlu1 %4923 }
 0x5ad   : > { %v5264_v30 = vadd.f32 %v10714_v48, %v5228_v26 }
 0x5ae   : > { %v5066_v62 = vpop.permute.xlu0 %5065 }
 0x5af   : > { %5350 = vst.msk [vmem:[#allocation2 + $0x69] sm:$0xff] %vm908_vm0, %v5264_v30  ;;  %v5163_v11 = vmul.f32 %v10694_v16, %v5066_v62 }
 0x5b1   : > { %v5195_v61 = vadd.f32 %v5163_v11, %v10586_v5  ;;  %v12103_v11 = vld [vmem:[#allocation23_spill] sm:$0xff] }
 0x5b2   : > { %v5030_v22 = vpop.permute.xlu2 %5029 }
 0x5b3   : > { %v5231_v51 = vmul.f32 %v10704_v19, %v5195_v61  ;;  %v5154_v59 = vmul.f32 %v10694_v16, %v5030_v22  ;;  %v610_v61 = vmul.f32 %v10774_v33, %v12103_v11  ;;  %v12104_v22 = vld [vmem:[#allocation15_spill] sm:$0xff] }
 0x5b4   : > { %v4936_v7 = vpop.permute.xlu1 %4935 }
 0x5b5   : > { %v5267_v37 = vadd.f32 %v10714_v48, %v5231_v51  ;;  %v5186_v20 = vadd.f32 %v5154_v59, %v10578_v54 }
 0x5b6   : > { %v5078_v42 = vpop.permute.xlu0 %5077 }
 0x5b7   : > { %5353 = vst.msk [vmem:[#allocation2 + $0x91] sm:$0xff] %vm908_vm0, %v5267_v37  ;;  %v5222_v1 = vmul.f32 %v10704_v19, %v5186_v20  ;;  %v5166_v14 = vmul.f32 %v10694_v16, %v5078_v42 }
 0x5b9   : > { %v5258_v47 = vadd.f32 %v10714_v48, %v5222_v1  ;;  %v5198_v5 = vadd.f32 %v5166_v14, %v10601_v36  ;;  %v12105_v1 = vld [vmem:[#allocation8_spill] sm:$0xff] }
 0x5ba   : > { %v5042_v29 = vpop.permute.xlu2 %5041 }
 0x5bb   : > { %5344 = vst.msk [vmem:[#allocation2 + $0x21] sm:$0xff] %vm908_vm0, %v5258_v47  ;;  %v5234_v40 = vmul.f32 %v10704_v19, %v5198_v5  ;;  %v5157_v35 = vmul.f32 %v10694_v16, %v5042_v29  ;;  %v12106_v47 = vld [vmem:[#allocation10_spill] sm:$0xff]  ;;  %v5375_v29 = vld [vmem:[#allocation2] sm:$0xff] }
 0x5bc   : > { %v4948_v53 = vpop.permute.xlu1 %4947 }
 0x5bd   : > { %v5270_v54 = vadd.f32 %v10714_v48, %v5234_v40  ;;  %v5189_v49 = vadd.f32 %v5157_v35, %v10593_v50  ;;  %v4988_v32 = vmul.f32 %v10541_v41, %v4948_v53  ;;  %v10769_v50 = vld [vmem:[%s11369_s9] ss:$0 sm:$0xff]  ;;  %v12107_v40 = vld [vmem:[#allocation113_spill] sm:$0xff] }
 0x5be   : > { %v5090_v13 = vpop.permute.xlu0 %5089  ;;  %v528_v51 = vmul.f32 %v10769_v50, %v12104_v22  ;;  %v530_v14 = vmul.f32 %v10769_v50, %v12105_v1  ;;  %v531_v5 = vmul.f32 %v10769_v50, %v12106_v47  ;;  %v526_v35 = vmul.f32 %v10769_v50, %v12107_v40  ;;  %v12113_v1 = vld [vmem:[#allocation116_spill] sm:$0xff] }
 0x5bf   : > { %5356 = vst.msk [vmem:[#allocation2 + $0xb1] sm:$0xff] %vm908_vm0, %v5270_v54  ;;  %v5225_v6 = vmul.f32 %v10704_v19, %v5189_v49  ;;  %v5169_v36 = vmul.f32 %v10694_v16, %v5090_v13  ;;  %v10762_v46 = vadd.f32 %v4988_v32, %v10598_v60  ;;  %v4985_v32 = vmul.f32 %v10541_v41, %v4936_v7  ;;  %v5376_v13 = vld [vmem:[#allocation2 + $0x8] sm:$0xff] }
 0x5c0   : > { %v10799_v49 = vadd.f32 %v610_v61, %v528_v51  ;;  %v10823_v51 = vld [vmem:[%s11369_s9 + $0x2] ss:$0 sm:$0xff]  ;;  %v527_v47 = vmul.f32 %v10769_v50, %v12113_v1 }
 0x5c1   : > { %v5261_v4 = vadd.f32 %v10714_v48, %v5225_v6  ;;  %v5201_v17 = vadd.f32 %v5169_v36, %v10616_v31  ;;  %v5392_v6 = vld [vmem:[#allocation2 + $0x9] sm:$0xff] }
 0x5c2   : > { %v5050_v15 = vpop.permute.xlu2 %5049  ;;  %v5423_v40 = vld [vmem:[#allocation2 + $0x2] sm:$0xff] }
 0x5c3   : > { %5347 = vst.msk [vmem:[#allocation2 + $0x49] sm:$0xff] %vm908_vm0, %v5261_v4  ;;  %v5237_v60 = vmul.f32 %v10704_v19, %v5201_v17  ;;  %v5159_v43 = vmul.f32 %v10694_v16, %v5050_v15  ;;  %v12108_v4 = vld [vmem:[#allocation27_spill] sm:$0xff]  ;;  %v12109_v15 = vld [vmem:[#allocation18_spill] sm:$0xff] }
 0x5c4   : > { %v10807_v17 = vmul.f32 %v10774_v33, %v12108_v4 }
 0x5c5   : > { %v5273_v56 = vadd.f32 %v10714_v48, %v5237_v60  ;;  %v5191_v31 = vadd.f32 %v5159_v43, %v10608_v21  ;;  %v5026_v26 = vpop.permute.xlu1 %5025  ;;  %v529_v60 = vmul.f32 %v10769_v50, %v12109_v15  ;;  %v12110_v43 = vld [vmem:[#allocation29_spill] sm:$0xff] }
 0x5c6   : > { %v5102_v30 = vpop.permute.xlu0 %5101  ;;  %v5153_v62 = vmul.f32 %v10694_v16, %v5026_v26 }
 0x5c7   : > { %5359 = vst.msk [vmem:[#allocation2 + $0xd9] sm:$0xff] %vm908_vm0, %v5273_v56  ;;  %v5227_v59 = vmul.f32 %v10704_v19, %v5191_v31  ;;  %v5172_v37 = vmul.f32 %v10694_v16, %v5102_v30  ;;  %v608_v56 = vmul.f32 %v10774_v33, %v12110_v43  ;;  %v12111_v31 = vld [vmem:[#allocation20_spill] sm:$0xff]  ;;  %v12112_v30 = vld [vmem:[#allocation22_spill] sm:$0xff] }
 0x5c8   : > { %v5185_v20 = vadd.f32 %v5153_v62, %v10613_v12  ;;  %v5391_v12 = vld [vmem:[#allocation2 + $0x1] sm:$0xff]  ;;  %v609_v26 = vmul.f32 %v10774_v33, %v12111_v31  ;;  %v612_v62 = vmul.f32 %v10774_v33, %v12112_v30 }
 0x5c9   : > { %v5263_v21 = vadd.f32 %v10714_v48, %v5227_v59  ;;  %v5204_v42 = vadd.f32 %v5172_v37, %v10631_v9  ;;  %v624_v59 = vadd.f32 %v608_v56, %v526_v35  ;;  %v5407_v37 = vmax.f32 %v5375_v29, %v5391_v12  ;;  %v12114_v29 = vld [vmem:[#allocation21_spill] sm:$0xff] }
 0x5ca   : > { %v5221_v53 = vmul.f32 %v10704_v19, %v5185_v20  ;;  %v5062_v54 = vpop.permute.xlu2 %5061  ;;  %v5408_v20 = vmax.f32 %v5376_v13, %v5392_v6  ;;  %v10835_v12 = vmul.f32 %v10769_v50, %v12114_v29  ;;  %v12116_v6 = vld [vmem:[#allocation78_spill] sm:$0xff] }
 0x5cb   : > { %5349 = vst.msk [vmem:[#allocation2 + $0x61] sm:$0xff] %vm908_vm0, %v5263_v21  ;;  %v5240_v9 = vmul.f32 %v10704_v19, %v5204_v42  ;;  %v5162_v36 = vmul.f32 %v10694_v16, %v5062_v54  ;;  %v5439_v30 = vmax.f32 %v5407_v37, %v5423_v40  ;;  %v12120_v37 = vld [vmem:[#allocation59_spill] sm:$0xff] }
 0x5cc   : > { %v5257_v7 = vadd.f32 %v10714_v48, %v5221_v53  ;;  %v5424_v53 = vld [vmem:[#allocation2 + $0xa] sm:$0xff] }
 0x5cd   : > { %v5276_v11 = vadd.f32 %v10714_v48, %v5240_v9  ;;  %v5194_v61 = vadd.f32 %v5162_v36, %v10623_v63  ;;  %v5038_v22 = vpop.permute.xlu1 %5037  ;;  %v5017_v63 = vadd.f32 %v4985_v32, %v10583_v38  ;;  %v12115_v9 = vld [vmem:[#allocation32_spill] sm:$0xff]  ;;  %v706_v36 = vmul.f32 %v10823_v51, %v12116_v6  ;;  %v12117_v32 = vld [vmem:[#allocation35_spill] sm:$0xff] }
 0x5ce   : > { %5343 = vst.msk [vmem:[#allocation2 + $0x19] sm:$0xff] %vm908_vm0, %v5257_v7  ;;  %v5130_v21 = vpop.permute.xlu0 %5129  ;;  %v5156_v42 = vmul.f32 %v10694_v16, %v5038_v22  ;;  %v611_v13 = vmul.f32 %v10774_v33, %v12115_v9  ;;  %v10842_v38 = vadd.f32 %v612_v62, %v530_v14  ;;  %v613_v15 = vmul.f32 %v10774_v33, %v12117_v32  ;;  %v10850_v7 = vld [vmem:[%s11369_s9 + $0x3] ss:$0 sm:$0xff] }
 0x5cf   : > { %5362 = vst.msk [vmem:[#allocation2 + $0xf9] sm:$0xff] %vm908_vm0, %v5276_v11  ;;  %v5230_v54 = vmul.f32 %v10704_v19, %v5194_v61  ;;  %v5179_v35 = vmul.f32 %v10694_v16, %v5130_v21  ;;  %v722_v31 = vadd.f32 %v706_v36, %v624_v59  ;;  %v5440_v11 = vmax.f32 %v5408_v20, %v5424_v53 }
 0x5d0   : > { %v5188_v4 = vadd.f32 %v5156_v42, %v10628_v8  ;;  %v12118_v8 = vld [vmem:[#allocation26_spill] sm:$0xff]  ;;  %v625_v62 = vadd.f32 %v609_v26, %v527_v47  ;;  %v627_v1 = vadd.f32 %v611_v13, %v529_v60  ;;  %v804_v20 = vmul.f32 %v10850_v7, %v12120_v37 }
 0x5d1   : > { %v5266_v43 = vadd.f32 %v10714_v48, %v5230_v54  ;;  %v5211_v56 = vadd.f32 %v5179_v35, %v5017_v63  ;;  %v10855_v14 = vmul.f32 %v10774_v33, %v12118_v8  ;;  %v12119_v63 = vld [vmem:[#allocation40_spill] sm:$0xff]  ;;  %v10865_v53 = vadd.f32 %v613_v15, %v531_v5  ;;  %v12122_v5 = vld [vmem:[#allocation55_spill] sm:$0xff] }
 0x5d2   : > { %v5224_v61 = vmul.f32 %v10704_v19, %v5188_v4  ;;  %v5074_v22 = vpop.permute.xlu2 %5073  ;;  %v708_v59 = vmul.f32 %v10823_v51, %v12119_v63  ;;  %v12121_v54 = vld [vmem:[#allocation52_spill] sm:$0xff]  ;;  %v820_v13 = vadd.f32 %v804_v20, %v722_v31  ;;  %v709_v15 = vmul.f32 %v10823_v51, %v12122_v5  ;;  %v12124_v63 = vld [vmem:[#allocation19_spill] sm:$0xff]  ;;  %v5377_v20 = vld [vmem:[#allocation2 + $0x30] sm:$0xff] }
 0x5d3   : > { %5352 = vst.msk [vmem:[#allocation2 + $0x81] sm:$0xff] %vm908_vm0, %v5266_v43  ;;  %v5247_v21 = vmul.f32 %v10704_v19, %v5211_v56  ;;  %v5165_v42 = vmul.f32 %v10694_v16, %v5074_v22  ;;  %v707_v26 = vmul.f32 %v10823_v51, %v12121_v54  ;;  %v805_v37 = vmul.f32 %v10850_v7, %v12124_v63 }
 0x5d4   : > { %v5260_v40 = vadd.f32 %v10714_v48, %v5224_v61  ;;  %v5488_v61 = vld [vmem:[#allocation2 + $0x21] sm:$0xff]  ;;  %v724_v31 = vadd.f32 %v708_v59, %v10799_v49 }
 0x5d5   : > { %v5455_v47 = vld [vmem:[#allocation2 + $0x18] sm:$0xff]  ;;  %v5456_v35 = vld [vmem:[#allocation2 + $0x20] sm:$0xff]  ;;  %v5283_v29 = vadd.f32 %v10714_v48, %v5247_v21  ;;  %v5197_v9 = vadd.f32 %v5165_v42, %v10637_v2  ;;  %v5046_v60 = vpop.permute.xlu1 %5045  ;;  %v723_v43 = vadd.f32 %v707_v26, %v625_v62  ;;  %v12123_v62 = vld [vmem:[#allocation77_spill] sm:$0xff] }
 0x5d6   : > { %v5471_v6 = vmax.f32 %v5439_v30, %v5455_v47  ;;  %v5472_v36 = vmax.f32 %v5440_v11, %v5456_v35  ;;  %5346 = vst.msk [vmem:[#allocation2 + $0x39] sm:$0xff] %vm908_vm0, %v5260_v40  ;;  %v5110_v4 = vpop.permute.xlu0 %5109  ;;  %v5158_v32 = vmul.f32 %v10694_v16, %v5046_v60  ;;  %v5487_v56 = vld [vmem:[#allocation2 + $0x19] sm:$0xff]  ;;  %v806_v42 = vmul.f32 %v10850_v7, %v12123_v62  ;;  %v5393_v40 = vld [vmem:[#allocation2 + $0x31] sm:$0xff] }
 0x5d7   : > { %5369 = vst.msk [vmem:[#allocation2 + $0x151] sm:$0xff] %vm908_vm0, %v5283_v29  ;;  %v5233_v22 = vmul.f32 %v10704_v19, %v5197_v9  ;;  %v5174_v2 = vmul.f32 %v10694_v16, %v5110_v4  ;;  %v10882_v30 = vld [vmem:[%s11370_s10] ss:$0 sm:$0xff]  ;;  %v12125_v26 = vld [vmem:[#allocation46_spill] sm:$0xff]  ;;  %v725_v60 = vadd.f32 %v709_v15, %v627_v1 }
 0x5d8   : > { %v5503_v11 = vmax.f32 %v5471_v6, %v5487_v56  ;;  %v5504_v8 = vmax.f32 %v5472_v36, %v5488_v61  ;;  %v5190_v21 = vadd.f32 %v5158_v32, %v10642_v28  ;;  %v5519_v54 = vld [vmem:[#allocation2 + $0x1a] sm:$0xff]  ;;  %v10893_v47 = vmul.f32 %v10823_v51, %v12125_v26  ;;  %v5520_v36 = vld [vmem:[#allocation2 + $0x22] sm:$0xff] }
 0x5d9   : > { %v5269_v49 = vadd.f32 %v10714_v48, %v5233_v22  ;;  %v5206_v59 = vadd.f32 %v5174_v2, %v10679_v34  ;;  %v840_v28 = vmul.f32 %v10882_v30, %v820_v13  ;;  %v821_v6 = vadd.f32 %v805_v37, %v723_v43  ;;  %v10904_v34 = vld [vmem:[%s11371_s11] ss:$0 sm:$0xff] }
 0x5da   : > { %v5535_v35 = vmax.f32 %v5503_v11, %v5519_v54  ;;  %v5226_v29 = vmul.f32 %v10704_v19, %v5190_v21  ;;  %v5086_v9 = vpop.permute.xlu2 %5085  ;;  %v5409_v13 = vmax.f32 %v5377_v20, %v5393_v40  ;;  %v5536_v5 = vmax.f32 %v5504_v8, %v5520_v36  ;;  %v12126_v15 = vld [vmem:[#allocation64_spill] sm:$0xff] }
 0x5db   : > { %5355 = vst.msk [vmem:[#allocation2 + $0xa9] sm:$0xff] %vm908_vm0, %v5269_v49  ;;  %v5242_v4 = vmul.f32 %v10704_v19, %v5206_v59  ;;  %v5168_v32 = vmul.f32 %v10694_v16, %v5086_v9  ;;  %v807_v43 = vmul.f32 %v10850_v7, %v12126_v15  ;;  %v822_v61 = vadd.f32 %v806_v42, %v724_v31  ;;  %v5457_v42 = vld [vmem:[#allocation2 + $0x48] sm:$0xff] }
 0x5dc   : > { %v5567_v56 = vmax.f32 %v5535_v35, %v5377_v20  ;;  %v5262_v1 = vadd.f32 %v10714_v48, %v5226_v29  ;;  %v860_v37 = vadd.f32 %v10904_v34, %v840_v28  ;;  %v841_v31 = vmul.f32 %v10882_v30, %v821_v6 }
 0x5dd   : > { %v5378_v22 = vld [vmem:[#allocation2 + $0x38] sm:$0xff]  ;;  %v5278_v21 = vadd.f32 %v10714_v48, %v5242_v4  ;;  %v5200_v62 = vadd.f32 %v5168_v32, %v10651_v44  ;;  %v5058_v63 = vpop.permute.xlu1 %5057  ;;  %v823_v32 = vadd.f32 %v807_v43, %v725_v60 }
 0x5de   : > { %v5394_v2 = vld [vmem:[#allocation2 + $0x39] sm:$0xff]  ;;  %v5599_v54 = vmax.f32 %v5567_v56, %v5393_v40  ;;  %v5568_v20 = vmax.f32 %v5536_v5, %v5378_v22  ;;  %5348 = vst.msk [vmem:[#allocation2 + $0x51] sm:$0xff] %vm908_vm0, %v5262_v1  ;;  %v5138_v49 = vpop.permute.xlu0 %5137  ;;  %v5161_v26 = vmul.f32 %v10694_v16, %v5058_v63  ;;  %v5489_v1 = vld [vmem:[#allocation2 + $0x49] sm:$0xff] }
 0x5df   : > { %v5425_v11 = vld [vmem:[#allocation2 + $0x32] sm:$0xff]  ;;  %5364 = vst.msk [vmem:[#allocation2 + $0x111] sm:$0xff] %vm908_vm0, %v5278_v21  ;;  %v5236_v59 = vmul.f32 %v10704_v19, %v5200_v62  ;;  %v5181_v44 = vmul.f32 %v10694_v16, %v5138_v49  ;;  %v5410_v40 = vmax.f32 %v5378_v22, %v5394_v2  ;;  %v5426_v9 = vld [vmem:[#allocation2 + $0x3a] sm:$0xff] }
 0x5e0   : > { %v5441_v8 = vmax.f32 %v5409_v13, %v5425_v11  ;;  %v5600_v35 = vmax.f32 %v5568_v20, %v5394_v2  ;;  %v5631_v29 = vmax.f32 %v5599_v54, %v5425_v11  ;;  %v5193_v6 = vadd.f32 %v5161_v26, %v10656_v45  ;;  %v5379_v54 = vld [vmem:[#allocation2 + $0x60] sm:$0xff]  ;;  %v5380_v26 = vld [vmem:[#allocation2 + $0x68] sm:$0xff] }
 0x5e1   : > { %v5272_v36 = vadd.f32 %v10714_v48, %v5236_v59  ;;  %v5213_v4 = vadd.f32 %v5181_v44, %v10673_v39  ;;  %v842_v39 = vmul.f32 %v10882_v30, %v822_v61  ;;  %v861_v45 = vadd.f32 %v10904_v34, %v841_v31 }
 0x5e2   : > { %v5473_v28 = vmax.f32 %v5441_v8, %v5457_v42  ;;  %v5632_v13 = vmax.f32 %v5600_v35, %v5426_v9  ;;  %v5647_v5 = vadd.f32 %v5631_v29, %v860_v37  ;;  %v5098_v56 = vpop.permute.xlu2 %5097  ;;  %v5229_v22 = vmul.f32 %v10704_v19, %v5193_v6  ;;  %v5395_v8 = vld [vmem:[#allocation2 + $0x61] sm:$0xff] }
 0x5e3   : > { %5358 = vst.msk [vmem:[#allocation2 + $0xc9] sm:$0xff] %vm908_vm0, %v5272_v36  ;;  %v5249_v15 = vmul.f32 %v10704_v19, %v5213_v4  ;;  %v5171_v2 = vmul.f32 %v10694_v16, %v5098_v56  ;;  %v5442_v11 = vmax.f32 %v5410_v40, %v5426_v9  ;;  %v726_v44 = vadd.f32 %v10893_v47, %v10842_v38 }
 0x5e4   : > { %v5505_v60 = vmax.f32 %v5473_v28, %v5489_v1  ;;  %5664 = vst.msk [vmem:[%s10932_s19] sm:$0x1] %vm5663_vm3, %v5647_v5  ;;  %v5265_v63 = vadd.f32 %v10714_v48, %v5229_v22  ;;  %v10941_v20 = vadd.f32 %v5632_v13, %v861_v45  ;;  %v843_v29 = vmul.f32 %v10882_v30, %v823_v32 }
 0x5e5   : > { %v5458_v43 = vld [vmem:[#allocation2 + $0x50] sm:$0xff]  ;;  %v5285_v62 = vadd.f32 %v10714_v48, %v5249_v15  ;;  %v5203_v37 = vadd.f32 %v5171_v2, %v10665_v58  ;;  %v5070_v61 = vpop.permute.xlu1 %5069  ;;  %5673 = vst.msk [vmem:[%s10932_s19 - $0x1] sm:$0x4] %vm5672_vm4, %v5647_v5  ;;  %v4982_v58 = vmul.f32 %v10541_v41, %v10737_v52  ;;  %v862_v41 = vadd.f32 %v10904_v34, %v842_v39  ;;  %v12128_v39 = vld [vmem:[#allocation137_spill] sm:$0xff] }
 0x5e6   : > { %v5521_v21 = vld [vmem:[#allocation2 + $0x4a] sm:$0xff]  ;;  %v5474_v49 = vmax.f32 %v5442_v11, %v5458_v43  ;;  %v5150_v42 = vpop.permute.xlu0 %5149  ;;  %v5164_v59 = vmul.f32 %v10694_v16, %v5070_v61  ;;  %5682 = vst.msk [vmem:[%s10932_s19 - $0x2] sm:$0x10] %vm5681_vm5, %v5647_v5  ;;  %v5411_v47 = vmax.f32 %v5379_v54, %v5395_v8  ;;  %v5522_v4 = vld [vmem:[#allocation2 + $0x52] sm:$0xff]  ;;  %v5427_v11 = vld [vmem:[#allocation2 + $0x62] sm:$0xff] }
 0x5e7   : > { %v5537_v31 = vmax.f32 %v5505_v60, %v5521_v21  ;;  %v5490_v40 = vld [vmem:[#allocation2 + $0x51] sm:$0xff]  ;;  %5371 = vst.msk [vmem:[#allocation2 + $0x169] sm:$0xff] %vm908_vm0, %v5285_v62  ;;  %v5239_v28 = vmul.f32 %v10704_v19, %v5203_v37  ;;  %v5184_v35 = vmul.f32 %v10694_v16, %v5150_v42  ;;  %v5586_v52 = vld [vmem:[#allocation2 + $0x69] sm:$0xff]  ;;  %v5014_v45 = vadd.f32 %v4982_v58, %v12128_v39 }
 0x5e8   : > { %v5506_v9 = vmax.f32 %v5474_v49, %v5490_v40  ;;  %5351 = vst.msk [vmem:[#allocation2 + $0x79] sm:$0xff] %vm908_vm0, %v5265_v63  ;;  %v5196_v38 = vadd.f32 %v5164_v59, %v10670_v24  ;;  %v5412_v56 = vmax.f32 %v5380_v26, %v5586_v52  ;;  %v12127_v24 = vld [vmem:[#allocation84_spill] sm:$0xff]  ;;  %v12129_v60 = vld [vmem:[#allocation79_spill] sm:$0xff] }
 0x5e9   : > { %v5569_v36 = vmax.f32 %v5537_v31, %v5379_v54  ;;  %v5275_v6 = vadd.f32 %v10714_v48, %v5239_v28  ;;  %v5216_v13 = vadd.f32 %v5184_v35, %v10687_v27  ;;  %5691 = vst.msk [vmem:[%s10932_s19 - $0x3] sm:$0x40] %vm5690_vm6, %v5647_v5  ;;  %v711_v2 = vmul.f32 %v10823_v51, %v12127_v24  ;;  %v12130_v37 = vld [vmem:[#allocation119_spill] sm:$0xff]  ;;  %v5618_v54 = vld [vmem:[#allocation2 + $0x6a] sm:$0xff] }
 0x5ea   : > { %v5538_v32 = vmax.f32 %v5506_v9, %v5522_v4  ;;  %v5232_v15 = vmul.f32 %v10704_v19, %v5196_v38  ;;  %v5118_v22 = vpop.permute.xlu2 %5117  ;;  %5699 = vst.msk [vmem:[%s10932_s19 + $0x4] sm:$0x1] %vm5663_vm3, %v10941_v20  ;;  %v808_v43 = vmul.f32 %v10850_v7, %v12129_v60  ;;  %v532_v61 = vmul.f32 %v10769_v50, %v12130_v37  ;;  %v12131_v9 = vld [vmem:[#allocation68_spill] sm:$0xff] }
 0x5eb   : > { %v5601_v1 = vmax.f32 %v5569_v36, %v5395_v8  ;;  %5361 = vst.msk [vmem:[#allocation2 + $0xf1] sm:$0xff] %vm908_vm0, %v5275_v6  ;;  %v5252_v27 = vmul.f32 %v10704_v19, %v5216_v13  ;;  %v5176_v5 = vmul.f32 %v10694_v16, %v5118_v22  ;;  %v5443_v8 = vmax.f32 %v5411_v47, %v5427_v11  ;;  %v5524_v60 = vld [vmem:[#allocation2 + $0x82] sm:$0xff] }
 0x5ec   : > { %v5570_v21 = vmax.f32 %v5538_v32, %v5380_v26  ;;  %v5268_v63 = vadd.f32 %v10714_v48, %v5232_v15  ;;  %5707 = vst.msk [vmem:[%s10932_s19 + $0x3] sm:$0x4] %vm5672_vm4, %v10941_v20  ;;  %v5444_v26 = vmax.f32 %v5412_v56, %v5618_v54  ;;  %v863_v28 = vadd.f32 %v10904_v34, %v843_v29  ;;  %v5397_v32 = vld [vmem:[#allocation2 + $0x91] sm:$0xff]  ;;  %v5492_v15 = vld [vmem:[#allocation2 + $0x81] sm:$0xff] }
 0x5ed   : > { %v5633_v62 = vmax.f32 %v5601_v1, %v5427_v11  ;;  %v5288_v49 = vadd.f32 %v10714_v48, %v5252_v27  ;;  %v5208_v31 = vadd.f32 %v5176_v5, %v5014_v45  ;;  %v5082_v42 = vpop.permute.xlu1 %5081  ;;  %5715 = vst.msk [vmem:[%s10932_s19 + $0x2] sm:$0x10] %vm5681_vm5, %v10941_v20  ;;  %v727_v35 = vadd.f32 %v711_v2, %v10865_v53 }
 0x5ee   : > { %v5602_v59 = vmax.f32 %v5570_v21, %v5586_v52  ;;  %5354 = vst.msk [vmem:[#allocation2 + $0x99] sm:$0xff] %vm908_vm0, %v5268_v63  ;;  %v5167_v40 = vmul.f32 %v10694_v16, %v5082_v42  ;;  %v809_v36 = vmul.f32 %v10850_v7, %v12131_v9  ;;  %v5381_v52 = vld [vmem:[#allocation2 + $0x90] sm:$0xff]  ;;  %v824_v53 = vadd.f32 %v808_v43, %v726_v44 }
 0x5ef   : > { %v5649_v58 = vadd.f32 %v5633_v62, %v862_v41  ;;  %v5459_v38 = vld [vmem:[#allocation2 + $0x78] sm:$0xff]  ;;  %v5460_v47 = vld [vmem:[#allocation2 + $0x80] sm:$0xff]  ;;  %5374 = vst.msk [vmem:[#allocation2 + $0x189] sm:$0xff] %vm908_vm0, %v5288_v49  ;;  %v5244_v41 = vmul.f32 %v10704_v19, %v5208_v31  ;;  %v630_v29 = vadd.f32 %v10855_v14, %v532_v61  ;;  %v631_v44 = vadd.f32 %v10807_v17, %v10835_v12  ;;  %v12132_v14 = vld [vmem:[#allocation58_spill] sm:$0xff] }
 0x5f0   : > { %v5634_v4 = vmax.f32 %v5602_v59, %v5618_v54  ;;  %v5475_v6 = vmax.f32 %v5443_v8, %v5459_v38  ;;  %v5476_v13 = vmax.f32 %v5444_v26, %v5460_v47  ;;  %v5199_v56 = vadd.f32 %v5167_v40, %v10684_v3  ;;  %v5491_v1 = vld [vmem:[#allocation2 + $0x79] sm:$0xff]  ;;  %v12133_v61 = vld [vmem:[#allocation49_spill] sm:$0xff]  ;;  %5723 = vst.msk [vmem:[%s10932_s19 + $0x1] sm:$0x40] %vm5690_vm6, %v10941_v20 }
 0x5f1   : > { %5665 = vst.msk [vmem:[%s10932_s19 + $0x8] sm:$0x1] %vm5663_vm3, %v5649_v58  ;;  %v5280_v22 = vadd.f32 %v10714_v48, %v5244_v41  ;;  %v712_v11 = vmul.f32 %v10823_v51, %v12132_v14  ;;  %v825_v27 = vadd.f32 %v809_v36, %v727_v35  ;;  %v5523_v5 = vld [vmem:[#allocation2 + $0x7a] sm:$0xff]  ;;  %v5413_v21 = vmax.f32 %v5381_v52, %v5397_v32  ;;  %v12135_v36 = vld [vmem:[#allocation93_spill] sm:$0xff] }
 0x5f2   : > { %5674 = vst.msk [vmem:[%s10932_s19 + $0x7] sm:$0x4] %vm5672_vm4, %v5649_v58  ;;  %v5650_v24 = vadd.f32 %v5634_v4, %v863_v28  ;;  %v5507_v2 = vmax.f32 %v5475_v6, %v5491_v1  ;;  %v5508_v39 = vmax.f32 %v5476_v13, %v5492_v15  ;;  %v5235_v45 = vmul.f32 %v10704_v19, %v5199_v56  ;;  %v5106_v3 = vpop.permute.xlu2 %5105  ;;  %v12134_v35 = vld [vmem:[#allocation87_spill] sm:$0xff]  ;;  %v5461_v47 = vld [vmem:[#allocation2 + $0xa8] sm:$0xff]  ;;  %v5462_v1 = vld [vmem:[#allocation2 + $0xb0] sm:$0xff] }
 0x5f3   : > { %5683 = vst.msk [vmem:[%s10932_s19 + $0x6] sm:$0x10] %vm5681_vm5, %v5649_v58  ;;  %v5173_v43 = vmul.f32 %v10694_v16, %v5106_v3  ;;  %v713_v17 = vmul.f32 %v10823_v51, %v12133_v61  ;;  %v844_v12 = vmul.f32 %v10882_v30, %v824_v53  ;;  %v728_v54 = vadd.f32 %v712_v11, %v630_v29  ;;  %v5493_v15 = vld [vmem:[#allocation2 + $0xa9] sm:$0xff] }
 0x5f4   : > { %5366 = vst.msk [vmem:[#allocation2 + $0x129] sm:$0xff] %vm908_vm0, %v5280_v22  ;;  %v5539_v62 = vmax.f32 %v5507_v2, %v5523_v5  ;;  %v5540_v63 = vmax.f32 %v5508_v39, %v5524_v60  ;;  %v5271_v37 = vadd.f32 %v10714_v48, %v5235_v45  ;;  %v845_v28 = vmul.f32 %v10882_v30, %v825_v27  ;;  %v5525_v14 = vld [vmem:[#allocation2 + $0xaa] sm:$0xff] }
 0x5f5   : > { %5692 = vst.msk [vmem:[%s10932_s19 + $0x5] sm:$0x40] %vm5690_vm6, %v5649_v58  ;;  %v5556_v8 = vld [vmem:[#allocation2 + $0x98] sm:$0xff]  ;;  %v5205_v42 = vadd.f32 %v5173_v43, %v10728_v25  ;;  %v811_v9 = vmul.f32 %v10850_v7, %v12134_v35  ;;  %v810_v38 = vmul.f32 %v10850_v7, %v12135_v36  ;;  %v729_v56 = vadd.f32 %v713_v17, %v631_v44  ;;  %v5094_v11 = vpop.permute.xlu1 %5093 }
 0x5f6   : > { %v5588_v49 = vld [vmem:[#allocation2 + $0x99] sm:$0xff]  ;;  %5700 = vst.msk [vmem:[%s10932_s19 + $0xc] sm:$0x1] %vm5663_vm3, %v5650_v24  ;;  %v5571_v59 = vmax.f32 %v5539_v62, %v5381_v52  ;;  %v5572_v26 = vmax.f32 %v5540_v63, %v5556_v8  ;;  %v864_v53 = vadd.f32 %v10904_v34, %v844_v12  ;;  %v5494_v44 = vld [vmem:[#allocation2 + $0xb1] sm:$0xff]  ;;  %v865_v27 = vadd.f32 %v10904_v34, %v845_v28 }
 0x5f7   : > { %v5619_v31 = vld [vmem:[#allocation2 + $0x92] sm:$0xff]  ;;  %5357 = vst.msk [vmem:[#allocation2 + $0xc1] sm:$0xff] %vm908_vm0, %v5271_v37  ;;  %v5414_v58 = vmax.f32 %v5556_v8, %v5588_v49  ;;  %v5620_v41 = vld [vmem:[#allocation2 + $0x9a] sm:$0xff]  ;;  %v5241_v25 = vmul.f32 %v10704_v19, %v5205_v42  ;;  %v826_v29 = vadd.f32 %v810_v38, %v728_v54  ;;  %v827_v3 = vadd.f32 %v811_v9, %v729_v56  ;;  %v11057_v28 = vld [vmem:[#allocation2 + $0xca] sm:$0xff] }
 0x5f8   : > { %v5445_v40 = vmax.f32 %v5413_v21, %v5619_v31  ;;  %5708 = vst.msk [vmem:[%s10932_s19 + $0xb] sm:$0x4] %vm5672_vm4, %v5650_v24  ;;  %v5603_v52 = vmax.f32 %v5571_v59, %v5397_v32  ;;  %v5604_v4 = vmax.f32 %v5572_v26, %v5588_v49  ;;  %v5526_v62 = vld [vmem:[#allocation2 + $0xb2] sm:$0xff]  ;;  %v5170_v61 = vmul.f32 %v10694_v16, %v5094_v11 }
 0x5f9   : > { %v5446_v6 = vmax.f32 %v5414_v58, %v5620_v41  ;;  %5716 = vst.msk [vmem:[%s10932_s19 + $0xa] sm:$0x10] %vm5681_vm5, %v5650_v24  ;;  %v5277_v22 = vadd.f32 %v10714_v48, %v5241_v25  ;;  %v846_v43 = vmul.f32 %v10882_v30, %v826_v29  ;;  %v847_v54 = vmul.f32 %v10882_v30, %v827_v3  ;;  %v11067_v38 = vld [vmem:[#allocation2 + $0xf0] sm:$0xff] }
 0x5fa   : > { %v5477_v13 = vmax.f32 %v5445_v40, %v5461_v47  ;;  %v5635_v2 = vmax.f32 %v5603_v52, %v5619_v31  ;;  %v5636_v39 = vmax.f32 %v5604_v4, %v5620_v41  ;;  %5724 = vst.msk [vmem:[%s10932_s19 + $0x9] sm:$0x40] %vm5690_vm6, %v5650_v24  ;;  %v11048_v31 = vld [vmem:[#allocation2 + $0xc9] sm:$0xff]  ;;  %v5202_v40 = vadd.f32 %v5170_v61, %v10708_v10  ;;  %v11069_v47 = vld [vmem:[#allocation2 + $0xf1] sm:$0xff]  ;;  %v5126_v52 = vpop.permute.xlu2 %5125 }
 0x5fb   : > { %v5478_v32 = vmax.f32 %v5446_v6, %v5462_v1  ;;  %5363 = vst.msk [vmem:[#allocation2 + $0x109] sm:$0xff] %vm908_vm0, %v5277_v22  ;;  %v866_v59 = vadd.f32 %v10904_v34, %v846_v43  ;;  %v867_v35 = vadd.f32 %v10904_v34, %v847_v54  ;;  %v11076_v6 = vld [vmem:[#allocation2 + $0xf8] sm:$0xff]  ;;  %v5417_v1 = vmax.f32 %v11067_v38, %v11069_v47  ;;  %v12139_v11 = vld [vmem:[#allocation122_spill] sm:$0xff] }
 0x5fc   : > { %v5509_v45 = vmax.f32 %v5477_v13, %v5493_v15  ;;  %v5651_v5 = vadd.f32 %v5635_v2, %v864_v53  ;;  %v5652_v24 = vadd.f32 %v5636_v39, %v865_v27  ;;  %v5238_v25 = vmul.f32 %v10704_v19, %v5202_v40  ;;  %v12136_v53 = vld [vmem:[#allocation37_spill] sm:$0xff]  ;;  %v11088_v15 = vld [vmem:[#allocation2 + $0xf9] sm:$0xff] }
 0x5fd   : > { %v5510_v20 = vmax.f32 %v5478_v32, %v5494_v44  ;;  %v5114_v4 = vpop.permute.xlu1 %5113  ;;  %v5178_v13 = vmul.f32 %v10694_v16, %v5126_v52  ;;  %v616_v29 = vmul.f32 %v10774_v33, %v12136_v53  ;;  %v535_v27 = vmul.f32 %v10769_v50, %v12139_v11 }
 0x5fe   : > { %v5541_v60 = vmax.f32 %v5509_v45, %v5525_v14  ;;  %v5383_v21 = vld [vmem:[#allocation2 + $0xc0] sm:$0xff]  ;;  %5666 = vst.msk [vmem:[%s10932_s19 + $0x10] sm:$0x1] %vm5663_vm3, %v5651_v5  ;;  %v11040_v17 = vld [vmem:[#allocation2 + $0xc8] sm:$0xff]  ;;  %v5175_v56 = vmul.f32 %v10694_v16, %v5114_v4  ;;  %v5274_v2 = vadd.f32 %v10714_v48, %v5238_v25 }
 0x5ff   : > { %v5542_v63 = vmax.f32 %v5510_v20, %v5526_v62  ;;  %v5399_v12 = vld [vmem:[#allocation2 + $0xc1] sm:$0xff]  ;;  %5675 = vst.msk [vmem:[%s10932_s19 + $0xf] sm:$0x4] %vm5672_vm4, %v5651_v5  ;;  %v5210_v39 = vadd.f32 %v5178_v13, %v10659_v57  ;;  %v12140_v20 = vld [vmem:[#allocation30_spill] sm:$0xff]  ;;  %v5416_v52 = vmax.f32 %v11040_v17, %v11048_v31 }
 0x600   : > { %v5573_v37 = vmax.f32 %v5541_v60, %v5383_v21  ;;  %5684 = vst.msk [vmem:[%s10932_s19 + $0xe] sm:$0x10] %vm5681_vm5, %v5651_v5  ;;  %v5431_v42 = vld [vmem:[#allocation2 + $0xc2] sm:$0xff]  ;;  %v5415_v10 = vmax.f32 %v5383_v21, %v5399_v12  ;;  %v5207_v32 = vadd.f32 %v5175_v56, %v10645_v0  ;;  %v618_v57 = vmul.f32 %v10774_v33, %v12140_v20  ;;  %v11107_v60 = vld [vmem:[#allocation2 + $0xf2] sm:$0xff] }
 0x601   : > { %v5574_v8 = vmax.f32 %v5542_v63, %v11040_v17  ;;  %5693 = vst.msk [vmem:[%s10932_s19 + $0xd] sm:$0x40] %vm5690_vm6, %v5651_v5  ;;  %v12137_v45 = vld [vmem:[#allocation12_spill] sm:$0xff]  ;;  %v5418_v5 = vmax.f32 %v11076_v6, %v11088_v15  ;;  %v5246_v43 = vmul.f32 %v10704_v19, %v5210_v39  ;;  %v5449_v54 = vmax.f32 %v5417_v1, %v11107_v60  ;;  %v12144_v56 = vld [vmem:[#allocation14_spill] sm:$0xff] }
 0x602   : > { %v5605_v49 = vmax.f32 %v5573_v37, %v5399_v12  ;;  %5701 = vst.msk [vmem:[%s10932_s19 + $0x14] sm:$0x1] %vm5663_vm3, %v5652_v24  ;;  %v5447_v22 = vmax.f32 %v5415_v10, %v5431_v42  ;;  %v534_v3 = vmul.f32 %v10769_v50, %v12137_v45  ;;  %v12138_v14 = vld [vmem:[#allocation88_spill] sm:$0xff]  ;;  %v5465_v0 = vld [vmem:[#allocation2 + $0x108] sm:$0xff]  ;;  %v5243_v21 = vmul.f32 %v10704_v19, %v5207_v32  ;;  %v5463_v12 = vld [vmem:[#allocation2 + $0xd8] sm:$0xff]  ;;  %v5146_v25 = vpop.permute.xlu2 %5145 }
 0x603   : > { %v5606_v26 = vmax.f32 %v5574_v8, %v11048_v31  ;;  %5709 = vst.msk [vmem:[%s10932_s19 + $0x13] sm:$0x4] %vm5672_vm4, %v5652_v24  ;;  %v714_v44 = vmul.f32 %v10823_v51, %v12138_v14  ;;  %v12141_v62 = vld [vmem:[#allocation24_spill] sm:$0xff]  ;;  %v12143_v8 = vld [vmem:[#allocation73_spill] sm:$0xff]  ;;  %v5481_v10 = vmax.f32 %v5449_v54, %v5465_v0  ;;  %v5183_v4 = vmul.f32 %v10694_v16, %v5146_v25  ;;  %v5498_v0 = vld [vmem:[#allocation2 + $0x111] sm:$0xff] }
 0x604   : > { %v5637_v58 = vmax.f32 %v5605_v49, %v5431_v42  ;;  %5717 = vst.msk [vmem:[%s10932_s19 + $0x12] sm:$0x10] %vm5681_vm5, %v5652_v24  ;;  %v12142_v63 = vld [vmem:[#allocation28_spill] sm:$0xff]  ;;  %v632_v61 = vadd.f32 %v616_v29, %v534_v3  ;;  %v812_v49 = vmul.f32 %v10850_v7, %v12143_v8  ;;  %v5279_v40 = vadd.f32 %v10714_v48, %v5243_v21  ;;  %v12145_v29 = vld [vmem:[#allocation62_spill] sm:$0xff]  ;;  %v12146_v3 = vld [vmem:[#allocation51_spill] sm:$0xff] }
 0x605   : > { %v5638_v9 = vmax.f32 %v5606_v26, %v11057_v28  ;;  %5725 = vst.msk [vmem:[%s10932_s19 + $0x11] sm:$0x40] %vm5690_vm6, %v5652_v24  ;;  %v536_v24 = vmul.f32 %v10769_v50, %v12141_v62  ;;  %v617_v37 = vmul.f32 %v10774_v33, %v12142_v63  ;;  %v11122_v42 = vld [vmem:[#allocation2 + $0xfa] sm:$0xff]  ;;  %v5466_v26 = vld [vmem:[#allocation2 + $0x110] sm:$0xff]  ;;  %v537_v53 = vmul.f32 %v10769_v50, %v12144_v56 }
 0x606   : > { %v5653_v36 = vadd.f32 %v5637_v58, %v866_v59  ;;  %v5479_v59 = vmax.f32 %v5447_v22, %v5463_v12  ;;  %5360 = vst.msk [vmem:[#allocation2 + $0xe1] sm:$0xff] %vm908_vm0, %v5274_v2  ;;  %v5282_v58 = vadd.f32 %v10714_v48, %v5246_v43  ;;  %v715_v1 = vmul.f32 %v10823_v51, %v12145_v29  ;;  %v5495_v22 = vld [vmem:[#allocation2 + $0xd9] sm:$0xff]  ;;  %v5497_v45 = vld [vmem:[#allocation2 + $0x109] sm:$0xff] }
 0x607   : > { %v5654_v41 = vadd.f32 %v5638_v9, %v867_v35  ;;  %v730_v35 = vadd.f32 %v714_v44, %v632_v61  ;;  %v633_v9 = vadd.f32 %v617_v37, %v535_v27  ;;  %5365 = vst.msk [vmem:[#allocation2 + $0x121] sm:$0xff] %vm908_vm0, %v5279_v40  ;;  %v634_v39 = vadd.f32 %v618_v57, %v536_v24  ;;  %v12147_v27 = vld [vmem:[#allocation45_spill] sm:$0xff]  ;;  %v12148_v21 = vld [vmem:[#allocation90_spill] sm:$0xff]  ;;  %v12150_v24 = vld [vmem:[#allocation95_spill] sm:$0xff] }
 0x608   : > { %5667 = vst.msk [vmem:[%s10932_s19 + $0x18] sm:$0x1] %vm5663_vm3, %v5653_v36  ;;  %v5511_v32 = vmax.f32 %v5479_v59, %v5495_v22  ;;  %v5215_v17 = vadd.f32 %v5183_v4, %v10735_v55  ;;  %v5513_v11 = vmax.f32 %v5481_v10, %v5497_v45  ;;  %v5448_v20 = vmax.f32 %v5416_v52, %v11057_v28  ;;  %v5529_v54 = vld [vmem:[#allocation2 + $0x10a] sm:$0xff]  ;;  %v5530_v56 = vld [vmem:[#allocation2 + $0x112] sm:$0xff] }
 0x609   : > { %5676 = vst.msk [vmem:[%s10932_s19 + $0x17] sm:$0x4] %vm5672_vm4, %v5653_v36  ;;  %v828_v14 = vadd.f32 %v812_v49, %v730_v35  ;;  %v731_v44 = vadd.f32 %v715_v1, %v633_v9  ;;  %v717_v55 = vmul.f32 %v10823_v51, %v12148_v21  ;;  %v813_v63 = vmul.f32 %v10850_v7, %v12150_v24 }
 0x60a   : > { %5685 = vst.msk [vmem:[%s10932_s19 + $0x16] sm:$0x10] %vm5681_vm5, %v5653_v36  ;;  %v5251_v57 = vmul.f32 %v10704_v19, %v5215_v17  ;;  %v5545_v40 = vmax.f32 %v5513_v11, %v5529_v54 }
 0x60b   : > { %5694 = vst.msk [vmem:[%s10932_s19 + $0x15] sm:$0x40] %vm5690_vm6, %v5653_v36  ;;  %v5450_v36 = vmax.f32 %v5418_v5, %v11122_v42  ;;  %v619_v5 = vmul.f32 %v10774_v33, %v12147_v27 }
 0x60c   : > { %5702 = vst.msk [vmem:[%s10932_s19 + $0x1c] sm:$0x1] %vm5663_vm3, %v5654_v41  ;;  %v5287_v49 = vadd.f32 %v10714_v48, %v5251_v57 }
 0x60d   : > { %5710 = vst.msk [vmem:[%s10932_s19 + $0x1b] sm:$0x4] %vm5672_vm4, %v5654_v41  ;;  %v5482_v2 = vmax.f32 %v5450_v36, %v5466_v26  ;;  %v5464_v61 = vld [vmem:[#allocation2 + $0xe0] sm:$0xff]  ;;  %v848_v26 = vmul.f32 %v10882_v30, %v828_v14  ;;  %v635_v9 = vadd.f32 %v619_v5, %v537_v53 }
 0x60e   : > { %5718 = vst.msk [vmem:[%s10932_s19 + $0x1a] sm:$0x10] %vm5681_vm5, %v5654_v41  ;;  %v5527_v12 = vld [vmem:[#allocation2 + $0xda] sm:$0xff]  ;;  %v5480_v8 = vmax.f32 %v5448_v20, %v5464_v61 }
 0x60f   : > { %5726 = vst.msk [vmem:[%s10932_s19 + $0x19] sm:$0x40] %vm5690_vm6, %v5654_v41  ;;  %v5134_v41 = vpop.permute.xlu1 %5133  ;;  %v5514_v37 = vmax.f32 %v5482_v2, %v5498_v0  ;;  %v5543_v28 = vmax.f32 %v5511_v32, %v5527_v12  ;;  %v5496_v35 = vld [vmem:[#allocation2 + $0xe1] sm:$0xff]  ;;  %v733_v53 = vadd.f32 %v717_v55, %v635_v9  ;;  %v868_v2 = vadd.f32 %v10904_v34, %v848_v26  ;;  %v5626_v55 = vld [vmem:[#allocation2 + $0x12a] sm:$0xff]  ;;  %v5989_v61 = vld [vmem:[%s11367_s7] ss:$0 sm:$0xff] }
 0x610   : > { %5368 = vst.msk [vmem:[#allocation2 + $0x141] sm:$0xff] %vm908_vm0, %v5282_v58  ;;  %v5180_v13 = vmul.f32 %v10694_v16, %v5134_v41  ;;  %v716_v16 = vmul.f32 %v10823_v51, %v12146_v3  ;;  %v829_v58 = vadd.f32 %v813_v63, %v731_v44  ;;  %v5512_v36 = vmax.f32 %v5480_v8, %v5496_v35  ;;  %v11157_v25 = vld [vmem:[#allocation2 + $0x120] sm:$0xff]  ;;  %v12152_v8 = vld [vmem:[#allocation125_spill] sm:$0xff] }
 0x611   : > { %v5575_v10 = vmax.f32 %v5543_v28, %v11067_v38  ;;  %5373 = vst.msk [vmem:[#allocation2 + $0x181] sm:$0xff] %vm908_vm0, %v5287_v49  ;;  %v12151_v41 = vld [vmem:[#allocation76_spill] sm:$0xff]  ;;  %v5577_v29 = vmax.f32 %v5545_v40, %v11157_v25  ;;  %v5546_v22 = vmax.f32 %v5514_v37, %v5530_v56  ;;  %v538_v28 = vmul.f32 %v10769_v50, %v12152_v8  ;;  %v11234_v40 = vld [vmem:[#allocation2 + $0x151] sm:$0xff]  ;;  %v12154_v9 = vld [vmem:[#allocation33_spill] sm:$0xff] }
 0x612   : > { %v5212_v31 = vadd.f32 %v5180_v13, %v10721_v23  ;;  %v12149_v23 = vld [vmem:[#allocation89_spill] sm:$0xff]  ;;  %v815_v52 = vmul.f32 %v10850_v7, %v12151_v41  ;;  %v5991_v50 = vld [vmem:[%s11369_s9 + $0x1] ss:$0 sm:$0xff] }
 0x613   : > { %v814_v62 = vmul.f32 %v10850_v7, %v12149_v23  ;;  %v5528_v13 = vld [vmem:[#allocation2 + $0xe2] sm:$0xff]  ;;  %v5607_v38 = vmax.f32 %v5575_v10, %v11069_v47 }
 0x614   : > { %v5248_v43 = vmul.f32 %v10704_v19, %v5212_v31  ;;  %v732_v19 = vadd.f32 %v716_v16, %v634_v39  ;;  %v5544_v1 = vmax.f32 %v5512_v36, %v5528_v13  ;;  %v849_v39 = vmul.f32 %v10882_v30, %v829_v58  ;;  %v11169_v32 = vld [vmem:[#allocation2 + $0x121] sm:$0xff]  ;;  %v11232_v58 = vld [vmem:[#allocation2 + $0x150] sm:$0xff] }
 0x615   : > { %v5639_v17 = vmax.f32 %v5607_v38, %v11107_v60  ;;  %v5609_v3 = vmax.f32 %v5577_v29, %v11169_v32  ;;  %v831_v14 = vadd.f32 %v815_v52, %v733_v53  ;;  %v11180_v60 = vld [vmem:[#allocation2 + $0x122] sm:$0xff]  ;;  %v621_v36 = vmul.f32 %v5991_v50, %v12154_v9  ;;  %v12156_v53 = vld [vmem:[#allocation67_spill] sm:$0xff] }
 0x616   : > { %v5284_v59 = vadd.f32 %v10714_v48, %v5248_v43  ;;  %v830_v4 = vadd.f32 %v814_v62, %v732_v19  ;;  %v11162_v48 = vld [vmem:[#allocation2 + $0x128] sm:$0xff]  ;;  %v5576_v45 = vmax.f32 %v5544_v1, %v11076_v6  ;;  %v869_v27 = vadd.f32 %v10904_v34, %v849_v39  ;;  %v12153_v19 = vld [vmem:[#allocation31_spill] sm:$0xff] }
 0x617   : > { %v5578_v31 = vmax.f32 %v5546_v22, %v11162_v48  ;;  %v5122_v16 = vpop.permute.xlu1 %5121  ;;  %v5655_v11 = vadd.f32 %v5639_v17, %v868_v2  ;;  %v11178_v6 = vld [vmem:[#allocation2 + $0x129] sm:$0xff]  ;;  %v5641_v0 = vmax.f32 %v5609_v3, %v11180_v60  ;;  %v851_v43 = vmul.f32 %v10882_v30, %v831_v14  ;;  %v12157_v2 = vld [vmem:[#allocation48_spill] sm:$0xff] }
 0x618   : > { %5370 = vst.msk [vmem:[#allocation2 + $0x159] sm:$0xff] %vm908_vm0, %v5284_v59  ;;  %v850_v47 = vmul.f32 %v10882_v30, %v830_v4  ;;  %v5608_v44 = vmax.f32 %v5576_v45, %v11088_v15  ;;  %v5988_v15 = vld [vmem:[%s11366_s6 + $0x7] ss:$0 sm:$0xff]  ;;  %v620_v26 = vmul.f32 %v10774_v33, %v12153_v19  ;;  %v5992_v33 = vld [vmem:[%s11369_s9] ss:$0 sm:$0xff]  ;;  %v12155_v10 = vld [vmem:[#allocation25_spill] sm:$0xff]  ;;  %v5421_v13 = vmax.f32 %v11232_v58, %v11234_v40 }
 0x619   : > { %5668 = vst.msk [vmem:[%s10932_s19 + $0x20] sm:$0x1] %vm5663_vm3, %v5655_v11  ;;  %v5610_v20 = vmax.f32 %v5578_v31, %v11178_v6  ;;  %v5177_v57 = vmul.f32 %v5988_v15, %v5122_v16  ;;  %v871_v63 = vadd.f32 %v10904_v34, %v851_v43  ;;  %v539_v41 = vmul.f32 %v5992_v33, %v12155_v10  ;;  %v12158_v45 = vld [vmem:[#allocation54_spill] sm:$0xff]  ;;  %v12159_v14 = vld [vmem:[#allocation17_spill] sm:$0xff] }
 0x61a   : > { %v5640_v5 = vmax.f32 %v5608_v44, %v11122_v42  ;;  %5677 = vst.msk [vmem:[%s10932_s19 + $0x1f] sm:$0x4] %vm5672_vm4, %v5655_v11  ;;  %v870_v42 = vadd.f32 %v10904_v34, %v850_v47  ;;  %v636_v52 = vadd.f32 %v620_v26, %v538_v28  ;;  %v5420_v56 = vmax.f32 %v11162_v48, %v11178_v6  ;;  %v12160_v44 = vld [vmem:[#allocation92_spill] sm:$0xff] }
 0x61b   : > { %5686 = vst.msk [vmem:[%s10932_s19 + $0x1e] sm:$0x10] %vm5681_vm5, %v5655_v11  ;;  %v5642_v23 = vmax.f32 %v5610_v20, %v5626_v55  ;;  %v5209_v24 = vadd.f32 %v5177_v57, %v10698_v18  ;;  %v5990_v18 = vld [vmem:[%s11368_s8] ss:$0 sm:$0xff]  ;;  %v718_v1 = vmul.f32 %v10823_v51, %v12156_v53  ;;  %v622_v39 = vmul.f32 %v5991_v50, %v12157_v2  ;;  %v5469_v57 = vld [vmem:[#allocation2 + $0x168] sm:$0xff] }
 0x61c   : > { %v5656_v21 = vadd.f32 %v5640_v5, %v869_v27  ;;  %5695 = vst.msk [vmem:[%s10932_s19 + $0x1d] sm:$0x40] %vm5690_vm6, %v5655_v11  ;;  %v5657_v62 = vadd.f32 %v5641_v0, %v870_v42  ;;  %v719_v17 = vmul.f32 %v10823_v51, %v12158_v45  ;;  %v5452_v47 = vmax.f32 %v5420_v56, %v5626_v55  ;;  %v12161_v27 = vld [vmem:[#allocation91_spill] sm:$0xff]  ;;  %v12162_v5 = vld [vmem:[#allocation97_spill] sm:$0xff]  ;;  %v12163_v0 = vld [vmem:[#allocation128_spill] sm:$0xff] }
 0x61d   : > { %v5658_v37 = vadd.f32 %v5642_v23, %v871_v63  ;;  %v5245_v12 = vmul.f32 %v5989_v61, %v5209_v24  ;;  %v734_v31 = vadd.f32 %v718_v1, %v636_v52  ;;  %v720_v11 = vmul.f32 %v10823_v51, %v12160_v44  ;;  %v5993_v52 = vld [vmem:[%s11369_s9 + $0x2] ss:$0 sm:$0xff]  ;;  %v12167_v44 = vld [vmem:[#allocation98_spill] sm:$0xff] }
 0x61e   : > { %5703 = vst.msk [vmem:[%s10932_s19 + $0x24] sm:$0x1] %vm5663_vm3, %v5656_v21  ;;  %v817_v6 = vmul.f32 %v10850_v7, %v12161_v27  ;;  %v816_v20 = vmul.f32 %v10850_v7, %v12162_v5 }
 0x61f   : > { %5711 = vst.msk [vmem:[%s10932_s19 + $0x23] sm:$0x4] %vm5672_vm4, %v5656_v21  ;;  %v5281_v54 = vadd.f32 %v5990_v18, %v5245_v12  ;;  %v5142_v49 = vpop.permute.xlu1 %5141  ;;  %v11248_v4 = vld [vmem:[#allocation2 + $0x152] sm:$0xff]  ;;  %v5500_v12 = vld [vmem:[#allocation2 + $0x141] sm:$0xff] }
 0x620   : > { %5719 = vst.msk [vmem:[%s10932_s19 + $0x22] sm:$0x10] %vm5681_vm5, %v5656_v21  ;;  %v5182_v59 = vmul.f32 %v5988_v15, %v5142_v49  ;;  %v5453_v38 = vmax.f32 %v5421_v13, %v11248_v4  ;;  %v5390_v3 = vld [vmem:[#allocation2 + $0x158] sm:$0xff]  ;;  %v541_v15 = vmul.f32 %v5992_v33, %v12163_v0  ;;  %v832_v51 = vadd.f32 %v816_v20, %v734_v31  ;;  %v12165_v49 = vld [vmem:[#allocation80_spill] sm:$0xff]  ;;  %v5566_v0 = vld [vmem:[#allocation2 + $0x188] sm:$0xff] }
 0x621   : > { %5727 = vst.msk [vmem:[%s10932_s19 + $0x21] sm:$0x40] %vm5690_vm6, %v5656_v21  ;;  %v5406_v16 = vld [vmem:[#allocation2 + $0x159] sm:$0xff] }
 0x622   : > { %5669 = vst.msk [vmem:[%s10932_s19 + $0x28] sm:$0x1] %vm5663_vm3, %v5657_v62  ;;  %v5214_v35 = vadd.f32 %v5182_v59, %v10762_v46  ;;  %v5419_v46 = vmax.f32 %v11157_v25, %v11169_v32  ;;  %v540_v25 = vmul.f32 %v5992_v33, %v12159_v14  ;;  %v637_v32 = vadd.f32 %v621_v36, %v539_v41  ;;  %v5532_v36 = vld [vmem:[#allocation2 + $0x142] sm:$0xff] }
 0x623   : > { %5678 = vst.msk [vmem:[%s10932_s19 + $0x27] sm:$0x4] %vm5672_vm4, %v5657_v62  ;;  %v5422_v21 = vmax.f32 %v5390_v3, %v5406_v16  ;;  %v5485_v23 = vmax.f32 %v5453_v38, %v5469_v57  ;;  %v818_v59 = vmul.f32 %v10850_v7, %v12165_v49  ;;  %v12166_v13 = vld [vmem:[#allocation72_spill] sm:$0xff]  ;;  %v852_v56 = vmul.f32 %v10882_v30, %v832_v51 }
 0x624   : > { %5687 = vst.msk [vmem:[%s10932_s19 + $0x26] sm:$0x10] %vm5681_vm5, %v5657_v62  ;;  %v5250_v29 = vmul.f32 %v5989_v61, %v5214_v35  ;;  %v5451_v48 = vmax.f32 %v5419_v46, %v11180_v60  ;;  %v638_v63 = vadd.f32 %v622_v39, %v540_v25  ;;  %v5438_v35 = vld [vmem:[#allocation2 + $0x15a] sm:$0xff]  ;;  %v721_v46 = vmul.f32 %v5993_v52, %v12166_v13 }
 0x625   : > { %5696 = vst.msk [vmem:[%s10932_s19 + $0x25] sm:$0x40] %vm5690_vm6, %v5657_v62  ;;  %v12164_v62 = vld [vmem:[#allocation34_spill] sm:$0xff]  ;;  %v5454_v33 = vmax.f32 %v5422_v21, %v5438_v35 }
 0x626   : > { %5704 = vst.msk [vmem:[%s10932_s19 + $0x2c] sm:$0x1] %vm5663_vm3, %v5658_v37  ;;  %v5286_v22 = vadd.f32 %v5990_v18, %v5250_v29  ;;  %v623_v24 = vmul.f32 %v5991_v50, %v12164_v62  ;;  %v5501_v18 = vld [vmem:[#allocation2 + $0x169] sm:$0xff]  ;;  %v736_v28 = vadd.f32 %v720_v11, %v638_v63  ;;  %v5597_v11 = vld [vmem:[#allocation2 + $0x181] sm:$0xff] }
 0x627   : > { %5712 = vst.msk [vmem:[%s10932_s19 + $0x2b] sm:$0x4] %vm5672_vm4, %v5658_v37  ;;  %v5517_v41 = vmax.f32 %v5485_v23, %v5501_v18  ;;  %v5598_v21 = vld [vmem:[#allocation2 + $0x189] sm:$0xff] }
 0x628   : > { %5720 = vst.msk [vmem:[%s10932_s19 + $0x2a] sm:$0x10] %vm5681_vm5, %v5658_v37  ;;  %v639_v26 = vadd.f32 %v623_v24, %v541_v15  ;;  %v834_v2 = vadd.f32 %v818_v59, %v736_v28  ;;  %v5629_v23 = vld [vmem:[#allocation2 + $0x182] sm:$0xff]  ;;  %v5630_v63 = vld [vmem:[#allocation2 + $0x18a] sm:$0xff] }
 0x629   : > { %5728 = vst.msk [vmem:[%s10932_s19 + $0x29] sm:$0x40] %vm5690_vm6, %v5658_v37  ;;  %v735_v37 = vadd.f32 %v719_v17, %v637_v32  ;;  %v5565_v17 = vld [vmem:[#allocation2 + $0x180] sm:$0xff] }
 0x62a   : > { %5367 = vst.msk [vmem:[#allocation2 + $0x139] sm:$0xff] %vm908_vm0, %v5281_v54  ;;  %v737_v45 = vadd.f32 %v721_v46, %v639_v26  ;;  %v854_v15 = vmul.f32 %v10882_v30, %v834_v2 }
 0x62b   : > { %5372 = vst.msk [vmem:[#allocation2 + $0x171] sm:$0xff] %vm908_vm0, %v5286_v22  ;;  %v833_v19 = vadd.f32 %v817_v6, %v735_v37 }
 0x62c   : > { %v874_v62 = vadd.f32 %v10904_v34, %v854_v15 }
 0x62d   : > { %v853_v39 = vmul.f32 %v10882_v30, %v833_v19 }
 0x631   : > { %v5467_v43 = vld [vmem:[#allocation2 + $0x138] sm:$0xff]  ;;  %v5468_v42 = vld [vmem:[#allocation2 + $0x140] sm:$0xff] }
 0x632   : > { %v5483_v60 = vmax.f32 %v5451_v48, %v5467_v43  ;;  %v5484_v55 = vmax.f32 %v5452_v47, %v5468_v42  ;;  %v5499_v61 = vld [vmem:[#allocation2 + $0x139] sm:$0xff]  ;;  %v5470_v29 = vld [vmem:[#allocation2 + $0x170] sm:$0xff]  ;;  %v5994_v47 = vld [vmem:[%s11369_s9 + $0x3] ss:$0 sm:$0xff] }
 0x633   : > { %v5531_v9 = vld [vmem:[#allocation2 + $0x13a] sm:$0xff]  ;;  %v5533_v53 = vld [vmem:[#allocation2 + $0x16a] sm:$0xff]  ;;  %v5486_v38 = vmax.f32 %v5454_v33, %v5470_v29  ;;  %v5534_v27 = vld [vmem:[#allocation2 + $0x172] sm:$0xff] }
 0x634   : > { %v5515_v54 = vmax.f32 %v5483_v60, %v5499_v61  ;;  %v5516_v8 = vmax.f32 %v5484_v55, %v5500_v12  ;;  %v5549_v22 = vmax.f32 %v5517_v41, %v5533_v53  ;;  %v5502_v31 = vld [vmem:[#allocation2 + $0x171] sm:$0xff] }
 0x635   : > { %v5518_v32 = vmax.f32 %v5486_v38, %v5502_v31 }
 0x636   : > { %v5547_v10 = vmax.f32 %v5515_v54, %v5531_v9  ;;  %v5548_v50 = vmax.f32 %v5516_v8, %v5532_v36  ;;  %v5581_v48 = vmax.f32 %v5549_v22, %v5565_v17 }
 0x637   : > { %v5550_v20 = vmax.f32 %v5518_v32, %v5534_v27 }
 0x638   : > { %v5579_v7 = vmax.f32 %v5547_v10, %v11232_v58  ;;  %v5580_v1 = vmax.f32 %v5548_v50, %v5390_v3  ;;  %v819_v58 = vmul.f32 %v5994_v47, %v12167_v44  ;;  %v872_v3 = vadd.f32 %v10904_v34, %v852_v56 }
 0x639   : > { %v5582_v42 = vmax.f32 %v5550_v20, %v5566_v0 }
 0x63a   : > { %v5611_v14 = vmax.f32 %v5579_v7, %v11234_v40  ;;  %v5612_v25 = vmax.f32 %v5580_v1, %v5406_v16  ;;  %v5613_v40 = vmax.f32 %v5581_v48, %v5597_v11  ;;  %v873_v16 = vadd.f32 %v10904_v34, %v853_v39 }
 0x63b   : > { %v835_v57 = vadd.f32 %v819_v58, %v737_v45  ;;  %v5614_v60 = vmax.f32 %v5582_v42, %v5598_v21 }
 0x63c   : > { %v5643_v6 = vmax.f32 %v5611_v14, %v11248_v4  ;;  %v5644_v5 = vmax.f32 %v5612_v25, %v5438_v35  ;;  %v5645_v55 = vmax.f32 %v5613_v40, %v5629_v23 }
 0x63d   : > { %v855_v24 = vmul.f32 %v10882_v30, %v835_v57  ;;  %v5646_v37 = vmax.f32 %v5614_v60, %v5630_v63 }
 0x63e   : > { %v5659_v43 = vadd.f32 %v5643_v6, %v872_v3  ;;  %v5660_v4 = vadd.f32 %v5644_v5, %v873_v16  ;;  %v5661_v51 = vadd.f32 %v5645_v55, %v874_v62 }
 0x63f   : > { %v875_v30 = vadd.f32 %v10904_v34, %v855_v24 }
 0x640   : > { %5670 = vst.msk [vmem:[%s10932_s19 + $0x30] sm:$0x1] %vm5663_vm3, %v5659_v43 }
 0x641   : > { %5679 = vst.msk [vmem:[%s10932_s19 + $0x2f] sm:$0x4] %vm5672_vm4, %v5659_v43  ;;  %v5662_v61 = vadd.f32 %v5646_v37, %v875_v30 }
 0x642   : > { %5688 = vst.msk [vmem:[%s10932_s19 + $0x2e] sm:$0x10] %vm5681_vm5, %v5659_v43 }
 0x643   : > { %5697 = vst.msk [vmem:[%s10932_s19 + $0x2d] sm:$0x40] %vm5690_vm6, %v5659_v43 }
 0x644   : > { %5705 = vst.msk [vmem:[%s10932_s19 + $0x34] sm:$0x1] %vm5663_vm3, %v5660_v4 }
 0x645   : > { %5713 = vst.msk [vmem:[%s10932_s19 + $0x33] sm:$0x4] %vm5672_vm4, %v5660_v4 }
 0x646   : > { %5721 = vst.msk [vmem:[%s10932_s19 + $0x32] sm:$0x10] %vm5681_vm5, %v5660_v4 }
 0x647   : > { %5729 = vst.msk [vmem:[%s10932_s19 + $0x31] sm:$0x40] %vm5690_vm6, %v5660_v4 }
 0x648   : > { %5671 = vst.msk [vmem:[%s10932_s19 + $0x38] sm:$0x1] %vm5663_vm3, %v5661_v51 }
 0x649   : > { %5680 = vst.msk [vmem:[%s10932_s19 + $0x37] sm:$0x4] %vm5672_vm4, %v5661_v51 }
 0x64a   : > { %5689 = vst.msk [vmem:[%s10932_s19 + $0x36] sm:$0x10] %vm5681_vm5, %v5661_v51 }
 0x64b   : > { %5698 = vst.msk [vmem:[%s10932_s19 + $0x35] sm:$0x40] %vm5690_vm6, %v5661_v51 }
 0x64c   : > { %5706 = vst.msk [vmem:[%s10932_s19 + $0x3c] sm:$0x1] %vm5663_vm3, %v5662_v61 }
 0x64d   : > { %5714 = vst.msk [vmem:[%s10932_s19 + $0x3b] sm:$0x4] %vm5672_vm4, %v5662_v61 }
 0x64e   : > { %5722 = vst.msk [vmem:[%s10932_s19 + $0x3a] sm:$0x10] %vm5681_vm5, %v5662_v61 }
 0x64f   : > { %5730 = vst.msk [vmem:[%s10932_s19 + $0x39] sm:$0x40] %vm5690_vm6, %v5662_v61 }
 0x650   : > { %6022 = shalt.err (!%p6019_p3)
}
 0x651   : > { %s6069_s20 = smov 128   ;;  %s6070_s19 = smov 8  }
 0x652   : > { %5823 = dma.vmem_to_hbm [thread:$0]  (%p6174_p5), %s5745_s25, 1024, %s5747_s26, %s5732_s28, %s6069_s20, %s6069_s20, %s6070_s19  }
 0x653 PF: > { %p5829_p4 = scmp.ge.s32.totalorder %s6057_s24, 2  ;;  %s5761_s16 = sand.u32 1, %s6045_s21  }
 0x654   : > { %s5762_s0 = scalar_lea.sflag [#allocation4], %s5761_s16 }
 0x655   : > { %p5826_p7 = pnand %p5829_p4, %p6178_p6 }
 0x657   : > { %p5827_p8 = pneg %p5826_p7 }
 0x659   : > { %6040 = dma.done.wait (%p5827_p8), %s5762_s0, 1024  }
 0x65a   : > { %6042 = vsyncadd (%p5827_p8), %s5762_s0, 4294966272  ;;  %p22_p9 = scmp.ge.s32.totalorder %s6161_s27, 4   ;;  %s12168_s21 = smov %s6049_s22 }
 0x65b   : > { %s12169_s22 = smov %s6053_s23  ;;  %s12170_s23 = smov %s6172_s30 }
 0x65c   : > { %s12171_s24 = smov %s6161_s27  ;;  %24 = sbr.rel (!%p22_p9) target bundleno = 6 (0x6), region = 105 }
 0x661   :  { %5768 = vsyncpa [#allocation4], 1 }
 0x662   :  { %5770 = vsyncpa [#allocation4 + $0x1], 1 }

</bundles_post_ra>
